<compile_context>
chip_gen: v7x
topology: tpu7x:2x2x1
jax: 0.10.0
libtpu: 0.0.40
codegen_flags: <defaults>
</compile_context>

<pallas_src>
import math

import jax
import jax.numpy as jnp
from jax.experimental import pallas as pl
from jax.experimental.pallas import tpu as pltpu

BN_EPS = 1e-5
# 8 dense layers: encoder [Lin+BN+ReLU]x3 + Lin ; decoder [Lin+BN+ReLU]x3 + Lin
RELU_PATTERN = (True, True, True, False, True, True, True, False)
N_DENSE = len(RELU_PATTERN)
EMBED_LAYER = 3      # embeddings = output of dense layer index 3 (encoder head)
LANE = 128           # pad every feature dim to a multiple of the lane width


def _round_up(n, m):
    return ((n + m - 1) // m) * m


# ----------------------------------------------------------------------------
# Pallas kernel: the full autoencoder forward for one batch tile
# ----------------------------------------------------------------------------
def stacked_ae_kernel(*refs):
    """refs = (x, w0, b0, ..., w7, b7, emb_out, rec_out); all blocks in VMEM.

    w_l: (Din_l, Dout_l) bf16, zero-padded to multiples of 128 and with the
    eval-mode BatchNorm already folded in.  b_l: (1, Dout_l) f32.  Matmuls run
    bf16 x bf16 -> f32 on the MXU; bias add / ReLU stay f32 on the VPU.
    Weights use constant index_maps, so they are DMA'd once and stay resident
    in VMEM while the grid walks the batch tiles.
    """
    x_ref = refs[0]
    wb_refs = refs[1:1 + 2 * N_DENSE]
    emb_ref, rec_ref = refs[1 + 2 * N_DENSE:]

    h = x_ref[...]                                        # (TILE_B, Din) f32
    for li in range(N_DENSE):
        w_ref = wb_refs[2 * li]
        b_ref = wb_refs[2 * li + 1]
        y = jnp.dot(h.astype(w_ref.dtype), w_ref[...],
                    preferred_element_type=jnp.float32) + b_ref[...]
        h = jnp.maximum(y, 0.0) if RELU_PATTERN[li] else y
        if li == EMBED_LAYER:
            emb_ref[...] = h.astype(emb_ref.dtype)        # lane-dense (padded to 128)
    rec_ref[...] = h.astype(rec_ref.dtype)                # lane-dense single store


def stacked_autoencoder_forward(kernel_params, x, *, n_channels, height, width,
                                embedding_size, batch_tile=None):
    """Pallas forward. x: (B, C, H, W) f32. Returns (embeddings, reconstruction)."""
    batch = x.shape[0]
    in_dim = n_channels * height * width
    out_dim = height * width
    x_flat = x.reshape(batch, -1).astype(jnp.float32)     # nn.Flatten()

    in_pad = kernel_params[0][0].shape[0]
    emb_pad = kernel_params[EMBED_LAYER][0].shape[1]
    out_pad = kernel_params[-1][0].shape[1]

    # Batch tiling: one grid axis over batch tiles; weights stream once.
    if batch_tile is None:
        batch_tile = min(128, _round_up(batch, 8))
    batch_pad = _round_up(batch, batch_tile)
    n_tiles = batch_pad // batch_tile

    x_p = jnp.zeros((batch_pad, in_pad), jnp.float32)
    x_p = x_p.at[:batch, :in_dim].set(x_flat)

    flat_args = [x_p]
    in_specs = [pl.BlockSpec((batch_tile, in_pad), lambda b: (b, 0))]
    for w_t, b_row in kernel_params:
        flat_args += [w_t, b_row]
        # Constant index_map -> block stays VMEM-resident across grid steps.
        in_specs += [pl.BlockSpec(w_t.shape, lambda b: (0, 0)),
                     pl.BlockSpec(b_row.shape, lambda b: (0, 0))]

    emb_p, rec_p = pl.pallas_call(
        stacked_ae_kernel,
        out_shape=(
            jax.ShapeDtypeStruct((batch_pad, emb_pad), jnp.float32),
            jax.ShapeDtypeStruct((batch_pad, out_pad), jnp.float32),
        ),
        grid_spec=pltpu.PrefetchScalarGridSpec(
            num_scalar_prefetch=0,
            grid=(n_tiles,),
            in_specs=in_specs,
            out_specs=(pl.BlockSpec((batch_tile, emb_pad), lambda b: (b, 0)),
                       pl.BlockSpec((batch_tile, out_pad), lambda b: (b, 0)))),
        compiler_params=pltpu.CompilerParams(
            dimension_semantics=("parallel",),          # engages 2nd TC on v7x
            vmem_limit_bytes=32 * 1024 * 1024),         # safe on v7x's 64 MiB
    )(*flat_args)

    emb = emb_p[:batch, :embedding_size]
    rec_flat = rec_p[:batch, :out_dim]
    # ReshapeLayer(-1, n_channels, height, width) — faithful to the module;
    # note the decoder head outputs height*width features, so this only keeps
    # the batch dimension intact when n_channels == 1.
    return emb, rec_flat.reshape(-1, n_channels, height, width)


# ----------------------------------------------------------------------------
# Parameter construction (PyTorch layout) + eval-mode BN folding + padding
# ----------------------------------------------------------------------------
def _linear_init(key, fan_in, fan_out):
    k_w, k_b = jax.random.split(key)
    bound = 1.0 / math.sqrt(fan_in)
    w = jax.random.uniform(k_w, (fan_out, fan_in), jnp.float32, -bound, bound)
    b = jax.random.uniform(k_b, (fan_out,), jnp.float32, -bound, bound)
    return w, b


def _bn_init(key, n):
    k1, k2, k3, k4 = jax.random.split(key, 4)
    return {
        "gamma": jax.random.uniform(k1, (n,), jnp.float32, 0.5, 1.5),
        "beta": 0.3 * jax.random.normal(k2, (n,), jnp.float32),
        "mean": 0.3 * jax.random.normal(k3, (n,), jnp.float32),
        "var": jax.random.uniform(k4, (n,), jnp.float32, 0.5, 2.0),
    }


def init_raw_params(key, height, width, n_channels, embedding_size):
    enc_dims = [height * width * n_channels, 500, 500, 2000, embedding_size]
    dec_dims = [embedding_size, 2000, 500, 500, height * width]
    raw = {"enc": [], "dec": []}
    for name, dims in (("enc", enc_dims), ("dec", dec_dims)):
        for li in range(4):
            key, k_lin, k_bn = jax.random.split(key, 3)
            w, b = _linear_init(k_lin, dims[li], dims[li + 1])
            bn = _bn_init(k_bn, dims[li + 1]) if li < 3 else None
            raw[name].append({"W": w, "b": b, "bn": bn})
    return raw


def fold_bn(raw):
    """Fold eval-mode BatchNorm1d into the preceding Linear (f32, unpadded).

    Returns a list of (W_t (in, out) f32, b (out,) f32) per dense layer.
    """
    folded = []
    for blk in raw["enc"] + raw["dec"]:
        w, b, bn = blk["W"], blk["b"], blk["bn"]
        if bn is not None:
            s = bn["gamma"] * jax.lax.rsqrt(bn["var"] + BN_EPS)
            w = w * s[:, None]
            b = (b - bn["mean"]) * s + bn["beta"]
        folded.append((jnp.asarray(w.T, jnp.float32),
                       jnp.asarray(b, jnp.float32)))
    return folded


def prepare_kernel_params(folded_f32):
    """Zero-pad feature dims to multiples of 128, cast weights to bf16.

    Padding is exact: extra weight rows/cols and bias entries are zero, so the
    valid outputs of every layer are unchanged (ReLU(0)=0, zero rows in the
    next layer's weights absorb the padded activations).
    """
    padded = []
    for w_t, b in folded_f32:
        di, do = w_t.shape
        dip, dop = _round_up(di, LANE), _round_up(do, LANE)
        w_p = jnp.zeros((dip, dop), jnp.float32).at[:di, :do].set(w_t)
        b_p = jnp.zeros((dop,), jnp.float32).at[:do].set(b)
        padded.append((w_p.astype(jnp.bfloat16), b_p.reshape(1, -1)))
    return padded


# ----------------------------------------------------------------------------
# Pure-JAX references
# ----------------------------------------------------------------------------
def ref_same_math(folded_f32, x):
    """Mirror of the kernel math (bf16 MXU operands, f32 accumulation), unpadded."""
    h = x.reshape(x.shape[0], -1).astype(jnp.float32)
    emb = None
    for li, (w_t, b) in enumerate(folded_f32):
        y = jnp.dot(h.astype(jnp.bfloat16), w_t.astype(jnp.bfloat16),
                    preferred_element_type=jnp.float32) + b
        h = jnp.maximum(y, 0.0) if RELU_PATTERN[li] else y
        if li == EMBED_LAYER:
            emb = h
    return emb, h


def ref_module_f32(raw, x, n_channels, height, width):
    """Faithful eval-mode f32 reference of the PyTorch module (unfused)."""
    h = x.reshape(x.shape[0], -1)
    emb = None
    for li, blk in enumerate(raw["enc"] + raw["dec"]):
        h = jnp.dot(h, blk["W"].T,
                    precision=jax.lax.Precision.HIGHEST) + blk["b"]
        if blk["bn"] is not None:
            bn = blk["bn"]
            h = (h - bn["mean"]) * jax.lax.rsqrt(bn["var"] + BN_EPS) \
                * bn["gamma"] + bn["beta"]
            h = jnp.maximum(h, 0.0)
            # Dropout: identity in eval mode.
        if li == EMBED_LAYER:
            emb = h
    return emb, h.reshape(-1, n_channels, height, width)


# ----------------------------------------------------------------------------
if __name__ == "__main__":
    BATCH = 32           # 4 batch tiles of 8 -> exercises the weight-resident grid
    HEIGHT = WIDTH = 16
    N_CHANNELS = 1       # decoder head outputs height*width features, so the
                         # module's ReshapeLayer(-1, C, H, W) is batch-consistent
                         # only for C == 1
    EMBEDDING = 32
    TILE_B = 8           # small demo tile; use 128 (v5e) / 256 (v6e, v7x) when
                         # batch is large enough for the MXU to bind

    root = jax.random.PRNGKey(0)
    k_par, k_x = jax.random.split(root)

    raw = init_raw_params(k_par, HEIGHT, WIDTH, N_CHANNELS, EMBEDDING)
    folded_f32 = fold_bn(raw)
    kernel_params = prepare_kernel_params(folded_f32)
    x = jax.random.normal(k_x, (BATCH, N_CHANNELS, HEIGHT, WIDTH), jnp.float32)

    emb, rec = stacked_autoencoder_forward(
        kernel_params, x, n_channels=N_CHANNELS, height=HEIGHT, width=WIDTH,
        embedding_size=EMBEDDING, batch_tile=TILE_B)
    emb, rec = jax.block_until_ready((emb, rec))

    assert emb.shape == (BATCH, EMBEDDING)
    assert rec.shape == (BATCH, N_CHANNELS, HEIGHT, WIDTH)

    # 1) Kernel vs a pure-JAX mirror of the same math (bf16 MXU / f32 acc,
    #    unpadded) — verifies zero-padding + tiling do not change results.
    emb_ref, rec_flat_ref = ref_same_math(folded_f32, x)
    assert jnp.allclose(emb, emb_ref, rtol=2e-3, atol=2e-3)
    assert jnp.allclose(rec.reshape(BATCH, -1), rec_flat_ref, rtol=2e-3, atol=2e-3)

    # 2) Kernel vs faithful unfused f32 module semantics
    #    (Linear -> BatchNorm(eval) -> ReLU -> Dropout(identity)).  The loose
    #    tolerance only covers the deliberate bf16 cast of MXU operands.
    emb_f32, rec_f32 = ref_module_f32(raw, x, N_CHANNELS, HEIGHT, WIDTH)
    assert jnp.allclose(emb, emb_f32, rtol=1e-1, atol=1e-1)
    assert jnp.allclose(rec, rec_f32, rtol=1e-1, atol=1e-1)

    print("KERNEL_OK")
</pallas_src>

<mosaic_0001>
module attributes {stable_mosaic.version = 11 : i64} {
  func.func @stacked_ae_kernel(%arg0: i32, %arg1: memref<8x256xf32, #tpu.memory_space<vmem>>, %arg2: memref<256x512xbf16, #tpu.memory_space<vmem>>, %arg3: memref<1x512xf32, #tpu.memory_space<vmem>>, %arg4: memref<512x512xbf16, #tpu.memory_space<vmem>>, %arg5: memref<1x512xf32, #tpu.memory_space<vmem>>, %arg6: memref<512x2048xbf16, #tpu.memory_space<vmem>>, %arg7: memref<1x2048xf32, #tpu.memory_space<vmem>>, %arg8: memref<2048x128xbf16, #tpu.memory_space<vmem>>, %arg9: memref<1x128xf32, #tpu.memory_space<vmem>>, %arg10: memref<128x2048xbf16, #tpu.memory_space<vmem>>, %arg11: memref<1x2048xf32, #tpu.memory_space<vmem>>, %arg12: memref<2048x512xbf16, #tpu.memory_space<vmem>>, %arg13: memref<1x512xf32, #tpu.memory_space<vmem>>, %arg14: memref<512x512xbf16, #tpu.memory_space<vmem>>, %arg15: memref<1x512xf32, #tpu.memory_space<vmem>>, %arg16: memref<512x256xbf16, #tpu.memory_space<vmem>>, %arg17: memref<1x256xf32, #tpu.memory_space<vmem>>, %arg18: memref<8x128xf32, #tpu.memory_space<vmem>>, %arg19: memref<8x256xf32, #tpu.memory_space<vmem>>) attributes {dimension_semantics = [#tpu.dimension_semantics<parallel>], iteration_bounds = array<i64: 4>, scalar_prefetch = 0 : i64, scratch_operands = 0 : i64, tpu.core_type = #tpu.core_type<tc>, window_params = [{transform_indices = @transform_0, window_bounds = array<i64: 8, 256>}, {pipeline_mode = #tpu.pipeline_mode<synchronous>, transform_indices = @transform_1, window_bounds = array<i64: 256, 512>}, {pipeline_mode = #tpu.pipeline_mode<synchronous>, transform_indices = @transform_2, window_bounds = array<i64: 1, 512>}, {pipeline_mode = #tpu.pipeline_mode<synchronous>, transform_indices = @transform_3, window_bounds = array<i64: 512, 512>}, {pipeline_mode = #tpu.pipeline_mode<synchronous>, transform_indices = @transform_4, window_bounds = array<i64: 1, 512>}, {pipeline_mode = #tpu.pipeline_mode<synchronous>, transform_indices = @transform_5, window_bounds = array<i64: 512, 2048>}, {pipeline_mode = #tpu.pipeline_mode<synchronous>, transform_indices = @transform_6, window_bounds = array<i64: 1, 2048>}, {pipeline_mode = #tpu.pipeline_mode<synchronous>, transform_indices = @transform_7, window_bounds = array<i64: 2048, 128>}, {pipeline_mode = #tpu.pipeline_mode<synchronous>, transform_indices = @transform_8, window_bounds = array<i64: 1, 128>}, {pipeline_mode = #tpu.pipeline_mode<synchronous>, transform_indices = @transform_9, window_bounds = array<i64: 128, 2048>}, {pipeline_mode = #tpu.pipeline_mode<synchronous>, transform_indices = @transform_10, window_bounds = array<i64: 1, 2048>}, {pipeline_mode = #tpu.pipeline_mode<synchronous>, transform_indices = @transform_11, window_bounds = array<i64: 2048, 512>}, {pipeline_mode = #tpu.pipeline_mode<synchronous>, transform_indices = @transform_12, window_bounds = array<i64: 1, 512>}, {pipeline_mode = #tpu.pipeline_mode<synchronous>, transform_indices = @transform_13, window_bounds = array<i64: 512, 512>}, {pipeline_mode = #tpu.pipeline_mode<synchronous>, transform_indices = @transform_14, window_bounds = array<i64: 1, 512>}, {pipeline_mode = #tpu.pipeline_mode<synchronous>, transform_indices = @transform_15, window_bounds = array<i64: 512, 256>}, {pipeline_mode = #tpu.pipeline_mode<synchronous>, transform_indices = @transform_16, window_bounds = array<i64: 1, 256>}, {transform_indices = @transform_17, window_bounds = array<i64: 8, 128>}, {transform_indices = @transform_18, window_bounds = array<i64: 8, 256>}]} {
    %c0 = arith.constant 0 : index
    %c0_0 = arith.constant 0 : index
    %0 = vector.load %arg1[%c0, %c0_0] : memref<8x256xf32, #tpu.memory_space<vmem>>, vector<8x256xf32>
    %1 = arith.truncf %0 : vector<8x256xf32> to vector<8x256xbf16>
    %c0_1 = arith.constant 0 : index
    %c0_2 = arith.constant 0 : index
    %2 = vector.load %arg2[%c0_1, %c0_2] : memref<256x512xbf16, #tpu.memory_space<vmem>>, vector<256x512xbf16>
    %cst = arith.constant dense<0.000000e+00> : vector<8x512xf32>
    %3 = tpu.matmul %1, %2, %cst {dimension_numbers = #tpu.dot_dimension_numbers<[1], [0], [0], [1], [0, 0, 1, 1], [], []>} : vector<8x256xbf16>, vector<256x512xbf16>, vector<8x512xf32> -> vector<8x512xf32>
    %c0_3 = arith.constant 0 : index
    %c0_4 = arith.constant 0 : index
    %4 = vector.load %arg3[%c0_3, %c0_4] : memref<1x512xf32, #tpu.memory_space<vmem>>, vector<1x512xf32>
    %5 = vector.broadcast %4 : vector<1x512xf32> to vector<8x512xf32>
    %6 = arith.addf %3, %5 : vector<8x512xf32>
    %cst_5 = arith.constant 0.000000e+00 : f32
    %7 = vector.broadcast %cst_5 : f32 to vector<8x512xf32>
    %8 = arith.maximumf %6, %7 : vector<8x512xf32>
    %9 = arith.truncf %8 : vector<8x512xf32> to vector<8x512xbf16>
    %c0_6 = arith.constant 0 : index
    %c0_7 = arith.constant 0 : index
    %10 = vector.load %arg4[%c0_6, %c0_7] : memref<512x512xbf16, #tpu.memory_space<vmem>>, vector<512x512xbf16>
    %cst_8 = arith.constant dense<0.000000e+00> : vector<8x512xf32>
    %11 = tpu.matmul %9, %10, %cst_8 {dimension_numbers = #tpu.dot_dimension_numbers<[1], [0], [0], [1], [0, 0, 1, 1], [], []>} : vector<8x512xbf16>, vector<512x512xbf16>, vector<8x512xf32> -> vector<8x512xf32>
    %c0_9 = arith.constant 0 : index
    %c0_10 = arith.constant 0 : index
    %12 = vector.load %arg5[%c0_9, %c0_10] : memref<1x512xf32, #tpu.memory_space<vmem>>, vector<1x512xf32>
    %13 = vector.broadcast %12 : vector<1x512xf32> to vector<8x512xf32>
    %14 = arith.addf %11, %13 : vector<8x512xf32>
    %cst_11 = arith.constant 0.000000e+00 : f32
    %15 = vector.broadcast %cst_11 : f32 to vector<8x512xf32>
    %16 = arith.maximumf %14, %15 : vector<8x512xf32>
    %17 = arith.truncf %16 : vector<8x512xf32> to vector<8x512xbf16>
    %c0_12 = arith.constant 0 : index
    %c0_13 = arith.constant 0 : index
    %18 = vector.load %arg6[%c0_12, %c0_13] : memref<512x2048xbf16, #tpu.memory_space<vmem>>, vector<512x2048xbf16>
    %cst_14 = arith.constant dense<0.000000e+00> : vector<8x2048xf32>
    %19 = tpu.matmul %17, %18, %cst_14 {dimension_numbers = #tpu.dot_dimension_numbers<[1], [0], [0], [1], [0, 0, 1, 1], [], []>} : vector<8x512xbf16>, vector<512x2048xbf16>, vector<8x2048xf32> -> vector<8x2048xf32>
    %c0_15 = arith.constant 0 : index
    %c0_16 = arith.constant 0 : index
    %20 = vector.load %arg7[%c0_15, %c0_16] : memref<1x2048xf32, #tpu.memory_space<vmem>>, vector<1x2048xf32>
    %21 = vector.broadcast %20 : vector<1x2048xf32> to vector<8x2048xf32>
    %22 = arith.addf %19, %21 : vector<8x2048xf32>
    %cst_17 = arith.constant 0.000000e+00 : f32
    %23 = vector.broadcast %cst_17 : f32 to vector<8x2048xf32>
    %24 = arith.maximumf %22, %23 : vector<8x2048xf32>
    %25 = arith.truncf %24 : vector<8x2048xf32> to vector<8x2048xbf16>
    %c0_18 = arith.constant 0 : index
    %c0_19 = arith.constant 0 : index
    %26 = vector.load %arg8[%c0_18, %c0_19] : memref<2048x128xbf16, #tpu.memory_space<vmem>>, vector<2048x128xbf16>
    %cst_20 = arith.constant dense<0.000000e+00> : vector<8x128xf32>
    %27 = tpu.matmul %25, %26, %cst_20 {dimension_numbers = #tpu.dot_dimension_numbers<[1], [0], [0], [1], [0, 0, 1, 1], [], []>} : vector<8x2048xbf16>, vector<2048x128xbf16>, vector<8x128xf32> -> vector<8x128xf32>
    %c0_21 = arith.constant 0 : index
    %c0_22 = arith.constant 0 : index
    %28 = vector.load %arg9[%c0_21, %c0_22] : memref<1x128xf32, #tpu.memory_space<vmem>>, vector<1x128xf32>
    %29 = vector.broadcast %28 : vector<1x128xf32> to vector<8x128xf32>
    %30 = arith.addf %27, %29 : vector<8x128xf32>
    %c0_23 = arith.constant 0 : index
    %c0_24 = arith.constant 0 : index
    %31 = vector.load %arg18[%c0_23, %c0_24] : memref<8x128xf32, #tpu.memory_space<vmem>>, vector<8x128xf32>
    tpu.vector_store %arg18[%c0_23, %c0_24], %30 {strides = array<i32>} : memref<8x128xf32, #tpu.memory_space<vmem>>, vector<8x128xf32>,
    %32 = arith.truncf %30 : vector<8x128xf32> to vector<8x128xbf16>
    %c0_25 = arith.constant 0 : index
    %c0_26 = arith.constant 0 : index
    %33 = vector.load %arg10[%c0_25, %c0_26] : memref<128x2048xbf16, #tpu.memory_space<vmem>>, vector<128x2048xbf16>
    %cst_27 = arith.constant dense<0.000000e+00> : vector<8x2048xf32>
    %34 = tpu.matmul %32, %33, %cst_27 {dimension_numbers = #tpu.dot_dimension_numbers<[1], [0], [0], [1], [0, 0, 1, 1], [], []>} : vector<8x128xbf16>, vector<128x2048xbf16>, vector<8x2048xf32> -> vector<8x2048xf32>
    %c0_28 = arith.constant 0 : index
    %c0_29 = arith.constant 0 : index
    %35 = vector.load %arg11[%c0_28, %c0_29] : memref<1x2048xf32, #tpu.memory_space<vmem>>, vector<1x2048xf32>
    %36 = vector.broadcast %35 : vector<1x2048xf32> to vector<8x2048xf32>
    %37 = arith.addf %34, %36 : vector<8x2048xf32>
    %cst_30 = arith.constant 0.000000e+00 : f32
    %38 = vector.broadcast %cst_30 : f32 to vector<8x2048xf32>
    %39 = arith.maximumf %37, %38 : vector<8x2048xf32>
    %40 = arith.truncf %39 : vector<8x2048xf32> to vector<8x2048xbf16>
    %c0_31 = arith.constant 0 : index
    %c0_32 = arith.constant 0 : index
    %41 = vector.load %arg12[%c0_31, %c0_32] : memref<2048x512xbf16, #tpu.memory_space<vmem>>, vector<2048x512xbf16>
    %cst_33 = arith.constant dense<0.000000e+00> : vector<8x512xf32>
    %42 = tpu.matmul %40, %41, %cst_33 {dimension_numbers = #tpu.dot_dimension_numbers<[1], [0], [0], [1], [0, 0, 1, 1], [], []>} : vector<8x2048xbf16>, vector<2048x512xbf16>, vector<8x512xf32> -> vector<8x512xf32>
    %c0_34 = arith.constant 0 : index
    %c0_35 = arith.constant 0 : index
    %43 = vector.load %arg13[%c0_34, %c0_35] : memref<1x512xf32, #tpu.memory_space<vmem>>, vector<1x512xf32>
    %44 = vector.broadcast %43 : vector<1x512xf32> to vector<8x512xf32>
    %45 = arith.addf %42, %44 : vector<8x512xf32>
    %cst_36 = arith.constant 0.000000e+00 : f32
    %46 = vector.broadcast %cst_36 : f32 to vector<8x512xf32>
    %47 = arith.maximumf %45, %46 : vector<8x512xf32>
    %48 = arith.truncf %47 : vector<8x512xf32> to vector<8x512xbf16>
    %c0_37 = arith.constant 0 : index
    %c0_38 = arith.constant 0 : index
    %49 = vector.load %arg14[%c0_37, %c0_38] : memref<512x512xbf16, #tpu.memory_space<vmem>>, vector<512x512xbf16>
    %cst_39 = arith.constant dense<0.000000e+00> : vector<8x512xf32>
    %50 = tpu.matmul %48, %49, %cst_39 {dimension_numbers = #tpu.dot_dimension_numbers<[1], [0], [0], [1], [0, 0, 1, 1], [], []>} : vector<8x512xbf16>, vector<512x512xbf16>, vector<8x512xf32> -> vector<8x512xf32>
    %c0_40 = arith.constant 0 : index
    %c0_41 = arith.constant 0 : index
    %51 = vector.load %arg15[%c0_40, %c0_41] : memref<1x512xf32, #tpu.memory_space<vmem>>, vector<1x512xf32>
    %52 = vector.broadcast %51 : vector<1x512xf32> to vector<8x512xf32>
    %53 = arith.addf %50, %52 : vector<8x512xf32>
    %cst_42 = arith.constant 0.000000e+00 : f32
    %54 = vector.broadcast %cst_42 : f32 to vector<8x512xf32>
    %55 = arith.maximumf %53, %54 : vector<8x512xf32>
    %56 = arith.truncf %55 : vector<8x512xf32> to vector<8x512xbf16>
    %c0_43 = arith.constant 0 : index
    %c0_44 = arith.constant 0 : index
    %57 = vector.load %arg16[%c0_43, %c0_44] : memref<512x256xbf16, #tpu.memory_space<vmem>>, vector<512x256xbf16>
    %cst_45 = arith.constant dense<0.000000e+00> : vector<8x256xf32>
    %58 = tpu.matmul %56, %57, %cst_45 {dimension_numbers = #tpu.dot_dimension_numbers<[1], [0], [0], [1], [0, 0, 1, 1], [], []>} : vector<8x512xbf16>, vector<512x256xbf16>, vector<8x256xf32> -> vector<8x256xf32>
    %c0_46 = arith.constant 0 : index
    %c0_47 = arith.constant 0 : index
    %59 = vector.load %arg17[%c0_46, %c0_47] : memref<1x256xf32, #tpu.memory_space<vmem>>, vector<1x256xf32>
    %60 = vector.broadcast %59 : vector<1x256xf32> to vector<8x256xf32>
    %61 = arith.addf %58, %60 : vector<8x256xf32>
    %c0_48 = arith.constant 0 : index
    %c0_49 = arith.constant 0 : index
    %62 = vector.load %arg19[%c0_48, %c0_49] : memref<8x256xf32, #tpu.memory_space<vmem>>, vector<8x256xf32>
    tpu.vector_store %arg19[%c0_48, %c0_49], %61 {strides = array<i32>} : memref<8x256xf32, #tpu.memory_space<vmem>>, vector<8x256xf32>,
    return
  }
  func.func @transform_0(%arg0: i32) -> (i32, i32) {
    %c0_i32 = arith.constant 0 : i32
    %c0_i32_0 = arith.constant 0 : i32
    return %arg0, %c0_i32 : i32, i32
  }
  func.func @transform_1(%arg0: i32) -> (i32, i32) {
    %c0_i32 = arith.constant 0 : i32
    %c0_i32_0 = arith.constant 0 : i32
    %c0_i32_1 = arith.constant 0 : i32
    return %c0_i32, %c0_i32_0 : i32, i32
  }
  func.func @transform_2(%arg0: i32) -> (i32, i32) {
    %c0_i32 = arith.constant 0 : i32
    %c0_i32_0 = arith.constant 0 : i32
    %c0_i32_1 = arith.constant 0 : i32
    return %c0_i32, %c0_i32_0 : i32, i32
  }
  func.func @transform_3(%arg0: i32) -> (i32, i32) {
    %c0_i32 = arith.constant 0 : i32
    %c0_i32_0 = arith.constant 0 : i32
    %c0_i32_1 = arith.constant 0 : i32
    return %c0_i32, %c0_i32_0 : i32, i32
  }
  func.func @transform_4(%arg0: i32) -> (i32, i32) {
    %c0_i32 = arith.constant 0 : i32
    %c0_i32_0 = arith.constant 0 : i32
    %c0_i32_1 = arith.constant 0 : i32
    return %c0_i32, %c0_i32_0 : i32, i32
  }
  func.func @transform_5(%arg0: i32) -> (i32, i32) {
    %c0_i32 = arith.constant 0 : i32
    %c0_i32_0 = arith.constant 0 : i32
    %c0_i32_1 = arith.constant 0 : i32
    return %c0_i32, %c0_i32_0 : i32, i32
  }
  func.func @transform_6(%arg0: i32) -> (i32, i32) {
    %c0_i32 = arith.constant 0 : i32
    %c0_i32_0 = arith.constant 0 : i32
    %c0_i32_1 = arith.constant 0 : i32
    return %c0_i32, %c0_i32_0 : i32, i32
  }
  func.func @transform_7(%arg0: i32) -> (i32, i32) {
    %c0_i32 = arith.constant 0 : i32
    %c0_i32_0 = arith.constant 0 : i32
    %c0_i32_1 = arith.constant 0 : i32
    return %c0_i32, %c0_i32_0 : i32, i32
  }
  func.func @transform_8(%arg0: i32) -> (i32, i32) {
    %c0_i32 = arith.constant 0 : i32
    %c0_i32_0 = arith.constant 0 : i32
    %c0_i32_1 = arith.constant 0 : i32
    return %c0_i32, %c0_i32_0 : i32, i32
  }
  func.func @transform_9(%arg0: i32) -> (i32, i32) {
    %c0_i32 = arith.constant 0 : i32
    %c0_i32_0 = arith.constant 0 : i32
    %c0_i32_1 = arith.constant 0 : i32
    return %c0_i32, %c0_i32_0 : i32, i32
  }
  func.func @transform_10(%arg0: i32) -> (i32, i32) {
    %c0_i32 = arith.constant 0 : i32
    %c0_i32_0 = arith.constant 0 : i32
    %c0_i32_1 = arith.constant 0 : i32
    return %c0_i32, %c0_i32_0 : i32, i32
  }
  func.func @transform_11(%arg0: i32) -> (i32, i32) {
    %c0_i32 = arith.constant 0 : i32
    %c0_i32_0 = arith.constant 0 : i32
    %c0_i32_1 = arith.constant 0 : i32
    return %c0_i32, %c0_i32_0 : i32, i32
  }
  func.func @transform_12(%arg0: i32) -> (i32, i32) {
    %c0_i32 = arith.constant 0 : i32
    %c0_i32_0 = arith.constant 0 : i32
    %c0_i32_1 = arith.constant 0 : i32
    return %c0_i32, %c0_i32_0 : i32, i32
  }
  func.func @transform_13(%arg0: i32) -> (i32, i32) {
    %c0_i32 = arith.constant 0 : i32
    %c0_i32_0 = arith.constant 0 : i32
    %c0_i32_1 = arith.constant 0 : i32
    return %c0_i32, %c0_i32_0 : i32, i32
  }
  func.func @transform_14(%arg0: i32) -> (i32, i32) {
    %c0_i32 = arith.constant 0 : i32
    %c0_i32_0 = arith.constant 0 : i32
    %c0_i32_1 = arith.constant 0 : i32
    return %c0_i32, %c0_i32_0 : i32, i32
  }
  func.func @transform_15(%arg0: i32) -> (i32, i32) {
    %c0_i32 = arith.constant 0 : i32
    %c0_i32_0 = arith.constant 0 : i32
    %c0_i32_1 = arith.constant 0 : i32
    return %c0_i32, %c0_i32_0 : i32, i32
  }
  func.func @transform_16(%arg0: i32) -> (i32, i32) {
    %c0_i32 = arith.constant 0 : i32
    %c0_i32_0 = arith.constant 0 : i32
    %c0_i32_1 = arith.constant 0 : i32
    return %c0_i32, %c0_i32_0 : i32, i32
  }
  func.func @transform_17(%arg0: i32) -> (i32, i32) {
    %c0_i32 = arith.constant 0 : i32
    %c0_i32_0 = arith.constant 0 : i32
    return %arg0, %c0_i32 : i32, i32
  }
  func.func @transform_18(%arg0: i32) -> (i32, i32) {
    %c0_i32 = arith.constant 0 : i32
    %c0_i32_0 = arith.constant 0 : i32
    return %arg0, %c0_i32 : i32, i32
  }
}

</mosaic_0001>

<bundles_post_ra>
// kernel: tpu_custom_call.1
= control target key start
LH: loop header
LB: loop body
LE: loop exit
PB: predicated region body
PF: predicated region fallthrough
CT: control target
= control target key end

     0   :  { %s19479_s0 = inlined_call_operand.hbm [shape: f32[32,256], index: 0, kind: input, shape index: {}]   ;;  %s19480_s1 = inlined_call_operand.hbm [shape: bf16[256,512], index: 1, kind: input, shape index: {}]   ;;  %s19481_s2 = inlined_call_operand.hbm [shape: f32[1,512], index: 2, kind: input, shape index: {}]   ;;  %s19482_s3 = inlined_call_operand.hbm [shape: bf16[512,512], index: 3, kind: input, shape index: {}]   ;;  %s19483_s4 = inlined_call_operand.hbm [shape: f32[1,512], index: 4, kind: input, shape index: {}]   ;;  %s19484_s5 = inlined_call_operand.hbm [shape: bf16[512,2048], index: 5, kind: input, shape index: {}]   ;;  %s19485_s6 = inlined_call_operand.hbm [shape: f32[1,2048], index: 6, kind: input, shape index: {}]   ;;  %s19486_s7 = inlined_call_operand.hbm [shape: bf16[2048,128], index: 7, kind: input, shape index: {}]   ;;  %s19487_s8 = inlined_call_operand.hbm [shape: f32[1,128], index: 8, kind: input, shape index: {}]   ;;  %s19488_s9 = inlined_call_operand.hbm [shape: bf16[128,2048], index: 9, kind: input, shape index: {}]   ;;  %s19489_s10 = inlined_call_operand.hbm [shape: f32[1,2048], index: 10, kind: input, shape index: {}]   ;;  %s19490_s11 = inlined_call_operand.hbm [shape: bf16[2048,512], index: 11, kind: input, shape index: {}]   ;;  %s19491_s12 = inlined_call_operand.hbm [shape: f32[1,512], index: 12, kind: input, shape index: {}]   ;;  %s19492_s13 = inlined_call_operand.hbm [shape: bf16[512,512], index: 13, kind: input, shape index: {}]   ;;  %s19493_s14 = inlined_call_operand.hbm [shape: f32[1,512], index: 14, kind: input, shape index: {}]   ;;  %s19494_s15 = inlined_call_operand.hbm [shape: bf16[512,256], index: 15, kind: input, shape index: {}]   ;;  %s19495_s16 = inlined_call_operand.hbm [shape: f32[1,256], index: 16, kind: input, shape index: {}]   ;;  %s19496_s17 = inlined_call_operand.hbm [shape: f32[32,128], index: 17, kind: output, shape index: {0}]   ;;  %s19497_s18 = inlined_call_operand.hbm [shape: f32[32,256], index: 18, kind: output, shape index: {1}]  }
   0x1   :  { %19521 = sst [smem:[#allocation49_spill]] %s19479_s0 }
   0x2   :  { %19522 = sst [smem:[#allocation50_spill]] %s19480_s1 }
   0x3   :  { %19523 = sst [smem:[#allocation51_spill]] %s19481_s2 }
   0x4   :  { %19524 = sst [smem:[#allocation52_spill]] %s19482_s3 }
   0x5   :  { %19525 = sst [smem:[#allocation53_spill]] %s19483_s4 }
   0x6   :  { %19526 = sst [smem:[#allocation54_spill]] %s19484_s5 }
   0x7   :  { %19527 = sst [smem:[#allocation55_spill]] %s19496_s17 }
   0x8   :  { %19528 = sst [smem:[#allocation56_spill]] %s19497_s18 }
   0x9   :  { %24 = vsyncpa [#allocation3], 0 }
   0xa   :  { %26 = vsyncpa [#allocation3 + $0x1], 0 }
   0xb   :  { %27 = vsyncpa [#allocation6], 0 }
   0xc   :  { %28 = vsyncpa [#allocation9], 0 }
   0xd   :  { %29 = vsyncpa [#allocation12], 0 }
   0xe   :  { %30 = vsyncpa [#allocation15], 0 }
   0xf   :  { %31 = vsyncpa [#allocation18], 0 }
  0x10   :  { %32 = vsyncpa [#allocation21], 0 }
  0x11   :  { %33 = vsyncpa [#allocation24], 0 }
  0x12   :  { %34 = vsyncpa [#allocation27], 0 }
  0x13   :  { %35 = vsyncpa [#allocation4], 0 }
  0x14   :  { %37 = vsyncpa [#allocation4 + $0x1], 0 }
  0x15   :  { %38 = vsyncpa [#allocation31], 0 }
  0x16   :  { %40 = vsyncpa [#allocation31 + $0x1], 0  ;;  %s18632_s27 = smov 0   ;;  %s18634_s28 = smov 0  }
  0x17   :  { %s18636_s29 = smov 0   ;;  %s18638_s30 = smov 0  }
  0x18 LB: > { %19529 = sst [smem:[#allocation43_spill]] %s18496_s27  ;;  %s18510_s0 = smov [#allocation5]   ;;  %s18508_s30 = sphi %s18638_s30, %s19007_s30   ;;  %s18504_s29 = sphi %s18636_s29, %s19587_s29   ;;  %s18500_s28 = sphi %s18634_s28, %s19586_s28   ;;  %s18496_s27 = sphi %s18632_s27, %s19585_s27  }
  0x19   : > { %19530 = sst [smem:[#allocation44_spill]] %s18500_s28  ;;  %s477_s19 = sshll.u32 %s18510_s0, 4  ;;  %s18658_s19 = int_to_ptr.vmem [resolvable:$true] %s477_s19 }
  0x1a   : > { %19531 = sst [smem:[#allocation45_spill]] %s18504_s29  ;;  %s18653_s1 = sadd.s32 4294967295, %s18508_s30  }
  0x1b   : > { %19532 = sst [smem:[#allocation46_spill]] %s18508_s30  ;;  %p14179_p0 = scmp.ge.s32.totalorder %s18508_s30, 1 }
  0x1c   : > { %19533 = sst [smem:[#allocation47_spill]] %s18653_s1  ;;  %p19515_p1 = scmp.eq.s32.totalorder %s18653_s1, 0 }
  0x1d   : > { %p465_p2 = scmp.lt.s32.totalorder %s18508_s30, 5  ;;  %s18511_s21 = smov [#allocation8]  }
  0x1e   : > { %s501_s22 = sshll.u32 %s18511_s21, 4  ;;  %s18512_s23 = smov [#allocation11]   ;;  %s18672_s22 = int_to_ptr.vmem [resolvable:$true] %s501_s22 }
  0x1f   : > { %p18660_p3 = pnand %p14179_p0, %p465_p2  ;;  %s525_s24 = sshll.u32 %s18512_s23, 4  ;;  %s18674_s24 = int_to_ptr.vmem [resolvable:$true] %s525_s24 }
  0x20   : > { %s19537_s0 = sld [smem:[#allocation50_spill]] }
  0x21   : > { %s19534_s20 = scalar_select %p18660_p3, 1, 0 }
  0x22   : > { %p16278_p4 = pneg %p18660_p3 }
  0x23   : > { %19535 = sst [smem:[#allocation48_spill]] %s19534_s20 }
  0x24   : > { %p18668_p5 = pnand %p16278_p4, %p19515_p1 }
  0x26   : > { %s17900_s18 = scalar_lea.hbm %s19537_s0, 8192  ;;  %p18684_p7 = pneg %p18668_p5 }
  0x27   : > { %p17901_p6 = scmp.ne.s32.totalorder %s19537_s0, %s17900_s18  ;;  %p17907_p10 = scmp.lt.u32.totalorder %s17900_s18, %s19537_s0 }
  0x29   : > { %p17903_p8 = pnand %p18684_p7, %p17901_p6 }
  0x2b   : > { %p17904_p9 = pneg %p17903_p8 }
  0x2d   : > { %p17909_p11 = pnand %p17907_p10, %p17904_p9 }
  0x2f   : > { %17912 = shalt.err (!%p17909_p11)
}
  0x30   : > { %s17913_s17 = scalar_lea.vmem %s18658_s19, 8192  ;;  %p17921_p2 = scmp.lt.s32.totalorder %s18658_s19, %s18658_s19 }
  0x31   : > { %p17914_p12 = scmp.ne.s32.totalorder %s18658_s19, %s17913_s17  ;;  %p17922_p4 = scmp.lt.s32.totalorder %s17913_s17, %s17913_s17 }
  0x33   : > { %p17916_p13 = pnand %p17914_p12, %p18684_p7  ;;  %p17923_p6 = por %p17922_p4, %p17921_p2 }
  0x35   : > { %p17917_p0 = pneg %p17916_p13 }
  0x37   : > { %p17924_p8 = pnand %p17923_p6, %p17917_p0 }
  0x39   : > { %17927 = shalt.err (!%p17924_p8)
}
  0x3a   : > { %s19511_s20 = smov 256   ;;  %s19513_s18 = smov 16  }
  0x3b   : > { %16281 = dma.hbm_to_vmem [thread:$0]  (!%p18668_p5), %s19537_s0, 8192, %s18658_s19, [#allocation6], %s19511_s20, %s19511_s20, %s19513_s18  }
  0x3c   : > { %s19539_s3 = sld [smem:[#allocation52_spill]] }
  0x42   : > { %s17928_s17 = scalar_lea.hbm %s19539_s3, 16384 }
  0x43   : > { %p17929_p9 = scmp.ne.s32.totalorder %s19539_s3, %s17928_s17  ;;  %p17935_p12 = scmp.lt.u32.totalorder %s17928_s17, %s19539_s3 }
  0x45   : > { %p17931_p10 = pnand %p17929_p9, %p18684_p7 }
  0x47   : > { %p17932_p11 = pneg %p17931_p10 }
  0x49   : > { %p17937_p13 = pnand %p17935_p12, %p17932_p11 }
  0x4b   : > { %17940 = shalt.err (!%p17937_p13)
}
  0x4c   : > { %s17941_s19 = scalar_lea.vmem %s18672_s22, 16384  ;;  %p17949_p6 = scmp.lt.s32.totalorder %s18672_s22, %s18672_s22 }
  0x4d   : > { %p17942_p0 = scmp.ne.s32.totalorder %s18672_s22, %s17941_s19  ;;  %p17950_p8 = scmp.lt.s32.totalorder %s17941_s19, %s17941_s19 }
  0x4f   : > { %p17944_p2 = pnand %p17942_p0, %p18684_p7  ;;  %p17951_p9 = por %p17950_p8, %p17949_p6 }
  0x51   : > { %p17945_p4 = pneg %p17944_p2 }
  0x53   : > { %p17952_p10 = pnand %p17951_p9, %p17945_p4 }
  0x55   : > { %17955 = shalt.err (!%p17952_p10)
}
  0x56   : > { %16287 = dma.hbm_to_vmem [thread:$0]  (!%p18668_p5), %s19539_s3, 16384, %s18672_s22, [#allocation9], %s19511_s20, %s19511_s20, %s19513_s18  }
  0x57   : > { %s19540_s5 = sld [smem:[#allocation54_spill]] }
  0x5d   : > { %s17956_s1 = scalar_lea.hbm %s19540_s5, 65536 }
  0x5e   : > { %p17957_p11 = scmp.ne.s32.totalorder %s19540_s5, %s17956_s1  ;;  %p17963_p0 = scmp.lt.u32.totalorder %s17956_s1, %s19540_s5 }
  0x60   : > { %p17959_p12 = pnand %p17957_p11, %p18684_p7 }
  0x62   : > { %p17960_p13 = pneg %p17959_p12 }
  0x64   : > { %p17965_p2 = pnand %p17963_p0, %p17960_p13 }
  0x66   : > { %17968 = shalt.err (!%p17965_p2)
}
  0x67   : > { %s17969_s22 = scalar_lea.vmem %s18674_s24, 65536  ;;  %p17977_p9 = scmp.lt.s32.totalorder %s18674_s24, %s18674_s24 }
  0x68   : > { %p17970_p4 = scmp.ne.s32.totalorder %s18674_s24, %s17969_s22  ;;  %p17978_p10 = scmp.lt.s32.totalorder %s17969_s22, %s17969_s22 }
  0x6a   : > { %p17972_p6 = pnand %p17970_p4, %p18684_p7  ;;  %p17979_p11 = por %p17978_p10, %p17977_p9 }
  0x6c   : > { %p17973_p8 = pneg %p17972_p6 }
  0x6e   : > { %p17980_p12 = pnand %p17979_p11, %p17973_p8 }
  0x70   : > { %17983 = shalt.err (!%p17980_p12)
}
  0x71   : > { %s19517_s19 = smov 1024   ;;  %s18516_s27 = smov 64  }
  0x72   : > { %16293 = dma.hbm_to_vmem [thread:$0]  (!%p18668_p5), %s19540_s5, 65536, %s18674_s24, [#allocation12], %s19517_s19, %s19517_s19, %s18516_s27  }
  0x73   : > { %s18517_s30 = smov [#allocation14]   ;;  %s17984_s23 = scalar_lea.hbm %s19486_s7, 16384 }
  0x74   : > { %s549_s1 = sshll.u32 %s18517_s30, 4  ;;  %p17985_p13 = scmp.ne.s32.totalorder %s19486_s7, %s17984_s23  ;;  %s550_s1 = int_to_ptr.vmem [resolvable:$true] %s549_s1 }
  0x75   : > { %p17991_p4 = scmp.lt.u32.totalorder %s17984_s23, %s19486_s7 }
  0x76   : > { %p17987_p0 = pnand %p17985_p13, %p18684_p7 }
  0x78   : > { %p17988_p2 = pneg %p17987_p0 }
  0x7a   : > { %p17993_p6 = pnand %p17991_p4, %p17988_p2 }
  0x7c   : > { %17996 = shalt.err (!%p17993_p6)
}
  0x7d   : > { %s17997_s24 = scalar_lea.vmem %s550_s1, 16384  ;;  %p18005_p11 = scmp.lt.s32.totalorder %s550_s1, %s550_s1 }
  0x7e   : > { %p17998_p8 = scmp.ne.s32.totalorder %s550_s1, %s17997_s24  ;;  %p18006_p12 = scmp.lt.s32.totalorder %s17997_s24, %s17997_s24 }
  0x80   : > { %p18000_p9 = pnand %p17998_p8, %p18684_p7  ;;  %p18007_p1 = por %p18006_p12, %p18005_p11 }
  0x82   : > { %p18001_p10 = pneg %p18000_p9 }
  0x84   : > { %p18008_p3 = pnand %p18007_p1, %p18001_p10 }
  0x86   : > { %18011 = shalt.err (!%p18008_p3)
}
  0x87   : > { %s18518_s28 = smov 4   ;;  %s18519_s29 = smov [#allocation17]  }
  0x88   : > { %16299 = dma.hbm_to_vmem [thread:$0]  (!%p18668_p5), %s19486_s7, 16384, %s550_s1, [#allocation15], %s18516_s27, %s18516_s27, %s18518_s28  }
  0x89   : > { %s573_s30 = sshll.u32 %s18519_s29, 4  ;;  %s18520_s25 = smov [#allocation20]   ;;  %s574_s30 = int_to_ptr.vmem [resolvable:$true] %s573_s30 }
  0x8a   : > { %s597_s26 = sshll.u32 %s18520_s25, 4  ;;  %s18012_s22 = scalar_lea.hbm %s19488_s9, 16384  ;;  %s598_s26 = int_to_ptr.vmem [resolvable:$true] %s597_s26 }
  0x8b   : > { %p18013_p1 = scmp.ne.s32.totalorder %s19488_s9, %s18012_s22  ;;  %p18019_p0 = scmp.lt.u32.totalorder %s18012_s22, %s19488_s9 }
  0x8d   : > { %p18015_p3 = pnand %p18013_p1, %p18684_p7 }
  0x8f   : > { %p18016_p13 = pneg %p18015_p3 }
  0x91   : > { %p18021_p2 = pnand %p18019_p0, %p18016_p13 }
  0x93   : > { %18024 = shalt.err (!%p18021_p2)
}
  0x94   : > { %s18025_s1 = scalar_lea.vmem %s574_s30, 16384  ;;  %p18033_p9 = scmp.lt.s32.totalorder %s574_s30, %s574_s30 }
  0x95   : > { %p18026_p4 = scmp.ne.s32.totalorder %s574_s30, %s18025_s1  ;;  %p18034_p10 = scmp.lt.s32.totalorder %s18025_s1, %s18025_s1 }
  0x97   : > { %p18028_p6 = pnand %p18026_p4, %p18684_p7  ;;  %p18035_p11 = por %p18034_p10, %p18033_p9 }
  0x99   : > { %p18029_p8 = pneg %p18028_p6 }
  0x9b   : > { %p18036_p12 = pnand %p18035_p11, %p18029_p8 }
  0x9d   : > { %18039 = shalt.err (!%p18036_p12)
}
  0x9e   : > { %s19541_s19 = smov 1024   ;;  %s18040_s25 = scalar_lea.hbm %s19490_s11, 65536 }
  0x9f   : > { %16305 = dma.hbm_to_vmem [thread:$0]  (!%p18668_p5), %s19488_s9, 16384, %s574_s30, [#allocation18], %s19541_s19, %s19541_s19, %s18516_s27  }
  0xa0   : > { %p18041_p1 = scmp.ne.s32.totalorder %s19490_s11, %s18040_s25  ;;  %p18047_p0 = scmp.lt.u32.totalorder %s18040_s25, %s19490_s11 }
  0xa2   : > { %p18043_p3 = pnand %p18041_p1, %p18684_p7 }
  0xa4   : > { %p18044_p13 = pneg %p18043_p3 }
  0xa6   : > { %p18049_p2 = pnand %p18047_p0, %p18044_p13 }
  0xa8   : > { %18052 = shalt.err (!%p18049_p2)
}
  0xa9   : > { %s18053_s20 = scalar_lea.vmem %s598_s26, 65536  ;;  %p18061_p9 = scmp.lt.s32.totalorder %s598_s26, %s598_s26 }
  0xaa   : > { %p18054_p4 = scmp.ne.s32.totalorder %s598_s26, %s18053_s20  ;;  %p18062_p10 = scmp.lt.s32.totalorder %s18053_s20, %s18053_s20 }
  0xac   : > { %p18056_p6 = pnand %p18054_p4, %p18684_p7  ;;  %p18063_p11 = por %p18062_p10, %p18061_p9 }
  0xae   : > { %p18057_p8 = pneg %p18056_p6 }
  0xb0   : > { %p18064_p12 = pnand %p18063_p11, %p18057_p8 }
  0xb2   : > { %18067 = shalt.err (!%p18064_p12)
}
  0xb3   : > { %s19542_s27 = smov 16   ;;  %s19543_s30 = smov 256  }
  0xb4   : > { %16311 = dma.hbm_to_vmem [thread:$0]  (!%p18668_p5), %s19490_s11, 65536, %s598_s26, [#allocation21], %s19543_s30, %s19543_s30, %s19542_s27  }
  0xb5   : > { %s18521_s0 = smov [#allocation23]   ;;  %s18522_s18 = smov [#allocation26]  }
  0xb6   : > { %s621_s28 = sshll.u32 %s18521_s0, 4  ;;  %s645_s29 = sshll.u32 %s18522_s18, 4  ;;  %s622_s28 = int_to_ptr.vmem [resolvable:$true] %s621_s28  ;;  %s646_s29 = int_to_ptr.vmem [resolvable:$true] %s645_s29 }
  0xb7   : > { %s18068_s17 = scalar_lea.hbm %s19492_s13, 16384 }
  0xb8   : > { %p18069_p1 = scmp.ne.s32.totalorder %s19492_s13, %s18068_s17  ;;  %p18075_p0 = scmp.lt.u32.totalorder %s18068_s17, %s19492_s13 }
  0xba   : > { %p18071_p3 = pnand %p18069_p1, %p18684_p7 }
  0xbc   : > { %p18072_p13 = pneg %p18071_p3 }
  0xbe   : > { %p18077_p2 = pnand %p18075_p0, %p18072_p13 }
  0xc0   : > { %18080 = shalt.err (!%p18077_p2)
}
  0xc1   : > { %s18081_s26 = scalar_lea.vmem %s622_s28, 16384  ;;  %p18089_p9 = scmp.lt.s32.totalorder %s622_s28, %s622_s28 }
  0xc2   : > { %p18082_p4 = scmp.ne.s32.totalorder %s622_s28, %s18081_s26  ;;  %p18090_p10 = scmp.lt.s32.totalorder %s18081_s26, %s18081_s26 }
  0xc4   : > { %p18084_p6 = pnand %p18082_p4, %p18684_p7  ;;  %p18091_p11 = por %p18090_p10, %p18089_p9 }
  0xc6   : > { %p18085_p8 = pneg %p18084_p6 }
  0xc8   : > { %p18092_p12 = pnand %p18091_p11, %p18085_p8 }
  0xca   : > { %18095 = shalt.err (!%p18092_p12)
}
  0xcb   : > { %16317 = dma.hbm_to_vmem [thread:$0]  (!%p18668_p5), %s19492_s13, 16384, %s622_s28, [#allocation24], %s19543_s30, %s19543_s30, %s19542_s27  }
  0xcc   : > { %s18096_s23 = scalar_lea.hbm %s19494_s15, 8192 }
  0xcd   : > { %p18097_p1 = scmp.ne.s32.totalorder %s19494_s15, %s18096_s23  ;;  %p18103_p0 = scmp.lt.u32.totalorder %s18096_s23, %s19494_s15 }
  0xcf   : > { %p18099_p3 = pnand %p18097_p1, %p18684_p7 }
  0xd1   : > { %p18100_p13 = pneg %p18099_p3 }
  0xd3   : > { %p18105_p2 = pnand %p18103_p0, %p18100_p13 }
  0xd5   : > { %18108 = shalt.err (!%p18105_p2)
}
  0xd6   : > { %s18109_s1 = scalar_lea.vmem %s646_s29, 8192  ;;  %p18117_p9 = scmp.lt.s32.totalorder %s646_s29, %s646_s29 }
  0xd7   : > { %p18110_p4 = scmp.ne.s32.totalorder %s646_s29, %s18109_s1  ;;  %p18118_p10 = scmp.lt.s32.totalorder %s18109_s1, %s18109_s1 }
  0xd9   : > { %p18112_p6 = pnand %p18110_p4, %p18684_p7  ;;  %p18119_p11 = por %p18118_p10, %p18117_p9 }
  0xdb   : > { %p18113_p8 = pneg %p18112_p6 }
  0xdd   : > { %p18120_p12 = pnand %p18119_p11, %p18113_p8 }
  0xdf   : > { %18123 = shalt.err (!%p18120_p12)
}
  0xe0   : > { %s18523_s27 = smov 128   ;;  %s18524_s30 = smov 8  }
  0xe1   : > { %16323 = dma.hbm_to_vmem [thread:$0]  (!%p18668_p5), %s19494_s15, 8192, %s646_s29, [#allocation27], %s18523_s27, %s18523_s27, %s18524_s30  }
  0xe2   : > { %s18525_s19 = smov [#allocation7]   ;;  %s18526_s18 = smov [#allocation10]  }
  0xe3   : > { %s491_s0 = sshll.u32 %s18525_s19, 4  ;;  %s515_s25 = sshll.u32 %s18526_s18, 4  ;;  %s492_s0 = int_to_ptr.vmem [resolvable:$true] %s491_s0  ;;  %s516_s25 = int_to_ptr.vmem [resolvable:$true] %s515_s25 }
  0xe4   : > { %s19544_s22 = sld [smem:[#allocation51_spill]] }
  0xea   : > { %s18124_s24 = scalar_lea.hbm %s19544_s22, 64 }
  0xeb   : > { %p18125_p1 = scmp.ne.s32.totalorder %s19544_s22, %s18124_s24  ;;  %p18131_p0 = scmp.lt.u32.totalorder %s18124_s24, %s19544_s22 }
  0xed   : > { %p18127_p3 = pnand %p18125_p1, %p18684_p7 }
  0xef   : > { %p18128_p13 = pneg %p18127_p3 }
  0xf1   : > { %p18133_p2 = pnand %p18131_p0, %p18128_p13 }
  0xf3   : > { %18136 = shalt.err (!%p18133_p2)
}
  0xf4   : > { %s18137_s29 = scalar_lea.vmem %s492_s0, 64  ;;  %p18145_p9 = scmp.lt.s32.totalorder %s492_s0, %s492_s0 }
  0xf5   : > { %p18138_p4 = scmp.ne.s32.totalorder %s492_s0, %s18137_s29  ;;  %p18146_p10 = scmp.lt.s32.totalorder %s18137_s29, %s18137_s29 }
  0xf7   : > { %p18140_p6 = pnand %p18138_p4, %p18684_p7  ;;  %p18147_p11 = por %p18146_p10, %p18145_p9 }
  0xf9   : > { %p18141_p8 = pneg %p18140_p6 }
  0xfb   : > { %p18148_p12 = pnand %p18147_p11, %p18141_p8 }
  0xfd   : > { %18151 = shalt.err (!%p18148_p12)
}
  0xfe   : > { %16284 = dma.hbm_to_vmem [thread:$0]  (!%p18668_p5), %s19544_s22, 64, %s492_s0, [#allocation6]  }
  0xff   : > { %s19545_s4 = sld [smem:[#allocation53_spill]] }
 0x105   : > { %s18152_s28 = scalar_lea.hbm %s19545_s4, 64 }
 0x106   : > { %p18153_p1 = scmp.ne.s32.totalorder %s19545_s4, %s18152_s28  ;;  %p18159_p0 = scmp.lt.u32.totalorder %s18152_s28, %s19545_s4 }
 0x108   : > { %p18155_p3 = pnand %p18153_p1, %p18684_p7 }
 0x10a   : > { %p18156_p13 = pneg %p18155_p3 }
 0x10c   : > { %p18161_p2 = pnand %p18159_p0, %p18156_p13 }
 0x10e   : > { %18164 = shalt.err (!%p18161_p2)
}
 0x10f   : > { %s18165_s17 = scalar_lea.vmem %s516_s25, 64  ;;  %p18173_p9 = scmp.lt.s32.totalorder %s516_s25, %s516_s25 }
 0x110   : > { %p18166_p4 = scmp.ne.s32.totalorder %s516_s25, %s18165_s17  ;;  %p18174_p10 = scmp.lt.s32.totalorder %s18165_s17, %s18165_s17 }
 0x112   : > { %p18168_p6 = pnand %p18166_p4, %p18684_p7  ;;  %p18175_p11 = por %p18174_p10, %p18173_p9 }
 0x114   : > { %p18169_p8 = pneg %p18168_p6 }
 0x116   : > { %p18176_p12 = pnand %p18175_p11, %p18169_p8 }
 0x118   : > { %18179 = shalt.err (!%p18176_p12)
}
 0x119   : > { %16290 = dma.hbm_to_vmem [thread:$0]  (!%p18668_p5), %s19545_s4, 64, %s516_s25, [#allocation9]  }
 0x11a   : > { %s18527_s20 = smov [#allocation13]   ;;  %s18528_s29 = smov [#allocation16]  }
 0x11b   : > { %s539_s1 = sshll.u32 %s18527_s20, 4  ;;  %s563_s27 = sshll.u32 %s18528_s29, 4  ;;  %s540_s1 = int_to_ptr.vmem [resolvable:$true] %s539_s1  ;;  %s564_s27 = int_to_ptr.vmem [resolvable:$true] %s563_s27 }
 0x11c   : > { %s18180_s5 = scalar_lea.hbm %s19485_s6, 256 }
 0x11d   : > { %p18181_p1 = scmp.ne.s32.totalorder %s19485_s6, %s18180_s5  ;;  %p18187_p0 = scmp.lt.u32.totalorder %s18180_s5, %s19485_s6 }
 0x11f   : > { %p18183_p3 = pnand %p18181_p1, %p18684_p7 }
 0x121   : > { %p18184_p13 = pneg %p18183_p3 }
 0x123   : > { %p18189_p2 = pnand %p18187_p0, %p18184_p13 }
 0x125   : > { %18192 = shalt.err (!%p18189_p2)
}
 0x126   : > { %s18193_s25 = scalar_lea.vmem %s540_s1, 256  ;;  %p18201_p9 = scmp.lt.s32.totalorder %s540_s1, %s540_s1 }
 0x127   : > { %p18194_p4 = scmp.ne.s32.totalorder %s540_s1, %s18193_s25  ;;  %p18202_p10 = scmp.lt.s32.totalorder %s18193_s25, %s18193_s25 }
 0x129   : > { %p18196_p6 = pnand %p18194_p4, %p18684_p7  ;;  %p18203_p11 = por %p18202_p10, %p18201_p9 }
 0x12b   : > { %p18197_p8 = pneg %p18196_p6 }
 0x12d   : > { %p18204_p12 = pnand %p18203_p11, %p18197_p8 }
 0x12f   : > { %18207 = shalt.err (!%p18204_p12)
}
 0x130   : > { %16296 = dma.hbm_to_vmem [thread:$0]  (!%p18668_p5), %s19485_s6, 256, %s540_s1, [#allocation12]  }
 0x131   : > { %s18208_s20 = scalar_lea.hbm %s19487_s8, 16 }
 0x132   : > { %p18209_p1 = scmp.ne.s32.totalorder %s19487_s8, %s18208_s20  ;;  %p18215_p0 = scmp.lt.u32.totalorder %s18208_s20, %s19487_s8 }
 0x134   : > { %p18211_p3 = pnand %p18209_p1, %p18684_p7 }
 0x136   : > { %p18212_p13 = pneg %p18211_p3 }
 0x138   : > { %p18217_p2 = pnand %p18215_p0, %p18212_p13 }
 0x13a   : > { %18220 = shalt.err (!%p18217_p2)
}
 0x13b   : > { %s18221_s28 = scalar_lea.vmem %s564_s27, 16  ;;  %s18228_s1 = scalar_lea.vmem %s564_s27, 32 }
 0x13c   : > { %p18222_p4 = scmp.ne.s32.totalorder %s564_s27, %s18221_s28  ;;  %p18229_p9 = scmp.lt.s32.totalorder %s564_s27, %s564_s27 }
 0x13d   : > { %p18230_p10 = scmp.lt.s32.totalorder %s18228_s1, %s18221_s28 }
 0x13e   : > { %p18224_p6 = pnand %p18222_p4, %p18684_p7 }
 0x13f   : > { %p18231_p11 = por %p18230_p10, %p18229_p9 }
 0x140   : > { %p18225_p8 = pneg %p18224_p6 }
 0x142   : > { %p18232_p12 = pnand %p18231_p11, %p18225_p8 }
 0x144   : > { %18235 = shalt.err (!%p18232_p12)
}
 0x145   : > { %16302 = dma.hbm_to_vmem [thread:$0]  (!%p18668_p5), %s19487_s8, 16, %s564_s27, [#allocation15]  }
 0x146   : > { %s18529_s18 = smov [#allocation19]   ;;  %s18530_s23 = smov [#allocation22]  }
 0x147   : > { %s587_s25 = sshll.u32 %s18529_s18, 4  ;;  %s611_s17 = sshll.u32 %s18530_s23, 4  ;;  %s588_s25 = int_to_ptr.vmem [resolvable:$true] %s587_s25  ;;  %s612_s17 = int_to_ptr.vmem [resolvable:$true] %s611_s17 }
 0x148   : > { %s18236_s20 = scalar_lea.hbm %s19489_s10, 256 }
 0x149   : > { %p18237_p1 = scmp.ne.s32.totalorder %s19489_s10, %s18236_s20  ;;  %p18243_p0 = scmp.lt.u32.totalorder %s18236_s20, %s19489_s10 }
 0x14b   : > { %p18239_p3 = pnand %p18237_p1, %p18684_p7 }
 0x14d   : > { %p18240_p13 = pneg %p18239_p3 }
 0x14f   : > { %p18245_p2 = pnand %p18243_p0, %p18240_p13 }
 0x151   : > { %18248 = shalt.err (!%p18245_p2)
}
 0x152   : > { %s18249_s27 = scalar_lea.vmem %s588_s25, 256  ;;  %p18257_p9 = scmp.lt.s32.totalorder %s588_s25, %s588_s25 }
 0x153   : > { %p18250_p4 = scmp.ne.s32.totalorder %s588_s25, %s18249_s27  ;;  %p18258_p10 = scmp.lt.s32.totalorder %s18249_s27, %s18249_s27 }
 0x155   : > { %p18252_p6 = pnand %p18250_p4, %p18684_p7  ;;  %p18259_p11 = por %p18258_p10, %p18257_p9 }
 0x157   : > { %p18253_p8 = pneg %p18252_p6 }
 0x159   : > { %p18260_p12 = pnand %p18259_p11, %p18253_p8 }
 0x15b   : > { %18263 = shalt.err (!%p18260_p12)
}
 0x15c   : > { %16308 = dma.hbm_to_vmem [thread:$0]  (!%p18668_p5), %s19489_s10, 256, %s588_s25, [#allocation18]  }
 0x15d   : > { %s18264_s18 = scalar_lea.hbm %s19491_s12, 64 }
 0x15e   : > { %p18265_p1 = scmp.ne.s32.totalorder %s19491_s12, %s18264_s18  ;;  %p18271_p0 = scmp.lt.u32.totalorder %s18264_s18, %s19491_s12 }
 0x160   : > { %p18267_p3 = pnand %p18265_p1, %p18684_p7 }
 0x162   : > { %p18268_p13 = pneg %p18267_p3 }
 0x164   : > { %p18273_p2 = pnand %p18271_p0, %p18268_p13 }
 0x166   : > { %18276 = shalt.err (!%p18273_p2)
}
 0x167   : > { %s18277_s29 = scalar_lea.vmem %s612_s17, 64  ;;  %p18285_p9 = scmp.lt.s32.totalorder %s612_s17, %s612_s17 }
 0x168   : > { %p18278_p4 = scmp.ne.s32.totalorder %s612_s17, %s18277_s29  ;;  %p18286_p10 = scmp.lt.s32.totalorder %s18277_s29, %s18277_s29 }
 0x16a   : > { %p18280_p6 = pnand %p18278_p4, %p18684_p7  ;;  %p18287_p11 = por %p18286_p10, %p18285_p9 }
 0x16c   : > { %p18281_p8 = pneg %p18280_p6 }
 0x16e   : > { %p18288_p12 = pnand %p18287_p11, %p18281_p8 }
 0x170   : > { %18291 = shalt.err (!%p18288_p12)
}
 0x171   : > { %16314 = dma.hbm_to_vmem [thread:$0]  (!%p18668_p5), %s19491_s12, 64, %s612_s17, [#allocation21]  }
 0x172   : > { %s18531_s3 = smov [#allocation25]   ;;  %s18532_s27 = smov [#allocation28]  }
 0x173   : > { %s635_s5 = sshll.u32 %s18531_s3, 4  ;;  %s659_s28 = sshll.u32 %s18532_s27, 4  ;;  %s636_s5 = int_to_ptr.vmem [resolvable:$true] %s635_s5  ;;  %s660_s28 = int_to_ptr.vmem [resolvable:$true] %s659_s28 }
 0x174   : > { %s18292_s19 = scalar_lea.hbm %s19493_s14, 64 }
 0x175   : > { %p18293_p1 = scmp.ne.s32.totalorder %s19493_s14, %s18292_s19  ;;  %p18299_p0 = scmp.lt.u32.totalorder %s18292_s19, %s19493_s14 }
 0x177   : > { %p18295_p3 = pnand %p18293_p1, %p18684_p7 }
 0x179   : > { %p18296_p13 = pneg %p18295_p3 }
 0x17b   : > { %p18301_p2 = pnand %p18299_p0, %p18296_p13 }
 0x17d   : > { %18304 = shalt.err (!%p18301_p2)
}
 0x17e   : > { %s18305_s17 = scalar_lea.vmem %s636_s5, 64  ;;  %p18313_p9 = scmp.lt.s32.totalorder %s636_s5, %s636_s5 }
 0x17f   : > { %p18306_p4 = scmp.ne.s32.totalorder %s636_s5, %s18305_s17  ;;  %p18314_p10 = scmp.lt.s32.totalorder %s18305_s17, %s18305_s17 }
 0x181   : > { %p18308_p6 = pnand %p18306_p4, %p18684_p7  ;;  %p18315_p11 = por %p18314_p10, %p18313_p9 }
 0x183   : > { %p18309_p8 = pneg %p18308_p6 }
 0x185   : > { %p18316_p12 = pnand %p18315_p11, %p18309_p8 }
 0x187   : > { %18319 = shalt.err (!%p18316_p12)
}
 0x188   : > { %16320 = dma.hbm_to_vmem [thread:$0]  (!%p18668_p5), %s19493_s14, 64, %s636_s5, [#allocation24]  }
 0x189   : > { %s18320_s3 = scalar_lea.hbm %s19495_s16, 32 }
 0x18a   : > { %p18321_p1 = scmp.ne.s32.totalorder %s19495_s16, %s18320_s3  ;;  %p18327_p0 = scmp.lt.u32.totalorder %s18320_s3, %s19495_s16 }
 0x18c   : > { %p18323_p3 = pnand %p18321_p1, %p18684_p7 }
 0x18e   : > { %p18324_p13 = pneg %p18323_p3 }
 0x190   : > { %p18329_p2 = pnand %p18327_p0, %p18324_p13 }
 0x192   : > { %18332 = shalt.err (!%p18329_p2)
}
 0x193   : > { %s18333_s18 = scalar_lea.vmem %s660_s28, 32  ;;  %p18341_p9 = scmp.lt.s32.totalorder %s660_s28, %s660_s28 }
 0x194   : > { %p18334_p4 = scmp.ne.s32.totalorder %s660_s28, %s18333_s18  ;;  %p18342_p10 = scmp.lt.s32.totalorder %s18333_s18, %s18333_s18 }
 0x196   : > { %p18336_p6 = pnand %p18334_p4, %p18684_p7  ;;  %p18343_p11 = por %p18342_p10, %p18341_p9 }
 0x198   : > { %p18337_p8 = pneg %p18336_p6 }
 0x19a   : > { %p18344_p12 = pnand %p18343_p11, %p18337_p8 }
 0x19c   : > { %18347 = shalt.err (!%p18344_p12)
}
 0x19d   : > { %s19546_s0 = sld [smem:[#allocation46_spill]]  ;;  %s19547_s24 = sld [smem:[#allocation45_spill]] }
 0x19e   : > { %s19548_s17 = sld [smem:[#allocation44_spill]]  ;;  %s19549_s21 = sld [smem:[#allocation43_spill]] }
 0x19f   : > { %s19550_s20 = sld [smem:[#allocation47_spill]] }
 0x1a0   : > { %16326 = dma.hbm_to_vmem [thread:$0]  (!%p18668_p5), %s19495_s16, 32, %s660_s28, [#allocation27]  }
 0x1a3   : > { %s14178_s29 = sadd.s32 4294967294, %s19546_s0   ;;  %s19007_s30 = sadd.s32 1, %s19546_s0  }
 0x1a4   : > { %s53_s2 = sadd.s32 1, %s19547_s24  ;;  %s50_s25 = ssub.s32 %s19546_s0, %s19007_s30 }
 0x1a5   : > { %p60_p7 = scmp.ne.s32.totalorder %s19547_s24, %s19548_s17  ;;  %p51_p1 = scmp.eq.s32.totalorder %s50_s25, 0 }
 0x1a6   : > { %p61_p3 = scmp.eq.s32.totalorder %s19546_s0, 0  ;;  %p66_p13 = scmp.ne.s32.totalorder %s19548_s17, %s19549_s21 }
 0x1a7   : > { %p426_p0 = scmp.eq.s32.totalorder %s19550_s20, 3  ;;  %p19551_p4 = scmp.eq.s32.totalorder %s19550_s20, 0 }
 0x1a8   : > { %s19019_s3 = scalar_select %p51_p1, %s19547_s24, %s53_s2  }
 0x1a9   : > { %p62_p2 = por %p61_p3, %p60_p7  ;;  %p19023_p6 = por %p19551_p4, %p66_p13 }
 0x1aa   : > { %p19027_p5 = por %p426_p0, %p60_p7  ;;  %p432_p8 = scmp.eq.s32.totalorder %s14178_s29, 3 }
 0x1ab   : > { %p16354_p9 = scmp.lt.s32.totalorder %s19546_s0, 4  ;;  %s670_s1 = sand.u32 1, %s19547_s24  }
 0x1ac   : > { %s19553_s28 = scalar_select %p19027_p5, 1, 0 }
 0x1ad   : > { %p19033_p10 = por %p432_p8, %p66_p13  ;;  %s14197_s19 = sshll.u32 %s670_s1, 4 }
 0x1ae   : > { %s15892_s18 = sshll.u32 %s19546_s0, 8  ;;  %s19555_s17 = sld [smem:[#allocation49_spill]] }
 0x1af   : > { %s19554_s26 = scalar_select %p19033_p10, 1, 0 }
 0x1b0   : > { %s674_s20 = scalar_lea.vmem [#allocation2], %s14197_s19  ;;  %p19043_p11 = pnand %p16354_p9, %p62_p2 }
 0x1b1   : > { %s682_s2 = sshll.u32 %s674_s20, 4  ;;  %s671_s0 = scalar_lea.sflag [#allocation3], %s670_s1  ;;  %s19047_s2 = int_to_ptr.vmem [resolvable:$true] %s682_s2 }
 0x1b2   : > { %p18350_p7 = pneg %p19043_p11 }
 0x1b4   : > { %s19041_s21 = scalar_lea.hbm %s19555_s17, %s15892_s18  ;;  %s18353_s18 = scalar_lea.hbm %s19555_s17, 1024 }
 0x1b5   : > { %s18348_s24 = scalar_lea.hbm %s19041_s21, 256  ;;  %p18354_p13 = scmp.lt.u32.totalorder %s19041_s21, %s19555_s17 }
 0x1b6   : > { %p18349_p12 = scmp.ne.s32.totalorder %s19041_s21, %s18348_s24  ;;  %p18355_p0 = scmp.lt.u32.totalorder %s18353_s18, %s18348_s24 }
 0x1b7   : > { %p18357_p4 = scmp.lt.u32.totalorder %s18348_s24, %s19041_s21 }
 0x1b8   : > { %p18351_p1 = pnand %p18350_p7, %p18349_p12  ;;  %p18356_p2 = por %p18355_p0, %p18354_p13 }
 0x1ba   : > { %p18352_p3 = pneg %p18351_p1  ;;  %p18358_p8 = por %p18357_p4, %p18356_p2 }
 0x1bc   : > { %p18359_p9 = pnand %p18358_p8, %p18352_p3 }
 0x1be   : > { %18362 = shalt.err (!%p18359_p9)
}
 0x1bf   : > { %s18363_s1 = scalar_lea.vmem %s19047_s2, 256  ;;  %s18533_s20 = smov [#allocation2]  }
 0x1c0   : > { %p18364_p12 = scmp.ne.s32.totalorder %s19047_s2, %s18363_s1  ;;  %s18368_s25 = sshll.u32 %s18533_s20, 4  ;;  %s18369_s25 = int_to_ptr.vmem [resolvable:$false] %s18368_s25 }
 0x1c1   : > { %s18370_s19 = scalar_lea.vmem %s18369_s25, 512  ;;  %p18371_p5 = scmp.lt.s32.totalorder %s19047_s2, %s18369_s25 }
 0x1c2   : > { %p18366_p1 = pnand %p18364_p12, %p18350_p7  ;;  %p18372_p13 = scmp.lt.s32.totalorder %s18370_s19, %s18363_s1 }
 0x1c4   : > { %p18367_p10 = pneg %p18366_p1  ;;  %p18373_p0 = por %p18372_p13, %p18371_p5 }
 0x1c6   : > { %p18374_p2 = pnand %p18373_p0, %p18367_p10 }
 0x1c8   : > { %18377 = shalt.err (!%p18374_p2)
}
 0x1c9   : > { %16330 = dma.hbm_to_vmem [thread:$0]  (!%p19043_p11), %s19041_s21, 256, %s19047_s2, %s671_s0  }
 0x1ca   : > { %s19557_s24 = sld [smem:[#allocation48_spill]] }
 0x1d0   : > { %p19558_p3 = scmp.ne.s32.totalorder %s19557_s24, 0 }
 0x1d1   : > { %s19559_s18 = sld [smem:[#allocation44_spill]] (!%p19558_p3) }
 0x1d2   : > { %691 = sbr.rel (%p19558_p3) target bundleno = 3429 (0xd65), region = 88 }
 0x1d7   : > { %s19077_s5 = sand.u32 (!%p19558_p3), 1, %s19559_s18  }
 0x1d8   : > { %s19520_s23 = sshll.u32 (!%p19558_p3), %s19077_s5, 4  ;;  %s694_s1 = scalar_lea.sflag (!%p19558_p3), [#allocation3], %s19077_s5 }
 0x1d9   : > { %s19083_s20 = scalar_lea.vmem [#allocation2], %s19520_s23 }
 0x1da   : > { %18451 = dma.done.wait (%p19023_p6), %s694_s1, 256  }
 0x1db   : > { %18453 = vsyncadd (%p19023_p6), %s694_s1, 4294967040  ;;  %s19560_s21 = sld [smem:[#allocation47_spill]] }
 0x1e1   : > { %p19561_p5 = scmp.eq.s32.totalorder %s19560_s21, 0 }
 0x1e3   : > { %18455 = dma.done.wait (%p19561_p5), [#allocation6], 8256   ;;  %p19562_p10 = pmov %p19561_p5 }
 0x1e4   : > { %p19563_p11 = pmov %p19561_p5 }
 0x1e5   : > { %18457 = vsyncadd (%p19562_p10), [#allocation6], 4294959040 }
 0x1e6   : > { %18459 = dma.done.wait (%p19563_p11), [#allocation9], 16448   ;;  %p19564_p7 = pmov %p19561_p5 }
 0x1e7   : > { %p19565_p4 = pmov %p19561_p5 }
 0x1e8   : > { %18461 = vsyncadd (%p19564_p7), [#allocation9], 4294950848 }
 0x1e9   : > { %18463 = dma.done.wait (%p19565_p4), [#allocation12], 65792   ;;  %p19566_p8 = pmov %p19565_p4 }
 0x1ea   : > { %p19567_p6 = pmov %p19565_p4 }
 0x1eb   : > { %18465 = vsyncadd (%p19566_p8), [#allocation12], 4294901504 }
 0x1ec   : > { %18467 = dma.done.wait (%p19567_p6), [#allocation15], 16400   ;;  %p19568_p9 = pmov %p19565_p4 }
 0x1ed   : > { %p19569_p12 = pmov %p19565_p4 }
 0x1ee   : > { %18469 = vsyncadd (%p19568_p9), [#allocation15], 4294950896 }
 0x1ef   : > { %18471 = dma.done.wait (%p19569_p12), [#allocation18], 16640   ;;  %p19570_p1 = pmov %p19565_p4 }
 0x1f1   : > { %18473 = vsyncadd (%p19570_p1), [#allocation18], 4294950656  ;;  %p19571_p13 = pmov %p19570_p1 }
 0x1f2   : > { %p19572_p0 = pmov %p19570_p1 }
 0x1f3   : > { %18475 = dma.done.wait (%p19571_p13), [#allocation21], 65600  }
 0x1f4   : > { %18477 = vsyncadd (%p19572_p0), [#allocation21], 4294901696  ;;  %p19573_p2 = pmov %p19572_p0 }
 0x1f5   : > { %p19574_p3 = pmov %p19572_p0 }
 0x1f6   : > { %18479 = dma.done.wait (%p19573_p2), [#allocation24], 16448  }
 0x1f7   : > { %18481 = vsyncadd (%p19574_p3), [#allocation24], 4294950848  ;;  %p19575_p5 = pmov %p19572_p0 }
 0x1f8   : > { %p19576_p10 = pmov %p19572_p0 }
 0x1f9   : > { %18483 = dma.done.wait (%p19575_p5), [#allocation27], 8224  }
 0x1fa   : > { %18485 = vsyncadd (%p19576_p10), [#allocation27], 4294959072  ;;  %v16428_v0 = vld [vmem:[#allocation5 + $0x4] ss:$16 sps:$4 sm:$0xff]   ;;  %v16430_v1 = vld [vmem:[#allocation5] ss:$16 sps:$4 sm:$0xff]  }
 0x1fb   : > { %1230 = vmatprep.subr.bf16.mxu1 %v16428_v0  ;;  %v16431_v2 = vld [vmem:[#allocation5 + $0x24] ss:$16 sps:$4 sm:$0xff]   ;;  %v16433_v3 = vld [vmem:[#allocation5 + $0x20] ss:$16 sps:$4 sm:$0xff]   ;;  %v821_v13 = vld [vmem:[%s19083_s20 + $0x8] sm:$0xff]  ;;  %s14218_s27 = sshll.u32 %s19077_s5, 3 }
 0x1fc   : > { %1231 = vmatpush1.bf16.msra.mxu1 %v16430_v1  ;;  %v16434_v4 = vld [vmem:[#allocation5 + $0x44] ss:$16 sps:$4 sm:$0xff]   ;;  %v16436_v5 = vld [vmem:[#allocation5 + $0x40] ss:$16 sps:$4 sm:$0xff]   ;;  %v19122_v14 = vpack.c.bf16 %v821_v13, %v821_v13  ;;  %v16524_v27 = vld [vmem:[#allocation8 + $0x4] ss:$16 sps:$4 sm:$0xff]  }
 0x1fd   : > { %1232 = vmatprep.subr.bf16.mxu1 %v16431_v2  ;;  %v16437_v6 = vld [vmem:[#allocation5 + $0x64] ss:$16 sps:$4 sm:$0xff]   ;;  %v16439_v7 = vld [vmem:[#allocation5 + $0x60] ss:$16 sps:$4 sm:$0xff]   ;;  %2110 = vmatprep.subr.bf16.mxu0 %v16524_v27  ;;  %v16530_v29 = vld [vmem:[#allocation8 + $0x24] ss:$16 sps:$4 sm:$0xff]  }
 0x1fe   : > { %v16440_v8 = vld [vmem:[#allocation5 + $0x84] ss:$16 sps:$4 sm:$0xff]   ;;  %v16442_v9 = vld [vmem:[#allocation5 + $0x80] ss:$16 sps:$4 sm:$0xff]   ;;  %1262 = vmatprep.mubr.bf16.mxu1 %v19122_v14  ;;  %v16536_v33 = vld [vmem:[#allocation8 + $0x44] ss:$16 sps:$4 sm:$0xff]  }
 0x1ff   : > { %v16443_v10 = vld [vmem:[#allocation5 + $0xa4] ss:$16 sps:$4 sm:$0xff]   ;;  %v16445_v11 = vld [vmem:[#allocation5 + $0xa0] ss:$16 sps:$4 sm:$0xff]   ;;  %v16542_v37 = vld [vmem:[#allocation8 + $0x64] ss:$16 sps:$4 sm:$0xff]  }
 0x200   : > { %1233 = vmatpush1.bf16.msra.mxu1 %v16433_v3  ;;  %v16446_v12 = vld [vmem:[#allocation5 + $0xc4] ss:$16 sps:$4 sm:$0xff]   ;;  %v16448_v15 = vld [vmem:[#allocation5 + $0xc0] ss:$16 sps:$4 sm:$0xff]   ;;  %v16548_v41 = vld [vmem:[#allocation8 + $0x84] ss:$16 sps:$4 sm:$0xff]  }
 0x201   : > { %1234 = vmatprep.subr.bf16.mxu1 %v16434_v4  ;;  %v16449_v16 = vld [vmem:[#allocation5 + $0xe4] ss:$16 sps:$4 sm:$0xff]   ;;  %v16451_v17 = vld [vmem:[#allocation5 + $0xe0] ss:$16 sps:$4 sm:$0xff]   ;;  %v16478_v44 = vld [vmem:[#allocation5 + $0xc] ss:$16 sps:$4 sm:$0xff]  }
 0x202   : > { %v16452_v18 = vld [vmem:[#allocation5 + $0x104] ss:$16 sps:$4 sm:$0xff]   ;;  %v16454_v19 = vld [vmem:[#allocation5 + $0x100] ss:$16 sps:$4 sm:$0xff]   ;;  %v16554_v46 = vld [vmem:[#allocation8 + $0xa4] ss:$16 sps:$4 sm:$0xff]  }
 0x203   : > { %v16455_v20 = vld [vmem:[#allocation5 + $0x124] ss:$16 sps:$4 sm:$0xff]   ;;  %v16457_v21 = vld [vmem:[#allocation5 + $0x120] ss:$16 sps:$4 sm:$0xff]   ;;  %v16476_v48 = vld [vmem:[#allocation5 + $0x8] ss:$16 sps:$4 sm:$0xff]  }
 0x204   : > { %1235 = vmatpush1.bf16.msra.mxu1 %v16436_v5  ;;  %v16458_v22 = vld [vmem:[#allocation5 + $0x144] ss:$16 sps:$4 sm:$0xff]   ;;  %v16460_v23 = vld [vmem:[#allocation5 + $0x140] ss:$16 sps:$4 sm:$0xff]   ;;  %v16481_v49 = vld [vmem:[#allocation5 + $0x2c] ss:$16 sps:$4 sm:$0xff]  }
 0x205   : > { %1236 = vmatprep.subr.bf16.mxu1 %v16437_v6  ;;  %v16461_v24 = vld [vmem:[#allocation5 + $0x164] ss:$16 sps:$4 sm:$0xff]   ;;  %v16463_v25 = vld [vmem:[#allocation5 + $0x160] ss:$16 sps:$4 sm:$0xff]   ;;  %v16560_v51 = vld [vmem:[#allocation8 + $0xc4] ss:$16 sps:$4 sm:$0xff]  }
 0x206   : > { %v16464_v26 = vld [vmem:[#allocation5 + $0x184] ss:$16 sps:$4 sm:$0xff]   ;;  %v16466_v30 = vld [vmem:[#allocation5 + $0x180] ss:$16 sps:$4 sm:$0xff]   ;;  %v16479_v52 = vld [vmem:[#allocation5 + $0x28] ss:$16 sps:$4 sm:$0xff]  }
 0x207   : > { %v16529_v28 = vld [vmem:[#allocation8] ss:$16 sps:$4 sm:$0xff]   ;;  %v16469_v34 = vld [vmem:[#allocation5 + $0x1a0] ss:$16 sps:$4 sm:$0xff]   ;;  %v16484_v53 = vld [vmem:[#allocation5 + $0x4c] ss:$16 sps:$4 sm:$0xff]  }
 0x208   : > { %1237 = vmatpush1.bf16.msra.mxu1 %v16439_v7  ;;  %2111 = vmatpush1.bf16.msra.mxu0 %v16529_v28  ;;  %v16467_v31 = vld [vmem:[#allocation5 + $0x1a4] ss:$16 sps:$4 sm:$0xff]   ;;  %v16472_v38 = vld [vmem:[#allocation5 + $0x1c0] ss:$16 sps:$4 sm:$0xff]   ;;  %v16566_v55 = vld [vmem:[#allocation8 + $0xe4] ss:$16 sps:$4 sm:$0xff]  }
 0x209   : > { %1238 = vmatprep.subr.bf16.mxu1 %v16440_v8  ;;  %2112 = vmatprep.subr.bf16.mxu0 %v16530_v29  ;;  %v16535_v32 = vld [vmem:[#allocation8 + $0x20] ss:$16 sps:$4 sm:$0xff]   ;;  %v16475_v42 = vld [vmem:[#allocation5 + $0x1e0] ss:$16 sps:$4 sm:$0xff]   ;;  %v16482_v56 = vld [vmem:[#allocation5 + $0x48] ss:$16 sps:$4 sm:$0xff]  }
 0x20a   : > { %v16470_v35 = vld [vmem:[#allocation5 + $0x1c4] ss:$16 sps:$4 sm:$0xff]   ;;  %v16487_v57 = vld [vmem:[#allocation5 + $0x6c] ss:$16 sps:$4 sm:$0xff]   ;;  %v16572_v59 = vld [vmem:[#allocation8 + $0x104] ss:$16 sps:$4 sm:$0xff]  }
 0x20b   : > { %v16541_v36 = vld [vmem:[#allocation8 + $0x40] ss:$16 sps:$4 sm:$0xff]   ;;  %v16485_v60 = vld [vmem:[#allocation5 + $0x68] ss:$16 sps:$4 sm:$0xff]   ;;  %v16490_v61 = vld [vmem:[#allocation5 + $0x8c] ss:$16 sps:$4 sm:$0xff]  }
 0x20c   : > { %1239 = vmatpush1.bf16.msra.mxu1 %v16442_v9  ;;  %2113 = vmatpush1.bf16.msra.mxu0 %v16535_v32  ;;  %v16547_v39 = vld [vmem:[#allocation8 + $0x60] ss:$16 sps:$4 sm:$0xff]   ;;  %v16578_v63 = vld [vmem:[#allocation8 + $0x124] ss:$16 sps:$4 sm:$0xff]   ;;  %v16493_v1 = vld [vmem:[#allocation5 + $0xac] ss:$16 sps:$4 sm:$0xff]  }
 0x20d   : > { %1240 = vmatprep.subr.bf16.mxu1 %v16443_v10  ;;  %2114 = vmatprep.subr.bf16.mxu0 %v16536_v33  ;;  %v16473_v40 = vld [vmem:[#allocation5 + $0x1e4] ss:$16 sps:$4 sm:$0xff]   ;;  %v16488_v0 = vld [vmem:[#allocation5 + $0x88] ss:$16 sps:$4 sm:$0xff]   ;;  %v16496_v5 = vld [vmem:[#allocation5 + $0xcc] ss:$16 sps:$4 sm:$0xff]  }
 0x20e   : > { %v820_v43 = vld [vmem:[%s19083_s20] sm:$0xff]  ;;  %v16584_v3 = vld [vmem:[#allocation8 + $0x144] ss:$16 sps:$4 sm:$0xff]   ;;  %v16499_v9 = vld [vmem:[#allocation5 + $0xec] ss:$16 sps:$4 sm:$0xff]   ;;  %s19285_s2 = scalar_lea.vmem [#allocation29], %s14218_s27 }
 0x20f   : > { %v16553_v45 = vld [vmem:[#allocation8 + $0x80] ss:$16 sps:$4 sm:$0xff]   ;;  %v19126_v47 = vpack.c.bf16 %v820_v43, %v820_v43  ;;  %v16491_v4 = vld [vmem:[#allocation5 + $0xa8] ss:$16 sps:$4 sm:$0xff]   ;;  %v16502_v13 = vld [vmem:[#allocation5 + $0x10c] ss:$16 sps:$4 sm:$0xff]  }
 0x210   : > { %1241 = vmatpush1.bf16.msra.mxu1 %v16445_v11  ;;  %2115 = vmatpush1.bf16.msra.mxu0 %v16541_v36  ;;  %v16559_v50 = vld [vmem:[#allocation8 + $0xa0] ss:$16 sps:$4 sm:$0xff]   ;;  %v16590_v7 = vld [vmem:[#allocation8 + $0x164] ss:$16 sps:$4 sm:$0xff]   ;;  %v16520_v28 = vld [vmem:[#allocation5 + $0x1cc] ss:$16 sps:$4 sm:$0xff]  }
 0x211   : > { %1242 = vmatprep.subr.bf16.mxu1 %v16446_v12  ;;  %2116 = vmatprep.subr.bf16.mxu0 %v16542_v37  ;;  %v16565_v54 = vld [vmem:[#allocation8 + $0xc0] ss:$16 sps:$4 sm:$0xff]   ;;  %v16494_v8 = vld [vmem:[#allocation5 + $0xc8] ss:$16 sps:$4 sm:$0xff]   ;;  %v16528_v32 = vld [vmem:[#allocation8 + $0xc] ss:$16 sps:$4 sm:$0xff]  }
 0x212   : > { %v16571_v58 = vld [vmem:[#allocation8 + $0xe0] ss:$16 sps:$4 sm:$0xff]   ;;  %v16596_v11 = vld [vmem:[#allocation8 + $0x184] ss:$16 sps:$4 sm:$0xff]   ;;  %v16526_v33 = vld [vmem:[#allocation8 + $0x8] ss:$16 sps:$4 sm:$0xff]  }
 0x213   : > { %v16577_v62 = vld [vmem:[#allocation8 + $0x100] ss:$16 sps:$4 sm:$0xff]   ;;  %v16497_v12 = vld [vmem:[#allocation5 + $0xe8] ss:$16 sps:$4 sm:$0xff]   ;;  %v16540_v36 = vld [vmem:[#allocation8 + $0x4c] ss:$16 sps:$4 sm:$0xff]  }
 0x214   : > { %1243 = vmatpush1.bf16.msra.mxu1 %v16448_v15  ;;  %2117 = vmatpush1.bf16.msra.mxu0 %v16547_v39  ;;  %v16583_v2 = vld [vmem:[#allocation8 + $0x120] ss:$16 sps:$4 sm:$0xff]   ;;  %v16602_v15 = vld [vmem:[#allocation8 + $0x1a4] ss:$16 sps:$4 sm:$0xff]   ;;  %v16538_v37 = vld [vmem:[#allocation8 + $0x48] ss:$16 sps:$4 sm:$0xff]  }
 0x215   : > { %1244 = vmatprep.subr.bf16.mxu1 %v16449_v16  ;;  %2118 = vmatprep.subr.bf16.mxu0 %v16548_v41  ;;  %v16589_v6 = vld [vmem:[#allocation8 + $0x140] ss:$16 sps:$4 sm:$0xff]   ;;  %v16500_v16 = vld [vmem:[#allocation5 + $0x108] ss:$16 sps:$4 sm:$0xff]   ;;  %v16544_v39 = vld [vmem:[#allocation8 + $0x68] ss:$16 sps:$4 sm:$0xff]  }
 0x216   : > { %v16595_v10 = vld [vmem:[#allocation8 + $0x160] ss:$16 sps:$4 sm:$0xff]   ;;  %v16515_v27 = vld [vmem:[#allocation5 + $0x1a8] ss:$16 sps:$4 sm:$0xff]   ;;  %v16550_v41 = vld [vmem:[#allocation8 + $0x88] ss:$16 sps:$4 sm:$0xff]  }
 0x217   : > { %v16518_v29 = vld [vmem:[#allocation5 + $0x1c8] ss:$16 sps:$4 sm:$0xff]   ;;  %v16556_v43 = vld [vmem:[#allocation8 + $0xa8] ss:$16 sps:$4 sm:$0xff]   ;;  %s15887_s29 = sshll.u32 %s19560_s21, 7  ;;  %s13910_s0 = sshll.u32 %s19285_s2, 4  ;;  %s13911_s0 = int_to_ptr.vmem [resolvable:$true] %s13910_s0 }
 0x218   : > { %1245 = vmatpush1.bf16.msra.mxu1 %v16451_v17  ;;  %2119 = vmatpush1.bf16.msra.mxu0 %v16553_v45  ;;  %v16505_v17 = vld [vmem:[#allocation5 + $0x12c] ss:$16 sps:$4 sm:$0xff]   ;;  %v16608_v45 = vld [vmem:[#allocation8 + $0x1c4] ss:$16 sps:$4 sm:$0xff]   ;;  %s19577_s24 = sld [smem:[#allocation55_spill]]  ;;  %s13892_s1 = scalar_lea.sflag [#allocation4], %s19077_s5 }
 0x219   : > { %1246 = vmatprep.subr.bf16.mxu1 %v16452_v18  ;;  %2120 = vmatprep.subr.bf16.mxu0 %v16554_v46  ;;  %v16607_v18 = vld [vmem:[#allocation8 + $0x1a0] ss:$16 sps:$4 sm:$0xff]   ;;  %v16562_v46 = vld [vmem:[#allocation8 + $0xc8] ss:$16 sps:$4 sm:$0xff]   ;;  %s18378_s20 = scalar_lea.vmem %s13911_s0, 128  ;;  %p19578_p7 = scmp.ne.s32.totalorder %s19553_s28, 0 }
 0x21a   : > { %p18379_p11 = scmp.ne.s32.totalorder %s13911_s0, %s18378_s20  ;;  %s18535_s27 = smov [#allocation29]  }
 0x21b   : > { %s18382_s23 = sshll.u32 %s18535_s27, 4  ;;  %s18383_s23 = int_to_ptr.vmem [resolvable:$false] %s18382_s23 }
 0x21c   : > { %1247 = vmatpush1.bf16.msra.mxu1 %v16454_v19  ;;  %2121 = vmatpush1.bf16.msra.mxu0 %v16559_v50  ;;  %v16503_v19 = vld [vmem:[#allocation5 + $0x128] ss:$16 sps:$4 sm:$0xff]   ;;  %v16568_v50 = vld [vmem:[#allocation8 + $0xe8] ss:$16 sps:$4 sm:$0xff]   ;;  %p18380_p4 = pnand %p18379_p11, %p19578_p7  ;;  %s18384_s4 = scalar_lea.vmem %s18383_s23, 256 }
 0x21d   : > { %1248 = vmatprep.subr.bf16.mxu1 %v16455_v20  ;;  %2122 = vmatprep.subr.bf16.mxu0 %v16560_v51  ;;  %v16508_v20 = vld [vmem:[#allocation5 + $0x14c] ss:$16 sps:$4 sm:$0xff]   ;;  %v16619_v51 = vld [vmem:[#allocation8 + $0x1e0] ss:$16 sps:$4 sm:$0xff]   ;;  %p18385_p6 = scmp.lt.s32.totalorder %s13911_s0, %s18383_s23  ;;  %p18386_p9 = scmp.lt.s32.totalorder %s18384_s4, %s18378_s20 }
 0x21e   : > { %s19408_s18 = scalar_lea.hbm %s19577_s24, %s15887_s29  ;;  %p18381_p8 = pneg %p18380_p4 }
 0x21f   : > { %p18387_p12 = por %p18386_p9, %p18385_p6 }
 0x220   : > { %1249 = vmatpush1.bf16.msra.mxu1 %v16457_v21  ;;  %2123 = vmatpush1.bf16.msra.mxu0 %v16565_v54  ;;  %v16506_v21 = vld [vmem:[#allocation5 + $0x148] ss:$16 sps:$4 sm:$0xff]   ;;  %v16574_v54 = vld [vmem:[#allocation8 + $0x108] ss:$16 sps:$4 sm:$0xff]  }
 0x221   : > { %1250 = vmatprep.subr.bf16.mxu1 %v16458_v22  ;;  %2124 = vmatprep.subr.bf16.mxu0 %v16566_v55  ;;  %v16511_v22 = vld [vmem:[#allocation5 + $0x16c] ss:$16 sps:$4 sm:$0xff]   ;;  %v16582_v55 = vld [vmem:[#allocation8 + $0x12c] ss:$16 sps:$4 sm:$0xff]   ;;  %p18388_p1 = pnand %p18387_p12, %p18381_p8 }
 0x224   : > { %1251 = vmatpush1.bf16.msra.mxu1 %v16460_v23  ;;  %2125 = vmatpush1.bf16.msra.mxu0 %v16571_v58  ;;  %v16509_v23 = vld [vmem:[#allocation5 + $0x168] ss:$16 sps:$4 sm:$0xff]   ;;  %v16586_v58 = vld [vmem:[#allocation8 + $0x148] ss:$16 sps:$4 sm:$0xff]  }
 0x225   : > { %1252 = vmatprep.subr.bf16.mxu1 %v16461_v24  ;;  %2126 = vmatprep.subr.bf16.mxu0 %v16572_v59  ;;  %v16514_v24 = vld [vmem:[#allocation5 + $0x18c] ss:$16 sps:$4 sm:$0xff]   ;;  %v16594_v59 = vld [vmem:[#allocation8 + $0x16c] ss:$16 sps:$4 sm:$0xff]  }
 0x228   : > { %1253 = vmatpush1.bf16.msra.mxu1 %v16463_v25  ;;  %2127 = vmatpush1.bf16.msra.mxu0 %v16577_v62  ;;  %v16512_v25 = vld [vmem:[#allocation5 + $0x188] ss:$16 sps:$4 sm:$0xff]   ;;  %v16598_v62 = vld [vmem:[#allocation8 + $0x188] ss:$16 sps:$4 sm:$0xff]  }
 0x229   : > { %1254 = vmatprep.subr.bf16.mxu1 %v16464_v26  ;;  %2128 = vmatprep.subr.bf16.mxu0 %v16578_v63  ;;  %v16517_v26 = vld [vmem:[#allocation5 + $0x1ac] ss:$16 sps:$4 sm:$0xff]   ;;  %v16606_v63 = vld [vmem:[#allocation8 + $0x1ac] ss:$16 sps:$4 sm:$0xff]  }
 0x22c   : > { %1255 = vmatpush1.bf16.msra.mxu1 %v16466_v30  ;;  %2129 = vmatpush1.bf16.msra.mxu0 %v16583_v2  ;;  %v16523_v30 = vld [vmem:[#allocation5 + $0x1ec] ss:$16 sps:$4 sm:$0xff]  }
 0x22d   : > { %1256 = vmatprep.subr.bf16.mxu1 %v16467_v31  ;;  %2130 = vmatprep.subr.bf16.mxu0 %v16584_v3  ;;  %v16521_v31 = vld [vmem:[#allocation5 + $0x1e8] ss:$16 sps:$4 sm:$0xff]   ;;  %v16610_v2 = vld [vmem:[#allocation8 + $0x1c8] ss:$16 sps:$4 sm:$0xff]   ;;  %v16618_v3 = vld [vmem:[#allocation8 + $0x1ec] ss:$16 sps:$4 sm:$0xff]  }
 0x230   : > { %1257 = vmatpush1.bf16.msra.mxu1 %v16469_v34  ;;  %2131 = vmatpush1.bf16.msra.mxu0 %v16589_v6  ;;  %v16534_v34 = vld [vmem:[#allocation8 + $0x2c] ss:$16 sps:$4 sm:$0xff]   ;;  %v890_v6 = vlaneseq }
 0x231   : > { %1258 = vmatprep.subr.bf16.mxu1 %v16470_v35  ;;  %2132 = vmatprep.subr.bf16.mxu0 %v16590_v7  ;;  %v16532_v35 = vld [vmem:[#allocation8 + $0x28] ss:$16 sps:$4 sm:$0xff]  }
 0x232   : > { %v19131_v7 = vshrl.u32 %v890_v6, 7  ;;  %v16697_v6 = vld [vmem:[#allocation8 + $0x38c] ss:$16 sps:$4 sm:$0xff]  }
 0x234   : > { %1259 = vmatpush1.bf16.msra.mxu1 %v16472_v38  ;;  %2133 = vmatpush1.bf16.msra.mxu0 %v16595_v10  ;;  %v16546_v38 = vld [vmem:[#allocation8 + $0x6c] ss:$16 sps:$4 sm:$0xff]   ;;  %v19139_v10 = vsub.s32 1, %v19131_v7 }
 0x235   : > { %1260 = vmatprep.subr.bf16.mxu1 %v16473_v40  ;;  %2134 = vmatprep.subr.bf16.mxu0 %v16596_v11  ;;  %v16552_v40 = vld [vmem:[#allocation8 + $0x8c] ss:$16 sps:$4 sm:$0xff]  }
 0x238   : > { %1261 = vmatpush1.bf16.msra.mxu1 %v16475_v42  ;;  %v16558_v42 = vld [vmem:[#allocation8 + $0xac] ss:$16 sps:$4 sm:$0xff]  }
 0x239   : > { %1271 = vmatprep.subr.bf16.mxu1 %v16478_v44  ;;  %v16564_v44 = vld [vmem:[#allocation8 + $0xcc] ss:$16 sps:$4 sm:$0xff]  }
 0x23b   : > { %1263 = vmatmul.mubr.bf16.vlgmr.msra.gmra.mrb[0].mxu1 %v19126_v47 }
 0x23c   : > { %1272 = vmatpush1.bf16.msra.mxu1 %v16476_v48  ;;  %1303 = vmatprep.mubr.bf16.mxu1 %v19122_v14  ;;  %v16601_v14 = vld [vmem:[#allocation8 + $0x180] ss:$16 sps:$4 sm:$0xff]   ;;  %v16570_v48 = vld [vmem:[#allocation8 + $0xec] ss:$16 sps:$4 sm:$0xff]  }
 0x23d   : > { %1273 = vmatprep.subr.bf16.mxu1 %v16481_v49  ;;  %2135 = vmatpush1.bf16.msra.mxu0 %v16601_v14  ;;  %v16614_v49 = vld [vmem:[#allocation8 + $0x1e4] ss:$16 sps:$4 sm:$0xff]  }
 0x23e   : > { %2136 = vmatprep.subr.bf16.mxu0 %v16602_v15 }
 0x240   : > { %1274 = vmatpush1.bf16.msra.mxu1 %v16479_v52  ;;  %v16576_v52 = vld [vmem:[#allocation8 + $0x10c] ss:$16 sps:$4 sm:$0xff]  }
 0x241   : > { %1275 = vmatprep.subr.bf16.mxu1 %v16484_v53  ;;  %2137 = vmatpush1.bf16.msra.mxu0 %v16607_v18  ;;  %v16622_v53 = vld [vmem:[#allocation8 + $0x204] ss:$16 sps:$4 sm:$0xff]  }
 0x242   : > { %2138 = vmatprep.subr.bf16.mxu0 %v16608_v45  ;;  %v16658_v45 = vld [vmem:[#allocation8 + $0x2c4] ss:$16 sps:$4 sm:$0xff]  }
 0x244   : > { %1276 = vmatpush1.bf16.msra.mxu1 %v16482_v56  ;;  %v16580_v56 = vld [vmem:[#allocation8 + $0x128] ss:$16 sps:$4 sm:$0xff]  }
 0x245   : > { %1277 = vmatprep.subr.bf16.mxu1 %v16487_v57  ;;  %v16588_v57 = vld [vmem:[#allocation8 + $0x14c] ss:$16 sps:$4 sm:$0xff]  }
 0x248   : > { %1278 = vmatpush1.bf16.msra.mxu1 %v16485_v60  ;;  %v16592_v60 = vld [vmem:[#allocation8 + $0x168] ss:$16 sps:$4 sm:$0xff]  }
 0x249   : > { %1279 = vmatprep.subr.bf16.mxu1 %v16490_v61  ;;  %v16600_v61 = vld [vmem:[#allocation8 + $0x18c] ss:$16 sps:$4 sm:$0xff]  }
 0x24c   : > { %1280 = vmatpush1.bf16.msra.mxu1 %v16488_v0  ;;  %v16604_v0 = vld [vmem:[#allocation8 + $0x1a8] ss:$16 sps:$4 sm:$0xff]  }
 0x24d   : > { %1281 = vmatprep.subr.bf16.mxu1 %v16493_v1  ;;  %v16612_v1 = vld [vmem:[#allocation8 + $0x1cc] ss:$16 sps:$4 sm:$0xff]  }
 0x250   : > { %1282 = vmatpush1.bf16.msra.mxu1 %v16491_v4  ;;  %v16616_v4 = vld [vmem:[#allocation8 + $0x1e8] ss:$16 sps:$4 sm:$0xff]  }
 0x251   : > { %1283 = vmatprep.subr.bf16.mxu1 %v16496_v5  ;;  %v16625_v5 = vld [vmem:[#allocation8 + $0x20c] ss:$16 sps:$4 sm:$0xff]  }
 0x254   : > { %1284 = vmatpush1.bf16.msra.mxu1 %v16494_v8  ;;  %v19134_v8 = vsub.s32 0, %v19131_v7 }
 0x255   : > { %1285 = vmatprep.subr.bf16.mxu1 %v16499_v9  ;;  %v19136_v9 = vld [vmem:[#allocation7] sm:$0xf] }
 0x256   : > { %v893_v11 = vrot.slane %v19136_v9, %v19134_v8 }
 0x258   : > { %1286 = vmatpush1.bf16.msra.mxu1 %v16497_v12  ;;  %v897_v12 = vrot.slane %v19136_v9, %v19139_v10 }
 0x259   : > { %1287 = vmatprep.subr.bf16.mxu1 %v16502_v13 }
 0x25c   : > { %1288 = vmatpush1.bf16.msra.mxu1 %v16500_v16 }
 0x25d   : > { %1289 = vmatprep.subr.bf16.mxu1 %v16505_v17 }
 0x260   : > { %1290 = vmatpush1.bf16.msra.mxu1 %v16503_v19 }
 0x261   : > { %1291 = vmatprep.subr.bf16.mxu1 %v16508_v20 }
 0x264   : > { %1292 = vmatpush1.bf16.msra.mxu1 %v16506_v21  ;;  %v16620_v21 = vld [vmem:[#allocation8 + $0x200] ss:$16 sps:$4 sm:$0xff]  }
 0x265   : > { %1293 = vmatprep.subr.bf16.mxu1 %v16511_v22  ;;  %v16623_v22 = vld [vmem:[#allocation8 + $0x208] ss:$16 sps:$4 sm:$0xff]  }
 0x268   : > { %1294 = vmatpush1.bf16.msra.mxu1 %v16509_v23 }
 0x269   : > { %1295 = vmatprep.subr.bf16.mxu1 %v16514_v24  ;;  %v16628_v24 = vld [vmem:[#allocation8 + $0x224] ss:$16 sps:$4 sm:$0xff]  }
 0x26c   : > { %1296 = vmatpush1.bf16.msra.mxu1 %v16512_v25  ;;  %v16631_v25 = vld [vmem:[#allocation8 + $0x22c] ss:$16 sps:$4 sm:$0xff]  }
 0x26d   : > { %1297 = vmatprep.subr.bf16.mxu1 %v16517_v26 }
 0x270   : > { %1298 = vmatpush1.bf16.msra.mxu1 %v16515_v27  ;;  %v16626_v27 = vld [vmem:[#allocation8 + $0x220] ss:$16 sps:$4 sm:$0xff]  }
 0x271   : > { %1299 = vmatprep.subr.bf16.mxu1 %v16520_v28  ;;  %v16629_v28 = vld [vmem:[#allocation8 + $0x228] ss:$16 sps:$4 sm:$0xff]  }
 0x274   : > { %1300 = vmatpush1.bf16.msra.mxu1 %v16518_v29  ;;  %v16634_v29 = vld [vmem:[#allocation8 + $0x244] ss:$16 sps:$4 sm:$0xff]  }
 0x275   : > { %1301 = vmatprep.subr.bf16.mxu1 %v16523_v30  ;;  %v16637_v30 = vld [vmem:[#allocation8 + $0x24c] ss:$16 sps:$4 sm:$0xff]  }
 0x278   : > { %1302 = vmatpush1.bf16.msra.mxu1 %v16521_v31  ;;  %v16632_v31 = vld [vmem:[#allocation8 + $0x240] ss:$16 sps:$4 sm:$0xff]  }
 0x279   : > { %2192 = vmatprep.subr.bf16.mxu1 %v16528_v32  ;;  %v16635_v32 = vld [vmem:[#allocation8 + $0x248] ss:$16 sps:$4 sm:$0xff]  }
 0x27b   : > { %1304 = vmatmul.mubr.bf16.vlgmr.msra.gmra.mrb[4].mxu1 %v19126_v47  ;;  %v16613_v47 = vld [vmem:[#allocation8 + $0x1c0] ss:$16 sps:$4 sm:$0xff]  }
 0x27c   : > { %2193 = vmatpush1.bf16.msra.mxu1 %v16526_v33  ;;  %2139 = vmatpush1.bf16.msra.mxu0 %v16613_v47  ;;  %v16640_v33 = vld [vmem:[#allocation8 + $0x264] ss:$16 sps:$4 sm:$0xff]   ;;  %v16656_v47 = vld [vmem:[#allocation8 + $0x2c0] ss:$16 sps:$4 sm:$0xff]  }
 0x27d   : > { %2194 = vmatprep.subr.bf16.mxu1 %v16534_v34  ;;  %2140 = vmatprep.subr.bf16.mxu0 %v16614_v49  ;;  %v16643_v34 = vld [vmem:[#allocation8 + $0x26c] ss:$16 sps:$4 sm:$0xff]   ;;  %v16664_v49 = vld [vmem:[#allocation8 + $0x2e4] ss:$16 sps:$4 sm:$0xff]  }
 0x280   : > { %2195 = vmatpush1.bf16.msra.mxu1 %v16532_v35  ;;  %2141 = vmatpush1.bf16.msra.mxu0 %v16619_v51  ;;  %v16638_v35 = vld [vmem:[#allocation8 + $0x260] ss:$16 sps:$4 sm:$0xff]  }
 0x281   : > { %2196 = vmatprep.subr.bf16.mxu1 %v16540_v36  ;;  %2151 = vmatprep.subr.bf16.mxu0 %v16622_v53  ;;  %v16641_v36 = vld [vmem:[#allocation8 + $0x268] ss:$16 sps:$4 sm:$0xff]   ;;  %v16662_v51 = vld [vmem:[#allocation8 + $0x2e0] ss:$16 sps:$4 sm:$0xff]   ;;  %v16670_v53 = vld [vmem:[#allocation8 + $0x304] ss:$16 sps:$4 sm:$0xff]  }
 0x284   : > { %2197 = vmatpush1.bf16.msra.mxu1 %v16538_v37  ;;  %v16646_v37 = vld [vmem:[#allocation8 + $0x284] ss:$16 sps:$4 sm:$0xff]  }
 0x285   : > { %2198 = vmatprep.subr.bf16.mxu1 %v16546_v38  ;;  %v16649_v38 = vld [vmem:[#allocation8 + $0x28c] ss:$16 sps:$4 sm:$0xff]  }
 0x288   : > { %2199 = vmatpush1.bf16.msra.mxu1 %v16544_v39  ;;  %v16644_v39 = vld [vmem:[#allocation8 + $0x280] ss:$16 sps:$4 sm:$0xff]  }
 0x289   : > { %2200 = vmatprep.subr.bf16.mxu1 %v16552_v40  ;;  %v16647_v40 = vld [vmem:[#allocation8 + $0x288] ss:$16 sps:$4 sm:$0xff]  }
 0x28c   : > { %2201 = vmatpush1.bf16.msra.mxu1 %v16550_v41  ;;  %v16652_v41 = vld [vmem:[#allocation8 + $0x2a4] ss:$16 sps:$4 sm:$0xff]  }
 0x28d   : > { %2202 = vmatprep.subr.bf16.mxu1 %v16558_v42  ;;  %v16655_v42 = vld [vmem:[#allocation8 + $0x2ac] ss:$16 sps:$4 sm:$0xff]  }
 0x290   : > { %2203 = vmatpush1.bf16.msra.mxu1 %v16556_v43  ;;  %v16650_v43 = vld [vmem:[#allocation8 + $0x2a0] ss:$16 sps:$4 sm:$0xff]  }
 0x291   : > { %2204 = vmatprep.subr.bf16.mxu1 %v16564_v44  ;;  %v16653_v44 = vld [vmem:[#allocation8 + $0x2a8] ss:$16 sps:$4 sm:$0xff]  }
 0x294   : > { %2205 = vmatpush1.bf16.msra.mxu1 %v16562_v46  ;;  %v16661_v46 = vld [vmem:[#allocation8 + $0x2cc] ss:$16 sps:$4 sm:$0xff]  }
 0x295   : > { %2206 = vmatprep.subr.bf16.mxu1 %v16570_v48  ;;  %v16659_v48 = vld [vmem:[#allocation8 + $0x2c8] ss:$16 sps:$4 sm:$0xff]  }
 0x298   : > { %2207 = vmatpush1.bf16.msra.mxu1 %v16568_v50  ;;  %v16667_v50 = vld [vmem:[#allocation8 + $0x2ec] ss:$16 sps:$4 sm:$0xff]  }
 0x299   : > { %2208 = vmatprep.subr.bf16.mxu1 %v16576_v52  ;;  %v16665_v52 = vld [vmem:[#allocation8 + $0x2e8] ss:$16 sps:$4 sm:$0xff]  }
 0x29c   : > { %2209 = vmatpush1.bf16.msra.mxu1 %v16574_v54  ;;  %v16673_v54 = vld [vmem:[#allocation8 + $0x30c] ss:$16 sps:$4 sm:$0xff]  }
 0x29d   : > { %2210 = vmatprep.subr.bf16.mxu1 %v16582_v55  ;;  %v16668_v55 = vld [vmem:[#allocation8 + $0x300] ss:$16 sps:$4 sm:$0xff]  }
 0x2a0   : > { %2211 = vmatpush1.bf16.msra.mxu1 %v16580_v56  ;;  %v16671_v56 = vld [vmem:[#allocation8 + $0x308] ss:$16 sps:$4 sm:$0xff]  }
 0x2a1   : > { %2212 = vmatprep.subr.bf16.mxu1 %v16588_v57  ;;  %v16676_v57 = vld [vmem:[#allocation8 + $0x324] ss:$16 sps:$4 sm:$0xff]  }
 0x2a4   : > { %2213 = vmatpush1.bf16.msra.mxu1 %v16586_v58  ;;  %v16679_v58 = vld [vmem:[#allocation8 + $0x32c] ss:$16 sps:$4 sm:$0xff]  }
 0x2a5   : > { %2214 = vmatprep.subr.bf16.mxu1 %v16594_v59  ;;  %v16674_v59 = vld [vmem:[#allocation8 + $0x320] ss:$16 sps:$4 sm:$0xff]  }
 0x2a8   : > { %2215 = vmatpush1.bf16.msra.mxu1 %v16592_v60  ;;  %v16677_v60 = vld [vmem:[#allocation8 + $0x328] ss:$16 sps:$4 sm:$0xff]  }
 0x2a9   : > { %2216 = vmatprep.subr.bf16.mxu1 %v16600_v61  ;;  %v16682_v61 = vld [vmem:[#allocation8 + $0x344] ss:$16 sps:$4 sm:$0xff]  }
 0x2ac   : > { %2217 = vmatpush1.bf16.msra.mxu1 %v16598_v62  ;;  %v16685_v62 = vld [vmem:[#allocation8 + $0x34c] ss:$16 sps:$4 sm:$0xff]  }
 0x2ad   : > { %2218 = vmatprep.subr.bf16.mxu1 %v16606_v63  ;;  %v16680_v63 = vld [vmem:[#allocation8 + $0x340] ss:$16 sps:$4 sm:$0xff]  }
 0x2b0   : > { %2219 = vmatpush1.bf16.msra.mxu1 %v16604_v0  ;;  %v16683_v0 = vld [vmem:[#allocation8 + $0x348] ss:$16 sps:$4 sm:$0xff]  }
 0x2b1   : > { %2220 = vmatprep.subr.bf16.mxu1 %v16612_v1  ;;  %v16688_v1 = vld [vmem:[#allocation8 + $0x364] ss:$16 sps:$4 sm:$0xff]  }
 0x2b4   : > { %2221 = vmatpush1.bf16.msra.mxu1 %v16610_v2  ;;  %v16691_v2 = vld [vmem:[#allocation8 + $0x36c] ss:$16 sps:$4 sm:$0xff]  }
 0x2b5   : > { %2222 = vmatprep.subr.bf16.mxu1 %v16618_v3  ;;  %v16686_v3 = vld [vmem:[#allocation8 + $0x360] ss:$16 sps:$4 sm:$0xff]  }
 0x2b8   : > { %2223 = vmatpush1.bf16.msra.mxu1 %v16616_v4  ;;  %v16689_v4 = vld [vmem:[#allocation8 + $0x368] ss:$16 sps:$4 sm:$0xff]  }
 0x2b9   : > { %2233 = vmatprep.subr.bf16.mxu1 %v16625_v5  ;;  %v16694_v5 = vld [vmem:[#allocation8 + $0x384] ss:$16 sps:$4 sm:$0xff]  }
 0x30e   : > { %v1264_v13 = vpop.f32.mrb[0].mxu1 }
 0x30f   : > { %v1265_v14 = vadd.f32 %v1264_v13, %v893_v11  ;;  %v1266_v15 = vpop.f32.mrb[1].mxu1  ;;  %v16692_v11 = vld [vmem:[#allocation8 + $0x380] ss:$16 sps:$4 sm:$0xff]   ;;  %v16700_v13 = vld [vmem:[#allocation8 + $0x3a4] ss:$16 sps:$4 sm:$0xff]  }
 0x310   : > { %v1267_v16 = vadd.f32 %v1266_v15, %v897_v12  ;;  %v1268_v17 = vpop.f32.mrb[2].mxu1  ;;  %v16695_v12 = vld [vmem:[#allocation8 + $0x388] ss:$16 sps:$4 sm:$0xff]   ;;  %v16698_v15 = vld [vmem:[#allocation8 + $0x3a0] ss:$16 sps:$4 sm:$0xff]  }
 0x311   : > { %v1312_v18 = vmax.f32 %v1265_v14, 0.0  ;;  %v1269_v19 = vpop.f32.mrb[3].mxu1  ;;  %v16703_v14 = vld [vmem:[#allocation8 + $0x3ac] ss:$16 sps:$4 sm:$0xff]   ;;  %v19146_v17 = vsub.s32 2, %v19131_v7 }
 0x312   : > { %v1313_v20 = vmax.f32 %v1267_v16, 0.0  ;;  %v16701_v16 = vld [vmem:[#allocation8 + $0x3a8] ss:$16 sps:$4 sm:$0xff]   ;;  %v16709_v19 = vld [vmem:[#allocation8 + $0x3cc] ss:$16 sps:$4 sm:$0xff]  }
 0x313   : > { %v1316_v23 = vpack.c.bf16 %v1312_v18, %v1312_v18  ;;  %v16706_v18 = vld [vmem:[#allocation8 + $0x3c4] ss:$16 sps:$4 sm:$0xff]  }
 0x314   : > { %v1317_v26 = vpack.c.bf16 %v1313_v20, %v1313_v20  ;;  %v19149_v20 = vsub.s32 3, %v19131_v7 }
 0x316   : > { %2142 = vmatprep.mubr.bf16.mxu0 %v1317_v26  ;;  %2224 = vmatprep.mubr.bf16.mxu1 %v1317_v26  ;;  %v905_v26 = vrot.slane %v19136_v9, %v19149_v20 }
 0x317   : > { %2143 = vmatmul.mubr.bf16.vlgmr.msra.gmra.mrb[0].mxu0 %v1316_v23  ;;  %2225 = vmatmul.mubr.bf16.vlgmr.msra.gmra.mrb[8].mxu1 %v1316_v23  ;;  %v901_v23 = vrot.slane %v19136_v9, %v19146_v17 }
 0x318   : > { %2152 = vmatpush1.bf16.msra.mxu0 %v16620_v21  ;;  %2234 = vmatpush1.bf16.msra.mxu1 %v16623_v22  ;;  %v16704_v21 = vld [vmem:[#allocation8 + $0x3c0] ss:$16 sps:$4 sm:$0xff]   ;;  %v16707_v22 = vld [vmem:[#allocation8 + $0x3c8] ss:$16 sps:$4 sm:$0xff]  }
 0x319   : > { %2153 = vmatprep.subr.bf16.mxu0 %v16628_v24  ;;  %2235 = vmatprep.subr.bf16.mxu1 %v16631_v25  ;;  %v16712_v24 = vld [vmem:[#allocation8 + $0x3e4] ss:$16 sps:$4 sm:$0xff]   ;;  %v16715_v25 = vld [vmem:[#allocation8 + $0x3ec] ss:$16 sps:$4 sm:$0xff]  }
 0x31c   : > { %2154 = vmatpush1.bf16.msra.mxu0 %v16626_v27  ;;  %2236 = vmatpush1.bf16.msra.mxu1 %v16629_v28  ;;  %v2282_v27 = vld [vmem:[#allocation11] sm:$0xff] }
 0x31d   : > { %2155 = vmatprep.subr.bf16.mxu0 %v16634_v29  ;;  %2237 = vmatprep.subr.bf16.mxu1 %v16637_v30  ;;  %v2290_v28 = vld [vmem:[#allocation11 + $0x40] sm:$0xff]  ;;  %v2283_v29 = vld [vmem:[#allocation11 + $0x8] sm:$0xff] }
 0x31e   : > { %v2291_v30 = vld [vmem:[#allocation11 + $0x48] sm:$0xff] }
 0x320   : > { %2156 = vmatpush1.bf16.msra.mxu0 %v16632_v31  ;;  %2238 = vmatpush1.bf16.msra.mxu1 %v16635_v32  ;;  %v16710_v32 = vld [vmem:[#allocation8 + $0x3e0] ss:$16 sps:$4 sm:$0xff]  }
 0x321   : > { %2157 = vmatprep.subr.bf16.mxu0 %v16640_v33  ;;  %2239 = vmatprep.subr.bf16.mxu1 %v16643_v34  ;;  %v16713_v33 = vld [vmem:[#allocation8 + $0x3e8] ss:$16 sps:$4 sm:$0xff]  }
 0x324   : > { %2158 = vmatpush1.bf16.msra.mxu0 %v16638_v35  ;;  %2240 = vmatpush1.bf16.msra.mxu1 %v16641_v36 }
 0x325   : > { %2159 = vmatprep.subr.bf16.mxu0 %v16646_v37  ;;  %2241 = vmatprep.subr.bf16.mxu1 %v16649_v38  ;;  %v2298_v38 = vld [vmem:[#allocation11 + $0x80] sm:$0xff] }
 0x328   : > { %2160 = vmatpush1.bf16.msra.mxu0 %v16644_v39  ;;  %2242 = vmatpush1.bf16.msra.mxu1 %v16647_v40  ;;  %v2306_v39 = vld [vmem:[#allocation11 + $0xc0] sm:$0xff]  ;;  %v2299_v40 = vld [vmem:[#allocation11 + $0x88] sm:$0xff] }
 0x329   : > { %2161 = vmatprep.subr.bf16.mxu0 %v16652_v41  ;;  %2243 = vmatprep.subr.bf16.mxu1 %v16655_v42  ;;  %v2307_v41 = vld [vmem:[#allocation11 + $0xc8] sm:$0xff] }
 0x32c   : > { %2162 = vmatpush1.bf16.msra.mxu0 %v16650_v43  ;;  %2244 = vmatpush1.bf16.msra.mxu1 %v16653_v44  ;;  %v14413_v43 = vcombine.high %v2282_v27, %v2290_v28  ;;  %v14415_v44 = vcombine.high %v2283_v29, %v2291_v30 }
 0x32d   : > { %2163 = vmatprep.subr.bf16.mxu0 %v16658_v45  ;;  %2245 = vmatprep.subr.bf16.mxu1 %v16661_v46 }
 0x330   : > { %2164 = vmatpush1.bf16.msra.mxu0 %v16656_v47  ;;  %2246 = vmatpush1.bf16.msra.mxu1 %v16659_v48  ;;  %v14412_v47 = vcombine.low %v2282_v27, %v2290_v28  ;;  %v14414_v48 = vcombine.low %v2283_v29, %v2291_v30  ;;  %v2387_v27 = vld [vmem:[#allocation11 + $0x348] sm:$0xff] }
 0x331   : > { %2165 = vmatprep.subr.bf16.mxu0 %v16664_v49  ;;  %2247 = vmatprep.subr.bf16.mxu1 %v16667_v50  ;;  %v2314_v49 = vld [vmem:[#allocation11 + $0x100] sm:$0xff] }
 0x332   : > { %v2322_v50 = vld [vmem:[#allocation11 + $0x140] sm:$0xff] }
 0x334   : > { %2166 = vmatpush1.bf16.msra.mxu0 %v16662_v51  ;;  %2248 = vmatpush1.bf16.msra.mxu1 %v16665_v52  ;;  %v2315_v51 = vld [vmem:[#allocation11 + $0x108] sm:$0xff] }
 0x335   : > { %2167 = vmatprep.subr.bf16.mxu0 %v16670_v53  ;;  %2249 = vmatprep.subr.bf16.mxu1 %v16673_v54  ;;  %v2323_v52 = vld [vmem:[#allocation11 + $0x148] sm:$0xff]  ;;  %v14429_v54 = vcombine.high %v2298_v38, %v2306_v39 }
 0x338   : > { %2168 = vmatpush1.bf16.msra.mxu0 %v16668_v55  ;;  %2250 = vmatpush1.bf16.msra.mxu1 %v16671_v56  ;;  %v14431_v55 = vcombine.high %v2299_v40, %v2307_v41  ;;  %v14428_v56 = vcombine.low %v2298_v38, %v2306_v39 }
 0x339   : > { %2169 = vmatprep.subr.bf16.mxu0 %v16676_v57  ;;  %2251 = vmatprep.subr.bf16.mxu1 %v16679_v58  ;;  %v14430_v57 = vcombine.low %v2299_v40, %v2307_v41  ;;  %v2330_v58 = vld [vmem:[#allocation11 + $0x180] sm:$0xff] }
 0x33a   : > { %v2410_v40 = vld [vmem:[#allocation11 + $0x400] sm:$0xff] }
 0x33b   : > { %v2418_v41 = vld [vmem:[#allocation11 + $0x440] sm:$0xff] }
 0x33c   : > { %2170 = vmatpush1.bf16.msra.mxu0 %v16674_v59  ;;  %2252 = vmatpush1.bf16.msra.mxu1 %v16677_v60  ;;  %v2338_v59 = vld [vmem:[#allocation11 + $0x1c0] sm:$0xff]  ;;  %v2331_v60 = vld [vmem:[#allocation11 + $0x188] sm:$0xff] }
 0x33d   : > { %2171 = vmatprep.subr.bf16.mxu0 %v16682_v61  ;;  %2253 = vmatprep.subr.bf16.mxu1 %v16685_v62  ;;  %v2339_v61 = vld [vmem:[#allocation11 + $0x1c8] sm:$0xff]  ;;  %v14445_v62 = vcombine.high %v2314_v49, %v2322_v50 }
 0x340   : > { %2172 = vmatpush1.bf16.msra.mxu0 %v16680_v63  ;;  %2254 = vmatpush1.bf16.msra.mxu1 %v16683_v0  ;;  %v14447_v63 = vcombine.high %v2315_v51, %v2323_v52  ;;  %v14444_v0 = vcombine.low %v2314_v49, %v2322_v50  ;;  %v2427_v49 = vld [vmem:[#allocation11 + $0x488] sm:$0xff] }
 0x341   : > { %2173 = vmatprep.subr.bf16.mxu0 %v16688_v1  ;;  %2255 = vmatprep.subr.bf16.mxu1 %v16691_v2  ;;  %v14446_v1 = vcombine.low %v2315_v51, %v2323_v52  ;;  %v2346_v2 = vld [vmem:[#allocation11 + $0x200] sm:$0xff]  ;;  %v2435_v50 = vld [vmem:[#allocation11 + $0x4c8] sm:$0xff]  ;;  %v14541_v51 = vcombine.high %v2410_v40, %v2418_v41 }
 0x344   : > { %2174 = vmatpush1.bf16.msra.mxu0 %v16686_v3  ;;  %2256 = vmatpush1.bf16.msra.mxu1 %v16689_v4  ;;  %v2354_v3 = vld [vmem:[#allocation11 + $0x240] sm:$0xff]  ;;  %v2347_v4 = vld [vmem:[#allocation11 + $0x208] sm:$0xff] }
 0x345   : > { %2175 = vmatprep.subr.bf16.mxu0 %v16694_v5  ;;  %2257 = vmatprep.subr.bf16.mxu1 %v16697_v6  ;;  %v2355_v5 = vld [vmem:[#allocation11 + $0x248] sm:$0xff]  ;;  %v14461_v6 = vcombine.high %v2330_v58, %v2338_v59 }
 0x348   : > { %2176 = vmatpush1.bf16.msra.mxu0 %v16692_v11  ;;  %2258 = vmatpush1.bf16.msra.mxu1 %v16695_v12  ;;  %v14463_v11 = vcombine.high %v2331_v60, %v2339_v61  ;;  %v14460_v12 = vcombine.low %v2330_v58, %v2338_v59  ;;  %v2451_v58 = vld [vmem:[#allocation11 + $0x548] sm:$0xff] }
 0x349   : > { %2177 = vmatprep.subr.bf16.mxu0 %v16700_v13  ;;  %2259 = vmatprep.subr.bf16.mxu1 %v16703_v14  ;;  %v14462_v13 = vcombine.low %v2331_v60, %v2339_v61  ;;  %v2362_v14 = vld [vmem:[#allocation11 + $0x280] sm:$0xff]  ;;  %v14559_v60 = vcombine.high %v2427_v49, %v2435_v50 }
 0x34c   : > { %2178 = vmatpush1.bf16.msra.mxu0 %v16698_v15  ;;  %2260 = vmatpush1.bf16.msra.mxu1 %v16701_v16  ;;  %v2370_v15 = vld [vmem:[#allocation11 + $0x2c0] sm:$0xff]  ;;  %v2363_v16 = vld [vmem:[#allocation11 + $0x288] sm:$0xff] }
 0x34d   : > { %2179 = vmatprep.subr.bf16.mxu0 %v16706_v18  ;;  %2261 = vmatprep.subr.bf16.mxu1 %v16709_v19  ;;  %v2371_v18 = vld [vmem:[#allocation11 + $0x2c8] sm:$0xff]  ;;  %v14477_v19 = vcombine.high %v2346_v2, %v2354_v3  ;;  %v14493_v28 = vcombine.high %v2362_v14, %v2370_v15  ;;  %v14492_v30 = vcombine.low %v2362_v14, %v2370_v15 }
 0x34e   : > { %v1305_v31 = vpop.f32.mrb[4].mxu1  ;;  %v14495_v29 = vcombine.high %v2363_v16, %v2371_v18  ;;  %v2483_v14 = vld [vmem:[#allocation11 + $0x648] sm:$0xff] }
 0x34f   : > { %v1306_v34 = vadd.f32 %v1305_v31, %v901_v23  ;;  %v1307_v35 = vpop.f32.mrb[5].mxu1  ;;  %v14478_v23 = vcombine.low %v2347_v4, %v2355_v5  ;;  %v14494_v31 = vcombine.low %v2363_v16, %v2371_v18 }
 0x350   : > { %v1308_v36 = vadd.f32 %v1307_v35, %v905_v26  ;;  %v1309_v37 = vpop.f32.mrb[6].mxu1  ;;  %2180 = vmatpush1.bf16.msra.mxu0 %v16704_v21  ;;  %2262 = vmatpush1.bf16.msra.mxu1 %v16707_v22  ;;  %v14479_v21 = vcombine.high %v2347_v4, %v2355_v5  ;;  %v14476_v22 = vcombine.low %v2346_v2, %v2354_v3  ;;  %v2379_v26 = vld [vmem:[#allocation11 + $0x308] sm:$0xff] }
 0x351   : > { %v1314_v9 = vmax.f32 %v1306_v34, 0.0  ;;  %v1310_v42 = vpop.f32.mrb[7].mxu1  ;;  %2181 = vmatprep.subr.bf16.mxu0 %v16712_v24  ;;  %2263 = vmatprep.subr.bf16.mxu1 %v16715_v25  ;;  %v2378_v24 = vld [vmem:[#allocation11 + $0x300] sm:$0xff]  ;;  %v2395_v34 = vld [vmem:[#allocation11 + $0x388] sm:$0xff]  ;;  %v14511_v37 = vcombine.high %v2379_v26, %v2387_v27  ;;  %v14510_v39 = vcombine.low %v2379_v26, %v2387_v27 }
 0x352   : > { %v1315_v45 = vmax.f32 %v1308_v36, 0.0  ;;  %v2386_v25 = vld [vmem:[#allocation11 + $0x340] sm:$0xff]  ;;  %v2403_v35 = vld [vmem:[#allocation11 + $0x3c8] sm:$0xff] }
 0x353   : > { %v1318_v53 = vpack.c.bf16 %v1314_v9, %v1314_v9  ;;  %v14509_v36 = vcombine.high %v2378_v24, %v2386_v25  ;;  %v14508_v38 = vcombine.low %v2378_v24, %v2386_v25  ;;  %v2411_v9 = vld [vmem:[#allocation11 + $0x408] sm:$0xff] }
 0x354   : > { %v1319_v46 = vpack.c.bf16 %v1315_v45, %v1315_v45  ;;  %2182 = vmatpush1.bf16.msra.mxu0 %v16710_v32  ;;  %2264 = vmatpush1.bf16.msra.mxu1 %v16713_v33  ;;  %v2394_v32 = vld [vmem:[#allocation11 + $0x380] sm:$0xff]  ;;  %v2419_v42 = vld [vmem:[#allocation11 + $0x448] sm:$0xff] }
 0x355   : > { %5438 = vmatprep.subr.bf16.mxu0 %v14413_v43  ;;  %5520 = vmatprep.subr.bf16.mxu1 %v14415_v44  ;;  %v2402_v33 = vld [vmem:[#allocation11 + $0x3c0] sm:$0xff]  ;;  %v14527_v44 = vcombine.high %v2395_v34, %v2403_v35  ;;  %v14543_v52 = vcombine.high %v2411_v9, %v2419_v42  ;;  %v2467_v2 = vld [vmem:[#allocation11 + $0x5c8] sm:$0xff] }
 0x356   : > { %2183 = vmatprep.mubr.bf16.mxu0 %v1319_v46  ;;  %2265 = vmatprep.mubr.bf16.mxu1 %v1319_v46  ;;  %v14525_v43 = vcombine.high %v2394_v32, %v2402_v33  ;;  %v14524_v45 = vcombine.low %v2394_v32, %v2402_v33  ;;  %v14526_v46 = vcombine.low %v2395_v34, %v2403_v35  ;;  %v2499_v24 = vld [vmem:[#allocation11 + $0x6c8] sm:$0xff]  ;;  %v2506_v33 = vld [vmem:[#allocation11 + $0x700] sm:$0xff] }
 0x357   : > { %2184 = vmatmul.mubr.bf16.vlgmr.msra.gmra.mrb[0].mxu0 %v1318_v53  ;;  %2266 = vmatmul.mubr.bf16.vlgmr.msra.gmra.mrb[8].mxu1 %v1318_v53  ;;  %v14540_v53 = vcombine.low %v2410_v40, %v2418_v41  ;;  %v2514_v34 = vld [vmem:[#allocation11 + $0x740] sm:$0xff]  ;;  %v2507_v35 = vld [vmem:[#allocation11 + $0x708] sm:$0xff] }
 0x358   : > { %5439 = vmatpush1.bf16.msra.mxu0 %v14412_v47  ;;  %5521 = vmatpush1.bf16.msra.mxu1 %v14414_v48  ;;  %v2426_v47 = vld [vmem:[#allocation11 + $0x480] sm:$0xff] }
 0x359   : > { %5440 = vmatprep.subr.bf16.mxu0 %v14429_v54  ;;  %5522 = vmatprep.subr.bf16.mxu1 %v14431_v55  ;;  %v2434_v48 = vld [vmem:[#allocation11 + $0x4c0] sm:$0xff]  ;;  %v14542_v54 = vcombine.low %v2411_v9, %v2419_v42  ;;  %v2523_v42 = vld [vmem:[#allocation11 + $0x788] sm:$0xff] }
 0x35a   : > { %v2442_v55 = vld [vmem:[#allocation11 + $0x500] sm:$0xff]  ;;  %v14557_v59 = vcombine.high %v2426_v47, %v2434_v48  ;;  %v14556_v61 = vcombine.low %v2426_v47, %v2434_v48 }
 0x35b   : > { %v2522_v41 = vld [vmem:[#allocation11 + $0x780] sm:$0xff] }
 0x35c   : > { %5441 = vmatpush1.bf16.msra.mxu0 %v14428_v56  ;;  %5523 = vmatpush1.bf16.msra.mxu1 %v14430_v57  ;;  %v2450_v56 = vld [vmem:[#allocation11 + $0x540] sm:$0xff]  ;;  %v2443_v57 = vld [vmem:[#allocation11 + $0x508] sm:$0xff] }
 0x35d   : > { %5442 = vmatprep.subr.bf16.mxu0 %v14445_v62  ;;  %5524 = vmatprep.subr.bf16.mxu1 %v14447_v63  ;;  %v14558_v62 = vcombine.low %v2427_v49, %v2435_v50  ;;  %v2458_v63 = vld [vmem:[#allocation11 + $0x580] sm:$0xff]  ;;  %v14573_v3 = vcombine.high %v2442_v55, %v2450_v56  ;;  %v14575_v4 = vcombine.high %v2443_v57, %v2451_v58  ;;  %v2539_v50 = vld [vmem:[#allocation11 + $0x808] sm:$0xff] }
 0x35e   : > { %v14572_v5 = vcombine.low %v2442_v55, %v2450_v56  ;;  %v2530_v9 = vld [vmem:[#allocation11 + $0x7c0] sm:$0xff]  ;;  %v19155_v56 = vld [vmem:[#allocation10] sm:$0xf] }
 0x35f   : > { %v2538_v48 = vld [vmem:[#allocation11 + $0x800] sm:$0xff] }
 0x360   : > { %5443 = vmatpush1.bf16.msra.mxu0 %v14444_v0  ;;  %5525 = vmatpush1.bf16.msra.mxu1 %v14446_v1  ;;  %v2466_v0 = vld [vmem:[#allocation11 + $0x5c0] sm:$0xff]  ;;  %v2459_v1 = vld [vmem:[#allocation11 + $0x588] sm:$0xff] }
 0x361   : > { %5444 = vmatprep.subr.bf16.mxu0 %v14461_v6  ;;  %5526 = vmatprep.subr.bf16.mxu1 %v14463_v11  ;;  %v14574_v6 = vcombine.low %v2443_v57, %v2451_v58  ;;  %v2474_v11 = vld [vmem:[#allocation11 + $0x600] sm:$0xff]  ;;  %v14589_v15 = vcombine.high %v2458_v63, %v2466_v0  ;;  %v14591_v16 = vcombine.high %v2459_v1, %v2467_v2 }
 0x362   : > { %v14588_v18 = vcombine.low %v2458_v63, %v2466_v0  ;;  %v2546_v49 = vld [vmem:[#allocation11 + $0x840] sm:$0xff]  ;;  %v1453_v57 = vrot.slane %v19155_v56, %v19134_v8  ;;  %v1457_v58 = vrot.slane %v19155_v56, %v19139_v10 }
 0x364   : > { %5445 = vmatpush1.bf16.msra.mxu0 %v14460_v12  ;;  %5527 = vmatpush1.bf16.msra.mxu1 %v14462_v13  ;;  %v2482_v12 = vld [vmem:[#allocation11 + $0x640] sm:$0xff]  ;;  %v2475_v13 = vld [vmem:[#allocation11 + $0x608] sm:$0xff] }
 0x365   : > { %5446 = vmatprep.subr.bf16.mxu0 %v14477_v19  ;;  %5528 = vmatprep.subr.bf16.mxu1 %v14479_v21  ;;  %v14590_v19 = vcombine.low %v2459_v1, %v2467_v2  ;;  %v2490_v21 = vld [vmem:[#allocation11 + $0x680] sm:$0xff]  ;;  %v14605_v25 = vcombine.high %v2474_v11, %v2482_v12  ;;  %v14607_v26 = vcombine.high %v2475_v13, %v2483_v14 }
 0x366   : > { %v14604_v27 = vcombine.low %v2474_v11, %v2482_v12 }
 0x368   : > { %5447 = vmatpush1.bf16.msra.mxu0 %v14476_v22  ;;  %5529 = vmatpush1.bf16.msra.mxu1 %v14478_v23  ;;  %v2498_v22 = vld [vmem:[#allocation11 + $0x6c0] sm:$0xff]  ;;  %v2491_v23 = vld [vmem:[#allocation11 + $0x688] sm:$0xff] }
 0x369   : > { %5448 = vmatprep.subr.bf16.mxu0 %v14493_v28  ;;  %5530 = vmatprep.subr.bf16.mxu1 %v14495_v29  ;;  %v14606_v28 = vcombine.low %v2475_v13, %v2483_v14  ;;  %v14621_v29 = vcombine.high %v2490_v21, %v2498_v22  ;;  %v14622_v32 = vcombine.low %v2491_v23, %v2499_v24  ;;  %v2554_v13 = vld [vmem:[#allocation11 + $0x880] sm:$0xff] }
 0x36c   : > { %5449 = vmatpush1.bf16.msra.mxu0 %v14492_v30  ;;  %5531 = vmatpush1.bf16.msra.mxu1 %v14494_v31  ;;  %v14623_v30 = vcombine.high %v2491_v23, %v2499_v24  ;;  %v14620_v31 = vcombine.low %v2490_v21, %v2498_v22  ;;  %v2570_v22 = vld [vmem:[#allocation11 + $0x900] sm:$0xff] }
 0x36d   : > { %5450 = vmatprep.subr.bf16.mxu0 %v14509_v36  ;;  %5532 = vmatprep.subr.bf16.mxu1 %v14511_v37  ;;  %v14637_v36 = vcombine.high %v2506_v33, %v2514_v34  ;;  %v2515_v37 = vld [vmem:[#allocation11 + $0x748] sm:$0xff] }
 0x36e   : > { %v14639_v40 = vcombine.high %v2507_v35, %v2515_v37 }
 0x370   : > { %5451 = vmatpush1.bf16.msra.mxu0 %v14508_v38  ;;  %5533 = vmatpush1.bf16.msra.mxu1 %v14510_v39  ;;  %v14636_v38 = vcombine.low %v2506_v33, %v2514_v34  ;;  %v14638_v39 = vcombine.low %v2507_v35, %v2515_v37  ;;  %v2586_v33 = vld [vmem:[#allocation11 + $0x980] sm:$0xff]  ;;  %v2587_v35 = vld [vmem:[#allocation11 + $0x988] sm:$0xff] }
 0x371   : > { %5452 = vmatprep.subr.bf16.mxu0 %v14525_v43  ;;  %5534 = vmatprep.subr.bf16.mxu1 %v14527_v44  ;;  %v14653_v43 = vcombine.high %v2522_v41, %v2530_v9  ;;  %v2531_v44 = vld [vmem:[#allocation11 + $0x7c8] sm:$0xff]  ;;  %v2594_v34 = vld [vmem:[#allocation11 + $0x9c0] sm:$0xff] }
 0x372   : > { %v14655_v47 = vcombine.high %v2523_v42, %v2531_v44 }
 0x374   : > { %5453 = vmatpush1.bf16.msra.mxu0 %v14524_v45  ;;  %5535 = vmatpush1.bf16.msra.mxu1 %v14526_v46  ;;  %v14652_v45 = vcombine.low %v2522_v41, %v2530_v9  ;;  %v14654_v46 = vcombine.low %v2523_v42, %v2531_v44  ;;  %v2602_v41 = vld [vmem:[#allocation11 + $0xa00] sm:$0xff]  ;;  %v2603_v42 = vld [vmem:[#allocation11 + $0xa08] sm:$0xff]  ;;  %v14716_v44 = vcombine.low %v2586_v33, %v2594_v34 }
 0x375   : > { %5454 = vmatprep.subr.bf16.mxu0 %v14541_v51  ;;  %5536 = vmatprep.subr.bf16.mxu1 %v14543_v52  ;;  %v14669_v51 = vcombine.high %v2538_v48, %v2546_v49  ;;  %v2547_v52 = vld [vmem:[#allocation11 + $0x848] sm:$0xff]  ;;  %v2610_v9 = vld [vmem:[#allocation11 + $0xa40] sm:$0xff] }
 0x376   : > { %v14671_v55 = vcombine.high %v2539_v50, %v2547_v52 }
 0x378   : > { %5455 = vmatpush1.bf16.msra.mxu0 %v14540_v53  ;;  %5537 = vmatpush1.bf16.msra.mxu1 %v14542_v54  ;;  %v14668_v53 = vcombine.low %v2538_v48, %v2546_v49  ;;  %v14670_v54 = vcombine.low %v2539_v50, %v2547_v52  ;;  %v2618_v48 = vld [vmem:[#allocation11 + $0xa80] sm:$0xff]  ;;  %v2619_v50 = vld [vmem:[#allocation11 + $0xa88] sm:$0xff]  ;;  %v14732_v52 = vcombine.low %v2602_v41, %v2610_v9 }
 0x379   : > { %5456 = vmatprep.subr.bf16.mxu0 %v14557_v59  ;;  %5538 = vmatprep.subr.bf16.mxu1 %v14559_v60  ;;  %v1465_v59 = vrot.slane %v19155_v56, %v19149_v20  ;;  %v2626_v49 = vld [vmem:[#allocation11 + $0xac0] sm:$0xff] }
 0x37c   : > { %5457 = vmatpush1.bf16.msra.mxu0 %v14556_v61  ;;  %5539 = vmatpush1.bf16.msra.mxu1 %v14558_v62 }
 0x37d   : > { %5458 = vmatprep.subr.bf16.mxu0 %v14573_v3  ;;  %5540 = vmatprep.subr.bf16.mxu1 %v14575_v4 }
 0x380   : > { %5459 = vmatpush1.bf16.msra.mxu0 %v14572_v5  ;;  %5541 = vmatpush1.bf16.msra.mxu1 %v14574_v6 }
 0x381   : > { %5460 = vmatprep.subr.bf16.mxu0 %v14589_v15  ;;  %5542 = vmatprep.subr.bf16.mxu1 %v14591_v16  ;;  %v2562_v15 = vld [vmem:[#allocation11 + $0x8c0] sm:$0xff]  ;;  %v2555_v16 = vld [vmem:[#allocation11 + $0x888] sm:$0xff] }
 0x382   : > { %v14685_v23 = vcombine.high %v2554_v13, %v2562_v15 }
 0x384   : > { %5461 = vmatpush1.bf16.msra.mxu0 %v14588_v18  ;;  %5543 = vmatpush1.bf16.msra.mxu1 %v14590_v19  ;;  %v2563_v18 = vld [vmem:[#allocation11 + $0x8c8] sm:$0xff] }
 0x385   : > { %5462 = vmatprep.subr.bf16.mxu0 %v14605_v25  ;;  %5544 = vmatprep.subr.bf16.mxu1 %v14607_v26  ;;  %v14687_v24 = vcombine.high %v2555_v16, %v2563_v18  ;;  %v2578_v25 = vld [vmem:[#allocation11 + $0x940] sm:$0xff]  ;;  %v2571_v26 = vld [vmem:[#allocation11 + $0x908] sm:$0xff] }
 0x386   : > { %v14700_v37 = vcombine.low %v2570_v22, %v2578_v25 }
 0x388   : > { %5463 = vmatpush1.bf16.msra.mxu0 %v14604_v27  ;;  %5545 = vmatpush1.bf16.msra.mxu1 %v14606_v28  ;;  %v2579_v27 = vld [vmem:[#allocation11 + $0x948] sm:$0xff] }
 0x389   : > { %5464 = vmatprep.subr.bf16.mxu0 %v14621_v29  ;;  %5546 = vmatprep.subr.bf16.mxu1 %v14623_v30  ;;  %v14684_v29 = vcombine.low %v2554_v13, %v2562_v15  ;;  %v14686_v30 = vcombine.low %v2555_v16, %v2563_v18  ;;  %v2674_v15 = vld [vmem:[#allocation11 + $0xc40] sm:$0xff]  ;;  %v2667_v16 = vld [vmem:[#allocation11 + $0xc08] sm:$0xff] }
 0x38a   : > { %v2675_v18 = vld [vmem:[#allocation11 + $0xc48] sm:$0xff] }
 0x38c   : > { %5465 = vmatpush1.bf16.msra.mxu0 %v14620_v31  ;;  %5547 = vmatpush1.bf16.msra.mxu1 %v14622_v32  ;;  %v14701_v31 = vcombine.high %v2570_v22, %v2578_v25  ;;  %v14703_v32 = vcombine.high %v2571_v26, %v2579_v27  ;;  %v14799_v25 = vcombine.high %v2667_v16, %v2675_v18 }
 0x38d   : > { %5466 = vmatprep.subr.bf16.mxu0 %v14637_v36  ;;  %5548 = vmatprep.subr.bf16.mxu1 %v14639_v40  ;;  %v2595_v36 = vld [vmem:[#allocation11 + $0x9c8] sm:$0xff] }
 0x38e   : > { %v14719_v40 = vcombine.high %v2587_v35, %v2595_v36 }
 0x390   : > { %5467 = vmatpush1.bf16.msra.mxu0 %v14636_v38  ;;  %5549 = vmatpush1.bf16.msra.mxu1 %v14638_v39  ;;  %v14702_v38 = vcombine.low %v2571_v26, %v2579_v27  ;;  %v14717_v39 = vcombine.high %v2586_v33, %v2594_v34  ;;  %v2682_v26 = vld [vmem:[#allocation11 + $0xc80] sm:$0xff] }
 0x391   : > { %5468 = vmatprep.subr.bf16.mxu0 %v14653_v43  ;;  %5550 = vmatprep.subr.bf16.mxu1 %v14655_v47  ;;  %v2611_v43 = vld [vmem:[#allocation11 + $0xa48] sm:$0xff]  ;;  %v2690_v27 = vld [vmem:[#allocation11 + $0xcc0] sm:$0xff] }
 0x392   : > { %v14735_v47 = vcombine.high %v2603_v42, %v2611_v43  ;;  %v14813_v33 = vcombine.high %v2682_v26, %v2690_v27 }
 0x394   : > { %5469 = vmatpush1.bf16.msra.mxu0 %v14652_v45  ;;  %5551 = vmatpush1.bf16.msra.mxu1 %v14654_v46  ;;  %v14718_v45 = vcombine.low %v2587_v35, %v2595_v36  ;;  %v14733_v46 = vcombine.high %v2602_v41, %v2610_v9  ;;  %v2698_v35 = vld [vmem:[#allocation11 + $0xd00] sm:$0xff] }
 0x395   : > { %5479 = vmatprep.subr.bf16.mxu0 %v14669_v51  ;;  %5561 = vmatprep.subr.bf16.mxu1 %v14671_v55  ;;  %v2627_v51 = vld [vmem:[#allocation11 + $0xac8] sm:$0xff]  ;;  %v2706_v36 = vld [vmem:[#allocation11 + $0xd40] sm:$0xff] }
 0x396   : > { %v14751_v55 = vcombine.high %v2619_v50, %v2627_v51  ;;  %v14829_v41 = vcombine.high %v2698_v35, %v2706_v36 }
 0x42a   : > { %v2185_v60 = vpop.f32.mrb[0].mxu0  ;;  %v19163_v61 = vpop.f32.mrb[8].mxu1 }
 0x42b   : > { %v16070_v62 = vadd.f32 %v2185_v60, %v1453_v57  ;;  %v2187_v63 = vpop.f32.mrb[1].mxu0  ;;  %v2269_v0 = vpop.f32.mrb[9].mxu1  ;;  %v2634_v57 = vld [vmem:[#allocation11 + $0xb00] sm:$0xff]  ;;  %v2643_v60 = vld [vmem:[#allocation11 + $0xb48] sm:$0xff] }
 0x42c   : > { %v16071_v1 = vadd.f32 %v2187_v63, %v1457_v58  ;;  %v16073_v2 = vadd.f32 %v2269_v0, %v1465_v59  ;;  %v2189_v3 = vpop.f32.mrb[2].mxu0  ;;  %v2271_v4 = vpop.f32.mrb[10].mxu1  ;;  %v2642_v58 = vld [vmem:[#allocation11 + $0xb40] sm:$0xff]  ;;  %v2635_v59 = vld [vmem:[#allocation11 + $0xb08] sm:$0xff]  ;;  %v14750_v63 = vcombine.low %v2619_v50, %v2627_v51 }
 0x42d   : > { %v2274_v5 = vmax.f32 %v16070_v62, 0.0  ;;  %v2190_v6 = vpop.f32.mrb[3].mxu0  ;;  %v2272_v11 = vpop.f32.mrb[11].mxu1  ;;  %v14748_v62 = vcombine.low %v2618_v48, %v2626_v49  ;;  %v14765_v0 = vcombine.high %v2634_v57, %v2642_v58  ;;  %v2658_v3 = vld [vmem:[#allocation11 + $0xbc0] sm:$0xff]  ;;  %v2651_v4 = vld [vmem:[#allocation11 + $0xb88] sm:$0xff] }
 0x42e   : > { %v2275_v12 = vmax.f32 %v16071_v1, 0.0  ;;  %v2277_v14 = vmax.f32 %v16073_v2, 0.0  ;;  %v14767_v1 = vcombine.high %v2635_v59, %v2643_v60  ;;  %v2650_v2 = vld [vmem:[#allocation11 + $0xb80] sm:$0xff]  ;;  %v14764_v6 = vcombine.low %v2634_v57, %v2642_v58 }
 0x42f   : > { %v19167_v21 = vpack.c.bf16 %v2274_v5, %v2274_v5  ;;  %v2659_v5 = vld [vmem:[#allocation11 + $0xbc8] sm:$0xff]  ;;  %v14766_v11 = vcombine.low %v2635_v59, %v2643_v60  ;;  %v14780_v22 = vcombine.low %v2650_v2, %v2658_v3  ;;  %v2730_v50 = vld [vmem:[#allocation11 + $0xe00] sm:$0xff] }
 0x430   : > { %v19165_v19 = vpack.c.bf16 %v2275_v12, %v2275_v12  ;;  %v19171_v28 = vpack.c.bf16 %v2277_v14, %v2277_v14  ;;  %v14781_v12 = vcombine.high %v2650_v2, %v2658_v3  ;;  %v14783_v13 = vcombine.high %v2651_v4, %v2659_v5  ;;  %v2666_v14 = vld [vmem:[#allocation11 + $0xc00] sm:$0xff] }
 0x431   : > { %v2738_v51 = vld [vmem:[#allocation11 + $0xe40] sm:$0xff] }
 0x432   : > { %5470 = vmatprep.mubr.bf16.mxu0 %v19165_v19  ;;  %5552 = vmatprep.mubr.bf16.mxu1 %v19165_v19  ;;  %v14861_v57 = vcombine.high %v2730_v50, %v2738_v51  ;;  %v2746_v59 = vld [vmem:[#allocation11 + $0xe80] sm:$0xff] }
 0x433   : > { %5471 = vmatmul.mubr.bf16.vlgmr.msra.gmra.mrb[4].mxu0 %v19167_v21  ;;  %5553 = vmatmul.mubr.bf16.vlgmr.msra.gmra.mrb[12].mxu1 %v19167_v21  ;;  %v2754_v60 = vld [vmem:[#allocation11 + $0xec0] sm:$0xff] }
 0x434   : > { %5480 = vmatpush1.bf16.msra.mxu0 %v14668_v53  ;;  %5562 = vmatpush1.bf16.msra.mxu1 %v14670_v54  ;;  %v14734_v53 = vcombine.low %v2603_v42, %v2611_v43  ;;  %v14749_v54 = vcombine.high %v2618_v48, %v2626_v49  ;;  %v2714_v42 = vld [vmem:[#allocation11 + $0xd80] sm:$0xff]  ;;  %v14877_v2 = vcombine.high %v2746_v59, %v2754_v60 }
 0x435   : > { %5511 = vmatprep.mubr.bf16.mxu0 %v19171_v28  ;;  %5593 = vmatprep.mubr.bf16.mxu1 %v19171_v28  ;;  %v2722_v43 = vld [vmem:[#allocation11 + $0xdc0] sm:$0xff] }
 0x436   : > { %5481 = vmatprep.subr.bf16.mxu0 %v14685_v23  ;;  %5563 = vmatprep.subr.bf16.mxu1 %v14687_v24  ;;  %v14782_v23 = vcombine.low %v2651_v4, %v2659_v5  ;;  %v14797_v24 = vcombine.high %v2666_v14, %v2674_v15  ;;  %v14845_v48 = vcombine.high %v2714_v42, %v2722_v43  ;;  %v2762_v4 = vld [vmem:[#allocation11 + $0xf00] sm:$0xff] }
 0x437   : > { %v2770_v5 = vld [vmem:[#allocation11 + $0xf40] sm:$0xff] }
 0x438   : > { %5482 = vmatpush1.bf16.msra.mxu0 %v14684_v29  ;;  %5564 = vmatpush1.bf16.msra.mxu1 %v14686_v30  ;;  %v2683_v29 = vld [vmem:[#allocation11 + $0xc88] sm:$0xff] }
 0x439   : > { %5483 = vmatprep.subr.bf16.mxu0 %v14701_v31  ;;  %5565 = vmatprep.subr.bf16.mxu1 %v14703_v32  ;;  %v2691_v30 = vld [vmem:[#allocation11 + $0xcc8] sm:$0xff]  ;;  %v14796_v31 = vcombine.low %v2666_v14, %v2674_v15  ;;  %v14798_v32 = vcombine.low %v2667_v16, %v2675_v18  ;;  %v1461_v14 = vrot.slane %v19155_v56, %v19146_v17  ;;  %v2778_v18 = vld [vmem:[#allocation11 + $0xf80] sm:$0xff]  ;;  %v2292_v56 = vld [vmem:[#allocation11 + $0x50] sm:$0xff] }
 0x43a   : > { %v14815_v34 = vcombine.high %v2683_v29, %v2691_v30  ;;  %v14893_v15 = vcombine.high %v2762_v4, %v2770_v5 }
 0x43c   : > { %5484 = vmatpush1.bf16.msra.mxu0 %v14700_v37  ;;  %5566 = vmatpush1.bf16.msra.mxu1 %v14702_v38  ;;  %v2699_v37 = vld [vmem:[#allocation11 + $0xd08] sm:$0xff] }
 0x43d   : > { %5485 = vmatprep.subr.bf16.mxu0 %v14717_v39  ;;  %5567 = vmatprep.subr.bf16.mxu1 %v14719_v40  ;;  %v2707_v38 = vld [vmem:[#allocation11 + $0xd48] sm:$0xff]  ;;  %v14812_v39 = vcombine.low %v2682_v26, %v2690_v27  ;;  %v14814_v40 = vcombine.low %v2683_v29, %v2691_v30  ;;  %v16072_v27 = vadd.f32 %v19163_v61, %v1461_v14  ;;  %v2301_v61 = vld [vmem:[#allocation11 + $0x98] sm:$0xff] }
 0x43e   : > { %v14831_v9 = vcombine.high %v2699_v37, %v2707_v38  ;;  %v2365_v14 = vld [vmem:[#allocation11 + $0x298] sm:$0xff] }
 0x440   : > { %5486 = vmatpush1.bf16.msra.mxu0 %v14716_v44  ;;  %5568 = vmatpush1.bf16.msra.mxu1 %v14718_v45  ;;  %v2715_v44 = vld [vmem:[#allocation11 + $0xd88] sm:$0xff] }
 0x441   : > { %5487 = vmatprep.subr.bf16.mxu0 %v14733_v46  ;;  %5569 = vmatprep.subr.bf16.mxu1 %v14735_v47  ;;  %v2723_v45 = vld [vmem:[#allocation11 + $0xdc8] sm:$0xff]  ;;  %v14828_v46 = vcombine.low %v2698_v35, %v2706_v36  ;;  %v14830_v47 = vcombine.low %v2699_v37, %v2707_v38  ;;  %v2276_v36 = vmax.f32 %v16072_v27, 0.0  ;;  %v2389_v27 = vld [vmem:[#allocation11 + $0x358] sm:$0xff] }
 0x442   : > { %v14847_v49 = vcombine.high %v2715_v44, %v2723_v45 }
 0x444   : > { %5488 = vmatpush1.bf16.msra.mxu0 %v14732_v52  ;;  %5570 = vmatpush1.bf16.msra.mxu1 %v14734_v53  ;;  %v2731_v52 = vld [vmem:[#allocation11 + $0xe08] sm:$0xff] }
 0x445   : > { %5489 = vmatprep.subr.bf16.mxu0 %v14749_v54  ;;  %5571 = vmatprep.subr.bf16.mxu1 %v14751_v55  ;;  %v2739_v53 = vld [vmem:[#allocation11 + $0xe48] sm:$0xff]  ;;  %v14844_v54 = vcombine.low %v2714_v42, %v2722_v43  ;;  %v14846_v55 = vcombine.low %v2715_v44, %v2723_v45  ;;  %v19180_v42 = vpack.c.bf16 %v2276_v36, %v2276_v36 }
 0x446   : > { %v14863_v58 = vcombine.high %v2731_v52, %v2739_v53 }
 0x448   : > { %5490 = vmatpush1.bf16.msra.mxu0 %v14748_v62  ;;  %5572 = vmatpush1.bf16.msra.mxu1 %v14750_v63  ;;  %v2747_v62 = vld [vmem:[#allocation11 + $0xe88] sm:$0xff] }
 0x449   : > { %5491 = vmatprep.subr.bf16.mxu0 %v14765_v0  ;;  %5573 = vmatprep.subr.bf16.mxu1 %v14767_v1  ;;  %v2755_v63 = vld [vmem:[#allocation11 + $0xec8] sm:$0xff]  ;;  %v14860_v0 = vcombine.low %v2730_v50, %v2738_v51  ;;  %v14862_v1 = vcombine.low %v2731_v52, %v2739_v53 }
 0x44a   : > { %v14879_v3 = vcombine.high %v2747_v62, %v2755_v63 }
 0x44c   : > { %5492 = vmatpush1.bf16.msra.mxu0 %v14764_v6  ;;  %5574 = vmatpush1.bf16.msra.mxu1 %v14766_v11  ;;  %v2763_v6 = vld [vmem:[#allocation11 + $0xf08] sm:$0xff] }
 0x44d   : > { %5493 = vmatprep.subr.bf16.mxu0 %v14781_v12  ;;  %5575 = vmatprep.subr.bf16.mxu1 %v14783_v13  ;;  %v2771_v11 = vld [vmem:[#allocation11 + $0xf48] sm:$0xff]  ;;  %v14876_v12 = vcombine.low %v2746_v59, %v2754_v60  ;;  %v14878_v13 = vcombine.low %v2747_v62, %v2755_v63 }
 0x44e   : > { %v14895_v16 = vcombine.high %v2763_v6, %v2771_v11  ;;  %v14894_v26 = vcombine.low %v2763_v6, %v2771_v11 }
 0x450   : > { %5494 = vmatpush1.bf16.msra.mxu0 %v14780_v22  ;;  %5576 = vmatpush1.bf16.msra.mxu1 %v14782_v23  ;;  %v2786_v22 = vld [vmem:[#allocation11 + $0xfc0] sm:$0xff]  ;;  %v2779_v23 = vld [vmem:[#allocation11 + $0xf88] sm:$0xff] }
 0x451   : > { %5495 = vmatprep.subr.bf16.mxu0 %v14797_v24  ;;  %5577 = vmatprep.subr.bf16.mxu1 %v14799_v25  ;;  %v2787_v24 = vld [vmem:[#allocation11 + $0xfc8] sm:$0xff]  ;;  %v14892_v25 = vcombine.low %v2762_v4, %v2770_v5  ;;  %v14909_v29 = vcombine.high %v2778_v18, %v2786_v22 }
 0x452   : > { %v14911_v30 = vcombine.high %v2779_v23, %v2787_v24  ;;  %v14910_v35 = vcombine.low %v2779_v23, %v2787_v24  ;;  %v2380_v24 = vld [vmem:[#allocation11 + $0x310] sm:$0xff] }
 0x454   : > { %5496 = vmatpush1.bf16.msra.mxu0 %v14796_v31  ;;  %5578 = vmatpush1.bf16.msra.mxu1 %v14798_v32  ;;  %v2284_v31 = vld [vmem:[#allocation11 + $0x10] sm:$0xff]  ;;  %v2285_v32 = vld [vmem:[#allocation11 + $0x18] sm:$0xff] }
 0x455   : > { %5497 = vmatprep.subr.bf16.mxu0 %v14813_v33  ;;  %5579 = vmatprep.subr.bf16.mxu1 %v14815_v34  ;;  %v2293_v33 = vld [vmem:[#allocation11 + $0x58] sm:$0xff]  ;;  %v14908_v34 = vcombine.low %v2778_v18, %v2786_v22  ;;  %v14417_v37 = vcombine.high %v2284_v31, %v2292_v56 }
 0x456   : > { %v14419_v38 = vcombine.high %v2285_v32, %v2293_v33  ;;  %v14418_v43 = vcombine.low %v2285_v32, %v2293_v33  ;;  %v2396_v32 = vld [vmem:[#allocation11 + $0x390] sm:$0xff] }
 0x457   : > { %v2404_v33 = vld [vmem:[#allocation11 + $0x3d0] sm:$0xff] }
 0x458   : > { %5498 = vmatpush1.bf16.msra.mxu0 %v14812_v39  ;;  %5580 = vmatpush1.bf16.msra.mxu1 %v14814_v40  ;;  %v2300_v39 = vld [vmem:[#allocation11 + $0x90] sm:$0xff] }
 0x459   : > { %5499 = vmatprep.subr.bf16.mxu0 %v14829_v41  ;;  %5581 = vmatprep.subr.bf16.mxu1 %v14831_v9  ;;  %v2308_v40 = vld [vmem:[#allocation11 + $0xd0] sm:$0xff]  ;;  %v2309_v41 = vld [vmem:[#allocation11 + $0xd8] sm:$0xff]  ;;  %v14416_v9 = vcombine.low %v2284_v31, %v2292_v56 }
 0x45a   : > { %v14433_v44 = vcombine.high %v2300_v39, %v2308_v40  ;;  %v14435_v45 = vcombine.high %v2301_v61, %v2309_v41  ;;  %v14432_v50 = vcombine.low %v2300_v39, %v2308_v40  ;;  %v14434_v51 = vcombine.low %v2301_v61, %v2309_v41  ;;  %v2412_v40 = vld [vmem:[#allocation11 + $0x410] sm:$0xff]  ;;  %v2413_v41 = vld [vmem:[#allocation11 + $0x418] sm:$0xff] }
 0x45b   : > { %v2420_v61 = vld [vmem:[#allocation11 + $0x450] sm:$0xff] }
 0x45c   : > { %5500 = vmatpush1.bf16.msra.mxu0 %v14828_v46  ;;  %5582 = vmatpush1.bf16.msra.mxu1 %v14830_v47  ;;  %v2316_v46 = vld [vmem:[#allocation11 + $0x110] sm:$0xff] }
 0x45d   : > { %5501 = vmatprep.subr.bf16.mxu0 %v14845_v48  ;;  %5583 = vmatprep.subr.bf16.mxu1 %v14847_v49  ;;  %v2324_v47 = vld [vmem:[#allocation11 + $0x150] sm:$0xff]  ;;  %v2317_v48 = vld [vmem:[#allocation11 + $0x118] sm:$0xff] }
 0x45e   : > { %v2325_v49 = vld [vmem:[#allocation11 + $0x158] sm:$0xff]  ;;  %v14449_v52 = vcombine.high %v2316_v46, %v2324_v47  ;;  %v14448_v59 = vcombine.low %v2316_v46, %v2324_v47  ;;  %v2428_v47 = vld [vmem:[#allocation11 + $0x490] sm:$0xff] }
 0x45f   : > { %v14451_v53 = vcombine.high %v2317_v48, %v2325_v49  ;;  %v14450_v60 = vcombine.low %v2317_v48, %v2325_v49  ;;  %v2436_v48 = vld [vmem:[#allocation11 + $0x4d0] sm:$0xff]  ;;  %v2429_v49 = vld [vmem:[#allocation11 + $0x498] sm:$0xff] }
 0x460   : > { %5502 = vmatpush1.bf16.msra.mxu0 %v14844_v54  ;;  %5584 = vmatpush1.bf16.msra.mxu1 %v14846_v55  ;;  %v2332_v54 = vld [vmem:[#allocation11 + $0x190] sm:$0xff] }
 0x461   : > { %5503 = vmatprep.subr.bf16.mxu0 %v14861_v57  ;;  %5585 = vmatprep.subr.bf16.mxu1 %v14863_v58  ;;  %v2340_v55 = vld [vmem:[#allocation11 + $0x1d0] sm:$0xff]  ;;  %v2333_v57 = vld [vmem:[#allocation11 + $0x198] sm:$0xff] }
 0x462   : > { %v2341_v58 = vld [vmem:[#allocation11 + $0x1d8] sm:$0xff]  ;;  %v14465_v62 = vcombine.high %v2332_v54, %v2340_v55  ;;  %v14464_v4 = vcombine.low %v2332_v54, %v2340_v55  ;;  %v2444_v55 = vld [vmem:[#allocation11 + $0x510] sm:$0xff] }
 0x463   : > { %v14467_v63 = vcombine.high %v2333_v57, %v2341_v58  ;;  %v14466_v5 = vcombine.low %v2333_v57, %v2341_v58  ;;  %v2452_v57 = vld [vmem:[#allocation11 + $0x550] sm:$0xff]  ;;  %v2445_v58 = vld [vmem:[#allocation11 + $0x518] sm:$0xff] }
 0x464   : > { %5504 = vmatpush1.bf16.msra.mxu0 %v14860_v0  ;;  %5586 = vmatpush1.bf16.msra.mxu1 %v14862_v1  ;;  %v2348_v0 = vld [vmem:[#allocation11 + $0x210] sm:$0xff] }
 0x465   : > { %5505 = vmatprep.subr.bf16.mxu0 %v14877_v2  ;;  %5587 = vmatprep.subr.bf16.mxu1 %v14879_v3  ;;  %v2356_v1 = vld [vmem:[#allocation11 + $0x250] sm:$0xff]  ;;  %v2349_v2 = vld [vmem:[#allocation11 + $0x218] sm:$0xff] }
 0x466   : > { %v2357_v3 = vld [vmem:[#allocation11 + $0x258] sm:$0xff]  ;;  %v14481_v6 = vcombine.high %v2348_v0, %v2356_v1 }
 0x467   : > { %v14483_v11 = vcombine.high %v2349_v2, %v2357_v3  ;;  %v14482_v18 = vcombine.low %v2349_v2, %v2357_v3  ;;  %v2468_v2 = vld [vmem:[#allocation11 + $0x5d0] sm:$0xff]  ;;  %v2461_v3 = vld [vmem:[#allocation11 + $0x598] sm:$0xff] }
 0x468   : > { %5506 = vmatpush1.bf16.msra.mxu0 %v14876_v12  ;;  %5588 = vmatpush1.bf16.msra.mxu1 %v14878_v13  ;;  %v2364_v12 = vld [vmem:[#allocation11 + $0x290] sm:$0xff] }
 0x469   : > { %5507 = vmatprep.subr.bf16.mxu0 %v14893_v15  ;;  %5589 = vmatprep.subr.bf16.mxu1 %v14895_v16  ;;  %v2372_v13 = vld [vmem:[#allocation11 + $0x2d0] sm:$0xff]  ;;  %v2373_v15 = vld [vmem:[#allocation11 + $0x2d8] sm:$0xff]  ;;  %v14480_v16 = vcombine.low %v2348_v0, %v2356_v1 }
 0x46a   : > { %v14497_v22 = vcombine.high %v2364_v12, %v2372_v13  ;;  %v14499_v23 = vcombine.high %v2365_v14, %v2373_v15  ;;  %v2460_v1 = vld [vmem:[#allocation11 + $0x590] sm:$0xff] }
 0x46c   : > { %5508 = vmatpush1.bf16.msra.mxu0 %v14892_v25  ;;  %5590 = vmatpush1.bf16.msra.mxu1 %v14894_v26  ;;  %v2388_v25 = vld [vmem:[#allocation11 + $0x350] sm:$0xff]  ;;  %v2381_v26 = vld [vmem:[#allocation11 + $0x318] sm:$0xff] }
 0x46d   : > { %5509 = vmatprep.subr.bf16.mxu0 %v14909_v29  ;;  %5591 = vmatprep.subr.bf16.mxu1 %v14911_v30  ;;  %v14496_v29 = vcombine.low %v2364_v12, %v2372_v13  ;;  %v14498_v30 = vcombine.low %v2365_v14, %v2373_v15  ;;  %v14513_v31 = vcombine.high %v2380_v24, %v2388_v25  ;;  %v2476_v13 = vld [vmem:[#allocation11 + $0x610] sm:$0xff]  ;;  %v2477_v15 = vld [vmem:[#allocation11 + $0x618] sm:$0xff] }
 0x46e   : > { %v14515_v56 = vcombine.high %v2381_v26, %v2389_v27  ;;  %v14512_v36 = vcombine.low %v2380_v24, %v2388_v25  ;;  %v2484_v14 = vld [vmem:[#allocation11 + $0x650] sm:$0xff] }
 0x46f   : > { %v2492_v25 = vld [vmem:[#allocation11 + $0x690] sm:$0xff] }
 0x470   : > { %5510 = vmatpush1.bf16.msra.mxu0 %v14908_v34  ;;  %5592 = vmatpush1.bf16.msra.mxu1 %v14910_v35  ;;  %v2397_v34 = vld [vmem:[#allocation11 + $0x398] sm:$0xff] }
 0x471   : > { %5602 = vmatprep.subr.bf16.mxu0 %v14417_v37  ;;  %5684 = vmatprep.subr.bf16.mxu1 %v14419_v38  ;;  %v2405_v35 = vld [vmem:[#allocation11 + $0x3d8] sm:$0xff]  ;;  %v14514_v37 = vcombine.low %v2381_v26, %v2389_v27  ;;  %v14529_v38 = vcombine.high %v2396_v32, %v2404_v33  ;;  %v2500_v26 = vld [vmem:[#allocation11 + $0x6d0] sm:$0xff] }
 0x472   : > { %v14531_v39 = vcombine.high %v2397_v34, %v2405_v35  ;;  %v2493_v27 = vld [vmem:[#allocation11 + $0x698] sm:$0xff] }
 0x473   : > { %5512 = vmatmul.mubr.bf16.vlgmr.msra.gmra.mrb[4].mxu0 %v19180_v42  ;;  %5594 = vmatmul.mubr.bf16.vlgmr.msra.gmra.mrb[12].mxu1 %v19180_v42 }
 0x474   : > { %5603 = vmatpush1.bf16.msra.mxu0 %v14416_v9  ;;  %5634 = vmatprep.mubr.bf16.mxu0 %v19165_v19  ;;  %v2421_v9 = vld [vmem:[#allocation11 + $0x458] sm:$0xff] }
 0x475   : > { %5685 = vmatpush1.bf16.msra.mxu1 %v14418_v43  ;;  %5716 = vmatprep.mubr.bf16.mxu1 %v19165_v19  ;;  %v14528_v43 = vcombine.low %v2396_v32, %v2404_v33  ;;  %v14547_v46 = vcombine.high %v2413_v41, %v2421_v9  ;;  %v2508_v33 = vld [vmem:[#allocation11 + $0x710] sm:$0xff] }
 0x476   : > { %5604 = vmatprep.subr.bf16.mxu0 %v14433_v44  ;;  %5686 = vmatprep.subr.bf16.mxu1 %v14435_v45  ;;  %v14530_v44 = vcombine.low %v2397_v34, %v2405_v35  ;;  %v14545_v45 = vcombine.high %v2412_v40, %v2420_v61  ;;  %v2516_v34 = vld [vmem:[#allocation11 + $0x750] sm:$0xff]  ;;  %v2509_v35 = vld [vmem:[#allocation11 + $0x718] sm:$0xff] }
 0x478   : > { %5605 = vmatpush1.bf16.msra.mxu0 %v14432_v50  ;;  %v2437_v50 = vld [vmem:[#allocation11 + $0x4d8] sm:$0xff] }
 0x479   : > { %5687 = vmatpush1.bf16.msra.mxu1 %v14434_v51  ;;  %5606 = vmatprep.subr.bf16.mxu0 %v14449_v52  ;;  %v14544_v51 = vcombine.low %v2412_v40, %v2420_v61  ;;  %v14546_v52 = vcombine.low %v2413_v41, %v2421_v9  ;;  %v14563_v54 = vcombine.high %v2429_v49, %v2437_v50  ;;  %v2524_v61 = vld [vmem:[#allocation11 + $0x790] sm:$0xff]  ;;  %v2525_v9 = vld [vmem:[#allocation11 + $0x798] sm:$0xff] }
 0x47a   : > { %5688 = vmatprep.subr.bf16.mxu1 %v14451_v53  ;;  %v14561_v53 = vcombine.high %v2428_v47, %v2436_v48  ;;  %v2532_v41 = vld [vmem:[#allocation11 + $0x7d0] sm:$0xff] }
 0x47c   : > { %5607 = vmatpush1.bf16.msra.mxu0 %v14448_v59  ;;  %v2453_v59 = vld [vmem:[#allocation11 + $0x558] sm:$0xff] }
 0x47d   : > { %5689 = vmatpush1.bf16.msra.mxu1 %v14450_v60  ;;  %5608 = vmatprep.subr.bf16.mxu0 %v14465_v62  ;;  %v14560_v60 = vcombine.low %v2428_v47, %v2436_v48  ;;  %v14562_v62 = vcombine.low %v2429_v49, %v2437_v50  ;;  %v14579_v0 = vcombine.high %v2445_v58, %v2453_v59  ;;  %v2540_v48 = vld [vmem:[#allocation11 + $0x810] sm:$0xff]  ;;  %v2541_v50 = vld [vmem:[#allocation11 + $0x818] sm:$0xff] }
 0x47e   : > { %5690 = vmatprep.subr.bf16.mxu1 %v14467_v63  ;;  %v14577_v63 = vcombine.high %v2444_v55, %v2452_v57  ;;  %v2548_v49 = vld [vmem:[#allocation11 + $0x850] sm:$0xff] }
 0x480   : > { %5609 = vmatpush1.bf16.msra.mxu0 %v14464_v4  ;;  %v2469_v4 = vld [vmem:[#allocation11 + $0x5d8] sm:$0xff] }
 0x481   : > { %5691 = vmatpush1.bf16.msra.mxu1 %v14466_v5  ;;  %5610 = vmatprep.subr.bf16.mxu0 %v14481_v6  ;;  %v14576_v5 = vcombine.low %v2444_v55, %v2452_v57  ;;  %v14578_v6 = vcombine.low %v2445_v58, %v2453_v59  ;;  %v14595_v12 = vcombine.high %v2461_v3, %v2469_v4  ;;  %v2556_v57 = vld [vmem:[#allocation11 + $0x890] sm:$0xff] }
 0x482   : > { %5692 = vmatprep.subr.bf16.mxu1 %v14483_v11  ;;  %v14593_v11 = vcombine.high %v2460_v1, %v2468_v2  ;;  %v2564_v58 = vld [vmem:[#allocation11 + $0x8d0] sm:$0xff]  ;;  %v14672_v59 = vcombine.low %v2540_v48, %v2548_v49 }
 0x484   : > { %5611 = vmatpush1.bf16.msra.mxu0 %v14480_v16  ;;  %v2485_v16 = vld [vmem:[#allocation11 + $0x658] sm:$0xff] }
 0x485   : > { %5693 = vmatpush1.bf16.msra.mxu1 %v14482_v18  ;;  %5612 = vmatprep.subr.bf16.mxu0 %v14497_v22  ;;  %v14592_v18 = vcombine.low %v2460_v1, %v2468_v2  ;;  %v14594_v22 = vcombine.low %v2461_v3, %v2469_v4  ;;  %v14611_v24 = vcombine.high %v2477_v15, %v2485_v16  ;;  %v2572_v1 = vld [vmem:[#allocation11 + $0x910] sm:$0xff]  ;;  %v2573_v4 = vld [vmem:[#allocation11 + $0x918] sm:$0xff] }
 0x486   : > { %5694 = vmatprep.subr.bf16.mxu1 %v14499_v23  ;;  %v14609_v23 = vcombine.high %v2476_v13, %v2484_v14  ;;  %v2580_v2 = vld [vmem:[#allocation11 + $0x950] sm:$0xff] }
 0x488   : > { %5613 = vmatpush1.bf16.msra.mxu0 %v14496_v29  ;;  %v2501_v29 = vld [vmem:[#allocation11 + $0x6d8] sm:$0xff] }
 0x489   : > { %5695 = vmatpush1.bf16.msra.mxu1 %v14498_v30  ;;  %5614 = vmatprep.subr.bf16.mxu0 %v14513_v31  ;;  %v14608_v30 = vcombine.low %v2476_v13, %v2484_v14  ;;  %v14610_v31 = vcombine.low %v2477_v15, %v2485_v16  ;;  %v14627_v32 = vcombine.high %v2493_v27, %v2501_v29  ;;  %v2588_v14 = vld [vmem:[#allocation11 + $0x990] sm:$0xff]  ;;  %v2589_v16 = vld [vmem:[#allocation11 + $0x998] sm:$0xff] }
 0x48a   : > { %5696 = vmatprep.subr.bf16.mxu1 %v14515_v56  ;;  %v14625_v56 = vcombine.high %v2492_v25, %v2500_v26  ;;  %v2596_v15 = vld [vmem:[#allocation11 + $0x9d0] sm:$0xff] }
 0x48c   : > { %5615 = vmatpush1.bf16.msra.mxu0 %v14512_v36  ;;  %v2517_v36 = vld [vmem:[#allocation11 + $0x758] sm:$0xff] }
 0x48d   : > { %5697 = vmatpush1.bf16.msra.mxu1 %v14514_v37  ;;  %5616 = vmatprep.subr.bf16.mxu0 %v14529_v38  ;;  %v14624_v37 = vcombine.low %v2492_v25, %v2500_v26  ;;  %v14626_v38 = vcombine.low %v2493_v27, %v2501_v29  ;;  %v14643_v40 = vcombine.high %v2509_v35, %v2517_v36  ;;  %v2604_v26 = vld [vmem:[#allocation11 + $0xa10] sm:$0xff]  ;;  %v2605_v29 = vld [vmem:[#allocation11 + $0xa18] sm:$0xff] }
 0x48e   : > { %5698 = vmatprep.subr.bf16.mxu1 %v14531_v39  ;;  %v14641_v39 = vcombine.high %v2508_v33, %v2516_v34  ;;  %v2612_v27 = vld [vmem:[#allocation11 + $0xa50] sm:$0xff] }
 0x490   : > { %5617 = vmatpush1.bf16.msra.mxu0 %v14528_v43  ;;  %v2533_v43 = vld [vmem:[#allocation11 + $0x7d8] sm:$0xff] }
 0x491   : > { %5699 = vmatpush1.bf16.msra.mxu1 %v14530_v44  ;;  %5618 = vmatprep.subr.bf16.mxu0 %v14545_v45  ;;  %v14640_v44 = vcombine.low %v2508_v33, %v2516_v34  ;;  %v14642_v45 = vcombine.low %v2509_v35, %v2517_v36  ;;  %v14659_v47 = vcombine.high %v2525_v9, %v2533_v43  ;;  %v2620_v34 = vld [vmem:[#allocation11 + $0xa90] sm:$0xff]  ;;  %v2621_v36 = vld [vmem:[#allocation11 + $0xa98] sm:$0xff] }
 0x492   : > { %5700 = vmatprep.subr.bf16.mxu1 %v14547_v46  ;;  %v14657_v46 = vcombine.high %v2524_v61, %v2532_v41  ;;  %v2628_v35 = vld [vmem:[#allocation11 + $0xad0] sm:$0xff] }
 0x494   : > { %5619 = vmatpush1.bf16.msra.mxu0 %v14544_v51  ;;  %v2549_v51 = vld [vmem:[#allocation11 + $0x858] sm:$0xff] }
 0x495   : > { %5701 = vmatpush1.bf16.msra.mxu1 %v14546_v52  ;;  %5620 = vmatprep.subr.bf16.mxu0 %v14561_v53  ;;  %v14656_v52 = vcombine.low %v2524_v61, %v2532_v41  ;;  %v14658_v53 = vcombine.low %v2525_v9, %v2533_v43  ;;  %v14675_v55 = vcombine.high %v2541_v50, %v2549_v51  ;;  %v2636_v41 = vld [vmem:[#allocation11 + $0xb10] sm:$0xff]  ;;  %v2637_v43 = vld [vmem:[#allocation11 + $0xb18] sm:$0xff] }
 0x496   : > { %5702 = vmatprep.subr.bf16.mxu1 %v14563_v54  ;;  %v14673_v54 = vcombine.high %v2540_v48, %v2548_v49  ;;  %v2644_v9 = vld [vmem:[#allocation11 + $0xb50] sm:$0xff] }
 0x497   : > { %v2652_v49 = vld [vmem:[#allocation11 + $0xb90] sm:$0xff] }
 0x498   : > { %5621 = vmatpush1.bf16.msra.mxu0 %v14560_v60  ;;  %v2557_v60 = vld [vmem:[#allocation11 + $0x898] sm:$0xff] }
 0x499   : > { %5703 = vmatpush1.bf16.msra.mxu1 %v14562_v62  ;;  %5622 = vmatprep.subr.bf16.mxu0 %v14577_v63  ;;  %v2565_v62 = vld [vmem:[#allocation11 + $0x8d8] sm:$0xff]  ;;  %v14674_v63 = vcombine.low %v2541_v50, %v2549_v51  ;;  %v2660_v50 = vld [vmem:[#allocation11 + $0xbd0] sm:$0xff] }
 0x49a   : > { %5704 = vmatprep.subr.bf16.mxu1 %v14579_v0  ;;  %v14689_v0 = vcombine.high %v2556_v57, %v2564_v58  ;;  %v14691_v3 = vcombine.high %v2557_v60, %v2565_v62  ;;  %v2653_v51 = vld [vmem:[#allocation11 + $0xb98] sm:$0xff] }
 0x49c   : > { %5623 = vmatpush1.bf16.msra.mxu0 %v14576_v5  ;;  %v2581_v5 = vld [vmem:[#allocation11 + $0x958] sm:$0xff] }
 0x49d   : > { %5705 = vmatpush1.bf16.msra.mxu1 %v14578_v6  ;;  %5624 = vmatprep.subr.bf16.mxu0 %v14593_v11  ;;  %v14688_v6 = vcombine.low %v2556_v57, %v2564_v58  ;;  %v14690_v11 = vcombine.low %v2557_v60, %v2565_v62  ;;  %v14707_v13 = vcombine.high %v2573_v4, %v2581_v5  ;;  %v2668_v58 = vld [vmem:[#allocation11 + $0xc10] sm:$0xff]  ;;  %v2669_v60 = vld [vmem:[#allocation11 + $0xc18] sm:$0xff] }
 0x49e   : > { %5706 = vmatprep.subr.bf16.mxu1 %v14595_v12  ;;  %v14705_v12 = vcombine.high %v2572_v1, %v2580_v2  ;;  %v2677_v62 = vld [vmem:[#allocation11 + $0xc58] sm:$0xff] }
 0x4a0   : > { %5625 = vmatpush1.bf16.msra.mxu0 %v14592_v18  ;;  %v2597_v18 = vld [vmem:[#allocation11 + $0x9d8] sm:$0xff] }
 0x4a1   : > { %5707 = vmatpush1.bf16.msra.mxu1 %v14594_v22  ;;  %5626 = vmatprep.subr.bf16.mxu0 %v14609_v23  ;;  %v14704_v22 = vcombine.low %v2572_v1, %v2580_v2  ;;  %v14706_v23 = vcombine.low %v2573_v4, %v2581_v5  ;;  %v14723_v25 = vcombine.high %v2589_v16, %v2597_v18  ;;  %v2692_v4 = vld [vmem:[#allocation11 + $0xcd0] sm:$0xff]  ;;  %v2685_v5 = vld [vmem:[#allocation11 + $0xc98] sm:$0xff] }
 0x4a2   : > { %5708 = vmatprep.subr.bf16.mxu1 %v14611_v24  ;;  %v14721_v24 = vcombine.high %v2588_v14, %v2596_v15  ;;  %v14803_v2 = vcombine.high %v2669_v60, %v2677_v62 }
 0x4a4   : > { %5627 = vmatpush1.bf16.msra.mxu0 %v14608_v30  ;;  %v2613_v30 = vld [vmem:[#allocation11 + $0xa58] sm:$0xff] }
 0x4a5   : > { %5709 = vmatpush1.bf16.msra.mxu1 %v14610_v31  ;;  %5628 = vmatprep.subr.bf16.mxu0 %v14625_v56  ;;  %v14720_v31 = vcombine.low %v2588_v14, %v2596_v15  ;;  %v14722_v56 = vcombine.low %v2589_v16, %v2597_v18  ;;  %v14739_v33 = vcombine.high %v2605_v29, %v2613_v30  ;;  %v2700_v15 = vld [vmem:[#allocation11 + $0xd10] sm:$0xff]  ;;  %v2701_v18 = vld [vmem:[#allocation11 + $0xd18] sm:$0xff] }
 0x4a6   : > { %5710 = vmatprep.subr.bf16.mxu1 %v14627_v32  ;;  %v14737_v32 = vcombine.high %v2604_v26, %v2612_v27  ;;  %v2708_v16 = vld [vmem:[#allocation11 + $0xd50] sm:$0xff] }
 0x4a8   : > { %5629 = vmatpush1.bf16.msra.mxu0 %v14624_v37  ;;  %v2629_v37 = vld [vmem:[#allocation11 + $0xad8] sm:$0xff] }
 0x4a9   : > { %5711 = vmatpush1.bf16.msra.mxu1 %v14626_v38  ;;  %5630 = vmatprep.subr.bf16.mxu0 %v14641_v39  ;;  %v14736_v38 = vcombine.low %v2604_v26, %v2612_v27  ;;  %v14738_v39 = vcombine.low %v2605_v29, %v2613_v30  ;;  %v14755_v61 = vcombine.high %v2621_v36, %v2629_v37  ;;  %v2716_v27 = vld [vmem:[#allocation11 + $0xd90] sm:$0xff]  ;;  %v2717_v30 = vld [vmem:[#allocation11 + $0xd98] sm:$0xff] }
 0x4aa   : > { %5712 = vmatprep.subr.bf16.mxu1 %v14643_v40  ;;  %v14753_v40 = vcombine.high %v2620_v34, %v2628_v35  ;;  %v2724_v29 = vld [vmem:[#allocation11 + $0xdd0] sm:$0xff] }
 0x4ac   : > { %5631 = vmatpush1.bf16.msra.mxu0 %v14640_v44  ;;  %v2645_v44 = vld [vmem:[#allocation11 + $0xb58] sm:$0xff] }
 0x4ad   : > { %5713 = vmatpush1.bf16.msra.mxu1 %v14642_v45  ;;  %5632 = vmatprep.subr.bf16.mxu0 %v14657_v46  ;;  %v14752_v45 = vcombine.low %v2620_v34, %v2628_v35  ;;  %v14754_v46 = vcombine.low %v2621_v36, %v2629_v37  ;;  %v14771_v48 = vcombine.high %v2637_v43, %v2645_v44  ;;  %v2732_v35 = vld [vmem:[#allocation11 + $0xe10] sm:$0xff]  ;;  %v2733_v37 = vld [vmem:[#allocation11 + $0xe18] sm:$0xff] }
 0x4ae   : > { %5714 = vmatprep.subr.bf16.mxu1 %v14659_v47  ;;  %v14769_v47 = vcombine.high %v2636_v41, %v2644_v9  ;;  %v2740_v36 = vld [vmem:[#allocation11 + $0xe50] sm:$0xff] }
 0x4b0   : > { %5633 = vmatpush1.bf16.msra.mxu0 %v14656_v52  ;;  %v2661_v52 = vld [vmem:[#allocation11 + $0xbd8] sm:$0xff] }
 0x4b1   : > { %5715 = vmatpush1.bf16.msra.mxu1 %v14658_v53  ;;  %5643 = vmatprep.subr.bf16.mxu0 %v14673_v54  ;;  %v14768_v53 = vcombine.low %v2636_v41, %v2644_v9  ;;  %v14770_v54 = vcombine.low %v2637_v43, %v2645_v44  ;;  %v14787_v57 = vcombine.high %v2653_v51, %v2661_v52  ;;  %v2748_v9 = vld [vmem:[#allocation11 + $0xe90] sm:$0xff]  ;;  %v2749_v44 = vld [vmem:[#allocation11 + $0xe98] sm:$0xff] }
 0x4b2   : > { %5725 = vmatprep.subr.bf16.mxu1 %v14675_v55  ;;  %v14785_v55 = vcombine.high %v2652_v49, %v2660_v50  ;;  %v2756_v43 = vld [vmem:[#allocation11 + $0xed0] sm:$0xff] }
 0x4b3   : > { %5635 = vmatmul.mubr.bf16.vlgmr.msra.gmra.mrb[8].mxu0 %v19167_v21 }
 0x4b4   : > { %5717 = vmatmul.mubr.bf16.vlgmr.msra.gmra.mrb[16].mxu1 %v19167_v21  ;;  %5644 = vmatpush1.bf16.msra.mxu0 %v14672_v59  ;;  %v2676_v59 = vld [vmem:[#allocation11 + $0xc50] sm:$0xff] }
 0x4b5   : > { %5675 = vmatprep.mubr.bf16.mxu0 %v19171_v28  ;;  %5726 = vmatpush1.bf16.msra.mxu1 %v14674_v63  ;;  %v14784_v63 = vcombine.low %v2652_v49, %v2660_v50  ;;  %v14801_v1 = vcombine.high %v2668_v58, %v2676_v59  ;;  %v2764_v50 = vld [vmem:[#allocation11 + $0xf10] sm:$0xff] }
 0x4b6   : > { %5757 = vmatprep.mubr.bf16.mxu1 %v19171_v28  ;;  %5645 = vmatprep.subr.bf16.mxu0 %v14689_v0  ;;  %v14786_v0 = vcombine.low %v2653_v51, %v2661_v52  ;;  %v2772_v51 = vld [vmem:[#allocation11 + $0xf50] sm:$0xff]  ;;  %v2765_v52 = vld [vmem:[#allocation11 + $0xf18] sm:$0xff] }
 0x4b7   : > { %5727 = vmatprep.subr.bf16.mxu1 %v14691_v3  ;;  %v2684_v3 = vld [vmem:[#allocation11 + $0xc90] sm:$0xff] }
 0x4b8   : > { %5646 = vmatpush1.bf16.msra.mxu0 %v14688_v6  ;;  %v2693_v6 = vld [vmem:[#allocation11 + $0xcd8] sm:$0xff] }
 0x4b9   : > { %5728 = vmatpush1.bf16.msra.mxu1 %v14690_v11  ;;  %5647 = vmatprep.subr.bf16.mxu0 %v14705_v12  ;;  %v14800_v11 = vcombine.low %v2668_v58, %v2676_v59  ;;  %v14802_v12 = vcombine.low %v2669_v60, %v2677_v62  ;;  %v14819_v14 = vcombine.high %v2685_v5, %v2693_v6  ;;  %v2780_v59 = vld [vmem:[#allocation11 + $0xf90] sm:$0xff]  ;;  %v2781_v62 = vld [vmem:[#allocation11 + $0xf98] sm:$0xff] }
 0x4ba   : > { %5729 = vmatprep.subr.bf16.mxu1 %v14707_v13  ;;  %v14817_v13 = vcombine.high %v2684_v3, %v2692_v4  ;;  %v2788_v60 = vld [vmem:[#allocation11 + $0xfd0] sm:$0xff] }
 0x4bc   : > { %5648 = vmatpush1.bf16.msra.mxu0 %v14704_v22  ;;  %v2709_v22 = vld [vmem:[#allocation11 + $0xd58] sm:$0xff] }
 0x4bd   : > { %5730 = vmatpush1.bf16.msra.mxu1 %v14706_v23  ;;  %5649 = vmatprep.subr.bf16.mxu0 %v14721_v24  ;;  %v14816_v23 = vcombine.low %v2684_v3, %v2692_v4  ;;  %v14818_v24 = vcombine.low %v2685_v5, %v2693_v6  ;;  %v14835_v26 = vcombine.high %v2701_v18, %v2709_v22  ;;  %v2286_v4 = vld [vmem:[#allocation11 + $0x20] sm:$0xff]  ;;  %v2287_v6 = vld [vmem:[#allocation11 + $0x28] sm:$0xff] }
 0x4be   : > { %5731 = vmatprep.subr.bf16.mxu1 %v14723_v25  ;;  %v14833_v25 = vcombine.high %v2700_v15, %v2708_v16  ;;  %v2294_v5 = vld [vmem:[#allocation11 + $0x60] sm:$0xff] }
 0x4c0   : > { %5650 = vmatpush1.bf16.msra.mxu0 %v14720_v31  ;;  %v2725_v31 = vld [vmem:[#allocation11 + $0xdd8] sm:$0xff] }
 0x4c1   : > { %5732 = vmatpush1.bf16.msra.mxu1 %v14722_v56  ;;  %5651 = vmatprep.subr.bf16.mxu0 %v14737_v32  ;;  %v14832_v56 = vcombine.low %v2700_v15, %v2708_v16  ;;  %v14834_v32 = vcombine.low %v2701_v18, %v2709_v22  ;;  %v14851_v34 = vcombine.high %v2717_v30, %v2725_v31  ;;  %v2302_v16 = vld [vmem:[#allocation11 + $0xa0] sm:$0xff] }
 0x4c2   : > { %5733 = vmatprep.subr.bf16.mxu1 %v14739_v33  ;;  %v14849_v33 = vcombine.high %v2716_v27, %v2724_v29  ;;  %v2310_v18 = vld [vmem:[#allocation11 + $0xe0] sm:$0xff]  ;;  %v14420_v22 = vcombine.low %v2286_v4, %v2294_v5 }
 0x4c4   : > { %5652 = vmatpush1.bf16.msra.mxu0 %v14736_v38  ;;  %v2741_v38 = vld [vmem:[#allocation11 + $0xe58] sm:$0xff] }
 0x4c5   : > { %5734 = vmatpush1.bf16.msra.mxu1 %v14738_v39  ;;  %5653 = vmatprep.subr.bf16.mxu0 %v14753_v40  ;;  %v14848_v39 = vcombine.low %v2716_v27, %v2724_v29  ;;  %v14850_v40 = vcombine.low %v2717_v30, %v2725_v31  ;;  %v14867_v41 = vcombine.high %v2733_v37, %v2741_v38  ;;  %v2318_v27 = vld [vmem:[#allocation11 + $0x120] sm:$0xff]  ;;  %v2319_v31 = vld [vmem:[#allocation11 + $0x128] sm:$0xff] }
 0x4c6   : > { %5735 = vmatprep.subr.bf16.mxu1 %v14755_v61  ;;  %v14865_v61 = vcombine.high %v2732_v35, %v2740_v36  ;;  %v2326_v29 = vld [vmem:[#allocation11 + $0x160] sm:$0xff] }
 0x4c8   : > { %5654 = vmatpush1.bf16.msra.mxu0 %v14752_v45  ;;  %v2757_v45 = vld [vmem:[#allocation11 + $0xed8] sm:$0xff] }
 0x4c9   : > { %5736 = vmatpush1.bf16.msra.mxu1 %v14754_v46  ;;  %5655 = vmatprep.subr.bf16.mxu0 %v14769_v47  ;;  %v14864_v46 = vcombine.low %v2732_v35, %v2740_v36  ;;  %v14866_v47 = vcombine.low %v2733_v37, %v2741_v38  ;;  %v14883_v49 = vcombine.high %v2749_v44, %v2757_v45  ;;  %v2334_v36 = vld [vmem:[#allocation11 + $0x1a0] sm:$0xff]  ;;  %v2335_v38 = vld [vmem:[#allocation11 + $0x1a8] sm:$0xff] }
 0x4ca   : > { %5737 = vmatprep.subr.bf16.mxu1 %v14771_v48  ;;  %v14881_v48 = vcombine.high %v2748_v9, %v2756_v43  ;;  %v2342_v37 = vld [vmem:[#allocation11 + $0x1e0] sm:$0xff] }
 0x4cc   : > { %5656 = vmatpush1.bf16.msra.mxu0 %v14768_v53  ;;  %v2773_v53 = vld [vmem:[#allocation11 + $0xf58] sm:$0xff] }
 0x4cd   : > { %5738 = vmatpush1.bf16.msra.mxu1 %v14770_v54  ;;  %5657 = vmatprep.subr.bf16.mxu0 %v14785_v55  ;;  %v14880_v54 = vcombine.low %v2748_v9, %v2756_v43  ;;  %v14882_v55 = vcombine.low %v2749_v44, %v2757_v45  ;;  %v14899_v58 = vcombine.high %v2765_v52, %v2773_v53  ;;  %v2350_v43 = vld [vmem:[#allocation11 + $0x220] sm:$0xff]  ;;  %v2351_v45 = vld [vmem:[#allocation11 + $0x228] sm:$0xff] }
 0x4ce   : > { %5739 = vmatprep.subr.bf16.mxu1 %v14787_v57  ;;  %v14897_v57 = vcombine.high %v2764_v50, %v2772_v51  ;;  %v2358_v44 = vld [vmem:[#allocation11 + $0x260] sm:$0xff] }
 0x4d0   : > { %5658 = vmatpush1.bf16.msra.mxu0 %v14784_v63  ;;  %v2789_v63 = vld [vmem:[#allocation11 + $0xfd8] sm:$0xff] }
 0x4d1   : > { %5740 = vmatpush1.bf16.msra.mxu1 %v14786_v0  ;;  %5659 = vmatprep.subr.bf16.mxu0 %v14801_v1  ;;  %v14896_v0 = vcombine.low %v2764_v50, %v2772_v51  ;;  %v14898_v1 = vcombine.low %v2765_v52, %v2773_v53  ;;  %v14915_v3 = vcombine.high %v2781_v62, %v2789_v63  ;;  %v2366_v51 = vld [vmem:[#allocation11 + $0x2a0] sm:$0xff]  ;;  %v2367_v53 = vld [vmem:[#allocation11 + $0x2a8] sm:$0xff] }
 0x4d2   : > { %5741 = vmatprep.subr.bf16.mxu1 %v14803_v2  ;;  %v14913_v2 = vcombine.high %v2780_v59, %v2788_v60  ;;  %v2374_v52 = vld [vmem:[#allocation11 + $0x2e0] sm:$0xff] }
 0x4d4   : > { %5660 = vmatpush1.bf16.msra.mxu0 %v14800_v11  ;;  %v2295_v11 = vld [vmem:[#allocation11 + $0x68] sm:$0xff] }
 0x4d5   : > { %5742 = vmatpush1.bf16.msra.mxu1 %v14802_v12  ;;  %5661 = vmatprep.subr.bf16.mxu0 %v14817_v13  ;;  %v14912_v12 = vcombine.low %v2780_v59, %v2788_v60  ;;  %v14914_v13 = vcombine.low %v2781_v62, %v2789_v63  ;;  %v14423_v15 = vcombine.high %v2287_v6, %v2295_v11  ;;  %v2382_v60 = vld [vmem:[#allocation11 + $0x320] sm:$0xff]  ;;  %v2383_v63 = vld [vmem:[#allocation11 + $0x328] sm:$0xff] }
 0x4d6   : > { %5743 = vmatprep.subr.bf16.mxu1 %v14819_v14  ;;  %v14421_v14 = vcombine.high %v2286_v4, %v2294_v5  ;;  %v2390_v62 = vld [vmem:[#allocation11 + $0x360] sm:$0xff] }
 0x4d7   : > { %v2398_v5 = vld [vmem:[#allocation11 + $0x3a0] sm:$0xff] }
 0x4d8   : > { %5662 = vmatpush1.bf16.msra.mxu0 %v14816_v23  ;;  %v2303_v23 = vld [vmem:[#allocation11 + $0xa8] sm:$0xff] }
 0x4d9   : > { %5744 = vmatpush1.bf16.msra.mxu1 %v14818_v24  ;;  %5663 = vmatprep.subr.bf16.mxu0 %v14833_v25  ;;  %v2311_v24 = vld [vmem:[#allocation11 + $0xe8] sm:$0xff]  ;;  %v14422_v25 = vcombine.low %v2287_v6, %v2295_v11  ;;  %v2406_v6 = vld [vmem:[#allocation11 + $0x3e0] sm:$0xff] }
 0x4da   : > { %5745 = vmatprep.subr.bf16.mxu1 %v14835_v26  ;;  %v14437_v26 = vcombine.high %v2302_v16, %v2310_v18  ;;  %v14439_v30 = vcombine.high %v2303_v23, %v2311_v24  ;;  %v2399_v11 = vld [vmem:[#allocation11 + $0x3a8] sm:$0xff] }
 0x4dc   : > { %5664 = vmatpush1.bf16.msra.mxu0 %v14832_v56  ;;  %v2327_v56 = vld [vmem:[#allocation11 + $0x168] sm:$0xff] }
 0x4dd   : > { %5746 = vmatpush1.bf16.msra.mxu1 %v14834_v32  ;;  %5665 = vmatprep.subr.bf16.mxu0 %v14849_v33  ;;  %v14436_v32 = vcombine.low %v2302_v16, %v2310_v18  ;;  %v14438_v33 = vcombine.low %v2303_v23, %v2311_v24  ;;  %v14455_v35 = vcombine.high %v2319_v31, %v2327_v56  ;;  %v2414_v18 = vld [vmem:[#allocation11 + $0x420] sm:$0xff]  ;;  %v2415_v23 = vld [vmem:[#allocation11 + $0x428] sm:$0xff] }
 0x4de   : > { %5747 = vmatprep.subr.bf16.mxu1 %v14851_v34  ;;  %v14453_v34 = vcombine.high %v2318_v27, %v2326_v29  ;;  %v2423_v24 = vld [vmem:[#allocation11 + $0x468] sm:$0xff] }
 0x4e0   : > { %5666 = vmatpush1.bf16.msra.mxu0 %v14848_v39  ;;  %v2343_v39 = vld [vmem:[#allocation11 + $0x1e8] sm:$0xff] }
 0x4e1   : > { %5748 = vmatpush1.bf16.msra.mxu1 %v14850_v40  ;;  %5667 = vmatprep.subr.bf16.mxu0 %v14865_v61  ;;  %v14452_v40 = vcombine.low %v2318_v27, %v2326_v29  ;;  %v14454_v61 = vcombine.low %v2319_v31, %v2327_v56  ;;  %v14471_v9 = vcombine.high %v2335_v38, %v2343_v39  ;;  %v2438_v31 = vld [vmem:[#allocation11 + $0x4e0] sm:$0xff]  ;;  %v2431_v56 = vld [vmem:[#allocation11 + $0x4a8] sm:$0xff] }
 0x4e2   : > { %5749 = vmatprep.subr.bf16.mxu1 %v14867_v41  ;;  %v14469_v41 = vcombine.high %v2334_v36, %v2342_v37  ;;  %v14551_v29 = vcombine.high %v2415_v23, %v2423_v24 }
 0x4e4   : > { %5668 = vmatpush1.bf16.msra.mxu0 %v14864_v46  ;;  %v2359_v46 = vld [vmem:[#allocation11 + $0x268] sm:$0xff] }
 0x4e5   : > { %5750 = vmatpush1.bf16.msra.mxu1 %v14866_v47  ;;  %5669 = vmatprep.subr.bf16.mxu0 %v14881_v48  ;;  %v14468_v47 = vcombine.low %v2334_v36, %v2342_v37  ;;  %v14470_v48 = vcombine.low %v2335_v38, %v2343_v39  ;;  %v14487_v50 = vcombine.high %v2351_v45, %v2359_v46  ;;  %v2446_v37 = vld [vmem:[#allocation11 + $0x520] sm:$0xff]  ;;  %v2447_v39 = vld [vmem:[#allocation11 + $0x528] sm:$0xff] }
 0x4e6   : > { %5751 = vmatprep.subr.bf16.mxu1 %v14883_v49  ;;  %v14485_v49 = vcombine.high %v2350_v43, %v2358_v44  ;;  %v2454_v38 = vld [vmem:[#allocation11 + $0x560] sm:$0xff] }
 0x4e8   : > { %5670 = vmatpush1.bf16.msra.mxu0 %v14880_v54  ;;  %v2375_v54 = vld [vmem:[#allocation11 + $0x2e8] sm:$0xff] }
 0x4e9   : > { %5752 = vmatpush1.bf16.msra.mxu1 %v14882_v55  ;;  %5671 = vmatprep.subr.bf16.mxu0 %v14897_v57  ;;  %v14484_v55 = vcombine.low %v2350_v43, %v2358_v44  ;;  %v14486_v57 = vcombine.low %v2351_v45, %v2359_v46  ;;  %v14503_v59 = vcombine.high %v2367_v53, %v2375_v54  ;;  %v2462_v44 = vld [vmem:[#allocation11 + $0x5a0] sm:$0xff]  ;;  %v2463_v46 = vld [vmem:[#allocation11 + $0x5a8] sm:$0xff] }
 0x4ea   : > { %5753 = vmatprep.subr.bf16.mxu1 %v14899_v58  ;;  %v14501_v58 = vcombine.high %v2366_v51, %v2374_v52  ;;  %v2470_v45 = vld [vmem:[#allocation11 + $0x5e0] sm:$0xff] }
 0x4ec   : > { %5672 = vmatpush1.bf16.msra.mxu0 %v14896_v0  ;;  %v2391_v0 = vld [vmem:[#allocation11 + $0x368] sm:$0xff] }
 0x4ed   : > { %5754 = vmatpush1.bf16.msra.mxu1 %v14898_v1  ;;  %5673 = vmatprep.subr.bf16.mxu0 %v14913_v2  ;;  %v14500_v1 = vcombine.low %v2366_v51, %v2374_v52  ;;  %v14502_v2 = vcombine.low %v2367_v53, %v2375_v54  ;;  %v14519_v4 = vcombine.high %v2383_v63, %v2391_v0  ;;  %v2478_v52 = vld [vmem:[#allocation11 + $0x620] sm:$0xff]  ;;  %v2479_v54 = vld [vmem:[#allocation11 + $0x628] sm:$0xff] }
 0x4ee   : > { %5755 = vmatprep.subr.bf16.mxu1 %v14915_v3  ;;  %v14517_v3 = vcombine.high %v2382_v60, %v2390_v62  ;;  %v2486_v53 = vld [vmem:[#allocation11 + $0x660] sm:$0xff] }
 0x4f0   : > { %5674 = vmatpush1.bf16.msra.mxu0 %v14912_v12  ;;  %v2407_v12 = vld [vmem:[#allocation11 + $0x3e8] sm:$0xff] }
 0x4f1   : > { %5756 = vmatpush1.bf16.msra.mxu1 %v14914_v13  ;;  %5766 = vmatprep.subr.bf16.mxu0 %v14421_v14  ;;  %v14516_v13 = vcombine.low %v2382_v60, %v2390_v62  ;;  %v14518_v14 = vcombine.low %v2383_v63, %v2391_v0  ;;  %v14535_v16 = vcombine.high %v2399_v11, %v2407_v12  ;;  %v2494_v62 = vld [vmem:[#allocation11 + $0x6a0] sm:$0xff]  ;;  %v2495_v0 = vld [vmem:[#allocation11 + $0x6a8] sm:$0xff] }
 0x4f2   : > { %5848 = vmatprep.subr.bf16.mxu1 %v14423_v15  ;;  %v14533_v15 = vcombine.high %v2398_v5, %v2406_v6  ;;  %v2502_v63 = vld [vmem:[#allocation11 + $0x6e0] sm:$0xff] }
 0x4f3   : > { %5676 = vmatmul.mubr.bf16.vlgmr.msra.gmra.mrb[8].mxu0 %v19180_v42 }
 0x4f4   : > { %5758 = vmatmul.mubr.bf16.vlgmr.msra.gmra.mrb[16].mxu1 %v19180_v42  ;;  %5767 = vmatpush1.bf16.msra.mxu0 %v14420_v22  ;;  %v2422_v22 = vld [vmem:[#allocation11 + $0x460] sm:$0xff] }
 0x4f5   : > { %5798 = vmatprep.mubr.bf16.mxu0 %v19165_v19  ;;  %5849 = vmatpush1.bf16.msra.mxu1 %v14422_v25  ;;  %v14532_v25 = vcombine.low %v2398_v5, %v2406_v6  ;;  %v14549_v27 = vcombine.high %v2414_v18, %v2422_v22  ;;  %v2510_v6 = vld [vmem:[#allocation11 + $0x720] sm:$0xff] }
 0x4f6   : > { %5880 = vmatprep.mubr.bf16.mxu1 %v19165_v19  ;;  %5768 = vmatprep.subr.bf16.mxu0 %v14437_v26  ;;  %v14534_v26 = vcombine.low %v2399_v11, %v2407_v12  ;;  %v2518_v11 = vld [vmem:[#allocation11 + $0x760] sm:$0xff]  ;;  %v2511_v12 = vld [vmem:[#allocation11 + $0x728] sm:$0xff] }
 0x4f7   : > { %5850 = vmatprep.subr.bf16.mxu1 %v14439_v30  ;;  %v2430_v30 = vld [vmem:[#allocation11 + $0x4a0] sm:$0xff] }
 0x4f8   : > { %5769 = vmatpush1.bf16.msra.mxu0 %v14436_v32  ;;  %v2439_v32 = vld [vmem:[#allocation11 + $0x4e8] sm:$0xff] }
 0x4f9   : > { %5851 = vmatpush1.bf16.msra.mxu1 %v14438_v33  ;;  %5770 = vmatprep.subr.bf16.mxu0 %v14453_v34  ;;  %v14548_v33 = vcombine.low %v2414_v18, %v2422_v22  ;;  %v14550_v34 = vcombine.low %v2415_v23, %v2423_v24  ;;  %v14567_v36 = vcombine.high %v2431_v56, %v2439_v32  ;;  %v2526_v22 = vld [vmem:[#allocation11 + $0x7a0] sm:$0xff]  ;;  %v2527_v24 = vld [vmem:[#allocation11 + $0x7a8] sm:$0xff] }
 0x4fa   : > { %5852 = vmatprep.subr.bf16.mxu1 %v14455_v35  ;;  %v14565_v35 = vcombine.high %v2430_v30, %v2438_v31  ;;  %v2534_v23 = vld [vmem:[#allocation11 + $0x7e0] sm:$0xff] }
 0x4fc   : > { %5771 = vmatpush1.bf16.msra.mxu0 %v14452_v40  ;;  %v2455_v40 = vld [vmem:[#allocation11 + $0x568] sm:$0xff] }
 0x4fd   : > { %5853 = vmatpush1.bf16.msra.mxu1 %v14454_v61  ;;  %5772 = vmatprep.subr.bf16.mxu0 %v14469_v41  ;;  %v14564_v61 = vcombine.low %v2430_v30, %v2438_v31  ;;  %v14566_v41 = vcombine.low %v2431_v56, %v2439_v32  ;;  %v14583_v43 = vcombine.high %v2447_v39, %v2455_v40  ;;  %v2542_v31 = vld [vmem:[#allocation11 + $0x820] sm:$0xff]  ;;  %v2543_v32 = vld [vmem:[#allocation11 + $0x828] sm:$0xff] }
 0x4fe   : > { %5854 = vmatprep.subr.bf16.mxu1 %v14471_v9  ;;  %v14581_v9 = vcombine.high %v2446_v37, %v2454_v38  ;;  %v2550_v56 = vld [vmem:[#allocation11 + $0x860] sm:$0xff] }
 0x500   : > { %5773 = vmatpush1.bf16.msra.mxu0 %v14468_v47  ;;  %v2471_v47 = vld [vmem:[#allocation11 + $0x5e8] sm:$0xff] }
 0x501   : > { %5855 = vmatpush1.bf16.msra.mxu1 %v14470_v48  ;;  %5774 = vmatprep.subr.bf16.mxu0 %v14485_v49  ;;  %v14580_v48 = vcombine.low %v2446_v37, %v2454_v38  ;;  %v14582_v49 = vcombine.low %v2447_v39, %v2455_v40  ;;  %v14599_v51 = vcombine.high %v2463_v46, %v2471_v47  ;;  %v2558_v38 = vld [vmem:[#allocation11 + $0x8a0] sm:$0xff] }
 0x502   : > { %5856 = vmatprep.subr.bf16.mxu1 %v14487_v50  ;;  %v14597_v50 = vcombine.high %v2462_v44, %v2470_v45  ;;  %v2566_v39 = vld [vmem:[#allocation11 + $0x8e0] sm:$0xff]  ;;  %v14676_v40 = vcombine.low %v2542_v31, %v2550_v56 }
 0x504   : > { %5775 = vmatpush1.bf16.msra.mxu0 %v14484_v55  ;;  %v2487_v55 = vld [vmem:[#allocation11 + $0x668] sm:$0xff] }
 0x505   : > { %5857 = vmatpush1.bf16.msra.mxu1 %v14486_v57  ;;  %5776 = vmatprep.subr.bf16.mxu0 %v14501_v58  ;;  %v14596_v57 = vcombine.low %v2462_v44, %v2470_v45  ;;  %v14598_v58 = vcombine.low %v2463_v46, %v2471_v47  ;;  %v14615_v60 = vcombine.high %v2479_v54, %v2487_v55  ;;  %v2574_v44 = vld [vmem:[#allocation11 + $0x920] sm:$0xff]  ;;  %v2575_v47 = vld [vmem:[#allocation11 + $0x928] sm:$0xff] }
 0x506   : > { %5858 = vmatprep.subr.bf16.mxu1 %v14503_v59  ;;  %v14613_v59 = vcombine.high %v2478_v52, %v2486_v53  ;;  %v2582_v45 = vld [vmem:[#allocation11 + $0x960] sm:$0xff] }
 0x508   : > { %5777 = vmatpush1.bf16.msra.mxu0 %v14500_v1  ;;  %v2503_v1 = vld [vmem:[#allocation11 + $0x6e8] sm:$0xff] }
 0x509   : > { %5859 = vmatpush1.bf16.msra.mxu1 %v14502_v2  ;;  %5778 = vmatprep.subr.bf16.mxu0 %v14517_v3  ;;  %v14612_v2 = vcombine.low %v2478_v52, %v2486_v53  ;;  %v14614_v3 = vcombine.low %v2479_v54, %v2487_v55  ;;  %v14631_v5 = vcombine.high %v2495_v0, %v2503_v1  ;;  %v2590_v53 = vld [vmem:[#allocation11 + $0x9a0] sm:$0xff]  ;;  %v2591_v55 = vld [vmem:[#allocation11 + $0x9a8] sm:$0xff] }
 0x50a   : > { %5860 = vmatprep.subr.bf16.mxu1 %v14519_v4  ;;  %v14629_v4 = vcombine.high %v2494_v62, %v2502_v63  ;;  %v2598_v54 = vld [vmem:[#allocation11 + $0x9e0] sm:$0xff] }
 0x50c   : > { %5779 = vmatpush1.bf16.msra.mxu0 %v14516_v13  ;;  %v2519_v13 = vld [vmem:[#allocation11 + $0x768] sm:$0xff] }
 0x50d   : > { %5861 = vmatpush1.bf16.msra.mxu1 %v14518_v14  ;;  %5780 = vmatprep.subr.bf16.mxu0 %v14533_v15  ;;  %v14628_v14 = vcombine.low %v2494_v62, %v2502_v63  ;;  %v14630_v15 = vcombine.low %v2495_v0, %v2503_v1  ;;  %v14647_v18 = vcombine.high %v2511_v12, %v2519_v13  ;;  %v2606_v63 = vld [vmem:[#allocation11 + $0xa20] sm:$0xff]  ;;  %v2607_v1 = vld [vmem:[#allocation11 + $0xa28] sm:$0xff] }
 0x50e   : > { %5862 = vmatprep.subr.bf16.mxu1 %v14535_v16  ;;  %v14645_v16 = vcombine.high %v2510_v6, %v2518_v11  ;;  %v2614_v0 = vld [vmem:[#allocation11 + $0xa60] sm:$0xff] }
 0x510   : > { %5781 = vmatpush1.bf16.msra.mxu0 %v14532_v25  ;;  %v2535_v25 = vld [vmem:[#allocation11 + $0x7e8] sm:$0xff] }
 0x511   : > { %5863 = vmatpush1.bf16.msra.mxu1 %v14534_v26  ;;  %5782 = vmatprep.subr.bf16.mxu0 %v14549_v27  ;;  %v14644_v26 = vcombine.low %v2510_v6, %v2518_v11  ;;  %v14646_v27 = vcombine.low %v2511_v12, %v2519_v13  ;;  %v14663_v30 = vcombine.high %v2527_v24, %v2535_v25  ;;  %v2622_v11 = vld [vmem:[#allocation11 + $0xaa0] sm:$0xff]  ;;  %v2623_v13 = vld [vmem:[#allocation11 + $0xaa8] sm:$0xff] }
 0x512   : > { %5864 = vmatprep.subr.bf16.mxu1 %v14551_v29  ;;  %v14661_v29 = vcombine.high %v2526_v22, %v2534_v23  ;;  %v2630_v12 = vld [vmem:[#allocation11 + $0xae0] sm:$0xff] }
 0x514   : > { %5783 = vmatpush1.bf16.msra.mxu0 %v14548_v33  ;;  %v2551_v33 = vld [vmem:[#allocation11 + $0x868] sm:$0xff] }
 0x515   : > { %5865 = vmatpush1.bf16.msra.mxu1 %v14550_v34  ;;  %5784 = vmatprep.subr.bf16.mxu0 %v14565_v35  ;;  %v14660_v34 = vcombine.low %v2526_v22, %v2534_v23  ;;  %v14662_v35 = vcombine.low %v2527_v24, %v2535_v25  ;;  %v14679_v37 = vcombine.high %v2543_v32, %v2551_v33  ;;  %v2638_v23 = vld [vmem:[#allocation11 + $0xb20] sm:$0xff]  ;;  %v2639_v25 = vld [vmem:[#allocation11 + $0xb28] sm:$0xff] }
 0x516   : > { %5866 = vmatprep.subr.bf16.mxu1 %v14567_v36  ;;  %v14677_v36 = vcombine.high %v2542_v31, %v2550_v56  ;;  %v2646_v24 = vld [vmem:[#allocation11 + $0xb60] sm:$0xff] }
 0x518   : > { %5785 = vmatpush1.bf16.msra.mxu0 %v14564_v61  ;;  %v2559_v61 = vld [vmem:[#allocation11 + $0x8a8] sm:$0xff] }
 0x519   : > { %5867 = vmatpush1.bf16.msra.mxu1 %v14566_v41  ;;  %5786 = vmatprep.subr.bf16.mxu0 %v14581_v9  ;;  %v2567_v41 = vld [vmem:[#allocation11 + $0x8e8] sm:$0xff]  ;;  %v14678_v9 = vcombine.low %v2543_v32, %v2551_v33  ;;  %v2654_v33 = vld [vmem:[#allocation11 + $0xba0] sm:$0xff] }
 0x51a   : > { %5868 = vmatprep.subr.bf16.mxu1 %v14583_v43  ;;  %v14693_v43 = vcombine.high %v2558_v38, %v2566_v39  ;;  %v14695_v46 = vcombine.high %v2559_v61, %v2567_v41 }
 0x51c   : > { %5787 = vmatpush1.bf16.msra.mxu0 %v14580_v48  ;;  %v2583_v48 = vld [vmem:[#allocation11 + $0x968] sm:$0xff] }
 0x51d   : > { %5869 = vmatpush1.bf16.msra.mxu1 %v14582_v49  ;;  %5788 = vmatprep.subr.bf16.mxu0 %v14597_v50  ;;  %v14692_v49 = vcombine.low %v2558_v38, %v2566_v39  ;;  %v14694_v50 = vcombine.low %v2559_v61, %v2567_v41  ;;  %v14711_v52 = vcombine.high %v2575_v47, %v2583_v48  ;;  %v2663_v38 = vld [vmem:[#allocation11 + $0xbe8] sm:$0xff] }
 0x51e   : > { %5870 = vmatprep.subr.bf16.mxu1 %v14599_v51  ;;  %v14709_v51 = vcombine.high %v2574_v44, %v2582_v45  ;;  %v14772_v61 = vcombine.low %v2638_v23, %v2646_v24 }
 0x520   : > { %5789 = vmatpush1.bf16.msra.mxu0 %v14596_v57  ;;  %v2599_v57 = vld [vmem:[#allocation11 + $0x9e8] sm:$0xff] }
 0x521   : > { %5871 = vmatpush1.bf16.msra.mxu1 %v14598_v58  ;;  %5790 = vmatprep.subr.bf16.mxu0 %v14613_v59  ;;  %v14708_v58 = vcombine.low %v2574_v44, %v2582_v45  ;;  %v14710_v59 = vcombine.low %v2575_v47, %v2583_v48  ;;  %v14727_v62 = vcombine.high %v2591_v55, %v2599_v57  ;;  %v2678_v47 = vld [vmem:[#allocation11 + $0xc60] sm:$0xff]  ;;  %v2671_v48 = vld [vmem:[#allocation11 + $0xc28] sm:$0xff] }
 0x522   : > { %5872 = vmatprep.subr.bf16.mxu1 %v14615_v60  ;;  %v14725_v60 = vcombine.high %v2590_v53, %v2598_v54 }
 0x524   : > { %5791 = vmatpush1.bf16.msra.mxu0 %v14612_v2  ;;  %v2615_v2 = vld [vmem:[#allocation11 + $0xa68] sm:$0xff] }
 0x525   : > { %5873 = vmatpush1.bf16.msra.mxu1 %v14614_v3  ;;  %5792 = vmatprep.subr.bf16.mxu0 %v14629_v4  ;;  %v14724_v3 = vcombine.low %v2590_v53, %v2598_v54  ;;  %v14726_v4 = vcombine.low %v2591_v55, %v2599_v57  ;;  %v14743_v6 = vcombine.high %v2607_v1, %v2615_v2  ;;  %v2686_v54 = vld [vmem:[#allocation11 + $0xca0] sm:$0xff]  ;;  %v2687_v57 = vld [vmem:[#allocation11 + $0xca8] sm:$0xff] }
 0x526   : > { %5874 = vmatprep.subr.bf16.mxu1 %v14631_v5  ;;  %v14741_v5 = vcombine.high %v2606_v63, %v2614_v0  ;;  %v2694_v55 = vld [vmem:[#allocation11 + $0xce0] sm:$0xff] }
 0x528   : > { %5793 = vmatpush1.bf16.msra.mxu0 %v14628_v14  ;;  %v2631_v14 = vld [vmem:[#allocation11 + $0xae8] sm:$0xff] }
 0x529   : > { %5875 = vmatpush1.bf16.msra.mxu1 %v14630_v15  ;;  %5794 = vmatprep.subr.bf16.mxu0 %v14645_v16  ;;  %v14740_v15 = vcombine.low %v2606_v63, %v2614_v0  ;;  %v14742_v16 = vcombine.low %v2607_v1, %v2615_v2  ;;  %v14759_v22 = vcombine.high %v2623_v13, %v2631_v14  ;;  %v2702_v0 = vld [vmem:[#allocation11 + $0xd20] sm:$0xff]  ;;  %v2703_v2 = vld [vmem:[#allocation11 + $0xd28] sm:$0xff] }
 0x52a   : > { %5876 = vmatprep.subr.bf16.mxu1 %v14647_v18  ;;  %v14757_v18 = vcombine.high %v2622_v11, %v2630_v12  ;;  %v2710_v1 = vld [vmem:[#allocation11 + $0xd60] sm:$0xff] }
 0x52c   : > { %5795 = vmatpush1.bf16.msra.mxu0 %v14644_v26  ;;  %v2647_v26 = vld [vmem:[#allocation11 + $0xb68] sm:$0xff] }
 0x52d   : > { %5877 = vmatpush1.bf16.msra.mxu1 %v14646_v27  ;;  %5796 = vmatprep.subr.bf16.mxu0 %v14661_v29  ;;  %v14756_v27 = vcombine.low %v2622_v11, %v2630_v12  ;;  %v14758_v29 = vcombine.low %v2623_v13, %v2631_v14  ;;  %v14775_v32 = vcombine.high %v2639_v25, %v2647_v26  ;;  %v2718_v12 = vld [vmem:[#allocation11 + $0xda0] sm:$0xff]  ;;  %v2719_v14 = vld [vmem:[#allocation11 + $0xda8] sm:$0xff] }
 0x52e   : > { %5878 = vmatprep.subr.bf16.mxu1 %v14663_v30  ;;  %v14773_v30 = vcombine.high %v2638_v23, %v2646_v24  ;;  %v2726_v13 = vld [vmem:[#allocation11 + $0xde0] sm:$0xff] }
 0x52f   : > { %v2734_v24 = vld [vmem:[#allocation11 + $0xe20] sm:$0xff] }
 0x530   : > { %5797 = vmatpush1.bf16.msra.mxu0 %v14660_v34  ;;  %v2662_v34 = vld [vmem:[#allocation11 + $0xbe0] sm:$0xff] }
 0x531   : > { %5879 = vmatpush1.bf16.msra.mxu1 %v14662_v35  ;;  %5807 = vmatprep.subr.bf16.mxu0 %v14677_v36  ;;  %v14789_v44 = vcombine.high %v2654_v33, %v2662_v34 }
 0x532   : > { %5889 = vmatprep.subr.bf16.mxu1 %v14679_v37  ;;  %v2655_v37 = vld [vmem:[#allocation11 + $0xba8] sm:$0xff] }
 0x533   : > { %5799 = vmatmul.mubr.bf16.vlgmr.msra.gmra.mrb[12].mxu0 %v19167_v21  ;;  %v14791_v45 = vcombine.high %v2655_v37, %v2663_v38 }
 0x534   : > { %5881 = vmatmul.mubr.bf16.vlgmr.msra.gmra.mrb[20].mxu1 %v19167_v21  ;;  %5808 = vmatpush1.bf16.msra.mxu0 %v14676_v40 }
 0x535   : > { %5839 = vmatprep.mubr.bf16.mxu0 %v19171_v28  ;;  %5890 = vmatpush1.bf16.msra.mxu1 %v14678_v9 }
 0x536   : > { %5921 = vmatprep.mubr.bf16.mxu1 %v19171_v28  ;;  %5809 = vmatprep.subr.bf16.mxu0 %v14693_v43  ;;  %v14774_v43 = vcombine.low %v2639_v25, %v2647_v26  ;;  %v2742_v25 = vld [vmem:[#allocation11 + $0xe60] sm:$0xff]  ;;  %v2735_v26 = vld [vmem:[#allocation11 + $0xe28] sm:$0xff] }
 0x537   : > { %5891 = vmatprep.subr.bf16.mxu1 %v14695_v46  ;;  %v2670_v46 = vld [vmem:[#allocation11 + $0xc20] sm:$0xff] }
 0x538   : > { %5810 = vmatpush1.bf16.msra.mxu0 %v14692_v49  ;;  %v2679_v49 = vld [vmem:[#allocation11 + $0xc68] sm:$0xff] }
 0x539   : > { %5892 = vmatpush1.bf16.msra.mxu1 %v14694_v50  ;;  %5811 = vmatprep.subr.bf16.mxu0 %v14709_v51  ;;  %v14788_v50 = vcombine.low %v2654_v33, %v2662_v34  ;;  %v14790_v51 = vcombine.low %v2655_v37, %v2663_v38  ;;  %v14807_v53 = vcombine.high %v2671_v48, %v2679_v49  ;;  %v2750_v34 = vld [vmem:[#allocation11 + $0xea0] sm:$0xff]  ;;  %v2751_v38 = vld [vmem:[#allocation11 + $0xea8] sm:$0xff] }
 0x53a   : > { %5893 = vmatprep.subr.bf16.mxu1 %v14711_v52  ;;  %v14805_v52 = vcombine.high %v2670_v46, %v2678_v47  ;;  %v2758_v37 = vld [vmem:[#allocation11 + $0xee0] sm:$0xff] }
 0x53c   : > { %5812 = vmatpush1.bf16.msra.mxu0 %v14708_v58  ;;  %v2695_v58 = vld [vmem:[#allocation11 + $0xce8] sm:$0xff] }
 0x53d   : > { %5894 = vmatpush1.bf16.msra.mxu1 %v14710_v59  ;;  %5813 = vmatprep.subr.bf16.mxu0 %v14725_v60  ;;  %v14804_v59 = vcombine.low %v2670_v46, %v2678_v47  ;;  %v14806_v60 = vcombine.low %v2671_v48, %v2679_v49  ;;  %v14823_v63 = vcombine.high %v2687_v57, %v2695_v58  ;;  %v2775_v46 = vld [vmem:[#allocation11 + $0xf68] sm:$0xff] }
 0x53e   : > { %5895 = vmatprep.subr.bf16.mxu1 %v14727_v62  ;;  %v14821_v62 = vcombine.high %v2686_v54, %v2694_v55  ;;  %v14884_v47 = vcombine.low %v2750_v34, %v2758_v37 }
 0x540   : > { %5814 = vmatpush1.bf16.msra.mxu0 %v14724_v3  ;;  %v2711_v3 = vld [vmem:[#allocation11 + $0xd68] sm:$0xff] }
 0x541   : > { %5896 = vmatpush1.bf16.msra.mxu1 %v14726_v4  ;;  %5815 = vmatprep.subr.bf16.mxu0 %v14741_v5  ;;  %v14820_v4 = vcombine.low %v2686_v54, %v2694_v55  ;;  %v14822_v5 = vcombine.low %v2687_v57, %v2695_v58  ;;  %v14839_v11 = vcombine.high %v2703_v2, %v2711_v3  ;;  %v2791_v54 = vld [vmem:[#allocation11 + $0xfe8] sm:$0xff] }
 0x542   : > { %5897 = vmatprep.subr.bf16.mxu1 %v14743_v6  ;;  %v14837_v6 = vcombine.high %v2702_v0, %v2710_v1 }
 0x544   : > { %5816 = vmatpush1.bf16.msra.mxu0 %v14740_v15  ;;  %v2727_v15 = vld [vmem:[#allocation11 + $0xde8] sm:$0xff] }
 0x545   : > { %5898 = vmatpush1.bf16.msra.mxu1 %v14742_v16  ;;  %5817 = vmatprep.subr.bf16.mxu0 %v14757_v18  ;;  %v14836_v16 = vcombine.low %v2702_v0, %v2710_v1  ;;  %v14838_v18 = vcombine.low %v2703_v2, %v2711_v3  ;;  %v14855_v23 = vcombine.high %v2719_v14, %v2727_v15  ;;  %v2297_v0 = vld [vmem:[#allocation11 + $0x78] sm:$0xff] }
 0x546   : > { %v19198_v31 = vpop.f32.mrb[4].mxu0  ;;  %v19200_v56 = vpop.f32.mrb[12].mxu1  ;;  %5899 = vmatprep.subr.bf16.mxu1 %v14759_v22  ;;  %v14853_v22 = vcombine.high %v2718_v12, %v2726_v13 }
 0x547   : > { %v19202_v35 = vpop.f32.mrb[5].mxu0  ;;  %v19204_v36 = vpop.f32.mrb[13].mxu1 }
 0x548   : > { %v5517_v39 = vpop.f32.mrb[6].mxu0  ;;  %v5599_v40 = vpop.f32.mrb[14].mxu1  ;;  %5818 = vmatpush1.bf16.msra.mxu0 %v14756_v27  ;;  %v2743_v27 = vld [vmem:[#allocation11 + $0xe68] sm:$0xff] }
 0x549   : > { %5900 = vmatpush1.bf16.msra.mxu1 %v14758_v29  ;;  %v5518_v41 = vpop.f32.mrb[7].mxu0  ;;  %v5600_v9 = vpop.f32.mrb[15].mxu1  ;;  %5819 = vmatprep.subr.bf16.mxu0 %v14773_v30  ;;  %v14852_v29 = vcombine.low %v2718_v12, %v2726_v13  ;;  %v14854_v30 = vcombine.low %v2719_v14, %v2727_v15  ;;  %v14871_v33 = vcombine.high %v2735_v26, %v2743_v27  ;;  %v2759_v39 = vld [vmem:[#allocation11 + $0xee8] sm:$0xff]  ;;  %v2305_v12 = vld [vmem:[#allocation11 + $0xb8] sm:$0xff] }
 0x54a   : > { %5901 = vmatprep.subr.bf16.mxu1 %v14775_v32  ;;  %v14869_v32 = vcombine.high %v2734_v24, %v2742_v25  ;;  %v14868_v40 = vcombine.low %v2734_v24, %v2742_v25  ;;  %v14885_v41 = vcombine.high %v2750_v34, %v2758_v37  ;;  %v14887_v9 = vcombine.high %v2751_v38, %v2759_v39  ;;  %v2313_v13 = vld [vmem:[#allocation11 + $0xf8] sm:$0xff] }
 0x54b   : > { %v14886_v48 = vcombine.low %v2751_v38, %v2759_v39  ;;  %v2329_v24 = vld [vmem:[#allocation11 + $0x178] sm:$0xff] }
 0x54c   : > { %5820 = vmatpush1.bf16.msra.mxu0 %v14772_v61  ;;  %v14870_v61 = vcombine.low %v2735_v26, %v2743_v27  ;;  %v14442_v26 = vcombine.low %v2305_v12, %v2313_v13  ;;  %v2345_v34 = vld [vmem:[#allocation11 + $0x1f8] sm:$0xff] }
 0x54d   : > { %5902 = vmatpush1.bf16.msra.mxu1 %v14774_v43  ;;  %5821 = vmatprep.subr.bf16.mxu0 %v14789_v44  ;;  %v2766_v43 = vld [vmem:[#allocation11 + $0xf20] sm:$0xff] }
 0x54e   : > { %5903 = vmatprep.subr.bf16.mxu1 %v14791_v45  ;;  %v2774_v44 = vld [vmem:[#allocation11 + $0xf60] sm:$0xff]  ;;  %v2767_v45 = vld [vmem:[#allocation11 + $0xf28] sm:$0xff] }
 0x54f   : > { %v14901_v49 = vcombine.high %v2766_v43, %v2774_v44  ;;  %v14900_v55 = vcombine.low %v2766_v43, %v2774_v44  ;;  %v14902_v57 = vcombine.low %v2767_v45, %v2775_v46  ;;  %v2361_v43 = vld [vmem:[#allocation11 + $0x278] sm:$0xff] }
 0x550   : > { %5822 = vmatpush1.bf16.msra.mxu0 %v14788_v50  ;;  %v14903_v50 = vcombine.high %v2767_v45, %v2775_v46 }
 0x551   : > { %5904 = vmatpush1.bf16.msra.mxu1 %v14790_v51  ;;  %5823 = vmatprep.subr.bf16.mxu0 %v14805_v52  ;;  %v2782_v51 = vld [vmem:[#allocation11 + $0xfa0] sm:$0xff] }
 0x552   : > { %5905 = vmatprep.subr.bf16.mxu1 %v14807_v53  ;;  %v2790_v52 = vld [vmem:[#allocation11 + $0xfe0] sm:$0xff]  ;;  %v2783_v53 = vld [vmem:[#allocation11 + $0xfa8] sm:$0xff] }
 0x553   : > { %v14917_v58 = vcombine.high %v2782_v51, %v2790_v52  ;;  %v14916_v1 = vcombine.low %v2782_v51, %v2790_v52  ;;  %v14918_v2 = vcombine.low %v2783_v53, %v2791_v54 }
 0x554   : > { %5824 = vmatpush1.bf16.msra.mxu0 %v14804_v59  ;;  %v14919_v59 = vcombine.high %v2783_v53, %v2791_v54 }
 0x555   : > { %5906 = vmatpush1.bf16.msra.mxu1 %v14806_v60  ;;  %5825 = vmatprep.subr.bf16.mxu0 %v14821_v62  ;;  %v2288_v60 = vld [vmem:[#allocation11 + $0x30] sm:$0xff] }
 0x556   : > { %5907 = vmatprep.subr.bf16.mxu1 %v14823_v63  ;;  %v2296_v62 = vld [vmem:[#allocation11 + $0x70] sm:$0xff]  ;;  %v2289_v63 = vld [vmem:[#allocation11 + $0x38] sm:$0xff] }
 0x557   : > { %v14425_v3 = vcombine.high %v2288_v60, %v2296_v62  ;;  %v14426_v14 = vcombine.low %v2289_v63, %v2297_v0 }
 0x558   : > { %5826 = vmatpush1.bf16.msra.mxu0 %v14820_v4  ;;  %v14427_v4 = vcombine.high %v2289_v63, %v2297_v0 }
 0x559   : > { %5908 = vmatpush1.bf16.msra.mxu1 %v14822_v5  ;;  %5827 = vmatprep.subr.bf16.mxu0 %v14837_v6  ;;  %v2304_v5 = vld [vmem:[#allocation11 + $0xb0] sm:$0xff] }
 0x55a   : > { %5909 = vmatprep.subr.bf16.mxu1 %v14839_v11  ;;  %v2312_v6 = vld [vmem:[#allocation11 + $0xf0] sm:$0xff]  ;;  %v14424_v11 = vcombine.low %v2288_v60, %v2296_v62 }
 0x55b   : > { %v14441_v15 = vcombine.high %v2304_v5, %v2312_v6  ;;  %v14440_v25 = vcombine.low %v2304_v5, %v2312_v6 }
 0x55c   : > { %5828 = vmatpush1.bf16.msra.mxu0 %v14836_v16  ;;  %v2320_v16 = vld [vmem:[#allocation11 + $0x130] sm:$0xff] }
 0x55d   : > { %5910 = vmatpush1.bf16.msra.mxu1 %v14838_v18  ;;  %5829 = vmatprep.subr.bf16.mxu0 %v14853_v22  ;;  %v2328_v18 = vld [vmem:[#allocation11 + $0x170] sm:$0xff]  ;;  %v14443_v22 = vcombine.high %v2305_v12, %v2313_v13 }
 0x55e   : > { %5911 = vmatprep.subr.bf16.mxu1 %v14855_v23  ;;  %v2321_v23 = vld [vmem:[#allocation11 + $0x138] sm:$0xff]  ;;  %v14457_v27 = vcombine.high %v2320_v16, %v2328_v18  ;;  %v14456_v37 = vcombine.low %v2320_v16, %v2328_v18  ;;  %v2416_v13 = vld [vmem:[#allocation11 + $0x430] sm:$0xff] }
 0x55f   : > { %v14458_v38 = vcombine.low %v2321_v23, %v2329_v24  ;;  %v2425_v16 = vld [vmem:[#allocation11 + $0x478] sm:$0xff] }
 0x560   : > { %5830 = vmatpush1.bf16.msra.mxu0 %v14852_v29  ;;  %v14459_v29 = vcombine.high %v2321_v23, %v2329_v24 }
 0x561   : > { %5912 = vmatpush1.bf16.msra.mxu1 %v14854_v30  ;;  %5831 = vmatprep.subr.bf16.mxu0 %v14869_v32  ;;  %v2336_v30 = vld [vmem:[#allocation11 + $0x1b0] sm:$0xff] }
 0x562   : > { %5913 = vmatprep.subr.bf16.mxu1 %v14871_v33  ;;  %v2344_v32 = vld [vmem:[#allocation11 + $0x1f0] sm:$0xff]  ;;  %v2337_v33 = vld [vmem:[#allocation11 + $0x1b8] sm:$0xff] }
 0x563   : > { %v14473_v39 = vcombine.high %v2336_v30, %v2344_v32  ;;  %v14474_v44 = vcombine.low %v2337_v33, %v2345_v34 }
 0x564   : > { %5832 = vmatpush1.bf16.msra.mxu0 %v14868_v40  ;;  %v14475_v40 = vcombine.high %v2337_v33, %v2345_v34 }
 0x565   : > { %5914 = vmatpush1.bf16.msra.mxu1 %v14870_v61  ;;  %5833 = vmatprep.subr.bf16.mxu0 %v14885_v41  ;;  %v2352_v61 = vld [vmem:[#allocation11 + $0x230] sm:$0xff] }
 0x566   : > { %5915 = vmatprep.subr.bf16.mxu1 %v14887_v9  ;;  %v2360_v41 = vld [vmem:[#allocation11 + $0x270] sm:$0xff]  ;;  %v2353_v9 = vld [vmem:[#allocation11 + $0x238] sm:$0xff] }
 0x567   : > { %v14489_v45 = vcombine.high %v2352_v61, %v2360_v41  ;;  %v14491_v46 = vcombine.high %v2353_v9, %v2361_v43  ;;  %v14488_v51 = vcombine.low %v2352_v61, %v2360_v41  ;;  %v14490_v52 = vcombine.low %v2353_v9, %v2361_v43 }
 0x568   : > { %5834 = vmatpush1.bf16.msra.mxu0 %v14884_v47  ;;  %v2368_v47 = vld [vmem:[#allocation11 + $0x2b0] sm:$0xff] }
 0x569   : > { %5916 = vmatpush1.bf16.msra.mxu1 %v14886_v48  ;;  %5835 = vmatprep.subr.bf16.mxu0 %v14901_v49  ;;  %v2376_v48 = vld [vmem:[#allocation11 + $0x2f0] sm:$0xff]  ;;  %v2369_v49 = vld [vmem:[#allocation11 + $0x2b8] sm:$0xff] }
 0x56a   : > { %5917 = vmatprep.subr.bf16.mxu1 %v14903_v50  ;;  %v2377_v50 = vld [vmem:[#allocation11 + $0x2f8] sm:$0xff]  ;;  %v14505_v53 = vcombine.high %v2368_v47, %v2376_v48  ;;  %v14504_v60 = vcombine.low %v2368_v47, %v2376_v48 }
 0x56b   : > { %v14507_v54 = vcombine.high %v2369_v49, %v2377_v50  ;;  %v14506_v62 = vcombine.low %v2369_v49, %v2377_v50 }
 0x56c   : > { %5836 = vmatpush1.bf16.msra.mxu0 %v14900_v55  ;;  %v2384_v55 = vld [vmem:[#allocation11 + $0x330] sm:$0xff] }
 0x56d   : > { %5918 = vmatpush1.bf16.msra.mxu1 %v14902_v57  ;;  %5837 = vmatprep.subr.bf16.mxu0 %v14917_v58  ;;  %v2392_v57 = vld [vmem:[#allocation11 + $0x370] sm:$0xff]  ;;  %v2385_v58 = vld [vmem:[#allocation11 + $0x338] sm:$0xff] }
 0x56e   : > { %5919 = vmatprep.subr.bf16.mxu1 %v14919_v59  ;;  %v2393_v59 = vld [vmem:[#allocation11 + $0x378] sm:$0xff]  ;;  %v14521_v63 = vcombine.high %v2384_v55, %v2392_v57  ;;  %v14520_v5 = vcombine.low %v2384_v55, %v2392_v57 }
 0x56f   : > { %v14523_v0 = vcombine.high %v2385_v58, %v2393_v59  ;;  %v14522_v6 = vcombine.low %v2385_v58, %v2393_v59 }
 0x570   : > { %5838 = vmatpush1.bf16.msra.mxu0 %v14916_v1  ;;  %v2400_v1 = vld [vmem:[#allocation11 + $0x3b0] sm:$0xff] }
 0x571   : > { %5920 = vmatpush1.bf16.msra.mxu1 %v14918_v2  ;;  %5930 = vmatprep.subr.bf16.mxu0 %v14425_v3  ;;  %v2408_v2 = vld [vmem:[#allocation11 + $0x3f0] sm:$0xff]  ;;  %v2401_v3 = vld [vmem:[#allocation11 + $0x3b8] sm:$0xff] }
 0x572   : > { %6012 = vmatprep.subr.bf16.mxu1 %v14427_v4  ;;  %v2409_v4 = vld [vmem:[#allocation11 + $0x3f8] sm:$0xff]  ;;  %v14536_v18 = vcombine.low %v2400_v1, %v2408_v2 }
 0x573   : > { %5840 = vmatmul.mubr.bf16.vlgmr.msra.gmra.mrb[12].mxu0 %v19180_v42  ;;  %v14539_v12 = vcombine.high %v2401_v3, %v2409_v4 }
 0x574   : > { %5922 = vmatmul.mubr.bf16.vlgmr.msra.gmra.mrb[20].mxu1 %v19180_v42  ;;  %5931 = vmatpush1.bf16.msra.mxu0 %v14424_v11  ;;  %v14537_v11 = vcombine.high %v2400_v1, %v2408_v2 }
 0x575   : > { %5962 = vmatprep.mubr.bf16.mxu0 %v19165_v19  ;;  %6013 = vmatpush1.bf16.msra.mxu1 %v14426_v14  ;;  %v2424_v14 = vld [vmem:[#allocation11 + $0x470] sm:$0xff] }
 0x576   : > { %6044 = vmatprep.mubr.bf16.mxu1 %v19165_v19  ;;  %5932 = vmatprep.subr.bf16.mxu0 %v14441_v15  ;;  %v14472_v19 = vcombine.low %v2336_v30, %v2344_v32  ;;  %v2417_v15 = vld [vmem:[#allocation11 + $0x438] sm:$0xff]  ;;  %v14553_v23 = vcombine.high %v2416_v13, %v2424_v14  ;;  %v14552_v30 = vcombine.low %v2416_v13, %v2424_v14 }
 0x577   : > { %6014 = vmatprep.subr.bf16.mxu1 %v14443_v22  ;;  %v14538_v22 = vcombine.low %v2401_v3, %v2409_v4  ;;  %v14555_v24 = vcombine.high %v2417_v15, %v2425_v16  ;;  %v14554_v32 = vcombine.low %v2417_v15, %v2425_v16 }
 0x578   : > { %5933 = vmatpush1.bf16.msra.mxu0 %v14440_v25  ;;  %v2432_v25 = vld [vmem:[#allocation11 + $0x4b0] sm:$0xff] }
 0x579   : > { %6015 = vmatpush1.bf16.msra.mxu1 %v14442_v26  ;;  %5934 = vmatprep.subr.bf16.mxu0 %v14457_v27  ;;  %v2440_v26 = vld [vmem:[#allocation11 + $0x4f0] sm:$0xff]  ;;  %v2433_v27 = vld [vmem:[#allocation11 + $0x4b8] sm:$0xff] }
 0x57a   : > { %6016 = vmatprep.subr.bf16.mxu1 %v14459_v29  ;;  %v2441_v29 = vld [vmem:[#allocation11 + $0x4f8] sm:$0xff]  ;;  %v14569_v33 = vcombine.high %v2432_v25, %v2440_v26  ;;  %v14568_v61 = vcombine.low %v2432_v25, %v2440_v26 }
 0x57b   : > { %v14571_v34 = vcombine.high %v2433_v27, %v2441_v29  ;;  %v14570_v41 = vcombine.low %v2433_v27, %v2441_v29 }
 0x57c   : > { %5935 = vmatpush1.bf16.msra.mxu0 %v14456_v37  ;;  %v2448_v37 = vld [vmem:[#allocation11 + $0x530] sm:$0xff] }
 0x57d   : > { %6017 = vmatpush1.bf16.msra.mxu1 %v14458_v38  ;;  %5936 = vmatprep.subr.bf16.mxu0 %v14473_v39  ;;  %v2456_v38 = vld [vmem:[#allocation11 + $0x570] sm:$0xff]  ;;  %v2449_v39 = vld [vmem:[#allocation11 + $0x538] sm:$0xff] }
 0x57e   : > { %6018 = vmatprep.subr.bf16.mxu1 %v14475_v40  ;;  %v2457_v40 = vld [vmem:[#allocation11 + $0x578] sm:$0xff]  ;;  %v14585_v9 = vcombine.high %v2448_v37, %v2456_v38  ;;  %v14584_v47 = vcombine.low %v2448_v37, %v2456_v38 }
 0x57f   : > { %v14587_v43 = vcombine.high %v2449_v39, %v2457_v40  ;;  %v14586_v48 = vcombine.low %v2449_v39, %v2457_v40 }
 0x580   : > { %5937 = vmatpush1.bf16.msra.mxu0 %v14472_v19  ;;  %v2464_v19 = vld [vmem:[#allocation11 + $0x5b0] sm:$0xff] }
 0x581   : > { %6019 = vmatpush1.bf16.msra.mxu1 %v14474_v44  ;;  %5938 = vmatprep.subr.bf16.mxu0 %v14489_v45  ;;  %v2472_v44 = vld [vmem:[#allocation11 + $0x5f0] sm:$0xff]  ;;  %v2465_v45 = vld [vmem:[#allocation11 + $0x5b8] sm:$0xff] }
 0x582   : > { %6020 = vmatprep.subr.bf16.mxu1 %v14491_v46  ;;  %v2473_v46 = vld [vmem:[#allocation11 + $0x5f8] sm:$0xff]  ;;  %v14601_v49 = vcombine.high %v2464_v19, %v2472_v44  ;;  %v14600_v55 = vcombine.low %v2464_v19, %v2472_v44 }
 0x583   : > { %v14603_v50 = vcombine.high %v2465_v45, %v2473_v46  ;;  %v14602_v57 = vcombine.low %v2465_v45, %v2473_v46  ;;  %v2569_v19 = vld [vmem:[#allocation11 + $0x8f8] sm:$0xff]  ;;  %v2576_v46 = vld [vmem:[#allocation11 + $0x930] sm:$0xff] }
 0x584   : > { %5939 = vmatpush1.bf16.msra.mxu0 %v14488_v51  ;;  %v2480_v51 = vld [vmem:[#allocation11 + $0x630] sm:$0xff] }
 0x585   : > { %6021 = vmatpush1.bf16.msra.mxu1 %v14490_v52  ;;  %5940 = vmatprep.subr.bf16.mxu0 %v14505_v53  ;;  %v2488_v52 = vld [vmem:[#allocation11 + $0x670] sm:$0xff]  ;;  %v2481_v53 = vld [vmem:[#allocation11 + $0x638] sm:$0xff] }
 0x586   : > { %6022 = vmatprep.subr.bf16.mxu1 %v14507_v54  ;;  %v2489_v54 = vld [vmem:[#allocation11 + $0x678] sm:$0xff]  ;;  %v14617_v58 = vcombine.high %v2480_v51, %v2488_v52  ;;  %v14616_v1 = vcombine.low %v2480_v51, %v2488_v52 }
 0x587   : > { %v14619_v59 = vcombine.high %v2481_v53, %v2489_v54  ;;  %v14618_v2 = vcombine.low %v2481_v53, %v2489_v54 }
 0x588   : > { %5941 = vmatpush1.bf16.msra.mxu0 %v14504_v60  ;;  %v2496_v60 = vld [vmem:[#allocation11 + $0x6b0] sm:$0xff] }
 0x589   : > { %6023 = vmatpush1.bf16.msra.mxu1 %v14506_v62  ;;  %5942 = vmatprep.subr.bf16.mxu0 %v14521_v63  ;;  %v2504_v62 = vld [vmem:[#allocation11 + $0x6f0] sm:$0xff]  ;;  %v2497_v63 = vld [vmem:[#allocation11 + $0x6b8] sm:$0xff] }
 0x58a   : > { %6024 = vmatprep.subr.bf16.mxu1 %v14523_v0  ;;  %v2505_v0 = vld [vmem:[#allocation11 + $0x6f8] sm:$0xff]  ;;  %v14633_v3 = vcombine.high %v2496_v60, %v2504_v62  ;;  %v14632_v13 = vcombine.low %v2496_v60, %v2504_v62 }
 0x58b   : > { %v14635_v4 = vcombine.high %v2497_v63, %v2505_v0  ;;  %v14634_v14 = vcombine.low %v2497_v63, %v2505_v0  ;;  %v2608_v0 = vld [vmem:[#allocation11 + $0xa30] sm:$0xff] }
 0x58c   : > { %5943 = vmatpush1.bf16.msra.mxu0 %v14520_v5  ;;  %v2512_v5 = vld [vmem:[#allocation11 + $0x730] sm:$0xff] }
 0x58d   : > { %6025 = vmatpush1.bf16.msra.mxu1 %v14522_v6  ;;  %5944 = vmatprep.subr.bf16.mxu0 %v14537_v11  ;;  %v2520_v6 = vld [vmem:[#allocation11 + $0x770] sm:$0xff]  ;;  %v2513_v11 = vld [vmem:[#allocation11 + $0x738] sm:$0xff] }
 0x58e   : > { %6026 = vmatprep.subr.bf16.mxu1 %v14539_v12  ;;  %v2521_v12 = vld [vmem:[#allocation11 + $0x778] sm:$0xff]  ;;  %v14649_v15 = vcombine.high %v2512_v5, %v2520_v6  ;;  %v14648_v25 = vcombine.low %v2512_v5, %v2520_v6 }
 0x58f   : > { %v14651_v16 = vcombine.high %v2513_v11, %v2521_v12  ;;  %v14650_v26 = vcombine.low %v2513_v11, %v2521_v12  ;;  %v2624_v11 = vld [vmem:[#allocation11 + $0xab0] sm:$0xff] }
 0x590   : > { %5945 = vmatpush1.bf16.msra.mxu0 %v14536_v18  ;;  %v2528_v18 = vld [vmem:[#allocation11 + $0x7b0] sm:$0xff] }
 0x591   : > { %6027 = vmatpush1.bf16.msra.mxu1 %v14538_v22  ;;  %5946 = vmatprep.subr.bf16.mxu0 %v14553_v23  ;;  %v2536_v22 = vld [vmem:[#allocation11 + $0x7f0] sm:$0xff]  ;;  %v2529_v23 = vld [vmem:[#allocation11 + $0x7b8] sm:$0xff] }
 0x592   : > { %6028 = vmatprep.subr.bf16.mxu1 %v14555_v24  ;;  %v2537_v24 = vld [vmem:[#allocation11 + $0x7f8] sm:$0xff]  ;;  %v14665_v27 = vcombine.high %v2528_v18, %v2536_v22  ;;  %v14664_v37 = vcombine.low %v2528_v18, %v2536_v22  ;;  %v2632_v12 = vld [vmem:[#allocation11 + $0xaf0] sm:$0xff] }
 0x593   : > { %v14667_v29 = vcombine.high %v2529_v23, %v2537_v24  ;;  %v14666_v38 = vcombine.low %v2529_v23, %v2537_v24  ;;  %v14761_v18 = vcombine.high %v2624_v11, %v2632_v12  ;;  %v2640_v23 = vld [vmem:[#allocation11 + $0xb30] sm:$0xff] }
 0x594   : > { %5947 = vmatpush1.bf16.msra.mxu0 %v14552_v30  ;;  %v2544_v30 = vld [vmem:[#allocation11 + $0x830] sm:$0xff] }
 0x595   : > { %6029 = vmatpush1.bf16.msra.mxu1 %v14554_v32  ;;  %5948 = vmatprep.subr.bf16.mxu0 %v14569_v33  ;;  %v2552_v32 = vld [vmem:[#allocation11 + $0x870] sm:$0xff]  ;;  %v2545_v33 = vld [vmem:[#allocation11 + $0x838] sm:$0xff] }
 0x596   : > { %6030 = vmatprep.subr.bf16.mxu1 %v14571_v34  ;;  %v2553_v34 = vld [vmem:[#allocation11 + $0x878] sm:$0xff]  ;;  %v14681_v39 = vcombine.high %v2544_v30, %v2552_v32  ;;  %v2648_v24 = vld [vmem:[#allocation11 + $0xb70] sm:$0xff] }
 0x597   : > { %v14683_v40 = vcombine.high %v2545_v33, %v2553_v34  ;;  %v14682_v44 = vcombine.low %v2545_v33, %v2553_v34  ;;  %v2656_v34 = vld [vmem:[#allocation11 + $0xbb0] sm:$0xff] }
 0x598   : > { %5949 = vmatpush1.bf16.msra.mxu0 %v14568_v61  ;;  %v2560_v61 = vld [vmem:[#allocation11 + $0x8b0] sm:$0xff] }
 0x599   : > { %6031 = vmatpush1.bf16.msra.mxu1 %v14570_v41  ;;  %5950 = vmatprep.subr.bf16.mxu0 %v14585_v9  ;;  %v2568_v41 = vld [vmem:[#allocation11 + $0x8f0] sm:$0xff]  ;;  %v14680_v9 = vcombine.low %v2544_v30, %v2552_v32  ;;  %v14777_v30 = vcombine.high %v2640_v23, %v2648_v24 }
 0x59a   : > { %6032 = vmatprep.subr.bf16.mxu1 %v14587_v43  ;;  %v2561_v43 = vld [vmem:[#allocation11 + $0x8b8] sm:$0xff]  ;;  %v14697_v45 = vcombine.high %v2560_v61, %v2568_v41  ;;  %v14696_v51 = vcombine.low %v2560_v61, %v2568_v41 }
 0x59b   : > { %v14698_v52 = vcombine.low %v2561_v43, %v2569_v19  ;;  %v2665_v61 = vld [vmem:[#allocation11 + $0xbf8] sm:$0xff] }
 0x59c   : > { %5951 = vmatpush1.bf16.msra.mxu0 %v14584_v47  ;;  %v2584_v47 = vld [vmem:[#allocation11 + $0x970] sm:$0xff] }
 0x59d   : > { %6033 = vmatpush1.bf16.msra.mxu1 %v14586_v48  ;;  %5952 = vmatprep.subr.bf16.mxu0 %v14601_v49  ;;  %v14699_v48 = vcombine.high %v2561_v43, %v2569_v19  ;;  %v2577_v49 = vld [vmem:[#allocation11 + $0x938] sm:$0xff]  ;;  %v14713_v53 = vcombine.high %v2576_v46, %v2584_v47  ;;  %v14712_v60 = vcombine.low %v2576_v46, %v2584_v47 }
 0x59e   : > { %6034 = vmatprep.subr.bf16.mxu1 %v14603_v50  ;;  %v2585_v50 = vld [vmem:[#allocation11 + $0x978] sm:$0xff]  ;;  %v14776_v43 = vcombine.low %v2640_v23, %v2648_v24 }
 0x59f   : > { %v14715_v54 = vcombine.high %v2577_v49, %v2585_v50 }
 0x5a0   : > { %5953 = vmatpush1.bf16.msra.mxu0 %v14600_v55  ;;  %v2592_v55 = vld [vmem:[#allocation11 + $0x9b0] sm:$0xff] }
 0x5a1   : > { %6035 = vmatpush1.bf16.msra.mxu1 %v14602_v57  ;;  %5954 = vmatprep.subr.bf16.mxu0 %v14617_v58  ;;  %v2600_v57 = vld [vmem:[#allocation11 + $0x9f0] sm:$0xff]  ;;  %v2593_v58 = vld [vmem:[#allocation11 + $0x9b8] sm:$0xff] }
 0x5a2   : > { %6036 = vmatprep.subr.bf16.mxu1 %v14619_v59  ;;  %v2601_v59 = vld [vmem:[#allocation11 + $0x9f8] sm:$0xff]  ;;  %v14729_v62 = vcombine.high %v2592_v55, %v2600_v57 }
 0x5a3   : > { %v14731_v63 = vcombine.high %v2593_v58, %v2601_v59 }
 0x5a4   : > { %5955 = vmatpush1.bf16.msra.mxu0 %v14616_v1  ;;  %v2616_v1 = vld [vmem:[#allocation11 + $0xa70] sm:$0xff] }
 0x5a5   : > { %6037 = vmatpush1.bf16.msra.mxu1 %v14618_v2  ;;  %5956 = vmatprep.subr.bf16.mxu0 %v14633_v3  ;;  %v2609_v2 = vld [vmem:[#allocation11 + $0xa38] sm:$0xff]  ;;  %v14745_v5 = vcombine.high %v2608_v0, %v2616_v1 }
 0x5a6   : > { %6038 = vmatprep.subr.bf16.mxu1 %v14635_v4  ;;  %v2617_v3 = vld [vmem:[#allocation11 + $0xa78] sm:$0xff]  ;;  %v14730_v4 = vcombine.low %v2593_v58, %v2601_v59  ;;  %v2688_v58 = vld [vmem:[#allocation11 + $0xcb0] sm:$0xff] }
 0x5a7   : > { %v14747_v6 = vcombine.high %v2609_v2, %v2617_v3  ;;  %v2696_v59 = vld [vmem:[#allocation11 + $0xcf0] sm:$0xff] }
 0x5a8   : > { %5957 = vmatpush1.bf16.msra.mxu0 %v14632_v13  ;;  %v2625_v13 = vld [vmem:[#allocation11 + $0xab8] sm:$0xff] }
 0x5a9   : > { %6039 = vmatpush1.bf16.msra.mxu1 %v14634_v14  ;;  %5958 = vmatprep.subr.bf16.mxu0 %v14649_v15  ;;  %v2633_v14 = vld [vmem:[#allocation11 + $0xaf8] sm:$0xff]  ;;  %v14744_v15 = vcombine.low %v2608_v0, %v2616_v1  ;;  %v14825_v0 = vcombine.high %v2688_v58, %v2696_v59 }
 0x5aa   : > { %6040 = vmatprep.subr.bf16.mxu1 %v14651_v16  ;;  %v14746_v16 = vcombine.low %v2609_v2, %v2617_v3  ;;  %v14763_v22 = vcombine.high %v2625_v13, %v2633_v14  ;;  %v2704_v2 = vld [vmem:[#allocation11 + $0xd30] sm:$0xff] }
 0x5ab   : > { %v2712_v3 = vld [vmem:[#allocation11 + $0xd70] sm:$0xff] }
 0x5ac   : > { %5959 = vmatpush1.bf16.msra.mxu0 %v14648_v25  ;;  %v2641_v25 = vld [vmem:[#allocation11 + $0xb38] sm:$0xff] }
 0x5ad   : > { %6041 = vmatpush1.bf16.msra.mxu1 %v14650_v26  ;;  %5960 = vmatprep.subr.bf16.mxu0 %v14665_v27  ;;  %v2649_v26 = vld [vmem:[#allocation11 + $0xb78] sm:$0xff]  ;;  %v14760_v27 = vcombine.low %v2624_v11, %v2632_v12  ;;  %v14841_v11 = vcombine.high %v2704_v2, %v2712_v3 }
 0x5ae   : > { %6042 = vmatprep.subr.bf16.mxu1 %v14667_v29  ;;  %v14762_v29 = vcombine.low %v2625_v13, %v2633_v14  ;;  %v14779_v33 = vcombine.high %v2641_v25, %v2649_v26  ;;  %v2720_v13 = vld [vmem:[#allocation11 + $0xdb0] sm:$0xff] }
 0x5af   : > { %v2728_v14 = vld [vmem:[#allocation11 + $0xdf0] sm:$0xff] }
 0x5b0   : > { %5961 = vmatpush1.bf16.msra.mxu0 %v14664_v37  ;;  %v2664_v37 = vld [vmem:[#allocation11 + $0xbf0] sm:$0xff]  ;;  %v14857_v23 = vcombine.high %v2720_v13, %v2728_v14 }
 0x5b1   : > { %6043 = vmatpush1.bf16.msra.mxu1 %v14666_v38  ;;  %5971 = vmatprep.subr.bf16.mxu0 %v14681_v39  ;;  %v14793_v46 = vcombine.high %v2656_v34, %v2664_v37 }
 0x5b2   : > { %6053 = vmatprep.subr.bf16.mxu1 %v14683_v40  ;;  %v2657_v40 = vld [vmem:[#allocation11 + $0xbb8] sm:$0xff] }
 0x5b3   : > { %5963 = vmatmul.mubr.bf16.vlgmr.msra.gmra.mrb[16].mxu0 %v19167_v21 }
 0x5b4   : > { %6045 = vmatmul.mubr.bf16.vlgmr.msra.gmra.mrb[24].mxu1 %v19167_v21  ;;  %5972 = vmatpush1.bf16.msra.mxu0 %v14680_v9  ;;  %v14714_v21 = vcombine.low %v2577_v49, %v2585_v50  ;;  %v2672_v49 = vld [vmem:[#allocation11 + $0xc30] sm:$0xff] }
 0x5b5   : > { %6003 = vmatprep.mubr.bf16.mxu0 %v19171_v28  ;;  %6054 = vmatpush1.bf16.msra.mxu1 %v14682_v44  ;;  %v2680_v50 = vld [vmem:[#allocation11 + $0xc70] sm:$0xff] }
 0x5b6   : > { %6085 = vmatprep.mubr.bf16.mxu1 %v19171_v28  ;;  %5973 = vmatprep.subr.bf16.mxu0 %v14697_v45  ;;  %v14728_v28 = vcombine.low %v2592_v55, %v2600_v57  ;;  %v14778_v45 = vcombine.low %v2641_v25, %v2649_v26  ;;  %v14809_v55 = vcombine.high %v2672_v49, %v2680_v50  ;;  %v2736_v25 = vld [vmem:[#allocation11 + $0xe30] sm:$0xff] }
 0x5b7   : > { %6055 = vmatprep.subr.bf16.mxu1 %v14699_v48  ;;  %v14795_v48 = vcombine.high %v2657_v40, %v2665_v61  ;;  %v2744_v26 = vld [vmem:[#allocation11 + $0xe70] sm:$0xff] }
 0x5b8   : > { %5974 = vmatpush1.bf16.msra.mxu0 %v14696_v51  ;;  %v2673_v51 = vld [vmem:[#allocation11 + $0xc38] sm:$0xff] }
 0x5b9   : > { %6056 = vmatpush1.bf16.msra.mxu1 %v14698_v52  ;;  %5975 = vmatprep.subr.bf16.mxu0 %v14713_v53  ;;  %v2681_v52 = vld [vmem:[#allocation11 + $0xc78] sm:$0xff]  ;;  %v14792_v53 = vcombine.low %v2656_v34, %v2664_v37  ;;  %v14873_v34 = vcombine.high %v2736_v25, %v2744_v26 }
 0x5ba   : > { %6057 = vmatprep.subr.bf16.mxu1 %v14715_v54  ;;  %v14794_v54 = vcombine.low %v2657_v40, %v2665_v61  ;;  %v14811_v57 = vcombine.high %v2673_v51, %v2681_v52  ;;  %v2752_v40 = vld [vmem:[#allocation11 + $0xeb0] sm:$0xff] }
 0x5bb   : > { %v2760_v61 = vld [vmem:[#allocation11 + $0xef0] sm:$0xff] }
 0x5bc   : > { %5976 = vmatpush1.bf16.msra.mxu0 %v14712_v60  ;;  %v2689_v60 = vld [vmem:[#allocation11 + $0xcb8] sm:$0xff] }
 0x5bd   : > { %6058 = vmatpush1.bf16.msra.mxu1 %v14714_v21  ;;  %5977 = vmatprep.subr.bf16.mxu0 %v14729_v62  ;;  %v2697_v21 = vld [vmem:[#allocation11 + $0xcf8] sm:$0xff]  ;;  %v14808_v62 = vcombine.low %v2672_v49, %v2680_v50 }
 0x5be   : > { %6059 = vmatprep.subr.bf16.mxu1 %v14731_v63  ;;  %v14810_v63 = vcombine.low %v2673_v51, %v2681_v52  ;;  %v14827_v1 = vcombine.high %v2689_v60, %v2697_v21  ;;  %v2769_v49 = vld [vmem:[#allocation11 + $0xf38] sm:$0xff]  ;;  %v19222_v51 = vld [vmem:[#allocation13] sm:$0xff]  ;;  %v14888_v52 = vcombine.low %v2752_v40, %v2760_v61 }
 0x5bf   : > { %v2777_v50 = vld [vmem:[#allocation11 + $0xf78] sm:$0xff] }
 0x5c0   : > { %5978 = vmatpush1.bf16.msra.mxu0 %v14728_v28  ;;  %v2705_v28 = vld [vmem:[#allocation11 + $0xd38] sm:$0xff] }
 0x5c1   : > { %6060 = vmatpush1.bf16.msra.mxu1 %v14730_v4  ;;  %5979 = vmatprep.subr.bf16.mxu0 %v14745_v5  ;;  %v2713_v4 = vld [vmem:[#allocation11 + $0xd78] sm:$0xff]  ;;  %v14824_v5 = vcombine.low %v2688_v58, %v2696_v59  ;;  %v2792_v58 = vld [vmem:[#allocation11 + $0xff0] sm:$0xff]  ;;  %v2805_v59 = vrot.slane %v19222_v51, %v19139_v10 }
 0x5c2   : > { %6061 = vmatprep.subr.bf16.mxu1 %v14747_v6  ;;  %v14826_v6 = vcombine.low %v2689_v60, %v2697_v21  ;;  %v14843_v12 = vcombine.high %v2705_v28, %v2713_v4  ;;  %v2785_v60 = vld [vmem:[#allocation11 + $0xfb8] sm:$0xff] }
 0x5c3   : > { %v2793_v21 = vld [vmem:[#allocation11 + $0xff8] sm:$0xff] }
 0x5c4   : > { %5980 = vmatpush1.bf16.msra.mxu0 %v14744_v15  ;;  %v2721_v15 = vld [vmem:[#allocation11 + $0xdb8] sm:$0xff] }
 0x5c5   : > { %6062 = vmatpush1.bf16.msra.mxu1 %v14746_v16  ;;  %5981 = vmatprep.subr.bf16.mxu0 %v14761_v18  ;;  %v2729_v16 = vld [vmem:[#allocation11 + $0xdf8] sm:$0xff]  ;;  %v14840_v18 = vcombine.low %v2704_v2, %v2712_v3  ;;  %v14923_v2 = vcombine.high %v2785_v60, %v2793_v21  ;;  %v16075_v3 = vadd.f32 %v19202_v35, %v2805_v59 }
 0x5c6   : > { %v19214_v32 = vpop.f32.mrb[8].mxu0  ;;  %6063 = vmatprep.subr.bf16.mxu1 %v14763_v22  ;;  %v14842_v22 = vcombine.low %v2705_v28, %v2713_v4  ;;  %v14859_v24 = vcombine.high %v2721_v15, %v2729_v16 }
 0x5c7   : > { %v19216_v38 = vpop.f32.mrb[16].mxu1  ;;  %v19218_v39 = vpop.f32.mrb[9].mxu0 }
 0x5c8   : > { %v19220_v41 = vpop.f32.mrb[17].mxu1  ;;  %v5681_v9 = vpop.f32.mrb[10].mxu0  ;;  %5982 = vmatpush1.bf16.msra.mxu0 %v14760_v27  ;;  %v2737_v27 = vld [vmem:[#allocation11 + $0xe38] sm:$0xff] }
 0x5c9   : > { %v5763_v19 = vpop.f32.mrb[18].mxu1  ;;  %6064 = vmatpush1.bf16.msra.mxu1 %v14762_v29  ;;  %v5682_v44 = vpop.f32.mrb[11].mxu0  ;;  %5983 = vmatprep.subr.bf16.mxu0 %v14777_v30  ;;  %v2745_v29 = vld [vmem:[#allocation11 + $0xe78] sm:$0xff]  ;;  %v14856_v30 = vcombine.low %v2720_v13, %v2728_v14  ;;  %v16718_v14 = vld [vmem:[#allocation14] sm:$0xff]  }
 0x5ca   : > { %v5764_v47 = vpop.f32.mrb[19].mxu1  ;;  %6065 = vmatprep.subr.bf16.mxu1 %v14779_v33  ;;  %v14858_v33 = vcombine.low %v2721_v15, %v2729_v16  ;;  %v14875_v37 = vcombine.high %v2737_v27, %v2745_v29  ;;  %v2753_v9 = vld [vmem:[#allocation11 + $0xeb8] sm:$0xff]  ;;  %v14872_v19 = vcombine.low %v2736_v25, %v2744_v26  ;;  %v14874_v44 = vcombine.low %v2737_v27, %v2745_v29  ;;  %v16719_v15 = vld [vmem:[#allocation14 + $0x80] sm:$0xff]   ;;  %v16725_v25 = vld [vmem:[#allocation14 + $0xd0] sm:$0xff]  }
 0x5cb   : > { %v2768_v47 = vld [vmem:[#allocation11 + $0xf30] sm:$0xff]  ;;  %v16720_v16 = vld [vmem:[#allocation14 + $0x48] sm:$0xff]   ;;  %v16726_v26 = vld [vmem:[#allocation14 + $0x10] sm:$0xff]  }
 0x5cc   : > { %5984 = vmatpush1.bf16.msra.mxu0 %v14776_v43  ;;  %v2761_v43 = vld [vmem:[#allocation11 + $0xef8] sm:$0xff]  ;;  %v16727_v27 = vld [vmem:[#allocation14 + $0x90] sm:$0xff]   ;;  %v16728_v29 = vld [vmem:[#allocation14 + $0x58] sm:$0xff]  }
 0x5cd   : > { %6066 = vmatpush1.bf16.msra.mxu1 %v14778_v45  ;;  %5985 = vmatprep.subr.bf16.mxu0 %v14793_v46  ;;  %v14889_v45 = vcombine.high %v2752_v40, %v2760_v61  ;;  %v14891_v46 = vcombine.high %v2753_v9, %v2761_v43  ;;  %v16734_v40 = vld [vmem:[#allocation14 + $0x20] sm:$0xff]  }
 0x5ce   : > { %6067 = vmatprep.subr.bf16.mxu1 %v14795_v48  ;;  %v2776_v48 = vld [vmem:[#allocation11 + $0xf70] sm:$0xff] }
 0x5cf   : > { %v16735_v61 = vld [vmem:[#allocation14 + $0xa0] sm:$0xff]  }
 0x5d0   : > { %5986 = vmatpush1.bf16.msra.mxu0 %v14792_v53  ;;  %v14890_v53 = vcombine.low %v2753_v9, %v2761_v43  ;;  %v16736_v9 = vld [vmem:[#allocation14 + $0x68] sm:$0xff]  }
 0x5d1   : > { %6068 = vmatpush1.bf16.msra.mxu1 %v14794_v54  ;;  %5987 = vmatprep.subr.bf16.mxu0 %v14809_v55  ;;  %v14905_v54 = vcombine.high %v2768_v47, %v2776_v48  ;;  %v14907_v55 = vcombine.high %v2769_v49, %v2777_v50  ;;  %v16737_v43 = vld [vmem:[#allocation14 + $0xe8] sm:$0xff]  }
 0x5d2   : > { %6069 = vmatprep.subr.bf16.mxu1 %v14811_v57  ;;  %v2784_v57 = vld [vmem:[#allocation11 + $0xfb0] sm:$0xff] }
 0x5d3   : > { %v14920_v4 = vcombine.low %v2784_v57, %v2792_v58 }
 0x5d4   : > { %5988 = vmatpush1.bf16.msra.mxu0 %v14808_v62  ;;  %v2813_v62 = vrot.slane %v19222_v51, %v19149_v20 }
 0x5d5   : > { %6070 = vmatpush1.bf16.msra.mxu1 %v14810_v63  ;;  %5989 = vmatprep.subr.bf16.mxu0 %v14825_v0  ;;  %v14904_v63 = vcombine.low %v2768_v47, %v2776_v48  ;;  %v14906_v0 = vcombine.low %v2769_v49, %v2777_v50  ;;  %v16739_v47 = vld [vmem:[#allocation14 + $0xa8] sm:$0xff]   ;;  %v16740_v48 = vld [vmem:[#allocation14 + $0x70] sm:$0xff]   ;;  %v2809_v49 = vrot.slane %v19222_v51, %v19146_v17 }
 0x5d6   : > { %6071 = vmatprep.subr.bf16.mxu1 %v14827_v1  ;;  %v14921_v1 = vcombine.high %v2784_v57, %v2792_v58  ;;  %v16077_v28 = vadd.f32 %v19204_v36, %v2813_v62  ;;  %v16721_v36 = vld [vmem:[#allocation14 + $0xc8] sm:$0xff]   ;;  %v16741_v50 = vld [vmem:[#allocation14 + $0xf0] sm:$0xff]   ;;  %v16744_v58 = vld [vmem:[#allocation14 + $0x78] sm:$0xff]  }
 0x5d7   : > { %v16743_v57 = vld [vmem:[#allocation14 + $0xb0] sm:$0xff]   ;;  %v16076_v59 = vadd.f32 %v19200_v56, %v2809_v49  ;;  %v16750_v56 = vld [vmem:[#allocation14 + $0x100] sm:$0xff]   ;;  %v16776_v49 = vld [vmem:[#allocation14 + $0x178] sm:$0xff]  }
 0x5d8   : > { %5990 = vmatpush1.bf16.msra.mxu0 %v14824_v5  ;;  %v14922_v5 = vcombine.low %v2785_v60, %v2793_v21  ;;  %v6097_v13 = vmax.f32 %v16077_v28, 0.0  ;;  %v16745_v60 = vld [vmem:[#allocation14 + $0xf8] sm:$0xff]  }
 0x5d9   : > { %6072 = vmatpush1.bf16.msra.mxu1 %v14826_v6  ;;  %5991 = vmatprep.subr.bf16.mxu0 %v14841_v11  ;;  %v16716_v6 = vld [vmem:[#allocation14 + $0x40] sm:$0xff]  }
 0x5da   : > { %6073 = vmatprep.subr.bf16.mxu1 %v14843_v12  ;;  %v16717_v11 = vld [vmem:[#allocation14 + $0xc0] sm:$0xff]   ;;  %v6095_v12 = vmax.f32 %v16075_v3, 0.0 }
 0x5db   : > { %v16749_v3 = vld [vmem:[#allocation14 + $0x1c0] sm:$0xff]  }
 0x5dc   : > { %5992 = vmatpush1.bf16.msra.mxu0 %v14840_v18  ;;  %v6111_v35 = vpack.c.bf16 %v6095_v12, %v6095_v12  ;;  %v6113_v18 = vpack.c.bf16 %v6097_v13, %v6097_v13  ;;  %v16753_v12 = vld [vmem:[#allocation14 + $0x1c8] sm:$0xff]  }
 0x5dd   : > { %6074 = vmatpush1.bf16.msra.mxu1 %v14842_v22  ;;  %5993 = vmatprep.subr.bf16.mxu0 %v14857_v23  ;;  %v16722_v22 = vld [vmem:[#allocation14 + $0x8] sm:$0xff]  }
 0x5de   : > { %6075 = vmatprep.subr.bf16.mxu1 %v14859_v24  ;;  %v16723_v23 = vld [vmem:[#allocation14 + $0x88] sm:$0xff]   ;;  %v16724_v24 = vld [vmem:[#allocation14 + $0x50] sm:$0xff]  }
 0x5e0   : > { %5994 = vmatpush1.bf16.msra.mxu0 %v14856_v30  ;;  %v16729_v30 = vld [vmem:[#allocation14 + $0xd8] sm:$0xff]  }
 0x5e1   : > { %6076 = vmatpush1.bf16.msra.mxu1 %v14858_v33  ;;  %5995 = vmatprep.subr.bf16.mxu0 %v14873_v34  ;;  %v16731_v33 = vld [vmem:[#allocation14 + $0x98] sm:$0xff]   ;;  %v16732_v34 = vld [vmem:[#allocation14 + $0x60] sm:$0xff]  }
 0x5e2   : > { %6077 = vmatprep.subr.bf16.mxu1 %v14875_v37  ;;  %v16733_v37 = vld [vmem:[#allocation14 + $0xe0] sm:$0xff]  }
 0x5e4   : > { %5996 = vmatpush1.bf16.msra.mxu0 %v14872_v19  ;;  %v19233_v19 = vsub.s32 5, %v19131_v7 }
 0x5e5   : > { %6078 = vmatpush1.bf16.msra.mxu1 %v14874_v44  ;;  %5997 = vmatprep.subr.bf16.mxu0 %v14889_v45  ;;  %v19236_v44 = vsub.s32 7, %v19131_v7  ;;  %v16738_v45 = vld [vmem:[#allocation14 + $0x28] sm:$0xff]  }
 0x5e6   : > { %6079 = vmatprep.subr.bf16.mxu1 %v14891_v46  ;;  %v2801_v46 = vrot.slane %v19222_v51, %v19134_v8 }
 0x5e8   : > { %5998 = vmatpush1.bf16.msra.mxu0 %v14888_v52  ;;  %v2821_v52 = vrot.slane %v19222_v51, %v19233_v19 }
 0x5e9   : > { %6080 = vmatpush1.bf16.msra.mxu1 %v14890_v53  ;;  %5999 = vmatprep.subr.bf16.mxu0 %v14905_v54  ;;  %v2829_v53 = vrot.slane %v19222_v51, %v19236_v44  ;;  %v16742_v54 = vld [vmem:[#allocation14 + $0x30] sm:$0xff]  }
 0x5ea   : > { %6081 = vmatprep.subr.bf16.mxu1 %v14907_v55  ;;  %v16074_v55 = vadd.f32 %v19198_v31, %v2801_v46  ;;  %v16079_v21 = vadd.f32 %v19218_v39, %v2821_v52  ;;  %v6096_v31 = vmax.f32 %v16076_v59, 0.0  ;;  %v16751_v39 = vld [vmem:[#allocation14 + $0x180] sm:$0xff]   ;;  %v16773_v46 = vld [vmem:[#allocation14 + $0x1f0] sm:$0xff]   ;;  %v16777_v52 = vld [vmem:[#allocation14 + $0x1f8] sm:$0xff]  }
 0x5eb   : > { %v16081_v62 = vadd.f32 %v19220_v41, %v2829_v53  ;;  %v16752_v41 = vld [vmem:[#allocation14 + $0x148] sm:$0xff]   ;;  %v16778_v53 = vld [vmem:[#allocation14 + $0x138] sm:$0xff]  }
 0x5ec   : > { %6000 = vmatpush1.bf16.msra.mxu0 %v14904_v63  ;;  %v16746_v63 = vld [vmem:[#allocation14 + $0x38] sm:$0xff]   ;;  %v6099_v28 = vmax.f32 %v16079_v21, 0.0  ;;  %v16784_v21 = vld [vmem:[#allocation14 + $0x248] sm:$0xff]  }
 0x5ed   : > { %6082 = vmatpush1.bf16.msra.mxu1 %v14906_v0  ;;  %6001 = vmatprep.subr.bf16.mxu0 %v14921_v1  ;;  %v6094_v0 = vmax.f32 %v16074_v55, 0.0  ;;  %v16747_v1 = vld [vmem:[#allocation14 + $0xb8] sm:$0xff]   ;;  %v16780_v55 = vld [vmem:[#allocation14 + $0x240] sm:$0xff]  }
 0x5ee   : > { %6083 = vmatprep.subr.bf16.mxu1 %v14923_v2  ;;  %v16748_v2 = vld [vmem:[#allocation14 + $0x140] sm:$0xff]  }
 0x5f0   : > { %6002 = vmatpush1.bf16.msra.mxu0 %v14920_v4  ;;  %v6101_v4 = vmax.f32 %v16081_v62, 0.0  ;;  %v16785_v62 = vld [vmem:[#allocation14 + $0x2c8] sm:$0xff]  }
 0x5f1   : > { %6084 = vmatpush1.bf16.msra.mxu1 %v14922_v5  ;;  %15894 = vmatprep.subr.bf16.mxu0 %v16716_v6  ;;  %v6110_v5 = vpack.c.bf16 %v6094_v0, %v6094_v0  ;;  %v6112_v6 = vpack.c.bf16 %v6096_v31, %v6096_v31  ;;  %v16787_v0 = vld [vmem:[#allocation14 + $0x288] sm:$0xff]   ;;  %v16790_v31 = vld [vmem:[#allocation14 + $0x210] sm:$0xff]  }
 0x5f2   : > { %15916 = vmatprep.subr.bf16.mxu1 %v16717_v11  ;;  %v6115_v11 = vpack.c.bf16 %v6099_v28, %v6099_v28  ;;  %v6117_v13 = vpack.c.bf16 %v6101_v4, %v6101_v4  ;;  %v16792_v28 = vld [vmem:[#allocation14 + $0x258] sm:$0xff]  }
 0x5f3   : > { %6004 = vmatmul.mubr.bf16.vlgmr.msra.gmra.mrb[16].mxu0 %v19180_v42  ;;  %v16793_v4 = vld [vmem:[#allocation14 + $0x2d8] sm:$0xff]  }
 0x5f4   : > { %6086 = vmatmul.mubr.bf16.vlgmr.msra.gmra.mrb[24].mxu1 %v19180_v42  ;;  %15895 = vmatpush3.bf16.msra.mxu0 %v16718_v14  ;;  %v16730_v42 = vld [vmem:[#allocation14 + $0x18] sm:$0xff]   ;;  %v16754_v14 = vld [vmem:[#allocation14 + $0x108] sm:$0xff]  }
 0x5f5   : > { %7189 = vmatprep.mubr.bf16.mxu0 %v6111_v35  ;;  %15917 = vmatpush3.bf16.msra.mxu1 %v16719_v15  ;;  %v16755_v15 = vld [vmem:[#allocation14 + $0x188] sm:$0xff]   ;;  %v16757_v35 = vld [vmem:[#allocation14 + $0x1d0] sm:$0xff]  }
 0x5f6   : > { %7229 = vmatprep.mubr.bf16.mxu1 %v6113_v18  ;;  %15896 = vmatprep.subr.bf16.mxu0 %v16720_v16  ;;  %v16756_v16 = vld [vmem:[#allocation14 + $0x150] sm:$0xff]  }
 0x5f7   : > { %15918 = vmatprep.subr.bf16.mxu1 %v16721_v36  ;;  %v16758_v36 = vld [vmem:[#allocation14 + $0x110] sm:$0xff]  }
 0x5f8   : > { %15897 = vmatpush3.bf16.msra.mxu0 %v16722_v22  ;;  %v16759_v18 = vld [vmem:[#allocation14 + $0x190] sm:$0xff]   ;;  %v16760_v22 = vld [vmem:[#allocation14 + $0x158] sm:$0xff]  }
 0x5f9   : > { %15919 = vmatpush3.bf16.msra.mxu1 %v16723_v23  ;;  %15898 = vmatprep.subr.bf16.mxu0 %v16724_v24  ;;  %v16761_v23 = vld [vmem:[#allocation14 + $0x1d8] sm:$0xff]  }
 0x5fa   : > { %15920 = vmatprep.subr.bf16.mxu1 %v16725_v25  ;;  %v16762_v24 = vld [vmem:[#allocation14 + $0x118] sm:$0xff]  }
 0x5fb   : > { %v16763_v25 = vld [vmem:[#allocation14 + $0x198] sm:$0xff]  }
 0x5fc   : > { %15899 = vmatpush3.bf16.msra.mxu0 %v16726_v26  ;;  %v16764_v26 = vld [vmem:[#allocation14 + $0x160] sm:$0xff]  }
 0x5fd   : > { %15921 = vmatpush3.bf16.msra.mxu1 %v16727_v27  ;;  %15900 = vmatprep.subr.bf16.mxu0 %v16728_v29  ;;  %v16765_v27 = vld [vmem:[#allocation14 + $0x1e0] sm:$0xff]  }
 0x5fe   : > { %15922 = vmatprep.subr.bf16.mxu1 %v16729_v30  ;;  %v16766_v29 = vld [vmem:[#allocation14 + $0x120] sm:$0xff]   ;;  %v19251_v30 = vsub.s32 4, %v19131_v7 }
 0x600   : > { %15901 = vmatpush3.bf16.msra.mxu0 %v16730_v42  ;;  %v16767_v42 = vld [vmem:[#allocation14 + $0x1a0] sm:$0xff]  }
 0x601   : > { %15923 = vmatpush3.bf16.msra.mxu1 %v16731_v33  ;;  %15902 = vmatprep.subr.bf16.mxu0 %v16732_v34  ;;  %v16768_v33 = vld [vmem:[#allocation14 + $0x168] sm:$0xff]   ;;  %v19254_v34 = vsub.s32 6, %v19131_v7 }
 0x602   : > { %15924 = vmatprep.subr.bf16.mxu1 %v16733_v37  ;;  %v16769_v37 = vld [vmem:[#allocation14 + $0x1e8] sm:$0xff]  }
 0x604   : > { %15903 = vmatpush3.bf16.msra.mxu0 %v16734_v40  ;;  %v16770_v40 = vld [vmem:[#allocation14 + $0x128] sm:$0xff]  }
 0x605   : > { %15925 = vmatpush3.bf16.msra.mxu1 %v16735_v61  ;;  %15904 = vmatprep.subr.bf16.mxu0 %v16736_v9  ;;  %v2817_v61 = vrot.slane %v19222_v51, %v19251_v30  ;;  %v16771_v9 = vld [vmem:[#allocation14 + $0x1a8] sm:$0xff]  }
 0x606   : > { %15926 = vmatprep.subr.bf16.mxu1 %v16737_v43  ;;  %v16772_v43 = vld [vmem:[#allocation14 + $0x170] sm:$0xff]  }
 0x607   : > { %v16078_v7 = vadd.f32 %v19214_v32, %v2817_v61  ;;  %v16782_v32 = vld [vmem:[#allocation14 + $0x200] sm:$0xff]  }
 0x608   : > { %15905 = vmatpush3.bf16.msra.mxu0 %v16738_v45  ;;  %v2825_v45 = vrot.slane %v19222_v51, %v19254_v34  ;;  %v16779_v51 = vld [vmem:[#allocation14 + $0x1b8] sm:$0xff]  }
 0x609   : > { %15927 = vmatpush3.bf16.msra.mxu1 %v16739_v47  ;;  %15906 = vmatprep.subr.bf16.mxu0 %v16740_v48  ;;  %v16774_v47 = vld [vmem:[#allocation14 + $0x130] sm:$0xff]  }
 0x60a   : > { %15928 = vmatprep.subr.bf16.mxu1 %v16741_v50  ;;  %v16775_v48 = vld [vmem:[#allocation14 + $0x1b0] sm:$0xff]   ;;  %v16080_v50 = vadd.f32 %v19216_v38, %v2825_v45 }
 0x60b   : > { %v16807_v45 = vld [vmem:[#allocation14 + $0x2b0] sm:$0xff]  }
 0x60c   : > { %15907 = vmatpush3.bf16.msra.mxu0 %v16742_v54  ;;  %v6098_v54 = vmax.f32 %v16078_v7, 0.0 }
 0x60d   : > { %15929 = vmatpush3.bf16.msra.mxu1 %v16743_v57  ;;  %15908 = vmatprep.subr.bf16.mxu0 %v16744_v58  ;;  %v6100_v57 = vmax.f32 %v16080_v50, 0.0  ;;  %v16781_v58 = vld [vmem:[#allocation14 + $0x2c0] sm:$0xff]  }
 0x60e   : > { %15930 = vmatprep.subr.bf16.mxu1 %v16745_v60  ;;  %v6114_v59 = vpack.c.bf16 %v6098_v54, %v6098_v54  ;;  %v16783_v60 = vld [vmem:[#allocation14 + $0x280] sm:$0xff]  }
 0x60f   : > { %v6116_v38 = vpack.c.bf16 %v6100_v57, %v6100_v57  ;;  %v16812_v57 = vld [vmem:[#allocation14 + $0x340] sm:$0xff]  }
 0x610   : > { %15909 = vmatpush3.bf16.msra.mxu0 %v16746_v63  ;;  %v16786_v63 = vld [vmem:[#allocation14 + $0x208] sm:$0xff]  }
 0x611   : > { %15931 = vmatpush3.bf16.msra.mxu1 %v16747_v1  ;;  %15938 = vmatprep.subr.bf16.mxu0 %v16748_v2  ;;  %v16788_v1 = vld [vmem:[#allocation14 + $0x250] sm:$0xff]  }
 0x612   : > { %15960 = vmatprep.subr.bf16.mxu1 %v16749_v3  ;;  %v16789_v2 = vld [vmem:[#allocation14 + $0x2d0] sm:$0xff]  }
 0x613   : > { %7190 = vmatmul.mubr.bf16.vlgmr.msra.gmra.mrb[20].mxu0 %v6110_v5  ;;  %v16791_v3 = vld [vmem:[#allocation14 + $0x290] sm:$0xff]   ;;  %v16795_v5 = vld [vmem:[#allocation14 + $0x298] sm:$0xff]  }
 0x614   : > { %7230 = vmatmul.mubr.bf16.vlgmr.msra.gmra.mrb[28].mxu1 %v6112_v6  ;;  %15939 = vmatpush3.bf16.msra.mxu0 %v16750_v56  ;;  %v16794_v56 = vld [vmem:[#allocation14 + $0x218] sm:$0xff]   ;;  %v16797_v6 = vld [vmem:[#allocation14 + $0x2e0] sm:$0xff]  }
 0x615   : > { %7269 = vmatprep.mubr.bf16.mxu0 %v6115_v11  ;;  %15961 = vmatpush3.bf16.msra.mxu1 %v16751_v39  ;;  %v16796_v39 = vld [vmem:[#allocation14 + $0x260] sm:$0xff]  }
 0x616   : > { %7309 = vmatprep.mubr.bf16.mxu1 %v6117_v13  ;;  %15940 = vmatprep.subr.bf16.mxu0 %v16752_v41  ;;  %v16798_v41 = vld [vmem:[#allocation14 + $0x220] sm:$0xff]   ;;  %v16800_v13 = vld [vmem:[#allocation14 + $0x268] sm:$0xff]  }
 0x617   : > { %15962 = vmatprep.subr.bf16.mxu1 %v16753_v12  ;;  %v16799_v11 = vld [vmem:[#allocation14 + $0x2a0] sm:$0xff]   ;;  %v19262_v12 = vld [vmem:[#allocation13 + $0x8] sm:$0xff] }
 0x618   : > { %15941 = vmatpush3.bf16.msra.mxu0 %v16754_v14  ;;  %v16801_v14 = vld [vmem:[#allocation14 + $0x2e8] sm:$0xff]  }
 0x619   : > { %15963 = vmatpush3.bf16.msra.mxu1 %v16755_v15  ;;  %15942 = vmatprep.subr.bf16.mxu0 %v16756_v16  ;;  %v2837_v15 = vrot.slane %v19262_v12, %v19139_v10  ;;  %v16802_v16 = vld [vmem:[#allocation14 + $0x228] sm:$0xff]  }
 0x61a   : > { %15964 = vmatprep.subr.bf16.mxu1 %v16757_v35  ;;  %v2833_v35 = vrot.slane %v19262_v12, %v19134_v8 }
 0x61c   : > { %15943 = vmatpush3.bf16.msra.mxu0 %v16758_v36  ;;  %v2845_v36 = vrot.slane %v19262_v12, %v19149_v20 }
 0x61d   : > { %15965 = vmatpush3.bf16.msra.mxu1 %v16759_v18  ;;  %15944 = vmatprep.subr.bf16.mxu0 %v16760_v22  ;;  %v16803_v18 = vld [vmem:[#allocation14 + $0x2a8] sm:$0xff]   ;;  %v16804_v22 = vld [vmem:[#allocation14 + $0x270] sm:$0xff]  }
 0x61e   : > { %15966 = vmatprep.subr.bf16.mxu1 %v16761_v23 }
 0x620   : > { %15945 = vmatpush3.bf16.msra.mxu0 %v16762_v24  ;;  %v2841_v24 = vrot.slane %v19262_v12, %v19146_v17 }
 0x621   : > { %15967 = vmatpush3.bf16.msra.mxu1 %v16763_v25  ;;  %15946 = vmatprep.subr.bf16.mxu0 %v16764_v26  ;;  %v16805_v25 = vld [vmem:[#allocation14 + $0x2f0] sm:$0xff]  }
 0x622   : > { %15968 = vmatprep.subr.bf16.mxu1 %v16765_v27 }
 0x624   : > { %15947 = vmatpush3.bf16.msra.mxu0 %v16766_v29 }
 0x625   : > { %15969 = vmatpush3.bf16.msra.mxu1 %v16767_v42  ;;  %15948 = vmatprep.subr.bf16.mxu0 %v16768_v33 }
 0x626   : > { %15970 = vmatprep.subr.bf16.mxu1 %v16769_v37  ;;  %v16806_v37 = vld [vmem:[#allocation14 + $0x230] sm:$0xff]  }
 0x628   : > { %15949 = vmatpush3.bf16.msra.mxu0 %v16770_v40 }
 0x629   : > { %15971 = vmatpush3.bf16.msra.mxu1 %v16771_v9  ;;  %15950 = vmatprep.subr.bf16.mxu0 %v16772_v43 }
 0x62a   : > { %15972 = vmatprep.subr.bf16.mxu1 %v16773_v46  ;;  %v16808_v46 = vld [vmem:[#allocation14 + $0x278] sm:$0xff]  }
 0x62c   : > { %15951 = vmatpush3.bf16.msra.mxu0 %v16774_v47 }
 0x62d   : > { %15973 = vmatpush3.bf16.msra.mxu1 %v16775_v48  ;;  %15952 = vmatprep.subr.bf16.mxu0 %v16776_v49  ;;  %v16809_v49 = vld [vmem:[#allocation14 + $0x2f8] sm:$0xff]  }
 0x62e   : > { %15974 = vmatprep.subr.bf16.mxu1 %v16777_v52 }
 0x630   : > { %15953 = vmatpush3.bf16.msra.mxu0 %v16778_v53  ;;  %v16810_v53 = vld [vmem:[#allocation14 + $0x238] sm:$0xff]  }
 0x631   : > { %15975 = vmatpush3.bf16.msra.mxu1 %v16779_v51  ;;  %15982 = vmatprep.subr.bf16.mxu0 %v16780_v55  ;;  %v16811_v55 = vld [vmem:[#allocation14 + $0x2b8] sm:$0xff]  }
 0x632   : > { %16004 = vmatprep.subr.bf16.mxu1 %v16781_v58 }
 0x633   : > { %7270 = vmatmul.mubr.bf16.vlgmr.msra.gmra.mrb[24].mxu0 %v6114_v59  ;;  %v16814_v59 = vld [vmem:[#allocation14 + $0x300] sm:$0xff]  }
 0x634   : > { %7310 = vmatmul.mubr.bf16.vlgmr.msra.gmra.mrb[32].mxu1 %v6116_v38  ;;  %15983 = vmatpush3.bf16.msra.mxu0 %v16782_v32  ;;  %v16813_v32 = vld [vmem:[#allocation14 + $0x3c0] sm:$0xff]   ;;  %v16816_v38 = vld [vmem:[#allocation14 + $0x348] sm:$0xff]  }
 0x635   : > { %16005 = vmatpush3.bf16.msra.mxu1 %v16783_v60  ;;  %15984 = vmatprep.subr.bf16.mxu0 %v16784_v21  ;;  %v16815_v21 = vld [vmem:[#allocation14 + $0x380] sm:$0xff]  }
 0x636   : > { %16006 = vmatprep.subr.bf16.mxu1 %v16785_v62 }
 0x638   : > { %15985 = vmatpush3.bf16.msra.mxu0 %v16786_v63  ;;  %v16817_v63 = vld [vmem:[#allocation14 + $0x3c8] sm:$0xff]  }
 0x639   : > { %16007 = vmatpush3.bf16.msra.mxu1 %v16787_v0  ;;  %15986 = vmatprep.subr.bf16.mxu0 %v16788_v1  ;;  %v16818_v0 = vld [vmem:[#allocation14 + $0x308] sm:$0xff]  }
 0x63a   : > { %16008 = vmatprep.subr.bf16.mxu1 %v16789_v2  ;;  %v16819_v1 = vld [vmem:[#allocation14 + $0x388] sm:$0xff]   ;;  %v16820_v2 = vld [vmem:[#allocation14 + $0x350] sm:$0xff]  }
 0x63c   : > { %15987 = vmatpush3.bf16.msra.mxu0 %v16790_v31  ;;  %v16821_v31 = vld [vmem:[#allocation14 + $0x3d0] sm:$0xff]  }
 0x63d   : > { %16009 = vmatpush3.bf16.msra.mxu1 %v16791_v3  ;;  %15988 = vmatprep.subr.bf16.mxu0 %v16792_v28  ;;  %v16822_v3 = vld [vmem:[#allocation14 + $0x310] sm:$0xff]  }
 0x63e   : > { %16010 = vmatprep.subr.bf16.mxu1 %v16793_v4  ;;  %v16823_v28 = vld [vmem:[#allocation14 + $0x390] sm:$0xff]   ;;  %v16824_v4 = vld [vmem:[#allocation14 + $0x358] sm:$0xff]  }
 0x640   : > { %15989 = vmatpush3.bf16.msra.mxu0 %v16794_v56  ;;  %v16825_v56 = vld [vmem:[#allocation14 + $0x3d8] sm:$0xff]  }
 0x641   : > { %16011 = vmatpush3.bf16.msra.mxu1 %v16795_v5  ;;  %15990 = vmatprep.subr.bf16.mxu0 %v16796_v39  ;;  %v16826_v5 = vld [vmem:[#allocation14 + $0x318] sm:$0xff]  }
 0x642   : > { %16012 = vmatprep.subr.bf16.mxu1 %v16797_v6  ;;  %v16827_v39 = vld [vmem:[#allocation14 + $0x398] sm:$0xff]   ;;  %v16828_v6 = vld [vmem:[#allocation14 + $0x360] sm:$0xff]  }
 0x644   : > { %15991 = vmatpush3.bf16.msra.mxu0 %v16798_v41  ;;  %v16829_v41 = vld [vmem:[#allocation14 + $0x3e0] sm:$0xff]  }
 0x645   : > { %16013 = vmatpush3.bf16.msra.mxu1 %v16799_v11  ;;  %15992 = vmatprep.subr.bf16.mxu0 %v16800_v13  ;;  %v16830_v11 = vld [vmem:[#allocation14 + $0x320] sm:$0xff]  }
 0x646   : > { %v5841_v23 = vpop.f32.mrb[12].mxu0  ;;  %16014 = vmatprep.subr.bf16.mxu1 %v16801_v14  ;;  %v16831_v13 = vld [vmem:[#allocation14 + $0x3a0] sm:$0xff]   ;;  %v16832_v14 = vld [vmem:[#allocation14 + $0x368] sm:$0xff]  }
 0x647   : > { %v5923_v26 = vpop.f32.mrb[20].mxu1  ;;  %v5843_v27 = vpop.f32.mrb[13].mxu0  ;;  %v16082_v40 = vadd.f32 %v5841_v23, %v2833_v35  ;;  %v16835_v35 = vld [vmem:[#allocation14 + $0x3a8] sm:$0xff]   ;;  %v16839_v23 = vld [vmem:[#allocation14 + $0x3b0] sm:$0xff]  }
 0x648   : > { %v16083_v29 = vadd.f32 %v5843_v27, %v2837_v15  ;;  %v5925_v42 = vpop.f32.mrb[21].mxu1  ;;  %v5845_v33 = vpop.f32.mrb[14].mxu0  ;;  %15993 = vmatpush3.bf16.msra.mxu0 %v16802_v16  ;;  %v16084_v47 = vadd.f32 %v5923_v26, %v2841_v24  ;;  %v16833_v15 = vld [vmem:[#allocation14 + $0x3e8] sm:$0xff]   ;;  %v16840_v24 = vld [vmem:[#allocation14 + $0x378] sm:$0xff]  }
 0x649   : > { %v16085_v61 = vadd.f32 %v5925_v42, %v2845_v36  ;;  %v5927_v9 = vpop.f32.mrb[22].mxu1  ;;  %16015 = vmatpush3.bf16.msra.mxu1 %v16803_v18  ;;  %v5846_v43 = vpop.f32.mrb[15].mxu0  ;;  %15994 = vmatprep.subr.bf16.mxu0 %v16804_v22  ;;  %v6102_v54 = vmax.f32 %v16082_v40, 0.0  ;;  %v16834_v16 = vld [vmem:[#allocation14 + $0x328] sm:$0xff]   ;;  %v16836_v36 = vld [vmem:[#allocation14 + $0x370] sm:$0xff]   ;;  %v16842_v26 = vld [vmem:[#allocation14 + $0x338] sm:$0xff]  }
 0x64a   : > { %v6103_v7 = vmax.f32 %v16083_v29, 0.0  ;;  %v5928_v48 = vpop.f32.mrb[23].mxu1  ;;  %16016 = vmatprep.subr.bf16.mxu1 %v16805_v25  ;;  %v6104_v58 = vmax.f32 %v16084_v47, 0.0  ;;  %v16837_v18 = vld [vmem:[#allocation14 + $0x3f0] sm:$0xff]   ;;  %v16841_v25 = vld [vmem:[#allocation14 + $0x3f8] sm:$0xff]   ;;  %v7479_v29 = vld [vmem:[#allocation17] sm:$0xff]  ;;  %v2849_v9 = vrot.slane %v19262_v12, %v19251_v30  ;;  %v2857_v43 = vrot.slane %v19262_v12, %v19254_v34 }
 0x64b   : > { %v6105_v50 = vmax.f32 %v16085_v61, 0.0  ;;  %v6118_v60 = vpack.c.bf16 %v6102_v54, %v6102_v54  ;;  %v16838_v22 = vld [vmem:[#allocation14 + $0x330] sm:$0xff]   ;;  %v16843_v27 = vld [vmem:[#allocation14 + $0x3b8] sm:$0xff]   ;;  %v7487_v42 = vld [vmem:[#allocation17 + $0x40] sm:$0xff] }
 0x64c   : > { %v6119_v52 = vpack.c.bf16 %v6103_v7, %v6103_v7  ;;  %15995 = vmatpush3.bf16.msra.mxu0 %v16806_v37  ;;  %v6120_v62 = vpack.c.bf16 %v6104_v58, %v6104_v58  ;;  %v7480_v33 = vld [vmem:[#allocation17 + $0x8] sm:$0xff]  ;;  %v15054_v37 = vcombine.high %v7479_v29, %v7487_v42 }
 0x64d   : > { %v6121_v51 = vpack.c.bf16 %v6105_v50, %v6105_v50  ;;  %16017 = vmatpush3.bf16.msra.mxu1 %v16807_v45  ;;  %15996 = vmatprep.subr.bf16.mxu0 %v16808_v46  ;;  %v7488_v40 = vld [vmem:[#allocation17 + $0x48] sm:$0xff]  ;;  %v2853_v45 = vrot.slane %v19262_v12, %v19233_v19  ;;  %v2861_v46 = vrot.slane %v19262_v12, %v19236_v44 }
 0x64e   : > { %7349 = vmatprep.mubr.bf16.mxu0 %v6119_v52  ;;  %16018 = vmatprep.subr.bf16.mxu1 %v16809_v49  ;;  %v15056_v61 = vcombine.high %v7480_v33, %v7488_v40  ;;  %v7504_v12 = vld [vmem:[#allocation17 + $0xc8] sm:$0xff] }
 0x64f   : > { %7389 = vmatprep.mubr.bf16.mxu1 %v6121_v51 }
 0x650   : > { %15997 = vmatpush3.bf16.msra.mxu0 %v16810_v53 }
 0x651   : > { %16019 = vmatpush3.bf16.msra.mxu1 %v16811_v55  ;;  %16026 = vmatprep.subr.bf16.mxu0 %v16812_v57 }
 0x652   : > { %16048 = vmatprep.subr.bf16.mxu1 %v16813_v32 }
 0x653   : > { %7350 = vmatmul.mubr.bf16.vlgmr.msra.gmra.mrb[28].mxu0 %v6118_v60 }
 0x654   : > { %7390 = vmatmul.mubr.bf16.vlgmr.msra.gmra.mrb[36].mxu1 %v6120_v62  ;;  %16027 = vmatpush3.bf16.msra.mxu0 %v16814_v59 }
 0x655   : > { %16049 = vmatpush3.bf16.msra.mxu1 %v16815_v21  ;;  %16028 = vmatprep.subr.bf16.mxu0 %v16816_v38  ;;  %v7495_v21 = vld [vmem:[#allocation17 + $0x80] sm:$0xff] }
 0x656   : > { %16050 = vmatprep.subr.bf16.mxu1 %v16817_v63  ;;  %v7503_v38 = vld [vmem:[#allocation17 + $0xc0] sm:$0xff]  ;;  %v7496_v63 = vld [vmem:[#allocation17 + $0x88] sm:$0xff] }
 0x658   : > { %16029 = vmatpush3.bf16.msra.mxu0 %v16818_v0 }
 0x659   : > { %16051 = vmatpush3.bf16.msra.mxu1 %v16819_v1  ;;  %16030 = vmatprep.subr.bf16.mxu0 %v16820_v2  ;;  %v15053_v1 = vcombine.low %v7479_v29, %v7487_v42  ;;  %v7544_v29 = vld [vmem:[#allocation17 + $0x208] sm:$0xff] }
 0x65a   : > { %16052 = vmatprep.subr.bf16.mxu1 %v16821_v31  ;;  %v7552_v42 = vld [vmem:[#allocation17 + $0x248] sm:$0xff] }
 0x65c   : > { %16031 = vmatpush3.bf16.msra.mxu0 %v16822_v3  ;;  %v15055_v3 = vcombine.low %v7480_v33, %v7488_v40 }
 0x65d   : > { %16053 = vmatpush3.bf16.msra.mxu1 %v16823_v28  ;;  %16032 = vmatprep.subr.bf16.mxu0 %v16824_v4  ;;  %v15070_v28 = vcombine.high %v7495_v21, %v7503_v38 }
 0x65e   : > { %16054 = vmatprep.subr.bf16.mxu1 %v16825_v56  ;;  %v15072_v56 = vcombine.high %v7496_v63, %v7504_v12 }
 0x660   : > { %16033 = vmatpush3.bf16.msra.mxu0 %v16826_v5  ;;  %v7511_v5 = vld [vmem:[#allocation17 + $0x100] sm:$0xff] }
 0x661   : > { %16055 = vmatpush3.bf16.msra.mxu1 %v16827_v39  ;;  %16034 = vmatprep.subr.bf16.mxu0 %v16828_v6  ;;  %v7519_v39 = vld [vmem:[#allocation17 + $0x140] sm:$0xff]  ;;  %v7512_v6 = vld [vmem:[#allocation17 + $0x108] sm:$0xff] }
 0x662   : > { %16056 = vmatprep.subr.bf16.mxu1 %v16829_v41  ;;  %v7520_v41 = vld [vmem:[#allocation17 + $0x148] sm:$0xff] }
 0x664   : > { %16035 = vmatpush3.bf16.msra.mxu0 %v16830_v11  ;;  %v15069_v11 = vcombine.low %v7495_v21, %v7503_v38 }
 0x665   : > { %16057 = vmatpush3.bf16.msra.mxu1 %v16831_v13  ;;  %16036 = vmatprep.subr.bf16.mxu0 %v16832_v14  ;;  %v15071_v13 = vcombine.low %v7496_v63, %v7504_v12  ;;  %v15086_v14 = vcombine.high %v7511_v5, %v7519_v39 }
 0x666   : > { %16058 = vmatprep.subr.bf16.mxu1 %v16833_v15  ;;  %v15088_v15 = vcombine.high %v7512_v6, %v7520_v41 }
 0x668   : > { %16037 = vmatpush3.bf16.msra.mxu0 %v16834_v16  ;;  %v7527_v16 = vld [vmem:[#allocation17 + $0x180] sm:$0xff] }
 0x669   : > { %16059 = vmatpush3.bf16.msra.mxu1 %v16835_v35  ;;  %16038 = vmatprep.subr.bf16.mxu0 %v16836_v36  ;;  %v7535_v35 = vld [vmem:[#allocation17 + $0x1c0] sm:$0xff]  ;;  %v7528_v36 = vld [vmem:[#allocation17 + $0x188] sm:$0xff] }
 0x66a   : > { %16060 = vmatprep.subr.bf16.mxu1 %v16837_v18  ;;  %v7536_v18 = vld [vmem:[#allocation17 + $0x1c8] sm:$0xff]  ;;  %v15101_v33 = vcombine.low %v7527_v16, %v7535_v35 }
 0x66c   : > { %16039 = vmatpush3.bf16.msra.mxu0 %v16838_v22  ;;  %v15085_v22 = vcombine.low %v7511_v5, %v7519_v39 }
 0x66d   : > { %16061 = vmatpush3.bf16.msra.mxu1 %v16839_v23  ;;  %16040 = vmatprep.subr.bf16.mxu0 %v16840_v24  ;;  %v15087_v23 = vcombine.low %v7512_v6, %v7520_v41  ;;  %v15102_v24 = vcombine.high %v7527_v16, %v7535_v35  ;;  %v7575_v41 = vld [vmem:[#allocation17 + $0x300] sm:$0xff] }
 0x66e   : > { %16062 = vmatprep.subr.bf16.mxu1 %v16841_v25  ;;  %v15104_v25 = vcombine.high %v7528_v36, %v7536_v18 }
 0x670   : > { %16041 = vmatpush3.bf16.msra.mxu0 %v16842_v26  ;;  %v7543_v26 = vld [vmem:[#allocation17 + $0x200] sm:$0xff] }
 0x671   : > { %16063 = vmatpush3.bf16.msra.mxu1 %v16843_v27  ;;  %8331 = vmatprep.subr.bf16.mxu0 %v15054_v37  ;;  %v7551_v27 = vld [vmem:[#allocation17 + $0x240] sm:$0xff]  ;;  %v15103_v37 = vcombine.low %v7528_v36, %v7536_v18 }
 0x672   : > { %8372 = vmatprep.subr.bf16.mxu1 %v15056_v61  ;;  %v15118_v40 = vcombine.high %v7543_v26, %v7551_v27  ;;  %v15120_v61 = vcombine.high %v7544_v29, %v7552_v42 }
 0x6c6   : > { %v6005_v47 = vpop.f32.mrb[16].mxu0 }
 0x6c7   : > { %v16086_v7 = vadd.f32 %v6005_v47, %v2849_v9  ;;  %v6087_v48 = vpop.f32.mrb[24].mxu1  ;;  %v6007_v49 = vpop.f32.mrb[17].mxu0  ;;  %v7559_v9 = vld [vmem:[#allocation17 + $0x280] sm:$0xff]  ;;  %v15117_v47 = vcombine.low %v7543_v26, %v7551_v27 }
 0x6c8   : > { %v16088_v50 = vadd.f32 %v6087_v48, %v2857_v43  ;;  %v16087_v52 = vadd.f32 %v6007_v49, %v2853_v45  ;;  %v6089_v53 = vpop.f32.mrb[25].mxu1  ;;  %v6009_v54 = vpop.f32.mrb[18].mxu0  ;;  %v7567_v43 = vld [vmem:[#allocation17 + $0x2c0] sm:$0xff]  ;;  %v7560_v45 = vld [vmem:[#allocation17 + $0x288] sm:$0xff] }
 0x6c9   : > { %v6106_v51 = vmax.f32 %v16086_v7, 0.0  ;;  %v16089_v55 = vadd.f32 %v6089_v53, %v2861_v46  ;;  %v6091_v57 = vpop.f32.mrb[26].mxu1  ;;  %v6010_v58 = vpop.f32.mrb[19].mxu0  ;;  %v7568_v46 = vld [vmem:[#allocation17 + $0x2c8] sm:$0xff]  ;;  %v15119_v7 = vcombine.low %v7544_v29, %v7552_v42  ;;  %v15134_v48 = vcombine.high %v7559_v9, %v7567_v43 }
 0x6ca   : > { %v6108_v32 = vmax.f32 %v16088_v50, 0.0  ;;  %v6107_v59 = vmax.f32 %v16087_v52, 0.0  ;;  %v6092_v60 = vpop.f32.mrb[27].mxu1  ;;  %v15136_v49 = vcombine.high %v7560_v45, %v7568_v46  ;;  %v15133_v50 = vcombine.low %v7559_v9, %v7567_v43  ;;  %v7600_v29 = vld [vmem:[#allocation17 + $0x3c8] sm:$0xff] }
 0x6cb   : > { %v6109_v62 = vmax.f32 %v16089_v55, 0.0  ;;  %v6122_v2 = vpack.c.bf16 %v6106_v51, %v6106_v51  ;;  %v15135_v52 = vcombine.low %v7560_v45, %v7568_v46  ;;  %v14924_v51 = vld [vmem:[#allocation16] ss:$0 sm:$0xff] }
 0x6cc   : > { %v6123_v0 = vpack.c.bf16 %v6107_v59, %v6107_v59  ;;  %v6124_v4 = vpack.c.bf16 %v6108_v32, %v6108_v32 }
 0x6cd   : > { %v6125_v31 = vpack.c.bf16 %v6109_v62, %v6109_v62 }
 0x6ce   : > { %7429 = vmatprep.mubr.bf16.mxu0 %v6123_v0 }
 0x6cf   : > { %7469 = vmatprep.mubr.bf16.mxu1 %v6125_v31  ;;  %7430 = vmatmul.mubr.bf16.vlgmr.msra.gmra.mrb[32].mxu0 %v6122_v2 }
 0x6d0   : > { %7470 = vmatmul.mubr.bf16.vlgmr.msra.gmra.mrb[40].mxu1 %v6124_v4  ;;  %8332 = vmatpush1.bf16.msra.mxu0 %v15053_v1 }
 0x6d1   : > { %8373 = vmatpush1.bf16.msra.mxu1 %v15055_v3  ;;  %8333 = vmatprep.subr.bf16.mxu0 %v15070_v28 }
 0x6d2   : > { %8374 = vmatprep.subr.bf16.mxu1 %v15072_v56 }
 0x6d4   : > { %8334 = vmatpush1.bf16.msra.mxu0 %v15069_v11  ;;  %v7583_v11 = vld [vmem:[#allocation17 + $0x340] sm:$0xff] }
 0x6d5   : > { %8375 = vmatpush1.bf16.msra.mxu1 %v15071_v13  ;;  %8335 = vmatprep.subr.bf16.mxu0 %v15086_v14  ;;  %v7576_v13 = vld [vmem:[#allocation17 + $0x308] sm:$0xff]  ;;  %v15150_v14 = vcombine.high %v7575_v41, %v7583_v11  ;;  %v15149_v16 = vcombine.low %v7575_v41, %v7583_v11  ;;  %v7513_v41 = vld [vmem:[#allocation17 + $0x110] sm:$0xff] }
 0x6d6   : > { %8376 = vmatprep.subr.bf16.mxu1 %v15088_v15  ;;  %v7584_v15 = vld [vmem:[#allocation17 + $0x348] sm:$0xff]  ;;  %v7521_v11 = vld [vmem:[#allocation17 + $0x150] sm:$0xff] }
 0x6d7   : > { %v15151_v35 = vcombine.low %v7576_v13, %v7584_v15  ;;  %v15152_v36 = vcombine.high %v7576_v13, %v7584_v15  ;;  %v7514_v13 = vld [vmem:[#allocation17 + $0x118] sm:$0xff] }
 0x6d8   : > { %8336 = vmatpush1.bf16.msra.mxu0 %v15085_v22  ;;  %v7591_v22 = vld [vmem:[#allocation17 + $0x380] sm:$0xff] }
 0x6d9   : > { %8377 = vmatpush1.bf16.msra.mxu1 %v15087_v23  ;;  %8337 = vmatprep.subr.bf16.mxu0 %v15102_v24  ;;  %v7599_v23 = vld [vmem:[#allocation17 + $0x3c0] sm:$0xff]  ;;  %v7592_v24 = vld [vmem:[#allocation17 + $0x388] sm:$0xff] }
 0x6da   : > { %8378 = vmatprep.subr.bf16.mxu1 %v15104_v25  ;;  %v15166_v27 = vcombine.high %v7591_v22, %v7599_v23  ;;  %v15168_v9 = vcombine.high %v7592_v24, %v7600_v29 }
 0x6dc   : > { %8338 = vmatpush1.bf16.msra.mxu0 %v15101_v33 }
 0x6dd   : > { %8379 = vmatpush1.bf16.msra.mxu1 %v15103_v37  ;;  %8339 = vmatprep.subr.bf16.mxu0 %v15118_v40  ;;  %v15165_v40 = vcombine.low %v7591_v22, %v7599_v23  ;;  %v7537_v22 = vld [vmem:[#allocation17 + $0x1d0] sm:$0xff]  ;;  %v7530_v23 = vld [vmem:[#allocation17 + $0x198] sm:$0xff] }
 0x6de   : > { %8380 = vmatprep.subr.bf16.mxu1 %v15120_v61  ;;  %v15167_v61 = vcombine.low %v7592_v24, %v7600_v29  ;;  %v7538_v24 = vld [vmem:[#allocation17 + $0x1d8] sm:$0xff] }
 0x6df   : > { %v15108_v29 = vcombine.high %v7530_v23, %v7538_v24 }
 0x6e0   : > { %8340 = vmatpush1.bf16.msra.mxu0 %v15117_v47 }
 0x6e1   : > { %8381 = vmatpush1.bf16.msra.mxu1 %v15119_v7  ;;  %8341 = vmatprep.subr.bf16.mxu0 %v15134_v48  ;;  %v7481_v48 = vld [vmem:[#allocation17 + $0x10] sm:$0xff] }
 0x6e2   : > { %8382 = vmatprep.subr.bf16.mxu1 %v15136_v49  ;;  %v7489_v49 = vld [vmem:[#allocation17 + $0x50] sm:$0xff] }
 0x6e4   : > { %8342 = vmatpush1.bf16.msra.mxu0 %v15133_v50  ;;  %v7482_v50 = vld [vmem:[#allocation17 + $0x18] sm:$0xff] }
 0x6e5   : > { %8383 = vmatpush1.bf16.msra.mxu1 %v15135_v52  ;;  %8343 = vmatprep.subr.bf16.mxu0 %v15150_v14  ;;  %v18534_v52 = vmov 0   ;;  %v7522_v14 = vld [vmem:[#allocation17 + $0x158] sm:$0xff] }
 0x6e6   : > { %v15910_v53 = vpop.f32.mrb[20].mxu0  ;;  %8384 = vmatprep.subr.bf16.mxu1 %v15152_v36  ;;  %8363 = vmatprep.mubr.bf16.mxu0 %v18534_v52  ;;  %v15092_v36 = vcombine.high %v7514_v13, %v7522_v14 }
 0x6e7   : > { %v15932_v54 = vpop.f32.mrb[28].mxu1  ;;  %v15911_v55 = vpop.f32.mrb[21].mxu0  ;;  %8404 = vmatprep.mubr.bf16.mxu1 %v18534_v52 }
 0x6e8   : > { %v15912_v57 = vadd.f32 %v15911_v55, %v15910_v53  ;;  %v15933_v58 = vpop.f32.mrb[29].mxu1  ;;  %v15913_v32 = vpop.f32.mrb[22].mxu0  ;;  %8344 = vmatpush1.bf16.msra.mxu0 %v15149_v16  ;;  %v15057_v53 = vcombine.low %v7481_v48, %v7489_v49 }
 0x6e9   : > { %v15934_v59 = vadd.f32 %v15933_v58, %v15932_v54  ;;  %v15935_v60 = vpop.f32.mrb[30].mxu1  ;;  %v15914_v21 = vpop.f32.mrb[23].mxu0  ;;  %8385 = vmatpush1.bf16.msra.mxu1 %v15151_v35  ;;  %8345 = vmatprep.subr.bf16.mxu0 %v15166_v27  ;;  %v15058_v54 = vcombine.high %v7481_v48, %v7489_v49  ;;  %v15090_v35 = vcombine.high %v7513_v41, %v7521_v11  ;;  %v7570_v48 = vld [vmem:[#allocation17 + $0x2d8] sm:$0xff] }
 0x6ea   : > { %v7192_v38 = vadd.f32 %v15912_v57, %v14924_v51  ;;  %v15936_v62 = vpop.f32.mrb[31].mxu1  ;;  %8386 = vmatprep.subr.bf16.mxu1 %v15168_v9  ;;  %v7490_v51 = vld [vmem:[#allocation17 + $0x58] sm:$0xff]  ;;  %v15107_v9 = vcombine.low %v7530_v23, %v7538_v24  ;;  %v7515_v23 = vld [vmem:[#allocation17 + $0x120] sm:$0xff] }
 0x6eb   : > { %v15059_v57 = vcombine.low %v7482_v50, %v7490_v51  ;;  %v15060_v58 = vcombine.high %v7482_v50, %v7490_v51  ;;  %v7577_v51 = vld [vmem:[#allocation17 + $0x310] sm:$0xff]  ;;  %v7523_v24 = vld [vmem:[#allocation17 + $0x160] sm:$0xff] }
 0x6ec   : > { %v7232_v63 = vadd.f32 %v15934_v59, %v7192_v38  ;;  %8346 = vmatpush1.bf16.msra.mxu0 %v15165_v40  ;;  %v7554_v40 = vld [vmem:[#allocation17 + $0x258] sm:$0xff] }
 0x6ed   : > { %8387 = vmatpush1.bf16.msra.mxu1 %v15167_v61  ;;  %8413 = vmatprep.subr.bf16.mxu0 %v15058_v54 }
 0x6ee   : > { %8454 = vmatprep.subr.bf16.mxu1 %v15060_v58  ;;  %v7586_v58 = vld [vmem:[#allocation17 + $0x358] sm:$0xff] }
 0x706   : > { %v15954_v12 = vpop.f32.mrb[24].mxu0 }
 0x707   : > { %v15976_v0 = vpop.f32.mrb[32].mxu1  ;;  %v15955_v1 = vpop.f32.mrb[25].mxu0 }
 0x708   : > { %v15956_v2 = vadd.f32 %v15955_v1, %v15954_v12  ;;  %v15977_v31 = vpop.f32.mrb[33].mxu1  ;;  %v15957_v3 = vpop.f32.mrb[26].mxu0 }
 0x709   : > { %v15978_v28 = vadd.f32 %v15977_v31, %v15976_v0  ;;  %v15979_v4 = vpop.f32.mrb[34].mxu1  ;;  %v15958_v56 = vpop.f32.mrb[27].mxu0  ;;  %v7497_v31 = vld [vmem:[#allocation17 + $0x90] sm:$0xff] }
 0x70a   : > { %v7272_v5 = vadd.f32 %v15956_v2, %v7232_v63  ;;  %v15980_v39 = vpop.f32.mrb[35].mxu1  ;;  %v7505_v3 = vld [vmem:[#allocation17 + $0xd0] sm:$0xff]  ;;  %v7506_v4 = vld [vmem:[#allocation17 + $0xd8] sm:$0xff] }
 0x70b   : > { %v15074_v39 = vcombine.high %v7497_v31, %v7505_v3  ;;  %v15073_v15 = vcombine.low %v7497_v31, %v7505_v3  ;;  %v7483_v3 = vld [vmem:[#allocation17 + $0x20] sm:$0xff] }
 0x70c   : > { %v7312_v6 = vadd.f32 %v15978_v28, %v7272_v5  ;;  %v7498_v28 = vld [vmem:[#allocation17 + $0x98] sm:$0xff] }
 0x70d   : > { %v15075_v16 = vcombine.low %v7498_v28, %v7506_v4 }
 0x726   : > { %v15998_v18 = vpop.f32.mrb[28].mxu0 }
 0x727   : > { %v16020_v25 = vpop.f32.mrb[36].mxu1  ;;  %v15999_v26 = vpop.f32.mrb[29].mxu0 }
 0x728   : > { %v16000_v42 = vadd.f32 %v15999_v26, %v15998_v18  ;;  %v16021_v33 = vpop.f32.mrb[37].mxu1  ;;  %v16001_v37 = vpop.f32.mrb[30].mxu0  ;;  %v7529_v18 = vld [vmem:[#allocation17 + $0x190] sm:$0xff]  ;;  %v15091_v26 = vcombine.low %v7514_v13, %v7522_v14  ;;  %v7499_v13 = vld [vmem:[#allocation17 + $0xa0] sm:$0xff] }
 0x729   : > { %v16022_v43 = vadd.f32 %v16021_v33, %v16020_v25  ;;  %v16023_v45 = vpop.f32.mrb[38].mxu1  ;;  %v16002_v46 = vpop.f32.mrb[31].mxu0  ;;  %v15089_v25 = vcombine.low %v7513_v41, %v7521_v11  ;;  %v15106_v27 = vcombine.high %v7529_v18, %v7537_v22  ;;  %v7553_v33 = vld [vmem:[#allocation17 + $0x250] sm:$0xff]  ;;  %v7546_v37 = vld [vmem:[#allocation17 + $0x218] sm:$0xff]  ;;  %v15105_v61 = vcombine.low %v7529_v18, %v7537_v22  ;;  %v7507_v14 = vld [vmem:[#allocation17 + $0xe0] sm:$0xff] }
 0x72a   : > { %v7352_v47 = vadd.f32 %v16000_v42, %v7312_v6  ;;  %v16024_v7 = vpop.f32.mrb[39].mxu1  ;;  %v15076_v6 = vcombine.high %v7498_v28, %v7506_v4  ;;  %v7545_v42 = vld [vmem:[#allocation17 + $0x210] sm:$0xff]  ;;  %v15124_v45 = vcombine.high %v7546_v37, %v7554_v40  ;;  %v15123_v50 = vcombine.low %v7546_v37, %v7554_v40  ;;  %v7491_v28 = vld [vmem:[#allocation17 + $0x60] sm:$0xff]  ;;  %v7484_v4 = vld [vmem:[#allocation17 + $0x28] sm:$0xff] }
 0x72b   : > { %v7561_v46 = vld [vmem:[#allocation17 + $0x290] sm:$0xff]  ;;  %v7562_v7 = vld [vmem:[#allocation17 + $0x298] sm:$0xff]  ;;  %v15121_v49 = vcombine.low %v7545_v42, %v7553_v33  ;;  %v15062_v41 = vcombine.high %v7483_v3, %v7491_v28  ;;  %v15078_v18 = vcombine.high %v7499_v13, %v7507_v14  ;;  %v7531_v37 = vld [vmem:[#allocation17 + $0x1a0] sm:$0xff] }
 0x72c   : > { %v7392_v55 = vadd.f32 %v16022_v43, %v7352_v47  ;;  %v15122_v43 = vcombine.high %v7545_v42, %v7553_v33  ;;  %v7569_v47 = vld [vmem:[#allocation17 + $0x2d0] sm:$0xff]  ;;  %v15140_v54 = vcombine.high %v7562_v7, %v7570_v48  ;;  %v15094_v42 = vcombine.high %v7515_v23, %v7523_v24  ;;  %v7539_v40 = vld [vmem:[#allocation17 + $0x1e0] sm:$0xff] }
 0x7a2   : > { %v16042_v32 = vpop.f32.mrb[32].mxu0 }
 0x7a3   : > { %v16064_v59 = vpop.f32.mrb[40].mxu1  ;;  %v16043_v60 = vpop.f32.mrb[33].mxu0 }
 0x7a4   : > { %v16044_v21 = vadd.f32 %v16043_v60, %v16042_v32  ;;  %v16065_v38 = vpop.f32.mrb[41].mxu1  ;;  %v16045_v62 = vpop.f32.mrb[34].mxu0  ;;  %v15137_v32 = vcombine.low %v7561_v46, %v7569_v47 }
 0x7a5   : > { %v16066_v63 = vadd.f32 %v16065_v38, %v16064_v59  ;;  %v16067_v12 = vpop.f32.mrb[42].mxu1  ;;  %v16046_v0 = vpop.f32.mrb[35].mxu0  ;;  %v15139_v59 = vcombine.low %v7562_v7, %v7570_v48  ;;  %v7593_v38 = vld [vmem:[#allocation17 + $0x390] sm:$0xff]  ;;  %v7547_v7 = vld [vmem:[#allocation17 + $0x220] sm:$0xff] }
 0x7a6   : > { %v7432_v1 = vadd.f32 %v16044_v21, %v7392_v55  ;;  %v16068_v2 = vpop.f32.mrb[43].mxu1  ;;  %v7585_v55 = vld [vmem:[#allocation17 + $0x350] sm:$0xff]  ;;  %v7602_v12 = vld [vmem:[#allocation17 + $0x3d8] sm:$0xff]  ;;  %v7555_v48 = vld [vmem:[#allocation17 + $0x260] sm:$0xff] }
 0x7a7   : > { %v15154_v60 = vcombine.high %v7577_v51, %v7585_v55  ;;  %v7601_v62 = vld [vmem:[#allocation17 + $0x3d0] sm:$0xff]  ;;  %v15153_v0 = vcombine.low %v7577_v51, %v7585_v55  ;;  %v15126_v51 = vcombine.high %v7547_v7, %v7555_v48 }
 0x7a8   : > { %v7472_v56 = vadd.f32 %v16066_v63, %v7432_v1  ;;  %v7594_v63 = vld [vmem:[#allocation17 + $0x398] sm:$0xff]  ;;  %v15170_v2 = vcombine.high %v7593_v38, %v7601_v62 }
 0x7a9   : > { %v15172_v31 = vcombine.high %v7594_v63, %v7602_v12 }
 0x7aa   : > { %v19283_v5 = vpack.c.bf16 %v7472_v56, %v7472_v56  ;;  %7477 = vst [vmem:[%s19285_s2] sm:$0xff] %v7472_v56  ;;  %v7492_v56 = vld [vmem:[#allocation17 + $0x68] sm:$0xff] }
 0x7ab   : > { %v15064_v11 = vcombine.high %v7484_v4, %v7492_v56 }
 0x7ac   : > { %8364 = vmatmul.mubr.bf16.vlgmr.msra.gmra.mrb[36].mxu0 %v19283_v5  ;;  %8405 = vmatmul.mubr.bf16.vlgmr.msra.gmra.mrb[44].mxu1 %v19283_v5 }
 0x7ad   : > { %8414 = vmatpush1.bf16.msra.mxu0 %v15057_v53  ;;  %8455 = vmatpush1.bf16.msra.mxu1 %v15059_v57  ;;  %v15138_v53 = vcombine.high %v7561_v46, %v7569_v47  ;;  %v7578_v57 = vld [vmem:[#allocation17 + $0x318] sm:$0xff]  ;;  %v15110_v46 = vcombine.high %v7531_v37, %v7539_v40 }
 0x7ae   : > { %8415 = vmatprep.subr.bf16.mxu0 %v15074_v39  ;;  %8456 = vmatprep.subr.bf16.mxu1 %v15076_v6  ;;  %v15156_v21 = vcombine.high %v7578_v57, %v7586_v58  ;;  %v15155_v1 = vcombine.low %v7578_v57, %v7586_v58  ;;  %v15169_v39 = vcombine.low %v7593_v38, %v7601_v62  ;;  %v7563_v57 = vld [vmem:[#allocation17 + $0x2a0] sm:$0xff] }
 0x7af   : > { %8445 = vmatprep.mubr.bf16.mxu0 %v18534_v52  ;;  %8486 = vmatprep.mubr.bf16.mxu1 %v18534_v52  ;;  %v15171_v6 = vcombine.low %v7594_v63, %v7602_v12  ;;  %v7571_v58 = vld [vmem:[#allocation17 + $0x2e0] sm:$0xff] }
 0x7b0   : > { %v15142_v38 = vcombine.high %v7563_v57, %v7571_v58  ;;  %v7579_v63 = vld [vmem:[#allocation17 + $0x320] sm:$0xff] }
 0x7b1   : > { %8416 = vmatpush1.bf16.msra.mxu0 %v15073_v15  ;;  %8457 = vmatpush1.bf16.msra.mxu1 %v15075_v16  ;;  %v7500_v15 = vld [vmem:[#allocation17 + $0xa8] sm:$0xff]  ;;  %v7587_v12 = vld [vmem:[#allocation17 + $0x360] sm:$0xff] }
 0x7b2   : > { %8417 = vmatprep.subr.bf16.mxu0 %v15090_v35  ;;  %8458 = vmatprep.subr.bf16.mxu1 %v15092_v36  ;;  %v7508_v16 = vld [vmem:[#allocation17 + $0xe8] sm:$0xff]  ;;  %v15061_v35 = vcombine.low %v7483_v3, %v7491_v28  ;;  %v15063_v36 = vcombine.low %v7484_v4, %v7492_v56  ;;  %v15158_v3 = vcombine.high %v7579_v63, %v7587_v12  ;;  %v7595_v4 = vld [vmem:[#allocation17 + $0x3a0] sm:$0xff] }
 0x7b3   : > { %v15080_v22 = vcombine.high %v7500_v15, %v7508_v16  ;;  %v7603_v56 = vld [vmem:[#allocation17 + $0x3e0] sm:$0xff] }
 0x7b5   : > { %8418 = vmatpush1.bf16.msra.mxu0 %v15089_v25  ;;  %8459 = vmatpush1.bf16.msra.mxu1 %v15091_v26  ;;  %v7516_v25 = vld [vmem:[#allocation17 + $0x128] sm:$0xff] }
 0x7b6   : > { %8419 = vmatprep.subr.bf16.mxu0 %v15106_v27  ;;  %8460 = vmatprep.subr.bf16.mxu1 %v15108_v29  ;;  %v7524_v26 = vld [vmem:[#allocation17 + $0x168] sm:$0xff]  ;;  %v15077_v27 = vcombine.low %v7499_v13, %v7507_v14  ;;  %v15079_v29 = vcombine.low %v7500_v15, %v7508_v16  ;;  %v15174_v13 = vcombine.high %v7595_v4, %v7603_v56  ;;  %v7485_v15 = vld [vmem:[#allocation17 + $0x30] sm:$0xff] }
 0x7b7   : > { %v15096_v33 = vcombine.high %v7516_v25, %v7524_v26  ;;  %v7493_v16 = vld [vmem:[#allocation17 + $0x70] sm:$0xff] }
 0x7b9   : > { %8420 = vmatpush1.bf16.msra.mxu0 %v15105_v61  ;;  %8461 = vmatpush1.bf16.msra.mxu1 %v15107_v9  ;;  %v7532_v61 = vld [vmem:[#allocation17 + $0x1a8] sm:$0xff] }
 0x7ba   : > { %8421 = vmatprep.subr.bf16.mxu0 %v15122_v43  ;;  %8462 = vmatprep.subr.bf16.mxu1 %v15124_v45  ;;  %v7540_v9 = vld [vmem:[#allocation17 + $0x1e8] sm:$0xff]  ;;  %v15093_v43 = vcombine.low %v7515_v23, %v7523_v24  ;;  %v15095_v45 = vcombine.low %v7516_v25, %v7524_v26  ;;  %v15066_v23 = vcombine.high %v7485_v15, %v7493_v16  ;;  %v7501_v25 = vld [vmem:[#allocation17 + $0xb0] sm:$0xff] }
 0x7bb   : > { %v15112_v47 = vcombine.high %v7532_v61, %v7540_v9  ;;  %v7509_v26 = vld [vmem:[#allocation17 + $0xf0] sm:$0xff] }
 0x7bd   : > { %8422 = vmatpush1.bf16.msra.mxu0 %v15121_v49  ;;  %8463 = vmatpush1.bf16.msra.mxu1 %v15123_v50  ;;  %v7548_v49 = vld [vmem:[#allocation17 + $0x228] sm:$0xff] }
 0x7be   : > { %8423 = vmatprep.subr.bf16.mxu0 %v15138_v53  ;;  %8464 = vmatprep.subr.bf16.mxu1 %v15140_v54  ;;  %v7556_v50 = vld [vmem:[#allocation17 + $0x268] sm:$0xff]  ;;  %v15109_v53 = vcombine.low %v7531_v37, %v7539_v40  ;;  %v15111_v54 = vcombine.low %v7532_v61, %v7540_v9  ;;  %v15082_v37 = vcombine.high %v7501_v25, %v7509_v26  ;;  %v7517_v61 = vld [vmem:[#allocation17 + $0x130] sm:$0xff] }
 0x7bf   : > { %v15128_v55 = vcombine.high %v7548_v49, %v7556_v50  ;;  %v7525_v9 = vld [vmem:[#allocation17 + $0x170] sm:$0xff] }
 0x7c1   : > { %8424 = vmatpush1.bf16.msra.mxu0 %v15137_v32  ;;  %8465 = vmatpush1.bf16.msra.mxu1 %v15139_v59  ;;  %v7564_v32 = vld [vmem:[#allocation17 + $0x2a8] sm:$0xff] }
 0x7c2   : > { %8425 = vmatprep.subr.bf16.mxu0 %v15154_v60  ;;  %8466 = vmatprep.subr.bf16.mxu1 %v15156_v21  ;;  %v7572_v59 = vld [vmem:[#allocation17 + $0x2e8] sm:$0xff]  ;;  %v15125_v60 = vcombine.low %v7547_v7, %v7555_v48  ;;  %v15127_v21 = vcombine.low %v7548_v49, %v7556_v50  ;;  %v15098_v7 = vcombine.high %v7517_v61, %v7525_v9  ;;  %v7533_v49 = vld [vmem:[#allocation17 + $0x1b0] sm:$0xff] }
 0x7c3   : > { %v15144_v62 = vcombine.high %v7564_v32, %v7572_v59  ;;  %v7541_v50 = vld [vmem:[#allocation17 + $0x1f0] sm:$0xff] }
 0x7c5   : > { %8426 = vmatpush1.bf16.msra.mxu0 %v15153_v0  ;;  %8467 = vmatpush1.bf16.msra.mxu1 %v15155_v1  ;;  %v7580_v0 = vld [vmem:[#allocation17 + $0x328] sm:$0xff] }
 0x7c6   : > { %8427 = vmatprep.subr.bf16.mxu0 %v15170_v2  ;;  %8468 = vmatprep.subr.bf16.mxu1 %v15172_v31  ;;  %v7588_v1 = vld [vmem:[#allocation17 + $0x368] sm:$0xff]  ;;  %v15141_v2 = vcombine.low %v7563_v57, %v7571_v58  ;;  %v15143_v31 = vcombine.low %v7564_v32, %v7572_v59  ;;  %v15114_v57 = vcombine.high %v7533_v49, %v7541_v50  ;;  %v7549_v32 = vld [vmem:[#allocation17 + $0x230] sm:$0xff] }
 0x7c7   : > { %v15160_v28 = vcombine.high %v7580_v0, %v7588_v1  ;;  %v7557_v59 = vld [vmem:[#allocation17 + $0x270] sm:$0xff] }
 0x7c9   : > { %8428 = vmatpush1.bf16.msra.mxu0 %v15169_v39  ;;  %8469 = vmatpush1.bf16.msra.mxu1 %v15171_v6  ;;  %v7596_v39 = vld [vmem:[#allocation17 + $0x3a8] sm:$0xff] }
 0x7ca   : > { %8495 = vmatprep.subr.bf16.mxu0 %v15062_v41  ;;  %8536 = vmatprep.subr.bf16.mxu1 %v15064_v11  ;;  %v7604_v6 = vld [vmem:[#allocation17 + $0x3e8] sm:$0xff]  ;;  %v15157_v41 = vcombine.low %v7579_v63, %v7587_v12  ;;  %v15159_v11 = vcombine.low %v7580_v0, %v7588_v1  ;;  %v15130_v63 = vcombine.high %v7549_v32, %v7557_v59  ;;  %v7565_v12 = vld [vmem:[#allocation17 + $0x2b0] sm:$0xff]  ;;  %v7566_v1 = vld [vmem:[#allocation17 + $0x2b8] sm:$0xff] }
 0x7cb   : > { %v15176_v14 = vcombine.high %v7596_v39, %v7604_v6  ;;  %v7573_v0 = vld [vmem:[#allocation17 + $0x2f0] sm:$0xff] }
 0x7cc   : > { %8446 = vmatmul.mubr.bf16.vlgmr.msra.gmra.mrb[40].mxu0 %v19283_v5  ;;  %8487 = vmatmul.mubr.bf16.vlgmr.msra.gmra.mrb[48].mxu1 %v19283_v5 }
 0x7cd   : > { %8496 = vmatpush1.bf16.msra.mxu0 %v15061_v35  ;;  %8537 = vmatpush1.bf16.msra.mxu1 %v15063_v36  ;;  %v7486_v35 = vld [vmem:[#allocation17 + $0x38] sm:$0xff] }
 0x7ce   : > { %8497 = vmatprep.subr.bf16.mxu0 %v15078_v18  ;;  %8538 = vmatprep.subr.bf16.mxu1 %v15080_v22  ;;  %v7494_v36 = vld [vmem:[#allocation17 + $0x78] sm:$0xff]  ;;  %v15173_v18 = vcombine.low %v7595_v4, %v7603_v56  ;;  %v15175_v22 = vcombine.low %v7596_v39, %v7604_v6  ;;  %v7581_v56 = vld [vmem:[#allocation17 + $0x330] sm:$0xff] }
 0x7cf   : > { %8527 = vmatprep.mubr.bf16.mxu0 %v18534_v52  ;;  %8568 = vmatprep.mubr.bf16.mxu1 %v18534_v52  ;;  %v15068_v24 = vcombine.high %v7486_v35, %v7494_v36  ;;  %v7589_v39 = vld [vmem:[#allocation17 + $0x370] sm:$0xff]  ;;  %v7582_v6 = vld [vmem:[#allocation17 + $0x338] sm:$0xff] }
 0x7d1   : > { %8498 = vmatpush1.bf16.msra.mxu0 %v15077_v27  ;;  %8539 = vmatpush1.bf16.msra.mxu1 %v15079_v29  ;;  %v7502_v27 = vld [vmem:[#allocation17 + $0xb8] sm:$0xff] }
 0x7d2   : > { %8499 = vmatprep.subr.bf16.mxu0 %v15094_v42  ;;  %8540 = vmatprep.subr.bf16.mxu1 %v15096_v33  ;;  %v7510_v29 = vld [vmem:[#allocation17 + $0xf8] sm:$0xff]  ;;  %v15065_v42 = vcombine.low %v7485_v15, %v7493_v16  ;;  %v15067_v33 = vcombine.low %v7486_v35, %v7494_v36  ;;  %v7597_v16 = vld [vmem:[#allocation17 + $0x3b0] sm:$0xff] }
 0x7d3   : > { %v15084_v40 = vcombine.high %v7502_v27, %v7510_v29  ;;  %v7605_v35 = vld [vmem:[#allocation17 + $0x3f0] sm:$0xff]  ;;  %v7598_v36 = vld [vmem:[#allocation17 + $0x3b8] sm:$0xff] }
 0x7d5   : > { %8500 = vmatpush1.bf16.msra.mxu0 %v15093_v43  ;;  %8541 = vmatpush1.bf16.msra.mxu1 %v15095_v45  ;;  %v7518_v43 = vld [vmem:[#allocation17 + $0x138] sm:$0xff] }
 0x7d6   : > { %8501 = vmatprep.subr.bf16.mxu0 %v15110_v46  ;;  %8542 = vmatprep.subr.bf16.mxu1 %v15112_v47  ;;  %v7526_v45 = vld [vmem:[#allocation17 + $0x178] sm:$0xff]  ;;  %v15081_v46 = vcombine.low %v7501_v25, %v7509_v26  ;;  %v15083_v47 = vcombine.low %v7502_v27, %v7510_v29  ;;  %v15177_v26 = vcombine.low %v7597_v16, %v7605_v35  ;;  %v16846_v29 = vld [vmem:[#allocation20 + $0x4] ss:$16 sps:$4 sm:$0xff]  }
 0x7d7   : > { %v15100_v48 = vcombine.high %v7518_v43, %v7526_v45 }
 0x7d9   : > { %8502 = vmatpush1.bf16.msra.mxu0 %v15109_v53  ;;  %8543 = vmatpush1.bf16.msra.mxu1 %v15111_v54  ;;  %v7534_v53 = vld [vmem:[#allocation17 + $0x1b8] sm:$0xff] }
 0x7da   : > { %8503 = vmatprep.subr.bf16.mxu0 %v15126_v51  ;;  %8544 = vmatprep.subr.bf16.mxu1 %v15128_v55  ;;  %v7542_v54 = vld [vmem:[#allocation17 + $0x1f8] sm:$0xff]  ;;  %v15097_v51 = vcombine.low %v7517_v61, %v7525_v9  ;;  %v15099_v55 = vcombine.low %v7518_v43, %v7526_v45  ;;  %v16850_v9 = vld [vmem:[#allocation20 + $0x20] ss:$16 sps:$4 sm:$0xff]   ;;  %v16858_v45 = vld [vmem:[#allocation20 + $0x44] ss:$16 sps:$4 sm:$0xff]  }
 0x7db   : > { %v15116_v58 = vcombine.high %v7534_v53, %v7542_v54  ;;  %v16855_v61 = vld [vmem:[#allocation20 + $0x2c] ss:$16 sps:$4 sm:$0xff]   ;;  %v16853_v43 = vld [vmem:[#allocation20 + $0x28] ss:$16 sps:$4 sm:$0xff]  }
 0x7dd   : > { %8504 = vmatpush1.bf16.msra.mxu0 %v15125_v60  ;;  %8545 = vmatpush1.bf16.msra.mxu1 %v15127_v21  ;;  %v7550_v60 = vld [vmem:[#allocation17 + $0x238] sm:$0xff] }
 0x7de   : > { %8505 = vmatprep.subr.bf16.mxu0 %v15142_v38  ;;  %8546 = vmatprep.subr.bf16.mxu1 %v15144_v62  ;;  %v7558_v21 = vld [vmem:[#allocation17 + $0x278] sm:$0xff]  ;;  %v15113_v38 = vcombine.low %v7533_v49, %v7541_v50  ;;  %v15115_v62 = vcombine.low %v7534_v53, %v7542_v54  ;;  %v16862_v50 = vld [vmem:[#allocation20 + $0x60] ss:$16 sps:$4 sm:$0xff]   ;;  %v16870_v53 = vld [vmem:[#allocation20 + $0x84] ss:$16 sps:$4 sm:$0xff]  }
 0x7df   : > { %v16867_v49 = vld [vmem:[#allocation20 + $0x6c] ss:$16 sps:$4 sm:$0xff]  }
 0x7e0   : > { %v16873_v54 = vld [vmem:[#allocation20 + $0x8c] ss:$16 sps:$4 sm:$0xff]  }
 0x7e1   : > { %8506 = vmatpush1.bf16.msra.mxu0 %v15141_v2  ;;  %8547 = vmatpush1.bf16.msra.mxu1 %v15143_v31  ;;  %v7574_v2 = vld [vmem:[#allocation17 + $0x2f8] sm:$0xff]  ;;  %v15129_v31 = vcombine.low %v7549_v32, %v7557_v59  ;;  %v16874_v32 = vld [vmem:[#allocation20 + $0xa0] ss:$16 sps:$4 sm:$0xff]  }
 0x7e2   : > { %8507 = vmatprep.subr.bf16.mxu0 %v15158_v3  ;;  %8548 = vmatprep.subr.bf16.mxu1 %v15160_v28  ;;  %v15131_v3 = vcombine.low %v7550_v60, %v7558_v21  ;;  %v15146_v28 = vcombine.high %v7565_v12, %v7573_v0  ;;  %v15148_v4 = vcombine.high %v7566_v1, %v7574_v2  ;;  %v16877_v59 = vld [vmem:[#allocation20 + $0xa8] ss:$16 sps:$4 sm:$0xff]  }
 0x7e5   : > { %8508 = vmatpush1.bf16.msra.mxu0 %v15157_v41  ;;  %8549 = vmatpush1.bf16.msra.mxu1 %v15159_v11  ;;  %v7590_v41 = vld [vmem:[#allocation17 + $0x378] sm:$0xff]  ;;  %v15145_v11 = vcombine.low %v7565_v12, %v7573_v0  ;;  %v16886_v12 = vld [vmem:[#allocation20 + $0xe0] ss:$16 sps:$4 sm:$0xff]  }
 0x7e6   : > { %8509 = vmatprep.subr.bf16.mxu0 %v15174_v13  ;;  %8550 = vmatprep.subr.bf16.mxu1 %v15176_v14  ;;  %v15147_v13 = vcombine.low %v7566_v1, %v7574_v2  ;;  %v15162_v14 = vcombine.high %v7581_v56, %v7589_v39  ;;  %v15164_v15 = vcombine.high %v7582_v6, %v7590_v41  ;;  %v16889_v0 = vld [vmem:[#allocation20 + $0xe8] ss:$16 sps:$4 sm:$0xff]   ;;  %v16894_v1 = vld [vmem:[#allocation20 + $0x104] ss:$16 sps:$4 sm:$0xff]   ;;  %v16897_v2 = vld [vmem:[#allocation20 + $0x10c] ss:$16 sps:$4 sm:$0xff]  }
 0x7e9   : > { %8510 = vmatpush1.bf16.msra.mxu0 %v15173_v18  ;;  %8551 = vmatpush1.bf16.msra.mxu1 %v15175_v22  ;;  %v7606_v18 = vld [vmem:[#allocation17 + $0x3f8] sm:$0xff]  ;;  %v15161_v22 = vcombine.low %v7581_v56, %v7589_v39  ;;  %v16898_v56 = vld [vmem:[#allocation20 + $0x120] ss:$16 sps:$4 sm:$0xff]  }
 0x7ea   : > { %8577 = vmatprep.subr.bf16.mxu0 %v15066_v23  ;;  %8618 = vmatprep.subr.bf16.mxu1 %v15068_v24  ;;  %v15163_v23 = vcombine.low %v7582_v6, %v7590_v41  ;;  %v15178_v24 = vcombine.high %v7597_v16, %v7605_v35  ;;  %v15180_v25 = vcombine.high %v7598_v36, %v7606_v18  ;;  %v16901_v39 = vld [vmem:[#allocation20 + $0x128] ss:$16 sps:$4 sm:$0xff]   ;;  %v16906_v6 = vld [vmem:[#allocation20 + $0x144] ss:$16 sps:$4 sm:$0xff]   ;;  %v16909_v41 = vld [vmem:[#allocation20 + $0x14c] ss:$16 sps:$4 sm:$0xff]  }
 0x7eb   : > { %v15179_v27 = vcombine.low %v7598_v36, %v7606_v18  ;;  %v16910_v16 = vld [vmem:[#allocation20 + $0x160] ss:$16 sps:$4 sm:$0xff]   ;;  %v16913_v35 = vld [vmem:[#allocation20 + $0x168] ss:$16 sps:$4 sm:$0xff]   ;;  %v16918_v36 = vld [vmem:[#allocation20 + $0x184] ss:$16 sps:$4 sm:$0xff]  }
 0x7ec   : > { %8528 = vmatmul.mubr.bf16.vlgmr.msra.gmra.mrb[44].mxu0 %v19283_v5  ;;  %8569 = vmatmul.mubr.bf16.vlgmr.msra.gmra.mrb[52].mxu1 %v19283_v5  ;;  %v16921_v18 = vld [vmem:[#allocation20 + $0x18c] ss:$16 sps:$4 sm:$0xff]  }
 0x7ed   : > { %8578 = vmatpush1.bf16.msra.mxu0 %v15065_v42  ;;  %8619 = vmatpush1.bf16.msra.mxu1 %v15067_v33  ;;  %v16849_v42 = vld [vmem:[#allocation20 + $0xc] ss:$16 sps:$4 sm:$0xff]   ;;  %v16844_v33 = vld [vmem:[#allocation20] ss:$16 sps:$4 sm:$0xff]  }
 0x7ee   : > { %8579 = vmatprep.subr.bf16.mxu0 %v15082_v37  ;;  %8620 = vmatprep.subr.bf16.mxu1 %v15084_v40  ;;  %v16847_v37 = vld [vmem:[#allocation20 + $0x8] ss:$16 sps:$4 sm:$0xff]   ;;  %v16852_v40 = vld [vmem:[#allocation20 + $0x24] ss:$16 sps:$4 sm:$0xff]  }
 0x7ef   : > { %8609 = vmatprep.mubr.bf16.mxu0 %v18534_v52  ;;  %8650 = vmatprep.mubr.bf16.mxu1 %v18534_v52  ;;  %v15132_v52 = vcombine.high %v7550_v60, %v7558_v21  ;;  %v16882_v60 = vld [vmem:[#allocation20 + $0xc4] ss:$16 sps:$4 sm:$0xff]   ;;  %v16885_v21 = vld [vmem:[#allocation20 + $0xcc] ss:$16 sps:$4 sm:$0xff]  }
 0x7f1   : > { %8580 = vmatpush1.bf16.msra.mxu0 %v15081_v46  ;;  %8621 = vmatpush1.bf16.msra.mxu1 %v15083_v47  ;;  %v16861_v46 = vld [vmem:[#allocation20 + $0x4c] ss:$16 sps:$4 sm:$0xff]   ;;  %v16856_v47 = vld [vmem:[#allocation20 + $0x40] ss:$16 sps:$4 sm:$0xff]  }
 0x7f2   : > { %8581 = vmatprep.subr.bf16.mxu0 %v15098_v7  ;;  %8622 = vmatprep.subr.bf16.mxu1 %v15100_v48  ;;  %v16859_v7 = vld [vmem:[#allocation20 + $0x48] ss:$16 sps:$4 sm:$0xff]   ;;  %v16864_v48 = vld [vmem:[#allocation20 + $0x64] ss:$16 sps:$4 sm:$0xff]  }
 0x7f5   : > { %8582 = vmatpush1.bf16.msra.mxu0 %v15097_v51  ;;  %8623 = vmatpush1.bf16.msra.mxu1 %v15099_v55  ;;  %v16868_v51 = vld [vmem:[#allocation20 + $0x80] ss:$16 sps:$4 sm:$0xff]   ;;  %v16871_v55 = vld [vmem:[#allocation20 + $0x88] ss:$16 sps:$4 sm:$0xff]  }
 0x7f6   : > { %8583 = vmatprep.subr.bf16.mxu0 %v15114_v57  ;;  %8624 = vmatprep.subr.bf16.mxu1 %v15116_v58  ;;  %v16876_v57 = vld [vmem:[#allocation20 + $0xa4] ss:$16 sps:$4 sm:$0xff]   ;;  %v16879_v58 = vld [vmem:[#allocation20 + $0xac] ss:$16 sps:$4 sm:$0xff]  }
 0x7f9   : > { %8584 = vmatpush1.bf16.msra.mxu0 %v15113_v38  ;;  %8625 = vmatpush1.bf16.msra.mxu1 %v15115_v62  ;;  %v16880_v38 = vld [vmem:[#allocation20 + $0xc0] ss:$16 sps:$4 sm:$0xff]   ;;  %v16883_v62 = vld [vmem:[#allocation20 + $0xc8] ss:$16 sps:$4 sm:$0xff]  }
 0x7fa   : > { %8585 = vmatprep.subr.bf16.mxu0 %v15130_v63  ;;  %8626 = vmatprep.subr.bf16.mxu1 %v15132_v52  ;;  %v16888_v63 = vld [vmem:[#allocation20 + $0xe4] ss:$16 sps:$4 sm:$0xff]   ;;  %v16891_v52 = vld [vmem:[#allocation20 + $0xec] ss:$16 sps:$4 sm:$0xff]  }
 0x7fd   : > { %8586 = vmatpush1.bf16.msra.mxu0 %v15129_v31  ;;  %8627 = vmatpush1.bf16.msra.mxu1 %v15131_v3  ;;  %v16892_v31 = vld [vmem:[#allocation20 + $0x100] ss:$16 sps:$4 sm:$0xff]   ;;  %v16895_v3 = vld [vmem:[#allocation20 + $0x108] ss:$16 sps:$4 sm:$0xff]  }
 0x7fe   : > { %8587 = vmatprep.subr.bf16.mxu0 %v15146_v28  ;;  %8628 = vmatprep.subr.bf16.mxu1 %v15148_v4  ;;  %v16900_v28 = vld [vmem:[#allocation20 + $0x124] ss:$16 sps:$4 sm:$0xff]   ;;  %v16903_v4 = vld [vmem:[#allocation20 + $0x12c] ss:$16 sps:$4 sm:$0xff]  }
 0x801   : > { %8588 = vmatpush1.bf16.msra.mxu0 %v15145_v11  ;;  %8629 = vmatpush1.bf16.msra.mxu1 %v15147_v13  ;;  %v16904_v11 = vld [vmem:[#allocation20 + $0x140] ss:$16 sps:$4 sm:$0xff]   ;;  %v16907_v13 = vld [vmem:[#allocation20 + $0x148] ss:$16 sps:$4 sm:$0xff]  }
 0x802   : > { %8589 = vmatprep.subr.bf16.mxu0 %v15162_v14  ;;  %8630 = vmatprep.subr.bf16.mxu1 %v15164_v15  ;;  %v16912_v14 = vld [vmem:[#allocation20 + $0x164] ss:$16 sps:$4 sm:$0xff]   ;;  %v16915_v15 = vld [vmem:[#allocation20 + $0x16c] ss:$16 sps:$4 sm:$0xff]  }
 0x805   : > { %8590 = vmatpush1.bf16.msra.mxu0 %v15161_v22  ;;  %8631 = vmatpush1.bf16.msra.mxu1 %v15163_v23  ;;  %v16916_v22 = vld [vmem:[#allocation20 + $0x180] ss:$16 sps:$4 sm:$0xff]   ;;  %v16919_v23 = vld [vmem:[#allocation20 + $0x188] ss:$16 sps:$4 sm:$0xff]  }
 0x806   : > { %8591 = vmatprep.subr.bf16.mxu0 %v15178_v24  ;;  %8632 = vmatprep.subr.bf16.mxu1 %v15180_v25  ;;  %v16924_v24 = vld [vmem:[#allocation20 + $0x1a4] ss:$16 sps:$4 sm:$0xff]   ;;  %v16927_v25 = vld [vmem:[#allocation20 + $0x1ac] ss:$16 sps:$4 sm:$0xff]  }
 0x809   : > { %8592 = vmatpush1.bf16.msra.mxu0 %v15177_v26  ;;  %8633 = vmatpush1.bf16.msra.mxu1 %v15179_v27  ;;  %v16922_v26 = vld [vmem:[#allocation20 + $0x1a0] ss:$16 sps:$4 sm:$0xff]   ;;  %v16925_v27 = vld [vmem:[#allocation20 + $0x1a8] ss:$16 sps:$4 sm:$0xff]  }
 0x80a   : > { %11785 = vmatprep.subr.bf16.mxu0 %v16846_v29  ;;  %12113 = vmatprep.subr.bf16.mxu1 %v16849_v42  ;;  %v16930_v29 = vld [vmem:[#allocation20 + $0x1c4] ss:$16 sps:$4 sm:$0xff]   ;;  %v16933_v42 = vld [vmem:[#allocation20 + $0x1cc] ss:$16 sps:$4 sm:$0xff]  }
 0x80c   : > { %8610 = vmatmul.mubr.bf16.vlgmr.msra.gmra.mrb[48].mxu0 %v19283_v5  ;;  %8651 = vmatmul.mubr.bf16.vlgmr.msra.gmra.mrb[56].mxu1 %v19283_v5  ;;  %v16865_v5 = vld [vmem:[#allocation20 + $0x68] ss:$16 sps:$4 sm:$0xff]  }
 0x80d   : > { %11786 = vmatpush1.bf16.msra.mxu0 %v16844_v33  ;;  %12114 = vmatpush1.bf16.msra.mxu1 %v16847_v37  ;;  %v16928_v33 = vld [vmem:[#allocation20 + $0x1c0] ss:$16 sps:$4 sm:$0xff]   ;;  %v16931_v37 = vld [vmem:[#allocation20 + $0x1c8] ss:$16 sps:$4 sm:$0xff]  }
 0x80e   : > { %11787 = vmatprep.subr.bf16.mxu0 %v16852_v40  ;;  %12115 = vmatprep.subr.bf16.mxu1 %v16855_v61  ;;  %v16936_v40 = vld [vmem:[#allocation20 + $0x1e4] ss:$16 sps:$4 sm:$0xff]   ;;  %v16939_v61 = vld [vmem:[#allocation20 + $0x1ec] ss:$16 sps:$4 sm:$0xff]  }
 0x811   : > { %11788 = vmatpush1.bf16.msra.mxu0 %v16850_v9  ;;  %12116 = vmatpush1.bf16.msra.mxu1 %v16853_v43  ;;  %v16934_v9 = vld [vmem:[#allocation20 + $0x1e0] ss:$16 sps:$4 sm:$0xff]   ;;  %v16937_v43 = vld [vmem:[#allocation20 + $0x1e8] ss:$16 sps:$4 sm:$0xff]  }
 0x812   : > { %11789 = vmatprep.subr.bf16.mxu0 %v16858_v45  ;;  %12117 = vmatprep.subr.bf16.mxu1 %v16861_v46  ;;  %v16942_v45 = vld [vmem:[#allocation20 + $0x204] ss:$16 sps:$4 sm:$0xff]   ;;  %v16945_v46 = vld [vmem:[#allocation20 + $0x20c] ss:$16 sps:$4 sm:$0xff]  }
 0x815   : > { %11790 = vmatpush1.bf16.msra.mxu0 %v16856_v47  ;;  %12118 = vmatpush1.bf16.msra.mxu1 %v16859_v7  ;;  %v19302_v47 = vld [vmem:[#allocation19] sm:$0xff] }
 0x816   : > { %11791 = vmatprep.subr.bf16.mxu0 %v16864_v48  ;;  %12119 = vmatprep.subr.bf16.mxu1 %v16867_v49  ;;  %v7614_v7 = vrot.slane %v19302_v47, %v19134_v8  ;;  %v7618_v48 = vrot.slane %v19302_v47, %v19139_v10  ;;  %v7626_v49 = vrot.slane %v19302_v47, %v19149_v20 }
 0x819   : > { %11792 = vmatpush1.bf16.msra.mxu0 %v16862_v50  ;;  %12120 = vmatpush1.bf16.msra.mxu1 %v16865_v5 }
 0x81a   : > { %11793 = vmatprep.subr.bf16.mxu0 %v16870_v53  ;;  %12121 = vmatprep.subr.bf16.mxu1 %v16873_v54 }
 0x81d   : > { %11794 = vmatpush1.bf16.msra.mxu0 %v16868_v51  ;;  %12122 = vmatpush1.bf16.msra.mxu1 %v16871_v55 }
 0x81e   : > { %11795 = vmatprep.subr.bf16.mxu0 %v16876_v57  ;;  %12123 = vmatprep.subr.bf16.mxu1 %v16879_v58 }
 0x821   : > { %11796 = vmatpush1.bf16.msra.mxu0 %v16874_v32  ;;  %12124 = vmatpush1.bf16.msra.mxu1 %v16877_v59 }
 0x822   : > { %11797 = vmatprep.subr.bf16.mxu0 %v16882_v60  ;;  %12125 = vmatprep.subr.bf16.mxu1 %v16885_v21 }
 0x825   : > { %11798 = vmatpush1.bf16.msra.mxu0 %v16880_v38  ;;  %12126 = vmatpush1.bf16.msra.mxu1 %v16883_v62 }
 0x826   : > { %11799 = vmatprep.subr.bf16.mxu0 %v16888_v63  ;;  %12127 = vmatprep.subr.bf16.mxu1 %v16891_v52  ;;  %v16940_v52 = vld [vmem:[#allocation20 + $0x200] ss:$16 sps:$4 sm:$0xff]  }
 0x829   : > { %11800 = vmatpush1.bf16.msra.mxu0 %v16886_v12  ;;  %12128 = vmatpush1.bf16.msra.mxu1 %v16889_v0  ;;  %v16943_v12 = vld [vmem:[#allocation20 + $0x208] ss:$16 sps:$4 sm:$0xff]  }
 0x82a   : > { %11801 = vmatprep.subr.bf16.mxu0 %v16894_v1  ;;  %12129 = vmatprep.subr.bf16.mxu1 %v16897_v2  ;;  %v16948_v1 = vld [vmem:[#allocation20 + $0x224] ss:$16 sps:$4 sm:$0xff]   ;;  %v16951_v2 = vld [vmem:[#allocation20 + $0x22c] ss:$16 sps:$4 sm:$0xff]  }
 0x82d   : > { %11802 = vmatpush1.bf16.msra.mxu0 %v16892_v31  ;;  %12130 = vmatpush1.bf16.msra.mxu1 %v16895_v3  ;;  %v16946_v3 = vld [vmem:[#allocation20 + $0x220] ss:$16 sps:$4 sm:$0xff]  }
 0x82e   : > { %11803 = vmatprep.subr.bf16.mxu0 %v16900_v28  ;;  %12131 = vmatprep.subr.bf16.mxu1 %v16903_v4  ;;  %v16949_v28 = vld [vmem:[#allocation20 + $0x228] ss:$16 sps:$4 sm:$0xff]   ;;  %v16954_v4 = vld [vmem:[#allocation20 + $0x244] ss:$16 sps:$4 sm:$0xff]  }
 0x831   : > { %11804 = vmatpush1.bf16.msra.mxu0 %v16898_v56  ;;  %12132 = vmatpush1.bf16.msra.mxu1 %v16901_v39  ;;  %v16957_v56 = vld [vmem:[#allocation20 + $0x24c] ss:$16 sps:$4 sm:$0xff]   ;;  %v16952_v39 = vld [vmem:[#allocation20 + $0x240] ss:$16 sps:$4 sm:$0xff]  }
 0x832   : > { %11805 = vmatprep.subr.bf16.mxu0 %v16906_v6  ;;  %12133 = vmatprep.subr.bf16.mxu1 %v16909_v41  ;;  %v16955_v6 = vld [vmem:[#allocation20 + $0x248] ss:$16 sps:$4 sm:$0xff]   ;;  %v16960_v41 = vld [vmem:[#allocation20 + $0x264] ss:$16 sps:$4 sm:$0xff]  }
 0x835   : > { %11806 = vmatpush1.bf16.msra.mxu0 %v16904_v11  ;;  %12134 = vmatpush1.bf16.msra.mxu1 %v16907_v13  ;;  %v16963_v11 = vld [vmem:[#allocation20 + $0x26c] ss:$16 sps:$4 sm:$0xff]   ;;  %v16958_v13 = vld [vmem:[#allocation20 + $0x260] ss:$16 sps:$4 sm:$0xff]  }
 0x836   : > { %11807 = vmatprep.subr.bf16.mxu0 %v16912_v14  ;;  %12135 = vmatprep.subr.bf16.mxu1 %v16915_v15  ;;  %v16961_v14 = vld [vmem:[#allocation20 + $0x268] ss:$16 sps:$4 sm:$0xff]   ;;  %v16966_v15 = vld [vmem:[#allocation20 + $0x284] ss:$16 sps:$4 sm:$0xff]  }
 0x839   : > { %11808 = vmatpush1.bf16.msra.mxu0 %v16910_v16  ;;  %12136 = vmatpush1.bf16.msra.mxu1 %v16913_v35  ;;  %v16969_v16 = vld [vmem:[#allocation20 + $0x28c] ss:$16 sps:$4 sm:$0xff]   ;;  %v16964_v35 = vld [vmem:[#allocation20 + $0x280] ss:$16 sps:$4 sm:$0xff]  }
 0x83a   : > { %11809 = vmatprep.subr.bf16.mxu0 %v16918_v36  ;;  %12137 = vmatprep.subr.bf16.mxu1 %v16921_v18  ;;  %v16967_v36 = vld [vmem:[#allocation20 + $0x288] ss:$16 sps:$4 sm:$0xff]   ;;  %v16972_v18 = vld [vmem:[#allocation20 + $0x2a4] ss:$16 sps:$4 sm:$0xff]  }
 0x83d   : > { %11810 = vmatpush1.bf16.msra.mxu0 %v16916_v22  ;;  %12138 = vmatpush1.bf16.msra.mxu1 %v16919_v23  ;;  %v16975_v22 = vld [vmem:[#allocation20 + $0x2ac] ss:$16 sps:$4 sm:$0xff]   ;;  %v16970_v23 = vld [vmem:[#allocation20 + $0x2a0] ss:$16 sps:$4 sm:$0xff]  }
 0x83e   : > { %11811 = vmatprep.subr.bf16.mxu0 %v16924_v24  ;;  %12139 = vmatprep.subr.bf16.mxu1 %v16927_v25  ;;  %v16973_v24 = vld [vmem:[#allocation20 + $0x2a8] ss:$16 sps:$4 sm:$0xff]   ;;  %v16978_v25 = vld [vmem:[#allocation20 + $0x2c4] ss:$16 sps:$4 sm:$0xff]  }
 0x841   : > { %11812 = vmatpush1.bf16.msra.mxu0 %v16922_v26  ;;  %12140 = vmatpush1.bf16.msra.mxu1 %v16925_v27  ;;  %v16981_v26 = vld [vmem:[#allocation20 + $0x2cc] ss:$16 sps:$4 sm:$0xff]   ;;  %v16976_v27 = vld [vmem:[#allocation20 + $0x2c0] ss:$16 sps:$4 sm:$0xff]  }
 0x842   : > { %11813 = vmatprep.subr.bf16.mxu0 %v16930_v29  ;;  %12141 = vmatprep.subr.bf16.mxu1 %v16933_v42  ;;  %v16979_v29 = vld [vmem:[#allocation20 + $0x2c8] ss:$16 sps:$4 sm:$0xff]   ;;  %v16984_v42 = vld [vmem:[#allocation20 + $0x2e4] ss:$16 sps:$4 sm:$0xff]  }
 0x845   : > { %11814 = vmatpush1.bf16.msra.mxu0 %v16928_v33  ;;  %12142 = vmatpush1.bf16.msra.mxu1 %v16931_v37  ;;  %v16987_v33 = vld [vmem:[#allocation20 + $0x2ec] ss:$16 sps:$4 sm:$0xff]  }
 0x846   : > { %11815 = vmatprep.subr.bf16.mxu0 %v16936_v40  ;;  %12143 = vmatprep.subr.bf16.mxu1 %v16939_v61 }
 0x849   : > { %11816 = vmatpush1.bf16.msra.mxu0 %v16934_v9  ;;  %12144 = vmatpush1.bf16.msra.mxu1 %v16937_v43 }
 0x84a   : > { %11826 = vmatprep.subr.bf16.mxu0 %v16942_v45  ;;  %12154 = vmatprep.subr.bf16.mxu1 %v16945_v46  ;;  %v16982_v46 = vld [vmem:[#allocation20 + $0x2e0] ss:$16 sps:$4 sm:$0xff]  }
 0x87f   : > { %v8365_v50 = vpop.f32.mrb[36].mxu0  ;;  %v19310_v5 = vpop.f32.mrb[44].mxu1 }
 0x880   : > { %v8366_v53 = vadd.f32 %v8365_v50, %v7614_v7  ;;  %v8367_v54 = vpop.f32.mrb[37].mxu0  ;;  %v8408_v51 = vpop.f32.mrb[45].mxu1  ;;  %v16985_v7 = vld [vmem:[#allocation20 + $0x2e8] ss:$16 sps:$4 sm:$0xff]   ;;  %v16990_v50 = vld [vmem:[#allocation20 + $0x304] ss:$16 sps:$4 sm:$0xff]  }
 0x881   : > { %v8368_v55 = vadd.f32 %v8367_v54, %v7618_v48  ;;  %v8409_v57 = vadd.f32 %v8408_v51, %v7626_v49  ;;  %v8369_v58 = vpop.f32.mrb[38].mxu0  ;;  %v8410_v32 = vpop.f32.mrb[46].mxu1  ;;  %v16988_v54 = vld [vmem:[#allocation20 + $0x300] ss:$16 sps:$4 sm:$0xff]   ;;  %v16991_v51 = vld [vmem:[#allocation20 + $0x308] ss:$16 sps:$4 sm:$0xff]  }
 0x882   : > { %v8659_v59 = vmax.f32 %v8366_v53, 0.0  ;;  %v8370_v60 = vpop.f32.mrb[39].mxu0  ;;  %v8411_v21 = vpop.f32.mrb[47].mxu1  ;;  %v16993_v53 = vld [vmem:[#allocation20 + $0x30c] ss:$16 sps:$4 sm:$0xff]  }
 0x883   : > { %v8660_v38 = vmax.f32 %v8368_v55, 0.0  ;;  %v8662_v62 = vmax.f32 %v8409_v57, 0.0  ;;  %v16996_v55 = vld [vmem:[#allocation20 + $0x324] ss:$16 sps:$4 sm:$0xff]   ;;  %v16999_v57 = vld [vmem:[#allocation20 + $0x32c] ss:$16 sps:$4 sm:$0xff]  }
 0x884   : > { %v8675_v0 = vpack.c.bf16 %v8659_v59, %v8659_v59  ;;  %v16994_v58 = vld [vmem:[#allocation20 + $0x320] ss:$16 sps:$4 sm:$0xff]   ;;  %v16997_v32 = vld [vmem:[#allocation20 + $0x328] ss:$16 sps:$4 sm:$0xff]   ;;  %v17002_v59 = vld [vmem:[#allocation20 + $0x344] ss:$16 sps:$4 sm:$0xff]  }
 0x885   : > { %v8676_v63 = vpack.c.bf16 %v8660_v38, %v8660_v38  ;;  %v8678_v31 = vpack.c.bf16 %v8662_v62, %v8662_v62  ;;  %v17005_v60 = vld [vmem:[#allocation20 + $0x34c] ss:$16 sps:$4 sm:$0xff]   ;;  %v17000_v21 = vld [vmem:[#allocation20 + $0x340] ss:$16 sps:$4 sm:$0xff]   ;;  %v17003_v38 = vld [vmem:[#allocation20 + $0x348] ss:$16 sps:$4 sm:$0xff]  }
 0x886   : > { %v17008_v62 = vld [vmem:[#allocation20 + $0x364] ss:$16 sps:$4 sm:$0xff]  }
 0x887   : > { %11817 = vmatprep.mubr.bf16.mxu0 %v8676_v63  ;;  %12145 = vmatprep.mubr.bf16.mxu1 %v8676_v63  ;;  %v17011_v63 = vld [vmem:[#allocation20 + $0x36c] ss:$16 sps:$4 sm:$0xff]  }
 0x888   : > { %11818 = vmatmul.mubr.bf16.vlgmr.msra.gmra.mrb[52].mxu0 %v8675_v0  ;;  %12146 = vmatmul.mubr.bf16.vlgmr.msra.gmra.mrb[60].mxu1 %v8675_v0  ;;  %v17014_v0 = vld [vmem:[#allocation20 + $0x384] ss:$16 sps:$4 sm:$0xff]  }
 0x889   : > { %11827 = vmatpush1.bf16.msra.mxu0 %v16940_v52  ;;  %12155 = vmatpush1.bf16.msra.mxu1 %v16943_v12  ;;  %v17006_v52 = vld [vmem:[#allocation20 + $0x360] ss:$16 sps:$4 sm:$0xff]   ;;  %v17009_v12 = vld [vmem:[#allocation20 + $0x368] ss:$16 sps:$4 sm:$0xff]  }
 0x88a   : > { %11858 = vmatprep.mubr.bf16.mxu0 %v8678_v31  ;;  %12186 = vmatprep.mubr.bf16.mxu1 %v8678_v31  ;;  %v17015_v31 = vld [vmem:[#allocation20 + $0x388] ss:$16 sps:$4 sm:$0xff]  }
 0x88b   : > { %11828 = vmatprep.subr.bf16.mxu0 %v16948_v1  ;;  %12156 = vmatprep.subr.bf16.mxu1 %v16951_v2  ;;  %v17017_v1 = vld [vmem:[#allocation20 + $0x38c] ss:$16 sps:$4 sm:$0xff]   ;;  %v17012_v2 = vld [vmem:[#allocation20 + $0x380] ss:$16 sps:$4 sm:$0xff]  }
 0x88d   : > { %11829 = vmatpush1.bf16.msra.mxu0 %v16946_v3  ;;  %12157 = vmatpush1.bf16.msra.mxu1 %v16949_v28  ;;  %v17020_v3 = vld [vmem:[#allocation20 + $0x3a4] ss:$16 sps:$4 sm:$0xff]   ;;  %v17023_v28 = vld [vmem:[#allocation20 + $0x3ac] ss:$16 sps:$4 sm:$0xff]  }
 0x88e   : > { %11830 = vmatprep.subr.bf16.mxu0 %v16954_v4  ;;  %12158 = vmatprep.subr.bf16.mxu1 %v16957_v56  ;;  %v17018_v4 = vld [vmem:[#allocation20 + $0x3a0] ss:$16 sps:$4 sm:$0xff]   ;;  %v17021_v56 = vld [vmem:[#allocation20 + $0x3a8] ss:$16 sps:$4 sm:$0xff]  }
 0x891   : > { %11831 = vmatpush1.bf16.msra.mxu0 %v16952_v39  ;;  %12159 = vmatpush1.bf16.msra.mxu1 %v16955_v6  ;;  %v19320_v39 = vld [vmem:[#allocation19 + $0x8] sm:$0xff]  ;;  %v7622_v6 = vrot.slane %v19302_v47, %v19146_v17 }
 0x892   : > { %11832 = vmatprep.subr.bf16.mxu0 %v16960_v41  ;;  %12160 = vmatprep.subr.bf16.mxu1 %v16963_v11  ;;  %v17026_v41 = vld [vmem:[#allocation20 + $0x3c4] ss:$16 sps:$4 sm:$0xff]   ;;  %v17029_v11 = vld [vmem:[#allocation20 + $0x3cc] ss:$16 sps:$4 sm:$0xff]  }
 0x895   : > { %11833 = vmatpush1.bf16.msra.mxu0 %v16958_v13  ;;  %12161 = vmatpush1.bf16.msra.mxu1 %v16961_v14  ;;  %v7634_v13 = vrot.slane %v19302_v47, %v19233_v19  ;;  %v7654_v14 = vrot.slane %v19320_v39, %v19146_v17 }
 0x896   : > { %11834 = vmatprep.subr.bf16.mxu0 %v16966_v15  ;;  %12162 = vmatprep.subr.bf16.mxu1 %v16969_v16  ;;  %v7658_v15 = vrot.slane %v19320_v39, %v19149_v20  ;;  %v17024_v16 = vld [vmem:[#allocation20 + $0x3c0] ss:$16 sps:$4 sm:$0xff]  }
 0x899   : > { %11835 = vmatpush1.bf16.msra.mxu0 %v16964_v35  ;;  %12163 = vmatpush1.bf16.msra.mxu1 %v16967_v36  ;;  %v17027_v35 = vld [vmem:[#allocation20 + $0x3c8] ss:$16 sps:$4 sm:$0xff]   ;;  %v8407_v36 = vadd.f32 %v19310_v5, %v7622_v6 }
 0x89a   : > { %11836 = vmatprep.subr.bf16.mxu0 %v16972_v18  ;;  %12164 = vmatprep.subr.bf16.mxu1 %v16975_v22  ;;  %v17032_v18 = vld [vmem:[#allocation20 + $0x3e4] ss:$16 sps:$4 sm:$0xff]   ;;  %v17035_v22 = vld [vmem:[#allocation20 + $0x3ec] ss:$16 sps:$4 sm:$0xff]   ;;  %v17033_v5 = vld [vmem:[#allocation20 + $0x3e8] ss:$16 sps:$4 sm:$0xff]  }
 0x89b   : > { %v17069_v6 = vld [vmem:[#allocation20 + $0x4a8] ss:$16 sps:$4 sm:$0xff]  }
 0x89d   : > { %11837 = vmatpush1.bf16.msra.mxu0 %v16970_v23  ;;  %12165 = vmatpush1.bf16.msra.mxu1 %v16973_v24 }
 0x89e   : > { %11838 = vmatprep.subr.bf16.mxu0 %v16978_v25  ;;  %12166 = vmatprep.subr.bf16.mxu1 %v16981_v26 }
 0x89f   : > { %v19312_v37 = vpop.f32.mrb[40].mxu0  ;;  %v19314_v40 = vpop.f32.mrb[48].mxu1 }
 0x8a0   : > { %v19316_v61 = vpop.f32.mrb[41].mxu0  ;;  %v19318_v9 = vpop.f32.mrb[49].mxu1 }
 0x8a1   : > { %v8451_v43 = vpop.f32.mrb[42].mxu0  ;;  %v8492_v45 = vpop.f32.mrb[50].mxu1  ;;  %11839 = vmatpush1.bf16.msra.mxu0 %v16976_v27  ;;  %12167 = vmatpush1.bf16.msra.mxu1 %v16979_v29  ;;  %v8450_v23 = vadd.f32 %v19316_v61, %v7634_v13  ;;  %v7662_v13 = vrot.slane %v19320_v39, %v19251_v30 }
 0x8a2   : > { %v8452_v48 = vpop.f32.mrb[43].mxu0  ;;  %v8493_v49 = vpop.f32.mrb[51].mxu1  ;;  %11840 = vmatprep.subr.bf16.mxu0 %v16984_v42  ;;  %12168 = vmatprep.subr.bf16.mxu1 %v16987_v33  ;;  %v17030_v42 = vld [vmem:[#allocation20 + $0x3e0] ss:$16 sps:$4 sm:$0xff]  }
 0x8a3   : > { %v17041_v49 = vld [vmem:[#allocation20 + $0x40c] ss:$16 sps:$4 sm:$0xff]  }
 0x8a5   : > { %11841 = vmatpush1.bf16.msra.mxu0 %v16982_v46  ;;  %12169 = vmatpush1.bf16.msra.mxu1 %v16985_v7  ;;  %v17038_v46 = vld [vmem:[#allocation20 + $0x404] ss:$16 sps:$4 sm:$0xff]   ;;  %v8661_v7 = vmax.f32 %v8407_v36, 0.0  ;;  %v17075_v36 = vld [vmem:[#allocation20 + $0x4c8] ss:$16 sps:$4 sm:$0xff]  }
 0x8a6   : > { %11842 = vmatprep.subr.bf16.mxu0 %v16990_v50  ;;  %12170 = vmatprep.subr.bf16.mxu1 %v16993_v53  ;;  %v8664_v50 = vmax.f32 %v8450_v23, 0.0  ;;  %v17036_v53 = vld [vmem:[#allocation20 + $0x400] ss:$16 sps:$4 sm:$0xff]  }
 0x8a9   : > { %11843 = vmatpush1.bf16.msra.mxu0 %v16988_v54  ;;  %12171 = vmatpush1.bf16.msra.mxu1 %v16991_v51  ;;  %v8677_v54 = vpack.c.bf16 %v8661_v7, %v8661_v7  ;;  %v17039_v51 = vld [vmem:[#allocation20 + $0x408] ss:$16 sps:$4 sm:$0xff]  }
 0x8aa   : > { %11844 = vmatprep.subr.bf16.mxu0 %v16996_v55  ;;  %12172 = vmatprep.subr.bf16.mxu1 %v16999_v57  ;;  %v8680_v55 = vpack.c.bf16 %v8664_v50, %v8664_v50  ;;  %v17044_v57 = vld [vmem:[#allocation20 + $0x424] ss:$16 sps:$4 sm:$0xff]   ;;  %v17081_v50 = vld [vmem:[#allocation20 + $0x4e8] ss:$16 sps:$4 sm:$0xff]  }
 0x8ad   : > { %11845 = vmatpush1.bf16.msra.mxu0 %v16994_v58  ;;  %12173 = vmatpush1.bf16.msra.mxu1 %v16997_v32  ;;  %v17047_v58 = vld [vmem:[#allocation20 + $0x42c] ss:$16 sps:$4 sm:$0xff]   ;;  %v17042_v32 = vld [vmem:[#allocation20 + $0x420] ss:$16 sps:$4 sm:$0xff]  }
 0x8ae   : > { %11846 = vmatprep.subr.bf16.mxu0 %v17002_v59  ;;  %12174 = vmatprep.subr.bf16.mxu1 %v17005_v60  ;;  %v17045_v59 = vld [vmem:[#allocation20 + $0x428] ss:$16 sps:$4 sm:$0xff]   ;;  %v17050_v60 = vld [vmem:[#allocation20 + $0x444] ss:$16 sps:$4 sm:$0xff]  }
 0x8b1   : > { %11847 = vmatpush1.bf16.msra.mxu0 %v17000_v21  ;;  %12175 = vmatpush1.bf16.msra.mxu1 %v17003_v38  ;;  %v17053_v21 = vld [vmem:[#allocation20 + $0x44c] ss:$16 sps:$4 sm:$0xff]   ;;  %v17048_v38 = vld [vmem:[#allocation20 + $0x440] ss:$16 sps:$4 sm:$0xff]  }
 0x8b2   : > { %11848 = vmatprep.subr.bf16.mxu0 %v17008_v62  ;;  %12176 = vmatprep.subr.bf16.mxu1 %v17011_v63  ;;  %v17051_v62 = vld [vmem:[#allocation20 + $0x448] ss:$16 sps:$4 sm:$0xff]   ;;  %v17056_v63 = vld [vmem:[#allocation20 + $0x464] ss:$16 sps:$4 sm:$0xff]  }
 0x8b5   : > { %11849 = vmatpush1.bf16.msra.mxu0 %v17006_v52  ;;  %12177 = vmatpush1.bf16.msra.mxu1 %v17009_v12  ;;  %v17059_v52 = vld [vmem:[#allocation20 + $0x46c] ss:$16 sps:$4 sm:$0xff]   ;;  %v17054_v12 = vld [vmem:[#allocation20 + $0x460] ss:$16 sps:$4 sm:$0xff]  }
 0x8b6   : > { %11850 = vmatprep.subr.bf16.mxu0 %v17014_v0  ;;  %12178 = vmatprep.subr.bf16.mxu1 %v17017_v1  ;;  %v17057_v0 = vld [vmem:[#allocation20 + $0x468] ss:$16 sps:$4 sm:$0xff]   ;;  %v17062_v1 = vld [vmem:[#allocation20 + $0x484] ss:$16 sps:$4 sm:$0xff]  }
 0x8b9   : > { %11851 = vmatpush1.bf16.msra.mxu0 %v17012_v2  ;;  %12179 = vmatpush1.bf16.msra.mxu1 %v17015_v31  ;;  %v17065_v2 = vld [vmem:[#allocation20 + $0x48c] ss:$16 sps:$4 sm:$0xff]   ;;  %v17060_v31 = vld [vmem:[#allocation20 + $0x480] ss:$16 sps:$4 sm:$0xff]  }
 0x8ba   : > { %11852 = vmatprep.subr.bf16.mxu0 %v17020_v3  ;;  %12180 = vmatprep.subr.bf16.mxu1 %v17023_v28  ;;  %v17063_v3 = vld [vmem:[#allocation20 + $0x488] ss:$16 sps:$4 sm:$0xff]   ;;  %v17068_v28 = vld [vmem:[#allocation20 + $0x4a4] ss:$16 sps:$4 sm:$0xff]  }
 0x8bd   : > { %11853 = vmatpush1.bf16.msra.mxu0 %v17018_v4  ;;  %12181 = vmatpush1.bf16.msra.mxu1 %v17021_v56  ;;  %v17071_v4 = vld [vmem:[#allocation20 + $0x4ac] ss:$16 sps:$4 sm:$0xff]   ;;  %v17066_v56 = vld [vmem:[#allocation20 + $0x4a0] ss:$16 sps:$4 sm:$0xff]  }
 0x8be   : > { %11854 = vmatprep.subr.bf16.mxu0 %v17026_v41  ;;  %12182 = vmatprep.subr.bf16.mxu1 %v17029_v11  ;;  %v17074_v41 = vld [vmem:[#allocation20 + $0x4c4] ss:$16 sps:$4 sm:$0xff]   ;;  %v17077_v11 = vld [vmem:[#allocation20 + $0x4cc] ss:$16 sps:$4 sm:$0xff]  }
 0x8bf   : > { %v19332_v24 = vpop.f32.mrb[44].mxu0  ;;  %v8570_v25 = vpop.f32.mrb[52].mxu1 }
 0x8c0   : > { %v19334_v26 = vadd.f32 %v8570_v25, %v7654_v14  ;;  %v19336_v27 = vpop.f32.mrb[45].mxu0  ;;  %v8572_v29 = vpop.f32.mrb[53].mxu1  ;;  %v7670_v14 = vrot.slane %v19320_v39, %v19254_v34  ;;  %v17083_v25 = vld [vmem:[#allocation20 + $0x4ec] ss:$16 sps:$4 sm:$0xff]  }
 0x8c1   : > { %v19338_v33 = vadd.f32 %v8572_v29, %v7658_v15  ;;  %v8533_v43 = vpop.f32.mrb[46].mxu0  ;;  %v8574_v45 = vpop.f32.mrb[54].mxu1  ;;  %11855 = vmatpush1.bf16.msra.mxu0 %v17024_v16  ;;  %12183 = vmatpush1.bf16.msra.mxu1 %v17027_v35  ;;  %v7666_v15 = vrot.slane %v19320_v39, %v19233_v19  ;;  %v7674_v16 = vrot.slane %v19320_v39, %v19236_v44  ;;  %v17072_v35 = vld [vmem:[#allocation20 + $0x4c0] ss:$16 sps:$4 sm:$0xff]  }
 0x8c2   : > { %v8534_v48 = vpop.f32.mrb[47].mxu0  ;;  %v8575_v61 = vpop.f32.mrb[55].mxu1  ;;  %11856 = vmatprep.subr.bf16.mxu0 %v17032_v18  ;;  %12184 = vmatprep.subr.bf16.mxu1 %v17035_v22  ;;  %v17080_v18 = vld [vmem:[#allocation20 + $0x4e4] ss:$16 sps:$4 sm:$0xff]  }
 0x8c3   : > { %v17078_v48 = vld [vmem:[#allocation20 + $0x4e0] ss:$16 sps:$4 sm:$0xff]  }
 0x8c5   : > { %11857 = vmatpush1.bf16.msra.mxu0 %v17030_v42  ;;  %12185 = vmatpush1.bf16.msra.mxu1 %v17033_v5 }
 0x8c6   : > { %11867 = vmatprep.subr.bf16.mxu0 %v17038_v46  ;;  %12195 = vmatprep.subr.bf16.mxu1 %v17041_v49 }
 0x8c8   : > { %11859 = vmatmul.mubr.bf16.vlgmr.msra.gmra.mrb[52].mxu0 %v8677_v54  ;;  %12187 = vmatmul.mubr.bf16.vlgmr.msra.gmra.mrb[60].mxu1 %v8677_v54  ;;  %v17089_v54 = vld [vmem:[#allocation20 + $0x50c] ss:$16 sps:$4 sm:$0xff]  }
 0x8c9   : > { %11868 = vmatpush1.bf16.msra.mxu0 %v17036_v53  ;;  %11899 = vmatprep.mubr.bf16.mxu0 %v8680_v55  ;;  %v17086_v53 = vld [vmem:[#allocation20 + $0x504] ss:$16 sps:$4 sm:$0xff]  }
 0x8ca   : > { %12196 = vmatpush1.bf16.msra.mxu1 %v17039_v51  ;;  %12227 = vmatprep.mubr.bf16.mxu1 %v8680_v55  ;;  %v17084_v51 = vld [vmem:[#allocation20 + $0x500] ss:$16 sps:$4 sm:$0xff]   ;;  %v17087_v55 = vld [vmem:[#allocation20 + $0x508] ss:$16 sps:$4 sm:$0xff]  }
 0x8cb   : > { %11869 = vmatprep.subr.bf16.mxu0 %v17044_v57  ;;  %12197 = vmatprep.subr.bf16.mxu1 %v17047_v58  ;;  %v17092_v57 = vld [vmem:[#allocation20 + $0x524] ss:$16 sps:$4 sm:$0xff]   ;;  %v17095_v58 = vld [vmem:[#allocation20 + $0x52c] ss:$16 sps:$4 sm:$0xff]  }
 0x8cd   : > { %11870 = vmatpush1.bf16.msra.mxu0 %v17042_v32  ;;  %v17090_v32 = vld [vmem:[#allocation20 + $0x520] ss:$16 sps:$4 sm:$0xff]  }
 0x8ce   : > { %12198 = vmatpush1.bf16.msra.mxu1 %v17045_v59  ;;  %11871 = vmatprep.subr.bf16.mxu0 %v17050_v60  ;;  %v17093_v59 = vld [vmem:[#allocation20 + $0x528] ss:$16 sps:$4 sm:$0xff]   ;;  %v17098_v60 = vld [vmem:[#allocation20 + $0x544] ss:$16 sps:$4 sm:$0xff]  }
 0x8cf   : > { %12199 = vmatprep.subr.bf16.mxu1 %v17053_v21  ;;  %v17101_v21 = vld [vmem:[#allocation20 + $0x54c] ss:$16 sps:$4 sm:$0xff]  }
 0x8d1   : > { %11872 = vmatpush1.bf16.msra.mxu0 %v17048_v38  ;;  %v17096_v38 = vld [vmem:[#allocation20 + $0x540] ss:$16 sps:$4 sm:$0xff]  }
 0x8d2   : > { %12200 = vmatpush1.bf16.msra.mxu1 %v17051_v62  ;;  %11873 = vmatprep.subr.bf16.mxu0 %v17056_v63  ;;  %v17099_v62 = vld [vmem:[#allocation20 + $0x548] ss:$16 sps:$4 sm:$0xff]   ;;  %v17104_v63 = vld [vmem:[#allocation20 + $0x564] ss:$16 sps:$4 sm:$0xff]  }
 0x8d3   : > { %12201 = vmatprep.subr.bf16.mxu1 %v17059_v52  ;;  %v17107_v52 = vld [vmem:[#allocation20 + $0x56c] ss:$16 sps:$4 sm:$0xff]  }
 0x8d5   : > { %11874 = vmatpush1.bf16.msra.mxu0 %v17054_v12  ;;  %v17102_v12 = vld [vmem:[#allocation20 + $0x560] ss:$16 sps:$4 sm:$0xff]  }
 0x8d6   : > { %12202 = vmatpush1.bf16.msra.mxu1 %v17057_v0  ;;  %11875 = vmatprep.subr.bf16.mxu0 %v17062_v1  ;;  %v17105_v0 = vld [vmem:[#allocation20 + $0x568] ss:$16 sps:$4 sm:$0xff]   ;;  %v17110_v1 = vld [vmem:[#allocation20 + $0x584] ss:$16 sps:$4 sm:$0xff]  }
 0x8d7   : > { %12203 = vmatprep.subr.bf16.mxu1 %v17065_v2  ;;  %v17113_v2 = vld [vmem:[#allocation20 + $0x58c] ss:$16 sps:$4 sm:$0xff]  }
 0x8d9   : > { %11876 = vmatpush1.bf16.msra.mxu0 %v17060_v31  ;;  %v17108_v31 = vld [vmem:[#allocation20 + $0x580] ss:$16 sps:$4 sm:$0xff]  }
 0x8da   : > { %12204 = vmatpush1.bf16.msra.mxu1 %v17063_v3  ;;  %11877 = vmatprep.subr.bf16.mxu0 %v17068_v28  ;;  %v17111_v3 = vld [vmem:[#allocation20 + $0x588] ss:$16 sps:$4 sm:$0xff]   ;;  %v17116_v28 = vld [vmem:[#allocation20 + $0x5a4] ss:$16 sps:$4 sm:$0xff]  }
 0x8db   : > { %12205 = vmatprep.subr.bf16.mxu1 %v17071_v4  ;;  %v17119_v4 = vld [vmem:[#allocation20 + $0x5ac] ss:$16 sps:$4 sm:$0xff]  }
 0x8dd   : > { %11878 = vmatpush1.bf16.msra.mxu0 %v17066_v56  ;;  %v17114_v56 = vld [vmem:[#allocation20 + $0x5a0] ss:$16 sps:$4 sm:$0xff]  }
 0x8de   : > { %12206 = vmatpush1.bf16.msra.mxu1 %v17069_v6  ;;  %11879 = vmatprep.subr.bf16.mxu0 %v17074_v41  ;;  %v7630_v6 = vrot.slane %v19302_v47, %v19251_v30  ;;  %v17117_v41 = vld [vmem:[#allocation20 + $0x5a8] ss:$16 sps:$4 sm:$0xff]  }
 0x8df   : > { %v8611_v22 = vpop.f32.mrb[48].mxu0  ;;  %v8652_v23 = vpop.f32.mrb[56].mxu1  ;;  %12207 = vmatprep.subr.bf16.mxu1 %v17077_v11  ;;  %v17122_v11 = vld [vmem:[#allocation20 + $0x5c4] ss:$16 sps:$4 sm:$0xff]  }
 0x8e0   : > { %v19348_v29 = vadd.f32 %v8611_v22, %v7662_v13  ;;  %v19350_v42 = vadd.f32 %v8652_v23, %v7670_v14  ;;  %v8613_v43 = vpop.f32.mrb[49].mxu0  ;;  %v8654_v45 = vpop.f32.mrb[57].mxu1  ;;  %v17125_v13 = vld [vmem:[#allocation20 + $0x5cc] ss:$16 sps:$4 sm:$0xff]   ;;  %v7642_v14 = vrot.slane %v19302_v47, %v19236_v44  ;;  %v17126_v22 = vld [vmem:[#allocation20 + $0x5e0] ss:$16 sps:$4 sm:$0xff]  }
 0x8e1   : > { %v19352_v5 = vadd.f32 %v8613_v43, %v7666_v15  ;;  %v19354_v19 = vadd.f32 %v8654_v45, %v7674_v16  ;;  %v8615_v46 = vpop.f32.mrb[50].mxu0  ;;  %v8656_v7 = vpop.f32.mrb[58].mxu1  ;;  %11880 = vmatpush1.bf16.msra.mxu0 %v17072_v35  ;;  %v17120_v15 = vld [vmem:[#allocation20 + $0x5c0] ss:$16 sps:$4 sm:$0xff]   ;;  %v8448_v16 = vadd.f32 %v19312_v37, %v7630_v6  ;;  %v17123_v35 = vld [vmem:[#allocation20 + $0x5c8] ss:$16 sps:$4 sm:$0xff]  }
 0x8e2   : > { %12208 = vmatpush1.bf16.msra.mxu1 %v17075_v36  ;;  %v8616_v61 = vpop.f32.mrb[51].mxu0  ;;  %v8657_v49 = vpop.f32.mrb[59].mxu1  ;;  %11881 = vmatprep.subr.bf16.mxu0 %v17080_v18  ;;  %v17128_v36 = vld [vmem:[#allocation20 + $0x5e4] ss:$16 sps:$4 sm:$0xff]   ;;  %v17131_v18 = vld [vmem:[#allocation20 + $0x5ec] ss:$16 sps:$4 sm:$0xff]   ;;  %v8491_v30 = vadd.f32 %v19318_v9, %v7642_v14 }
 0x8e3   : > { %12209 = vmatprep.subr.bf16.mxu1 %v17083_v25  ;;  %v8663_v23 = vmax.f32 %v8448_v16, 0.0  ;;  %v17129_v25 = vld [vmem:[#allocation20 + $0x5e8] ss:$16 sps:$4 sm:$0xff]   ;;  %v17134_v43 = vld [vmem:[#allocation20 + $0x604] ss:$16 sps:$4 sm:$0xff]  }
 0x8e4   : > { %v17137_v44 = vld [vmem:[#allocation20 + $0x60c] ss:$16 sps:$4 sm:$0xff]   ;;  %v8666_v45 = vmax.f32 %v8491_v30, 0.0  ;;  %v17132_v37 = vld [vmem:[#allocation20 + $0x600] ss:$16 sps:$4 sm:$0xff]  }
 0x8e5   : > { %11882 = vmatpush1.bf16.msra.mxu0 %v17078_v48  ;;  %v8679_v46 = vpack.c.bf16 %v8663_v23, %v8663_v23  ;;  %v17135_v7 = vld [vmem:[#allocation20 + $0x608] ss:$16 sps:$4 sm:$0xff]   ;;  %v17140_v48 = vld [vmem:[#allocation20 + $0x624] ss:$16 sps:$4 sm:$0xff]   ;;  %v17143_v9 = vld [vmem:[#allocation20 + $0x62c] ss:$16 sps:$4 sm:$0xff]  }
 0x8e6   : > { %12210 = vmatpush1.bf16.msra.mxu1 %v17081_v50  ;;  %11883 = vmatprep.subr.bf16.mxu0 %v17086_v53  ;;  %v8682_v61 = vpack.c.bf16 %v8666_v45, %v8666_v45  ;;  %v17138_v49 = vld [vmem:[#allocation20 + $0x620] ss:$16 sps:$4 sm:$0xff]   ;;  %v17141_v50 = vld [vmem:[#allocation20 + $0x628] ss:$16 sps:$4 sm:$0xff]   ;;  %v17146_v53 = vld [vmem:[#allocation20 + $0x644] ss:$16 sps:$4 sm:$0xff]  }
 0x8e7   : > { %12211 = vmatprep.subr.bf16.mxu1 %v17089_v54  ;;  %v17149_v54 = vld [vmem:[#allocation20 + $0x64c] ss:$16 sps:$4 sm:$0xff]   ;;  %v17177_v6 = vld [vmem:[#allocation20 + $0x6e8] ss:$16 sps:$4 sm:$0xff]  }
 0x8e8   : > { %v17183_v14 = vld [vmem:[#allocation20 + $0x708] ss:$16 sps:$4 sm:$0xff]   ;;  %v17191_v16 = vld [vmem:[#allocation20 + $0x72c] ss:$16 sps:$4 sm:$0xff]  }
 0x8e9   : > { %11884 = vmatpush1.bf16.msra.mxu0 %v17084_v51  ;;  %v17144_v51 = vld [vmem:[#allocation20 + $0x640] ss:$16 sps:$4 sm:$0xff]   ;;  %v17197_v30 = vld [vmem:[#allocation20 + $0x74c] ss:$16 sps:$4 sm:$0xff]   ;;  %v17195_v23 = vld [vmem:[#allocation20 + $0x748] ss:$16 sps:$4 sm:$0xff]  }
 0x8ea   : > { %12212 = vmatpush1.bf16.msra.mxu1 %v17087_v55  ;;  %11885 = vmatprep.subr.bf16.mxu0 %v17092_v57  ;;  %v17147_v55 = vld [vmem:[#allocation20 + $0x648] ss:$16 sps:$4 sm:$0xff]   ;;  %v17152_v57 = vld [vmem:[#allocation20 + $0x664] ss:$16 sps:$4 sm:$0xff]  }
 0x8eb   : > { %12213 = vmatprep.subr.bf16.mxu1 %v17095_v58  ;;  %v17155_v58 = vld [vmem:[#allocation20 + $0x66c] ss:$16 sps:$4 sm:$0xff]   ;;  %v17201_v45 = vld [vmem:[#allocation20 + $0x768] ss:$16 sps:$4 sm:$0xff]  }
 0x8ed   : > { %11886 = vmatpush1.bf16.msra.mxu0 %v17090_v32  ;;  %v17150_v32 = vld [vmem:[#allocation20 + $0x660] ss:$16 sps:$4 sm:$0xff]  }
 0x8ee   : > { %12214 = vmatpush1.bf16.msra.mxu1 %v17093_v59  ;;  %11887 = vmatprep.subr.bf16.mxu0 %v17098_v60  ;;  %v17153_v59 = vld [vmem:[#allocation20 + $0x668] ss:$16 sps:$4 sm:$0xff]   ;;  %v17158_v60 = vld [vmem:[#allocation20 + $0x684] ss:$16 sps:$4 sm:$0xff]  }
 0x8ef   : > { %12215 = vmatprep.subr.bf16.mxu1 %v17101_v21  ;;  %v17161_v21 = vld [vmem:[#allocation20 + $0x68c] ss:$16 sps:$4 sm:$0xff]  }
 0x8f1   : > { %11888 = vmatpush1.bf16.msra.mxu0 %v17096_v38  ;;  %v17156_v38 = vld [vmem:[#allocation20 + $0x680] ss:$16 sps:$4 sm:$0xff]  }
 0x8f2   : > { %12216 = vmatpush1.bf16.msra.mxu1 %v17099_v62  ;;  %11889 = vmatprep.subr.bf16.mxu0 %v17104_v63  ;;  %v17159_v62 = vld [vmem:[#allocation20 + $0x688] ss:$16 sps:$4 sm:$0xff]   ;;  %v17164_v63 = vld [vmem:[#allocation20 + $0x6a4] ss:$16 sps:$4 sm:$0xff]  }
 0x8f3   : > { %12217 = vmatprep.subr.bf16.mxu1 %v17107_v52  ;;  %v17167_v52 = vld [vmem:[#allocation20 + $0x6ac] ss:$16 sps:$4 sm:$0xff]  }
 0x8f5   : > { %11890 = vmatpush1.bf16.msra.mxu0 %v17102_v12  ;;  %v17162_v12 = vld [vmem:[#allocation20 + $0x6a0] ss:$16 sps:$4 sm:$0xff]  }
 0x8f6   : > { %12218 = vmatpush1.bf16.msra.mxu1 %v17105_v0  ;;  %11891 = vmatprep.subr.bf16.mxu0 %v17110_v1  ;;  %v17165_v0 = vld [vmem:[#allocation20 + $0x6a8] ss:$16 sps:$4 sm:$0xff]   ;;  %v17170_v1 = vld [vmem:[#allocation20 + $0x6c4] ss:$16 sps:$4 sm:$0xff]  }
 0x8f7   : > { %12219 = vmatprep.subr.bf16.mxu1 %v17113_v2  ;;  %v17173_v2 = vld [vmem:[#allocation20 + $0x6cc] ss:$16 sps:$4 sm:$0xff]  }
 0x8f9   : > { %11892 = vmatpush1.bf16.msra.mxu0 %v17108_v31  ;;  %v17168_v31 = vld [vmem:[#allocation20 + $0x6c0] ss:$16 sps:$4 sm:$0xff]  }
 0x8fa   : > { %12220 = vmatpush1.bf16.msra.mxu1 %v17111_v3  ;;  %11893 = vmatprep.subr.bf16.mxu0 %v17116_v28  ;;  %v17171_v3 = vld [vmem:[#allocation20 + $0x6c8] ss:$16 sps:$4 sm:$0xff]   ;;  %v17176_v28 = vld [vmem:[#allocation20 + $0x6e4] ss:$16 sps:$4 sm:$0xff]  }
 0x8fb   : > { %12221 = vmatprep.subr.bf16.mxu1 %v17119_v4  ;;  %v17179_v4 = vld [vmem:[#allocation20 + $0x6ec] ss:$16 sps:$4 sm:$0xff]  }
 0x8fd   : > { %11894 = vmatpush1.bf16.msra.mxu0 %v17114_v56  ;;  %v17174_v56 = vld [vmem:[#allocation20 + $0x6e0] ss:$16 sps:$4 sm:$0xff]  }
 0x8fe   : > { %12222 = vmatpush1.bf16.msra.mxu1 %v17117_v41  ;;  %11895 = vmatprep.subr.bf16.mxu0 %v17122_v11  ;;  %v17182_v41 = vld [vmem:[#allocation20 + $0x704] ss:$16 sps:$4 sm:$0xff]   ;;  %v17185_v11 = vld [vmem:[#allocation20 + $0x70c] ss:$16 sps:$4 sm:$0xff]  }
 0x8ff   : > { %12223 = vmatprep.subr.bf16.mxu1 %v17125_v13  ;;  %v17180_v13 = vld [vmem:[#allocation20 + $0x700] ss:$16 sps:$4 sm:$0xff]  }
 0x901   : > { %11896 = vmatpush1.bf16.msra.mxu0 %v17120_v15  ;;  %v17188_v15 = vld [vmem:[#allocation20 + $0x724] ss:$16 sps:$4 sm:$0xff]  }
 0x902   : > { %12224 = vmatpush1.bf16.msra.mxu1 %v17123_v35  ;;  %11897 = vmatprep.subr.bf16.mxu0 %v17128_v36  ;;  %v17186_v35 = vld [vmem:[#allocation20 + $0x720] ss:$16 sps:$4 sm:$0xff]   ;;  %v17189_v36 = vld [vmem:[#allocation20 + $0x728] ss:$16 sps:$4 sm:$0xff]  }
 0x903   : > { %12225 = vmatprep.subr.bf16.mxu1 %v17131_v18  ;;  %v17194_v18 = vld [vmem:[#allocation20 + $0x744] ss:$16 sps:$4 sm:$0xff]  }
 0x905   : > { %11898 = vmatpush1.bf16.msra.mxu0 %v17126_v22  ;;  %v17192_v22 = vld [vmem:[#allocation20 + $0x740] ss:$16 sps:$4 sm:$0xff]  }
 0x906   : > { %12226 = vmatpush1.bf16.msra.mxu1 %v17129_v25  ;;  %11908 = vmatprep.subr.bf16.mxu0 %v17134_v43  ;;  %v17200_v25 = vld [vmem:[#allocation20 + $0x764] ss:$16 sps:$4 sm:$0xff]   ;;  %v17203_v43 = vld [vmem:[#allocation20 + $0x76c] ss:$16 sps:$4 sm:$0xff]  }
 0x907   : > { %12236 = vmatprep.subr.bf16.mxu1 %v17137_v44  ;;  %v17198_v44 = vld [vmem:[#allocation20 + $0x760] ss:$16 sps:$4 sm:$0xff]  }
 0x908   : > { %11900 = vmatmul.mubr.bf16.vlgmr.msra.gmra.mrb[52].mxu0 %v8679_v46 }
 0x909   : > { %12228 = vmatmul.mubr.bf16.vlgmr.msra.gmra.mrb[60].mxu1 %v8679_v46  ;;  %11909 = vmatpush1.bf16.msra.mxu0 %v17132_v37  ;;  %v17206_v37 = vld [vmem:[#allocation20 + $0x784] ss:$16 sps:$4 sm:$0xff]   ;;  %v17209_v46 = vld [vmem:[#allocation20 + $0x78c] ss:$16 sps:$4 sm:$0xff]  }
 0x90a   : > { %11940 = vmatprep.mubr.bf16.mxu0 %v8682_v61  ;;  %12237 = vmatpush1.bf16.msra.mxu1 %v17135_v7  ;;  %v17204_v7 = vld [vmem:[#allocation20 + $0x780] ss:$16 sps:$4 sm:$0xff]  }
 0x90b   : > { %12268 = vmatprep.mubr.bf16.mxu1 %v8682_v61  ;;  %11910 = vmatprep.subr.bf16.mxu0 %v17140_v48  ;;  %v17207_v48 = vld [vmem:[#allocation20 + $0x788] ss:$16 sps:$4 sm:$0xff]   ;;  %v17212_v61 = vld [vmem:[#allocation20 + $0x7a4] ss:$16 sps:$4 sm:$0xff]  }
 0x90c   : > { %12238 = vmatprep.subr.bf16.mxu1 %v17143_v9  ;;  %v17215_v9 = vld [vmem:[#allocation20 + $0x7ac] ss:$16 sps:$4 sm:$0xff]  }
 0x90d   : > { %11911 = vmatpush1.bf16.msra.mxu0 %v17138_v49  ;;  %v17210_v49 = vld [vmem:[#allocation20 + $0x7a0] ss:$16 sps:$4 sm:$0xff]  }
 0x90e   : > { %12239 = vmatpush1.bf16.msra.mxu1 %v17141_v50  ;;  %11912 = vmatprep.subr.bf16.mxu0 %v17146_v53  ;;  %v7638_v50 = vrot.slane %v19302_v47, %v19254_v34  ;;  %v17213_v53 = vld [vmem:[#allocation20 + $0x7a8] ss:$16 sps:$4 sm:$0xff]   ;;  %v17222_v47 = vld [vmem:[#allocation20 + $0x7e0] ss:$16 sps:$4 sm:$0xff]  }
 0x90f   : > { %12240 = vmatprep.subr.bf16.mxu1 %v17149_v54  ;;  %v17218_v54 = vld [vmem:[#allocation20 + $0x7c4] ss:$16 sps:$4 sm:$0xff]  }
 0x911   : > { %11913 = vmatpush1.bf16.msra.mxu0 %v17144_v51  ;;  %v17221_v51 = vld [vmem:[#allocation20 + $0x7cc] ss:$16 sps:$4 sm:$0xff]  }
 0x912   : > { %12241 = vmatpush1.bf16.msra.mxu1 %v17147_v55  ;;  %11914 = vmatprep.subr.bf16.mxu0 %v17152_v57  ;;  %v7650_v55 = vrot.slane %v19320_v39, %v19139_v10  ;;  %v17216_v57 = vld [vmem:[#allocation20 + $0x7c0] ss:$16 sps:$4 sm:$0xff]  }
 0x913   : > { %12242 = vmatprep.subr.bf16.mxu1 %v17155_v58  ;;  %v8489_v58 = vadd.f32 %v19314_v40, %v7638_v50  ;;  %v17228_v40 = vld [vmem:[#allocation20 + $0x800] ss:$16 sps:$4 sm:$0xff]   ;;  %v17279_v50 = vld [vmem:[#allocation20 + $0x908] ss:$16 sps:$4 sm:$0xff]  }
 0x914   : > { %v8532_v34 = vadd.f32 %v19336_v27, %v7650_v55  ;;  %v17239_v27 = vld [vmem:[#allocation20 + $0x82c] ss:$16 sps:$4 sm:$0xff]   ;;  %v17285_v55 = vld [vmem:[#allocation20 + $0x928] ss:$16 sps:$4 sm:$0xff]  }
 0x915   : > { %11915 = vmatpush1.bf16.msra.mxu0 %v17150_v32  ;;  %v17219_v32 = vld [vmem:[#allocation20 + $0x7c8] ss:$16 sps:$4 sm:$0xff]  }
 0x916   : > { %12243 = vmatpush1.bf16.msra.mxu1 %v17153_v59  ;;  %11916 = vmatprep.subr.bf16.mxu0 %v17158_v60  ;;  %v17224_v59 = vld [vmem:[#allocation20 + $0x7e4] ss:$16 sps:$4 sm:$0xff]   ;;  %v17227_v60 = vld [vmem:[#allocation20 + $0x7ec] ss:$16 sps:$4 sm:$0xff]  }
 0x917   : > { %12244 = vmatprep.subr.bf16.mxu1 %v17161_v21  ;;  %v8665_v21 = vmax.f32 %v8489_v58, 0.0  ;;  %v17293_v58 = vld [vmem:[#allocation20 + $0x94c] ss:$16 sps:$4 sm:$0xff]  }
 0x919   : > { %11917 = vmatpush1.bf16.msra.mxu0 %v17156_v38  ;;  %v17225_v38 = vld [vmem:[#allocation20 + $0x7e8] ss:$16 sps:$4 sm:$0xff]  }
 0x91a   : > { %12245 = vmatpush1.bf16.msra.mxu1 %v17159_v62  ;;  %11918 = vmatprep.subr.bf16.mxu0 %v17164_v63  ;;  %v17230_v62 = vld [vmem:[#allocation20 + $0x804] ss:$16 sps:$4 sm:$0xff]   ;;  %v17233_v63 = vld [vmem:[#allocation20 + $0x80c] ss:$16 sps:$4 sm:$0xff]  }
 0x91b   : > { %12246 = vmatprep.subr.bf16.mxu1 %v17167_v52  ;;  %v8668_v52 = vmax.f32 %v8532_v34, 0.0  ;;  %v17299_v34 = vld [vmem:[#allocation20 + $0x96c] ss:$16 sps:$4 sm:$0xff]  }
 0x91d   : > { %11919 = vmatpush1.bf16.msra.mxu0 %v17162_v12  ;;  %v8681_v12 = vpack.c.bf16 %v8665_v21, %v8665_v21  ;;  %v17297_v21 = vld [vmem:[#allocation20 + $0x968] ss:$16 sps:$4 sm:$0xff]  }
 0x91e   : > { %12247 = vmatpush1.bf16.msra.mxu1 %v17165_v0  ;;  %11920 = vmatprep.subr.bf16.mxu0 %v17170_v1  ;;  %v17231_v0 = vld [vmem:[#allocation20 + $0x808] ss:$16 sps:$4 sm:$0xff]   ;;  %v17236_v1 = vld [vmem:[#allocation20 + $0x824] ss:$16 sps:$4 sm:$0xff]  }
 0x91f   : > { %12248 = vmatprep.subr.bf16.mxu1 %v17173_v2  ;;  %v8684_v2 = vpack.c.bf16 %v8668_v52, %v8668_v52  ;;  %v17303_v52 = vld [vmem:[#allocation20 + $0x988] ss:$16 sps:$4 sm:$0xff]  }
 0x921   : > { %11921 = vmatpush1.bf16.msra.mxu0 %v17168_v31  ;;  %v17234_v31 = vld [vmem:[#allocation20 + $0x820] ss:$16 sps:$4 sm:$0xff]  }
 0x922   : > { %12249 = vmatpush1.bf16.msra.mxu1 %v17171_v3  ;;  %11922 = vmatprep.subr.bf16.mxu0 %v17176_v28  ;;  %v17237_v3 = vld [vmem:[#allocation20 + $0x828] ss:$16 sps:$4 sm:$0xff]   ;;  %v17242_v28 = vld [vmem:[#allocation20 + $0x844] ss:$16 sps:$4 sm:$0xff]  }
 0x923   : > { %12250 = vmatprep.subr.bf16.mxu1 %v17179_v4  ;;  %v17245_v4 = vld [vmem:[#allocation20 + $0x84c] ss:$16 sps:$4 sm:$0xff]  }
 0x925   : > { %11923 = vmatpush1.bf16.msra.mxu0 %v17174_v56  ;;  %v17240_v56 = vld [vmem:[#allocation20 + $0x840] ss:$16 sps:$4 sm:$0xff]  }
 0x926   : > { %12251 = vmatpush1.bf16.msra.mxu1 %v17177_v6  ;;  %11924 = vmatprep.subr.bf16.mxu0 %v17182_v41  ;;  %v17243_v6 = vld [vmem:[#allocation20 + $0x848] ss:$16 sps:$4 sm:$0xff]   ;;  %v17248_v41 = vld [vmem:[#allocation20 + $0x864] ss:$16 sps:$4 sm:$0xff]  }
 0x927   : > { %12252 = vmatprep.subr.bf16.mxu1 %v17185_v11  ;;  %v17251_v11 = vld [vmem:[#allocation20 + $0x86c] ss:$16 sps:$4 sm:$0xff]  }
 0x929   : > { %11925 = vmatpush1.bf16.msra.mxu0 %v17180_v13  ;;  %v17246_v13 = vld [vmem:[#allocation20 + $0x860] ss:$16 sps:$4 sm:$0xff]  }
 0x92a   : > { %12253 = vmatpush1.bf16.msra.mxu1 %v17183_v14  ;;  %11926 = vmatprep.subr.bf16.mxu0 %v17188_v15  ;;  %v17249_v14 = vld [vmem:[#allocation20 + $0x868] ss:$16 sps:$4 sm:$0xff]   ;;  %v17254_v15 = vld [vmem:[#allocation20 + $0x884] ss:$16 sps:$4 sm:$0xff]  }
 0x92b   : > { %12254 = vmatprep.subr.bf16.mxu1 %v17191_v16  ;;  %v17257_v16 = vld [vmem:[#allocation20 + $0x88c] ss:$16 sps:$4 sm:$0xff]  }
 0x92d   : > { %11927 = vmatpush1.bf16.msra.mxu0 %v17186_v35  ;;  %v17252_v35 = vld [vmem:[#allocation20 + $0x880] ss:$16 sps:$4 sm:$0xff]  }
 0x92e   : > { %12255 = vmatpush1.bf16.msra.mxu1 %v17189_v36  ;;  %11928 = vmatprep.subr.bf16.mxu0 %v17194_v18  ;;  %v17255_v36 = vld [vmem:[#allocation20 + $0x888] ss:$16 sps:$4 sm:$0xff]   ;;  %v17260_v18 = vld [vmem:[#allocation20 + $0x8a4] ss:$16 sps:$4 sm:$0xff]  }
 0x92f   : > { %12256 = vmatprep.subr.bf16.mxu1 %v17197_v30  ;;  %v17263_v30 = vld [vmem:[#allocation20 + $0x8ac] ss:$16 sps:$4 sm:$0xff]  }
 0x931   : > { %11929 = vmatpush1.bf16.msra.mxu0 %v17192_v22  ;;  %v17258_v22 = vld [vmem:[#allocation20 + $0x8a0] ss:$16 sps:$4 sm:$0xff]  }
 0x932   : > { %12257 = vmatpush1.bf16.msra.mxu1 %v17195_v23  ;;  %11930 = vmatprep.subr.bf16.mxu0 %v17200_v25  ;;  %v17261_v23 = vld [vmem:[#allocation20 + $0x8a8] ss:$16 sps:$4 sm:$0xff]   ;;  %v17266_v25 = vld [vmem:[#allocation20 + $0x8c4] ss:$16 sps:$4 sm:$0xff]  }
 0x933   : > { %12258 = vmatprep.subr.bf16.mxu1 %v17203_v43  ;;  %v17269_v43 = vld [vmem:[#allocation20 + $0x8cc] ss:$16 sps:$4 sm:$0xff]  }
 0x935   : > { %11931 = vmatpush1.bf16.msra.mxu0 %v17198_v44  ;;  %v17264_v44 = vld [vmem:[#allocation20 + $0x8c0] ss:$16 sps:$4 sm:$0xff]  }
 0x936   : > { %12259 = vmatpush1.bf16.msra.mxu1 %v17201_v45  ;;  %11932 = vmatprep.subr.bf16.mxu0 %v17206_v37  ;;  %v17267_v45 = vld [vmem:[#allocation20 + $0x8c8] ss:$16 sps:$4 sm:$0xff]   ;;  %v17272_v37 = vld [vmem:[#allocation20 + $0x8e4] ss:$16 sps:$4 sm:$0xff]  }
 0x937   : > { %12260 = vmatprep.subr.bf16.mxu1 %v17209_v46  ;;  %v17275_v46 = vld [vmem:[#allocation20 + $0x8ec] ss:$16 sps:$4 sm:$0xff]  }
 0x939   : > { %11933 = vmatpush1.bf16.msra.mxu0 %v17204_v7  ;;  %v17270_v7 = vld [vmem:[#allocation20 + $0x8e0] ss:$16 sps:$4 sm:$0xff]  }
 0x93a   : > { %12261 = vmatpush1.bf16.msra.mxu1 %v17207_v48  ;;  %11934 = vmatprep.subr.bf16.mxu0 %v17212_v61  ;;  %v17273_v48 = vld [vmem:[#allocation20 + $0x8e8] ss:$16 sps:$4 sm:$0xff]   ;;  %v17278_v61 = vld [vmem:[#allocation20 + $0x904] ss:$16 sps:$4 sm:$0xff]  }
 0x93b   : > { %12262 = vmatprep.subr.bf16.mxu1 %v17215_v9  ;;  %v17281_v9 = vld [vmem:[#allocation20 + $0x90c] ss:$16 sps:$4 sm:$0xff]  }
 0x93d   : > { %11935 = vmatpush1.bf16.msra.mxu0 %v17210_v49  ;;  %v17276_v49 = vld [vmem:[#allocation20 + $0x900] ss:$16 sps:$4 sm:$0xff]  }
 0x93e   : > { %12263 = vmatpush1.bf16.msra.mxu1 %v17213_v53  ;;  %11936 = vmatprep.subr.bf16.mxu0 %v17218_v54  ;;  %v17284_v53 = vld [vmem:[#allocation20 + $0x924] ss:$16 sps:$4 sm:$0xff]   ;;  %v17287_v54 = vld [vmem:[#allocation20 + $0x92c] ss:$16 sps:$4 sm:$0xff]  }
 0x93f   : > { %12264 = vmatprep.subr.bf16.mxu1 %v17221_v51  ;;  %v17282_v51 = vld [vmem:[#allocation20 + $0x920] ss:$16 sps:$4 sm:$0xff]  }
 0x941   : > { %11937 = vmatpush1.bf16.msra.mxu0 %v17216_v57  ;;  %v17290_v57 = vld [vmem:[#allocation20 + $0x944] ss:$16 sps:$4 sm:$0xff]  }
 0x942   : > { %12265 = vmatpush1.bf16.msra.mxu1 %v17219_v32  ;;  %11938 = vmatprep.subr.bf16.mxu0 %v17224_v59  ;;  %v17288_v32 = vld [vmem:[#allocation20 + $0x940] ss:$16 sps:$4 sm:$0xff]   ;;  %v17291_v59 = vld [vmem:[#allocation20 + $0x948] ss:$16 sps:$4 sm:$0xff]  }
 0x943   : > { %12266 = vmatprep.subr.bf16.mxu1 %v17227_v60  ;;  %v17296_v60 = vld [vmem:[#allocation20 + $0x964] ss:$16 sps:$4 sm:$0xff]  }
 0x945   : > { %11939 = vmatpush1.bf16.msra.mxu0 %v17222_v47  ;;  %v17294_v47 = vld [vmem:[#allocation20 + $0x960] ss:$16 sps:$4 sm:$0xff]  }
 0x946   : > { %12267 = vmatpush1.bf16.msra.mxu1 %v17225_v38  ;;  %11949 = vmatprep.subr.bf16.mxu0 %v17230_v62  ;;  %v17302_v38 = vld [vmem:[#allocation20 + $0x984] ss:$16 sps:$4 sm:$0xff]   ;;  %v17305_v62 = vld [vmem:[#allocation20 + $0x98c] ss:$16 sps:$4 sm:$0xff]  }
 0x947   : > { %12277 = vmatprep.subr.bf16.mxu1 %v17233_v63  ;;  %v17300_v63 = vld [vmem:[#allocation20 + $0x980] ss:$16 sps:$4 sm:$0xff]  }
 0x948   : > { %11941 = vmatmul.mubr.bf16.vlgmr.msra.gmra.mrb[52].mxu0 %v8681_v12 }
 0x949   : > { %12269 = vmatmul.mubr.bf16.vlgmr.msra.gmra.mrb[60].mxu1 %v8681_v12  ;;  %11950 = vmatpush1.bf16.msra.mxu0 %v17228_v40  ;;  %v17308_v40 = vld [vmem:[#allocation20 + $0x9a4] ss:$16 sps:$4 sm:$0xff]   ;;  %v17311_v12 = vld [vmem:[#allocation20 + $0x9ac] ss:$16 sps:$4 sm:$0xff]  }
 0x94a   : > { %11981 = vmatprep.mubr.bf16.mxu0 %v8684_v2  ;;  %12278 = vmatpush1.bf16.msra.mxu1 %v17231_v0  ;;  %v17306_v0 = vld [vmem:[#allocation20 + $0x9a0] ss:$16 sps:$4 sm:$0xff]  }
 0x94b   : > { %12309 = vmatprep.mubr.bf16.mxu1 %v8684_v2  ;;  %11951 = vmatprep.subr.bf16.mxu0 %v17236_v1  ;;  %v7646_v1 = vrot.slane %v19320_v39, %v19134_v8  ;;  %v17309_v2 = vld [vmem:[#allocation20 + $0x9a8] ss:$16 sps:$4 sm:$0xff]  }
 0x94c   : > { %12279 = vmatprep.subr.bf16.mxu1 %v17239_v27  ;;  %v17314_v27 = vld [vmem:[#allocation20 + $0x9c4] ss:$16 sps:$4 sm:$0xff]   ;;  %v17321_v39 = vld [vmem:[#allocation20 + $0x9e8] ss:$16 sps:$4 sm:$0xff]  }
 0x94d   : > { %11952 = vmatpush1.bf16.msra.mxu0 %v17234_v31  ;;  %v17317_v31 = vld [vmem:[#allocation20 + $0x9cc] ss:$16 sps:$4 sm:$0xff]  }
 0x94e   : > { %12280 = vmatpush1.bf16.msra.mxu1 %v17237_v3  ;;  %11953 = vmatprep.subr.bf16.mxu0 %v17242_v28  ;;  %v17312_v3 = vld [vmem:[#allocation20 + $0x9c0] ss:$16 sps:$4 sm:$0xff]   ;;  %v8530_v28 = vadd.f32 %v19332_v24, %v7646_v1  ;;  %v17386_v1 = vld [vmem:[#allocation20 + $0xb44] ss:$16 sps:$4 sm:$0xff]  }
 0x94f   : > { %12281 = vmatprep.subr.bf16.mxu1 %v17245_v4  ;;  %v17315_v4 = vld [vmem:[#allocation20 + $0x9c8] ss:$16 sps:$4 sm:$0xff]  }
 0x951   : > { %11954 = vmatpush1.bf16.msra.mxu0 %v17240_v56  ;;  %v17320_v56 = vld [vmem:[#allocation20 + $0x9e4] ss:$16 sps:$4 sm:$0xff]  }
 0x952   : > { %12282 = vmatpush1.bf16.msra.mxu1 %v17243_v6  ;;  %11955 = vmatprep.subr.bf16.mxu0 %v17248_v41  ;;  %v17323_v6 = vld [vmem:[#allocation20 + $0x9ec] ss:$16 sps:$4 sm:$0xff]   ;;  %v17318_v41 = vld [vmem:[#allocation20 + $0x9e0] ss:$16 sps:$4 sm:$0xff]  }
 0x953   : > { %12283 = vmatprep.subr.bf16.mxu1 %v17251_v11  ;;  %v8667_v11 = vmax.f32 %v8530_v28, 0.0  ;;  %v17395_v28 = vld [vmem:[#allocation20 + $0xb6c] ss:$16 sps:$4 sm:$0xff]  }
 0x955   : > { %11956 = vmatpush1.bf16.msra.mxu0 %v17246_v13  ;;  %v17326_v13 = vld [vmem:[#allocation20 + $0xa04] ss:$16 sps:$4 sm:$0xff]   ;;  %v8683_v24 = vpack.c.bf16 %v8667_v11, %v8667_v11  ;;  %v17396_v11 = vld [vmem:[#allocation20 + $0xb80] ss:$16 sps:$4 sm:$0xff]  }
 0x956   : > { %12284 = vmatpush1.bf16.msra.mxu1 %v17249_v14  ;;  %11957 = vmatprep.subr.bf16.mxu0 %v17254_v15  ;;  %v17329_v14 = vld [vmem:[#allocation20 + $0xa0c] ss:$16 sps:$4 sm:$0xff]   ;;  %v8670_v15 = vmax.f32 %v19338_v33, 0.0 }
 0x957   : > { %12285 = vmatprep.subr.bf16.mxu1 %v17257_v16  ;;  %v17324_v16 = vld [vmem:[#allocation20 + $0xa00] ss:$16 sps:$4 sm:$0xff]   ;;  %v17341_v33 = vld [vmem:[#allocation20 + $0xa4c] ss:$16 sps:$4 sm:$0xff]  }
 0x959   : > { %11958 = vmatpush1.bf16.msra.mxu0 %v17252_v35  ;;  %v17327_v35 = vld [vmem:[#allocation20 + $0xa08] ss:$16 sps:$4 sm:$0xff]  }
 0x95a   : > { %12286 = vmatpush1.bf16.msra.mxu1 %v17255_v36  ;;  %11959 = vmatprep.subr.bf16.mxu0 %v17260_v18  ;;  %v17332_v36 = vld [vmem:[#allocation20 + $0xa24] ss:$16 sps:$4 sm:$0xff]   ;;  %v8686_v18 = vpack.c.bf16 %v8670_v15, %v8670_v15  ;;  %v17402_v15 = vld [vmem:[#allocation20 + $0xba0] ss:$16 sps:$4 sm:$0xff]  }
 0x95b   : > { %12287 = vmatprep.subr.bf16.mxu1 %v17263_v30  ;;  %v17335_v30 = vld [vmem:[#allocation20 + $0xa2c] ss:$16 sps:$4 sm:$0xff]  }
 0x95d   : > { %11960 = vmatpush1.bf16.msra.mxu0 %v17258_v22  ;;  %v17330_v22 = vld [vmem:[#allocation20 + $0xa20] ss:$16 sps:$4 sm:$0xff]  }
 0x95e   : > { %12288 = vmatpush1.bf16.msra.mxu1 %v17261_v23  ;;  %11961 = vmatprep.subr.bf16.mxu0 %v17266_v25  ;;  %v17333_v23 = vld [vmem:[#allocation20 + $0xa28] ss:$16 sps:$4 sm:$0xff]   ;;  %v17338_v25 = vld [vmem:[#allocation20 + $0xa44] ss:$16 sps:$4 sm:$0xff]  }
 0x95f   : > { %12289 = vmatprep.subr.bf16.mxu1 %v17269_v43  ;;  %v17336_v43 = vld [vmem:[#allocation20 + $0xa40] ss:$16 sps:$4 sm:$0xff]  }
 0x961   : > { %11962 = vmatpush1.bf16.msra.mxu0 %v17264_v44  ;;  %v17339_v44 = vld [vmem:[#allocation20 + $0xa48] ss:$16 sps:$4 sm:$0xff]  }
 0x962   : > { %12290 = vmatpush1.bf16.msra.mxu1 %v17267_v45  ;;  %11963 = vmatprep.subr.bf16.mxu0 %v17272_v37  ;;  %v17344_v45 = vld [vmem:[#allocation20 + $0xa64] ss:$16 sps:$4 sm:$0xff]   ;;  %v17347_v37 = vld [vmem:[#allocation20 + $0xa6c] ss:$16 sps:$4 sm:$0xff]  }
 0x963   : > { %12291 = vmatprep.subr.bf16.mxu1 %v17275_v46  ;;  %v17342_v46 = vld [vmem:[#allocation20 + $0xa60] ss:$16 sps:$4 sm:$0xff]  }
 0x965   : > { %11964 = vmatpush1.bf16.msra.mxu0 %v17270_v7  ;;  %v17345_v7 = vld [vmem:[#allocation20 + $0xa68] ss:$16 sps:$4 sm:$0xff]  }
 0x966   : > { %12292 = vmatpush1.bf16.msra.mxu1 %v17273_v48  ;;  %11965 = vmatprep.subr.bf16.mxu0 %v17278_v61  ;;  %v17350_v48 = vld [vmem:[#allocation20 + $0xa84] ss:$16 sps:$4 sm:$0xff]   ;;  %v17353_v61 = vld [vmem:[#allocation20 + $0xa8c] ss:$16 sps:$4 sm:$0xff]  }
 0x967   : > { %12293 = vmatprep.subr.bf16.mxu1 %v17281_v9  ;;  %v17348_v9 = vld [vmem:[#allocation20 + $0xa80] ss:$16 sps:$4 sm:$0xff]  }
 0x969   : > { %11966 = vmatpush1.bf16.msra.mxu0 %v17276_v49  ;;  %v17351_v49 = vld [vmem:[#allocation20 + $0xa88] ss:$16 sps:$4 sm:$0xff]  }
 0x96a   : > { %12294 = vmatpush1.bf16.msra.mxu1 %v17279_v50  ;;  %11967 = vmatprep.subr.bf16.mxu0 %v17284_v53  ;;  %v17356_v50 = vld [vmem:[#allocation20 + $0xaa4] ss:$16 sps:$4 sm:$0xff]   ;;  %v17359_v53 = vld [vmem:[#allocation20 + $0xaac] ss:$16 sps:$4 sm:$0xff]  }
 0x96b   : > { %12295 = vmatprep.subr.bf16.mxu1 %v17287_v54  ;;  %v17354_v54 = vld [vmem:[#allocation20 + $0xaa0] ss:$16 sps:$4 sm:$0xff]  }
 0x96d   : > { %11968 = vmatpush1.bf16.msra.mxu0 %v17282_v51  ;;  %v17357_v51 = vld [vmem:[#allocation20 + $0xaa8] ss:$16 sps:$4 sm:$0xff]  }
 0x96e   : > { %12296 = vmatpush1.bf16.msra.mxu1 %v17285_v55  ;;  %11969 = vmatprep.subr.bf16.mxu0 %v17290_v57  ;;  %v17362_v55 = vld [vmem:[#allocation20 + $0xac4] ss:$16 sps:$4 sm:$0xff]   ;;  %v17365_v57 = vld [vmem:[#allocation20 + $0xacc] ss:$16 sps:$4 sm:$0xff]  }
 0x96f   : > { %12297 = vmatprep.subr.bf16.mxu1 %v17293_v58  ;;  %v17360_v58 = vld [vmem:[#allocation20 + $0xac0] ss:$16 sps:$4 sm:$0xff]  }
 0x971   : > { %11970 = vmatpush1.bf16.msra.mxu0 %v17288_v32  ;;  %v17363_v32 = vld [vmem:[#allocation20 + $0xac8] ss:$16 sps:$4 sm:$0xff]  }
 0x972   : > { %12298 = vmatpush1.bf16.msra.mxu1 %v17291_v59  ;;  %11971 = vmatprep.subr.bf16.mxu0 %v17296_v60  ;;  %v17368_v59 = vld [vmem:[#allocation20 + $0xae4] ss:$16 sps:$4 sm:$0xff]   ;;  %v17371_v60 = vld [vmem:[#allocation20 + $0xaec] ss:$16 sps:$4 sm:$0xff]  }
 0x973   : > { %12299 = vmatprep.subr.bf16.mxu1 %v17299_v34  ;;  %v17366_v34 = vld [vmem:[#allocation20 + $0xae0] ss:$16 sps:$4 sm:$0xff]  }
 0x975   : > { %11972 = vmatpush1.bf16.msra.mxu0 %v17294_v47  ;;  %v17369_v47 = vld [vmem:[#allocation20 + $0xae8] ss:$16 sps:$4 sm:$0xff]  }
 0x976   : > { %12300 = vmatpush1.bf16.msra.mxu1 %v17297_v21  ;;  %11973 = vmatprep.subr.bf16.mxu0 %v17302_v38  ;;  %v17374_v21 = vld [vmem:[#allocation20 + $0xb04] ss:$16 sps:$4 sm:$0xff]   ;;  %v17377_v38 = vld [vmem:[#allocation20 + $0xb0c] ss:$16 sps:$4 sm:$0xff]  }
 0x977   : > { %12301 = vmatprep.subr.bf16.mxu1 %v17305_v62  ;;  %v17372_v62 = vld [vmem:[#allocation20 + $0xb00] ss:$16 sps:$4 sm:$0xff]  }
 0x979   : > { %11974 = vmatpush1.bf16.msra.mxu0 %v17300_v63  ;;  %v17375_v63 = vld [vmem:[#allocation20 + $0xb08] ss:$16 sps:$4 sm:$0xff]  }
 0x97a   : > { %12302 = vmatpush1.bf16.msra.mxu1 %v17303_v52  ;;  %11975 = vmatprep.subr.bf16.mxu0 %v17308_v40  ;;  %v17380_v52 = vld [vmem:[#allocation20 + $0xb24] ss:$16 sps:$4 sm:$0xff]   ;;  %v17383_v40 = vld [vmem:[#allocation20 + $0xb2c] ss:$16 sps:$4 sm:$0xff]  }
 0x97b   : > { %12303 = vmatprep.subr.bf16.mxu1 %v17311_v12  ;;  %v17378_v12 = vld [vmem:[#allocation20 + $0xb20] ss:$16 sps:$4 sm:$0xff]  }
 0x97d   : > { %11976 = vmatpush1.bf16.msra.mxu0 %v17306_v0  ;;  %v17381_v0 = vld [vmem:[#allocation20 + $0xb28] ss:$16 sps:$4 sm:$0xff]  }
 0x97e   : > { %12304 = vmatpush1.bf16.msra.mxu1 %v17309_v2  ;;  %11977 = vmatprep.subr.bf16.mxu0 %v17314_v27  ;;  %v17389_v2 = vld [vmem:[#allocation20 + $0xb4c] ss:$16 sps:$4 sm:$0xff]   ;;  %v17384_v27 = vld [vmem:[#allocation20 + $0xb40] ss:$16 sps:$4 sm:$0xff]  }
 0x97f   : > { %12305 = vmatprep.subr.bf16.mxu1 %v17317_v31  ;;  %v17387_v31 = vld [vmem:[#allocation20 + $0xb48] ss:$16 sps:$4 sm:$0xff]  }
 0x981   : > { %11978 = vmatpush1.bf16.msra.mxu0 %v17312_v3  ;;  %v17392_v3 = vld [vmem:[#allocation20 + $0xb64] ss:$16 sps:$4 sm:$0xff]  }
 0x982   : > { %12306 = vmatpush1.bf16.msra.mxu1 %v17315_v4  ;;  %11979 = vmatprep.subr.bf16.mxu0 %v17320_v56  ;;  %v17390_v4 = vld [vmem:[#allocation20 + $0xb60] ss:$16 sps:$4 sm:$0xff]   ;;  %v17393_v56 = vld [vmem:[#allocation20 + $0xb68] ss:$16 sps:$4 sm:$0xff]  }
 0x983   : > { %12307 = vmatprep.subr.bf16.mxu1 %v17323_v6  ;;  %v17398_v6 = vld [vmem:[#allocation20 + $0xb84] ss:$16 sps:$4 sm:$0xff]  }
 0x985   : > { %11980 = vmatpush1.bf16.msra.mxu0 %v17318_v41  ;;  %v17401_v41 = vld [vmem:[#allocation20 + $0xb8c] ss:$16 sps:$4 sm:$0xff]  }
 0x986   : > { %12308 = vmatpush1.bf16.msra.mxu1 %v17321_v39  ;;  %11990 = vmatprep.subr.bf16.mxu0 %v17326_v13  ;;  %v17399_v39 = vld [vmem:[#allocation20 + $0xb88] ss:$16 sps:$4 sm:$0xff]   ;;  %v17404_v13 = vld [vmem:[#allocation20 + $0xba4] ss:$16 sps:$4 sm:$0xff]  }
 0x987   : > { %12318 = vmatprep.subr.bf16.mxu1 %v17329_v14  ;;  %v17407_v14 = vld [vmem:[#allocation20 + $0xbac] ss:$16 sps:$4 sm:$0xff]  }
 0x988   : > { %11982 = vmatmul.mubr.bf16.vlgmr.msra.gmra.mrb[52].mxu0 %v8683_v24 }
 0x989   : > { %12310 = vmatmul.mubr.bf16.vlgmr.msra.gmra.mrb[60].mxu1 %v8683_v24  ;;  %11991 = vmatpush1.bf16.msra.mxu0 %v17324_v16  ;;  %v17405_v16 = vld [vmem:[#allocation20 + $0xba8] ss:$16 sps:$4 sm:$0xff]   ;;  %v17410_v24 = vld [vmem:[#allocation20 + $0xbc4] ss:$16 sps:$4 sm:$0xff]  }
 0x98a   : > { %12022 = vmatprep.mubr.bf16.mxu0 %v8686_v18  ;;  %12319 = vmatpush1.bf16.msra.mxu1 %v17327_v35  ;;  %v17413_v35 = vld [vmem:[#allocation20 + $0xbcc] ss:$16 sps:$4 sm:$0xff]  }
 0x98b   : > { %12350 = vmatprep.mubr.bf16.mxu1 %v8686_v18  ;;  %11992 = vmatprep.subr.bf16.mxu0 %v17332_v36  ;;  %v17408_v36 = vld [vmem:[#allocation20 + $0xbc0] ss:$16 sps:$4 sm:$0xff]   ;;  %v17411_v18 = vld [vmem:[#allocation20 + $0xbc8] ss:$16 sps:$4 sm:$0xff]  }
 0x98c   : > { %12320 = vmatprep.subr.bf16.mxu1 %v17335_v30  ;;  %v17416_v30 = vld [vmem:[#allocation20 + $0xbe4] ss:$16 sps:$4 sm:$0xff]  }
 0x98d   : > { %11993 = vmatpush1.bf16.msra.mxu0 %v17330_v22  ;;  %v17419_v22 = vld [vmem:[#allocation20 + $0xbec] ss:$16 sps:$4 sm:$0xff]  }
 0x98e   : > { %12321 = vmatpush1.bf16.msra.mxu1 %v17333_v23  ;;  %11994 = vmatprep.subr.bf16.mxu0 %v17338_v25  ;;  %v17414_v23 = vld [vmem:[#allocation20 + $0xbe0] ss:$16 sps:$4 sm:$0xff]   ;;  %v8669_v25 = vmax.f32 %v19334_v26, 0.0 }
 0x98f   : > { %12322 = vmatprep.subr.bf16.mxu1 %v17341_v33  ;;  %v17417_v33 = vld [vmem:[#allocation20 + $0xbe8] ss:$16 sps:$4 sm:$0xff]   ;;  %v17426_v26 = vld [vmem:[#allocation20 + $0xc20] ss:$16 sps:$4 sm:$0xff]  }
 0x991   : > { %11995 = vmatpush1.bf16.msra.mxu0 %v17336_v43  ;;  %v17422_v43 = vld [vmem:[#allocation20 + $0xc04] ss:$16 sps:$4 sm:$0xff]  }
 0x992   : > { %12323 = vmatpush1.bf16.msra.mxu1 %v17339_v44  ;;  %11996 = vmatprep.subr.bf16.mxu0 %v17344_v45  ;;  %v17425_v44 = vld [vmem:[#allocation20 + $0xc0c] ss:$16 sps:$4 sm:$0xff]   ;;  %v8672_v45 = vmax.f32 %v19352_v5, 0.0 }
 0x993   : > { %12324 = vmatprep.subr.bf16.mxu1 %v17347_v37  ;;  %v17420_v37 = vld [vmem:[#allocation20 + $0xc00] ss:$16 sps:$4 sm:$0xff]   ;;  %v17437_v5 = vld [vmem:[#allocation20 + $0xc4c] ss:$16 sps:$4 sm:$0xff]  }
 0x995   : > { %11997 = vmatpush1.bf16.msra.mxu0 %v17342_v46  ;;  %v8685_v46 = vpack.c.bf16 %v8669_v25, %v8669_v25  ;;  %v17500_v25 = vld [vmem:[#allocation20 + $0xda4] ss:$16 sps:$4 sm:$0xff]  }
 0x996   : > { %12325 = vmatpush1.bf16.msra.mxu1 %v17345_v7  ;;  %11998 = vmatprep.subr.bf16.mxu0 %v17350_v48  ;;  %v17423_v7 = vld [vmem:[#allocation20 + $0xc08] ss:$16 sps:$4 sm:$0xff]   ;;  %v17428_v48 = vld [vmem:[#allocation20 + $0xc24] ss:$16 sps:$4 sm:$0xff]  }
 0x997   : > { %12326 = vmatprep.subr.bf16.mxu1 %v17353_v61  ;;  %v8688_v61 = vpack.c.bf16 %v8672_v45, %v8672_v45  ;;  %v17506_v45 = vld [vmem:[#allocation20 + $0xdc4] ss:$16 sps:$4 sm:$0xff]  }
 0x999   : > { %11999 = vmatpush1.bf16.msra.mxu0 %v17348_v9  ;;  %v17431_v9 = vld [vmem:[#allocation20 + $0xc2c] ss:$16 sps:$4 sm:$0xff]  }
 0x99a   : > { %12327 = vmatpush1.bf16.msra.mxu1 %v17351_v49  ;;  %12000 = vmatprep.subr.bf16.mxu0 %v17356_v50  ;;  %v17429_v49 = vld [vmem:[#allocation20 + $0xc28] ss:$16 sps:$4 sm:$0xff]   ;;  %v17434_v50 = vld [vmem:[#allocation20 + $0xc44] ss:$16 sps:$4 sm:$0xff]  }
 0x99b   : > { %12328 = vmatprep.subr.bf16.mxu1 %v17359_v53  ;;  %v17432_v53 = vld [vmem:[#allocation20 + $0xc40] ss:$16 sps:$4 sm:$0xff]  }
 0x99d   : > { %12001 = vmatpush1.bf16.msra.mxu0 %v17354_v54  ;;  %v17435_v54 = vld [vmem:[#allocation20 + $0xc48] ss:$16 sps:$4 sm:$0xff]  }
 0x99e   : > { %12329 = vmatpush1.bf16.msra.mxu1 %v17357_v51  ;;  %12002 = vmatprep.subr.bf16.mxu0 %v17362_v55  ;;  %v17440_v51 = vld [vmem:[#allocation20 + $0xc64] ss:$16 sps:$4 sm:$0xff]   ;;  %v17443_v55 = vld [vmem:[#allocation20 + $0xc6c] ss:$16 sps:$4 sm:$0xff]  }
 0x99f   : > { %12330 = vmatprep.subr.bf16.mxu1 %v17365_v57  ;;  %v17438_v57 = vld [vmem:[#allocation20 + $0xc60] ss:$16 sps:$4 sm:$0xff]  }
 0x9a1   : > { %12003 = vmatpush1.bf16.msra.mxu0 %v17360_v58  ;;  %v17441_v58 = vld [vmem:[#allocation20 + $0xc68] ss:$16 sps:$4 sm:$0xff]  }
 0x9a2   : > { %12331 = vmatpush1.bf16.msra.mxu1 %v17363_v32  ;;  %12004 = vmatprep.subr.bf16.mxu0 %v17368_v59  ;;  %v17446_v32 = vld [vmem:[#allocation20 + $0xc84] ss:$16 sps:$4 sm:$0xff]   ;;  %v17449_v59 = vld [vmem:[#allocation20 + $0xc8c] ss:$16 sps:$4 sm:$0xff]  }
 0x9a3   : > { %12332 = vmatprep.subr.bf16.mxu1 %v17371_v60  ;;  %v17444_v60 = vld [vmem:[#allocation20 + $0xc80] ss:$16 sps:$4 sm:$0xff]  }
 0x9a5   : > { %12005 = vmatpush1.bf16.msra.mxu0 %v17366_v34  ;;  %v17447_v34 = vld [vmem:[#allocation20 + $0xc88] ss:$16 sps:$4 sm:$0xff]  }
 0x9a6   : > { %12333 = vmatpush1.bf16.msra.mxu1 %v17369_v47  ;;  %12006 = vmatprep.subr.bf16.mxu0 %v17374_v21  ;;  %v17452_v47 = vld [vmem:[#allocation20 + $0xca4] ss:$16 sps:$4 sm:$0xff]   ;;  %v17455_v21 = vld [vmem:[#allocation20 + $0xcac] ss:$16 sps:$4 sm:$0xff]  }
 0x9a7   : > { %12334 = vmatprep.subr.bf16.mxu1 %v17377_v38  ;;  %v17450_v38 = vld [vmem:[#allocation20 + $0xca0] ss:$16 sps:$4 sm:$0xff]  }
 0x9a9   : > { %12007 = vmatpush1.bf16.msra.mxu0 %v17372_v62  ;;  %v17453_v62 = vld [vmem:[#allocation20 + $0xca8] ss:$16 sps:$4 sm:$0xff]  }
 0x9aa   : > { %12335 = vmatpush1.bf16.msra.mxu1 %v17375_v63  ;;  %12008 = vmatprep.subr.bf16.mxu0 %v17380_v52  ;;  %v17458_v63 = vld [vmem:[#allocation20 + $0xcc4] ss:$16 sps:$4 sm:$0xff]   ;;  %v17461_v52 = vld [vmem:[#allocation20 + $0xccc] ss:$16 sps:$4 sm:$0xff]  }
 0x9ab   : > { %12336 = vmatprep.subr.bf16.mxu1 %v17383_v40  ;;  %v17456_v40 = vld [vmem:[#allocation20 + $0xcc0] ss:$16 sps:$4 sm:$0xff]  }
 0x9ad   : > { %12009 = vmatpush1.bf16.msra.mxu0 %v17378_v12  ;;  %v17459_v12 = vld [vmem:[#allocation20 + $0xcc8] ss:$16 sps:$4 sm:$0xff]  }
 0x9ae   : > { %12337 = vmatpush1.bf16.msra.mxu1 %v17381_v0  ;;  %12010 = vmatprep.subr.bf16.mxu0 %v17386_v1  ;;  %v17464_v0 = vld [vmem:[#allocation20 + $0xce4] ss:$16 sps:$4 sm:$0xff]   ;;  %v17467_v1 = vld [vmem:[#allocation20 + $0xcec] ss:$16 sps:$4 sm:$0xff]  }
 0x9af   : > { %12338 = vmatprep.subr.bf16.mxu1 %v17389_v2  ;;  %v17462_v2 = vld [vmem:[#allocation20 + $0xce0] ss:$16 sps:$4 sm:$0xff]  }
 0x9b1   : > { %12011 = vmatpush1.bf16.msra.mxu0 %v17384_v27  ;;  %v17465_v27 = vld [vmem:[#allocation20 + $0xce8] ss:$16 sps:$4 sm:$0xff]  }
 0x9b2   : > { %12339 = vmatpush1.bf16.msra.mxu1 %v17387_v31  ;;  %12012 = vmatprep.subr.bf16.mxu0 %v17392_v3  ;;  %v17470_v31 = vld [vmem:[#allocation20 + $0xd04] ss:$16 sps:$4 sm:$0xff]   ;;  %v17473_v3 = vld [vmem:[#allocation20 + $0xd0c] ss:$16 sps:$4 sm:$0xff]  }
 0x9b3   : > { %12340 = vmatprep.subr.bf16.mxu1 %v17395_v28  ;;  %v17468_v28 = vld [vmem:[#allocation20 + $0xd00] ss:$16 sps:$4 sm:$0xff]  }
 0x9b5   : > { %12013 = vmatpush1.bf16.msra.mxu0 %v17390_v4  ;;  %v17471_v4 = vld [vmem:[#allocation20 + $0xd08] ss:$16 sps:$4 sm:$0xff]  }
 0x9b6   : > { %12341 = vmatpush1.bf16.msra.mxu1 %v17393_v56  ;;  %12014 = vmatprep.subr.bf16.mxu0 %v17398_v6  ;;  %v17476_v56 = vld [vmem:[#allocation20 + $0xd24] ss:$16 sps:$4 sm:$0xff]   ;;  %v17479_v6 = vld [vmem:[#allocation20 + $0xd2c] ss:$16 sps:$4 sm:$0xff]  }
 0x9b7   : > { %12342 = vmatprep.subr.bf16.mxu1 %v17401_v41  ;;  %v17474_v41 = vld [vmem:[#allocation20 + $0xd20] ss:$16 sps:$4 sm:$0xff]  }
 0x9b9   : > { %12015 = vmatpush1.bf16.msra.mxu0 %v17396_v11  ;;  %v17477_v11 = vld [vmem:[#allocation20 + $0xd28] ss:$16 sps:$4 sm:$0xff]  }
 0x9ba   : > { %12343 = vmatpush1.bf16.msra.mxu1 %v17399_v39  ;;  %12016 = vmatprep.subr.bf16.mxu0 %v17404_v13  ;;  %v17482_v39 = vld [vmem:[#allocation20 + $0xd44] ss:$16 sps:$4 sm:$0xff]   ;;  %v17485_v13 = vld [vmem:[#allocation20 + $0xd4c] ss:$16 sps:$4 sm:$0xff]  }
 0x9bb   : > { %12344 = vmatprep.subr.bf16.mxu1 %v17407_v14  ;;  %v17480_v14 = vld [vmem:[#allocation20 + $0xd40] ss:$16 sps:$4 sm:$0xff]  }
 0x9bd   : > { %12017 = vmatpush1.bf16.msra.mxu0 %v17402_v15  ;;  %v17483_v15 = vld [vmem:[#allocation20 + $0xd48] ss:$16 sps:$4 sm:$0xff]  }
 0x9be   : > { %12345 = vmatpush1.bf16.msra.mxu1 %v17405_v16  ;;  %12018 = vmatprep.subr.bf16.mxu0 %v17410_v24  ;;  %v17488_v16 = vld [vmem:[#allocation20 + $0xd64] ss:$16 sps:$4 sm:$0xff]   ;;  %v17491_v24 = vld [vmem:[#allocation20 + $0xd6c] ss:$16 sps:$4 sm:$0xff]  }
 0x9bf   : > { %12346 = vmatprep.subr.bf16.mxu1 %v17413_v35  ;;  %v17486_v35 = vld [vmem:[#allocation20 + $0xd60] ss:$16 sps:$4 sm:$0xff]  }
 0x9c1   : > { %12019 = vmatpush1.bf16.msra.mxu0 %v17408_v36  ;;  %v17489_v36 = vld [vmem:[#allocation20 + $0xd68] ss:$16 sps:$4 sm:$0xff]  }
 0x9c2   : > { %12347 = vmatpush1.bf16.msra.mxu1 %v17411_v18  ;;  %12020 = vmatprep.subr.bf16.mxu0 %v17416_v30  ;;  %v17494_v18 = vld [vmem:[#allocation20 + $0xd84] ss:$16 sps:$4 sm:$0xff]   ;;  %v17497_v30 = vld [vmem:[#allocation20 + $0xd8c] ss:$16 sps:$4 sm:$0xff]  }
 0x9c3   : > { %12348 = vmatprep.subr.bf16.mxu1 %v17419_v22  ;;  %v17492_v22 = vld [vmem:[#allocation20 + $0xd80] ss:$16 sps:$4 sm:$0xff]  }
 0x9c5   : > { %12021 = vmatpush1.bf16.msra.mxu0 %v17414_v23  ;;  %v17495_v23 = vld [vmem:[#allocation20 + $0xd88] ss:$16 sps:$4 sm:$0xff]  }
 0x9c6   : > { %12349 = vmatpush1.bf16.msra.mxu1 %v17417_v33  ;;  %12031 = vmatprep.subr.bf16.mxu0 %v17422_v43  ;;  %v17503_v33 = vld [vmem:[#allocation20 + $0xdac] ss:$16 sps:$4 sm:$0xff]   ;;  %v17498_v43 = vld [vmem:[#allocation20 + $0xda0] ss:$16 sps:$4 sm:$0xff]  }
 0x9c7   : > { %12359 = vmatprep.subr.bf16.mxu1 %v17425_v44  ;;  %v17501_v44 = vld [vmem:[#allocation20 + $0xda8] ss:$16 sps:$4 sm:$0xff]  }
 0x9c8   : > { %12023 = vmatmul.mubr.bf16.vlgmr.msra.gmra.mrb[52].mxu0 %v8685_v46 }
 0x9c9   : > { %12351 = vmatmul.mubr.bf16.vlgmr.msra.gmra.mrb[60].mxu1 %v8685_v46  ;;  %12032 = vmatpush1.bf16.msra.mxu0 %v17420_v37  ;;  %v17509_v37 = vld [vmem:[#allocation20 + $0xdcc] ss:$16 sps:$4 sm:$0xff]   ;;  %v17504_v46 = vld [vmem:[#allocation20 + $0xdc0] ss:$16 sps:$4 sm:$0xff]  }
 0x9ca   : > { %12063 = vmatprep.mubr.bf16.mxu0 %v8688_v61  ;;  %12360 = vmatpush1.bf16.msra.mxu1 %v17423_v7  ;;  %v17507_v7 = vld [vmem:[#allocation20 + $0xdc8] ss:$16 sps:$4 sm:$0xff]  }
 0x9cb   : > { %12391 = vmatprep.mubr.bf16.mxu1 %v8688_v61  ;;  %12033 = vmatprep.subr.bf16.mxu0 %v17428_v48  ;;  %v17512_v48 = vld [vmem:[#allocation20 + $0xde4] ss:$16 sps:$4 sm:$0xff]   ;;  %v17515_v61 = vld [vmem:[#allocation20 + $0xdec] ss:$16 sps:$4 sm:$0xff]  }
 0x9cc   : > { %12361 = vmatprep.subr.bf16.mxu1 %v17431_v9  ;;  %v17510_v9 = vld [vmem:[#allocation20 + $0xde0] ss:$16 sps:$4 sm:$0xff]  }
 0x9cd   : > { %12034 = vmatpush1.bf16.msra.mxu0 %v17426_v26  ;;  %v8671_v26 = vmax.f32 %v19348_v29, 0.0  ;;  %v17522_v29 = vld [vmem:[#allocation20 + $0xe20] ss:$16 sps:$4 sm:$0xff]  }
 0x9ce   : > { %12362 = vmatpush1.bf16.msra.mxu1 %v17429_v49  ;;  %12035 = vmatprep.subr.bf16.mxu0 %v17434_v50  ;;  %v17513_v49 = vld [vmem:[#allocation20 + $0xde8] ss:$16 sps:$4 sm:$0xff]   ;;  %v17518_v50 = vld [vmem:[#allocation20 + $0xe04] ss:$16 sps:$4 sm:$0xff]  }
 0x9cf   : > { %12363 = vmatprep.subr.bf16.mxu1 %v17437_v5  ;;  %v17521_v5 = vld [vmem:[#allocation20 + $0xe0c] ss:$16 sps:$4 sm:$0xff]  }
 0x9d1   : > { %12036 = vmatpush1.bf16.msra.mxu0 %v17432_v53  ;;  %v8674_v53 = vmax.f32 %v19354_v19, 0.0  ;;  %v17533_v19 = vld [vmem:[#allocation20 + $0xe4c] ss:$16 sps:$4 sm:$0xff]  }
 0x9d2   : > { %12364 = vmatpush1.bf16.msra.mxu1 %v17435_v54  ;;  %12037 = vmatprep.subr.bf16.mxu0 %v17440_v51  ;;  %v17516_v54 = vld [vmem:[#allocation20 + $0xe00] ss:$16 sps:$4 sm:$0xff]   ;;  %v8687_v51 = vpack.c.bf16 %v8671_v26, %v8671_v26 }
 0x9d3   : > { %12365 = vmatprep.subr.bf16.mxu1 %v17443_v55  ;;  %v17519_v55 = vld [vmem:[#allocation20 + $0xe08] ss:$16 sps:$4 sm:$0xff]   ;;  %v17594_v26 = vld [vmem:[#allocation20 + $0xfa0] ss:$16 sps:$4 sm:$0xff]  }
 0x9d5   : > { %12038 = vmatpush1.bf16.msra.mxu0 %v17438_v57  ;;  %v17524_v57 = vld [vmem:[#allocation20 + $0xe24] ss:$16 sps:$4 sm:$0xff]  }
 0x9d6   : > { %12366 = vmatpush1.bf16.msra.mxu1 %v17441_v58  ;;  %12039 = vmatprep.subr.bf16.mxu0 %v17446_v32  ;;  %v8690_v58 = vpack.c.bf16 %v8674_v53, %v8674_v53  ;;  %v17527_v32 = vld [vmem:[#allocation20 + $0xe2c] ss:$16 sps:$4 sm:$0xff]   ;;  %v17600_v53 = vld [vmem:[#allocation20 + $0xfc0] ss:$16 sps:$4 sm:$0xff]  }
 0x9d7   : > { %12367 = vmatprep.subr.bf16.mxu1 %v17449_v59  ;;  %v17525_v59 = vld [vmem:[#allocation20 + $0xe28] ss:$16 sps:$4 sm:$0xff]  }
 0x9d9   : > { %12040 = vmatpush1.bf16.msra.mxu0 %v17444_v60  ;;  %v17530_v60 = vld [vmem:[#allocation20 + $0xe44] ss:$16 sps:$4 sm:$0xff]  }
 0x9da   : > { %12368 = vmatpush1.bf16.msra.mxu1 %v17447_v34  ;;  %12041 = vmatprep.subr.bf16.mxu0 %v17452_v47  ;;  %v17528_v34 = vld [vmem:[#allocation20 + $0xe40] ss:$16 sps:$4 sm:$0xff]   ;;  %v17531_v47 = vld [vmem:[#allocation20 + $0xe48] ss:$16 sps:$4 sm:$0xff]  }
 0x9db   : > { %12369 = vmatprep.subr.bf16.mxu1 %v17455_v21  ;;  %v17536_v21 = vld [vmem:[#allocation20 + $0xe64] ss:$16 sps:$4 sm:$0xff]  }
 0x9dd   : > { %12042 = vmatpush1.bf16.msra.mxu0 %v17450_v38  ;;  %v17539_v38 = vld [vmem:[#allocation20 + $0xe6c] ss:$16 sps:$4 sm:$0xff]  }
 0x9de   : > { %12370 = vmatpush1.bf16.msra.mxu1 %v17453_v62  ;;  %12043 = vmatprep.subr.bf16.mxu0 %v17458_v63  ;;  %v17534_v62 = vld [vmem:[#allocation20 + $0xe60] ss:$16 sps:$4 sm:$0xff]   ;;  %v17537_v63 = vld [vmem:[#allocation20 + $0xe68] ss:$16 sps:$4 sm:$0xff]  }
 0x9df   : > { %12371 = vmatprep.subr.bf16.mxu1 %v17461_v52  ;;  %v17542_v52 = vld [vmem:[#allocation20 + $0xe84] ss:$16 sps:$4 sm:$0xff]  }
 0x9e1   : > { %12044 = vmatpush1.bf16.msra.mxu0 %v17456_v40  ;;  %v17545_v40 = vld [vmem:[#allocation20 + $0xe8c] ss:$16 sps:$4 sm:$0xff]  }
 0x9e2   : > { %12372 = vmatpush1.bf16.msra.mxu1 %v17459_v12  ;;  %12045 = vmatprep.subr.bf16.mxu0 %v17464_v0  ;;  %v17540_v12 = vld [vmem:[#allocation20 + $0xe80] ss:$16 sps:$4 sm:$0xff]   ;;  %v17543_v0 = vld [vmem:[#allocation20 + $0xe88] ss:$16 sps:$4 sm:$0xff]  }
 0x9e3   : > { %12373 = vmatprep.subr.bf16.mxu1 %v17467_v1  ;;  %v17548_v1 = vld [vmem:[#allocation20 + $0xea4] ss:$16 sps:$4 sm:$0xff]  }
 0x9e5   : > { %12046 = vmatpush1.bf16.msra.mxu0 %v17462_v2  ;;  %v17551_v2 = vld [vmem:[#allocation20 + $0xeac] ss:$16 sps:$4 sm:$0xff]  }
 0x9e6   : > { %12374 = vmatpush1.bf16.msra.mxu1 %v17465_v27  ;;  %12047 = vmatprep.subr.bf16.mxu0 %v17470_v31  ;;  %v17546_v27 = vld [vmem:[#allocation20 + $0xea0] ss:$16 sps:$4 sm:$0xff]   ;;  %v17549_v31 = vld [vmem:[#allocation20 + $0xea8] ss:$16 sps:$4 sm:$0xff]  }
 0x9e7   : > { %12375 = vmatprep.subr.bf16.mxu1 %v17473_v3  ;;  %v17554_v3 = vld [vmem:[#allocation20 + $0xec4] ss:$16 sps:$4 sm:$0xff]  }
 0x9e9   : > { %12048 = vmatpush1.bf16.msra.mxu0 %v17468_v28  ;;  %v17557_v28 = vld [vmem:[#allocation20 + $0xecc] ss:$16 sps:$4 sm:$0xff]  }
 0x9ea   : > { %12376 = vmatpush1.bf16.msra.mxu1 %v17471_v4  ;;  %12049 = vmatprep.subr.bf16.mxu0 %v17476_v56  ;;  %v17552_v4 = vld [vmem:[#allocation20 + $0xec0] ss:$16 sps:$4 sm:$0xff]   ;;  %v17555_v56 = vld [vmem:[#allocation20 + $0xec8] ss:$16 sps:$4 sm:$0xff]  }
 0x9eb   : > { %12377 = vmatprep.subr.bf16.mxu1 %v17479_v6  ;;  %v17560_v6 = vld [vmem:[#allocation20 + $0xee4] ss:$16 sps:$4 sm:$0xff]  }
 0x9ed   : > { %12050 = vmatpush1.bf16.msra.mxu0 %v17474_v41  ;;  %v17563_v41 = vld [vmem:[#allocation20 + $0xeec] ss:$16 sps:$4 sm:$0xff]  }
 0x9ee   : > { %12378 = vmatpush1.bf16.msra.mxu1 %v17477_v11  ;;  %12051 = vmatprep.subr.bf16.mxu0 %v17482_v39  ;;  %v17558_v11 = vld [vmem:[#allocation20 + $0xee0] ss:$16 sps:$4 sm:$0xff]   ;;  %v17561_v39 = vld [vmem:[#allocation20 + $0xee8] ss:$16 sps:$4 sm:$0xff]  }
 0x9ef   : > { %12379 = vmatprep.subr.bf16.mxu1 %v17485_v13  ;;  %v17566_v13 = vld [vmem:[#allocation20 + $0xf04] ss:$16 sps:$4 sm:$0xff]  }
 0x9f1   : > { %12052 = vmatpush1.bf16.msra.mxu0 %v17480_v14  ;;  %v17569_v14 = vld [vmem:[#allocation20 + $0xf0c] ss:$16 sps:$4 sm:$0xff]  }
 0x9f2   : > { %12380 = vmatpush1.bf16.msra.mxu1 %v17483_v15  ;;  %12053 = vmatprep.subr.bf16.mxu0 %v17488_v16  ;;  %v17564_v15 = vld [vmem:[#allocation20 + $0xf00] ss:$16 sps:$4 sm:$0xff]   ;;  %v17567_v16 = vld [vmem:[#allocation20 + $0xf08] ss:$16 sps:$4 sm:$0xff]  }
 0x9f3   : > { %12381 = vmatprep.subr.bf16.mxu1 %v17491_v24  ;;  %v17572_v24 = vld [vmem:[#allocation20 + $0xf24] ss:$16 sps:$4 sm:$0xff]  }
 0x9f5   : > { %12054 = vmatpush1.bf16.msra.mxu0 %v17486_v35  ;;  %v17575_v35 = vld [vmem:[#allocation20 + $0xf2c] ss:$16 sps:$4 sm:$0xff]  }
 0x9f6   : > { %12382 = vmatpush1.bf16.msra.mxu1 %v17489_v36  ;;  %12055 = vmatprep.subr.bf16.mxu0 %v17494_v18  ;;  %v17570_v36 = vld [vmem:[#allocation20 + $0xf20] ss:$16 sps:$4 sm:$0xff]   ;;  %v17573_v18 = vld [vmem:[#allocation20 + $0xf28] ss:$16 sps:$4 sm:$0xff]  }
 0x9f7   : > { %12383 = vmatprep.subr.bf16.mxu1 %v17497_v30  ;;  %v17578_v30 = vld [vmem:[#allocation20 + $0xf44] ss:$16 sps:$4 sm:$0xff]  }
 0x9f9   : > { %12056 = vmatpush1.bf16.msra.mxu0 %v17492_v22  ;;  %v17581_v22 = vld [vmem:[#allocation20 + $0xf4c] ss:$16 sps:$4 sm:$0xff]  }
 0x9fa   : > { %12384 = vmatpush1.bf16.msra.mxu1 %v17495_v23  ;;  %12057 = vmatprep.subr.bf16.mxu0 %v17500_v25  ;;  %v17576_v23 = vld [vmem:[#allocation20 + $0xf40] ss:$16 sps:$4 sm:$0xff]   ;;  %v17579_v25 = vld [vmem:[#allocation20 + $0xf48] ss:$16 sps:$4 sm:$0xff]  }
 0x9fb   : > { %12385 = vmatprep.subr.bf16.mxu1 %v17503_v33  ;;  %v17584_v33 = vld [vmem:[#allocation20 + $0xf64] ss:$16 sps:$4 sm:$0xff]  }
 0x9fd   : > { %12058 = vmatpush1.bf16.msra.mxu0 %v17498_v43  ;;  %v17587_v43 = vld [vmem:[#allocation20 + $0xf6c] ss:$16 sps:$4 sm:$0xff]  }
 0x9fe   : > { %12386 = vmatpush1.bf16.msra.mxu1 %v17501_v44  ;;  %12059 = vmatprep.subr.bf16.mxu0 %v17506_v45  ;;  %v17582_v44 = vld [vmem:[#allocation20 + $0xf60] ss:$16 sps:$4 sm:$0xff]   ;;  %v17585_v45 = vld [vmem:[#allocation20 + $0xf68] ss:$16 sps:$4 sm:$0xff]  }
 0x9ff   : > { %12387 = vmatprep.subr.bf16.mxu1 %v17509_v37  ;;  %v17590_v37 = vld [vmem:[#allocation20 + $0xf84] ss:$16 sps:$4 sm:$0xff]  }
 0xa01   : > { %12060 = vmatpush1.bf16.msra.mxu0 %v17504_v46  ;;  %v17593_v46 = vld [vmem:[#allocation20 + $0xf8c] ss:$16 sps:$4 sm:$0xff]  }
 0xa02   : > { %12388 = vmatpush1.bf16.msra.mxu1 %v17507_v7  ;;  %12061 = vmatprep.subr.bf16.mxu0 %v17512_v48  ;;  %v17588_v7 = vld [vmem:[#allocation20 + $0xf80] ss:$16 sps:$4 sm:$0xff]   ;;  %v17591_v48 = vld [vmem:[#allocation20 + $0xf88] ss:$16 sps:$4 sm:$0xff]  }
 0xa03   : > { %12389 = vmatprep.subr.bf16.mxu1 %v17515_v61  ;;  %v17596_v61 = vld [vmem:[#allocation20 + $0xfa4] ss:$16 sps:$4 sm:$0xff]  }
 0xa05   : > { %12062 = vmatpush1.bf16.msra.mxu0 %v17510_v9  ;;  %v17599_v9 = vld [vmem:[#allocation20 + $0xfac] ss:$16 sps:$4 sm:$0xff]  }
 0xa06   : > { %12390 = vmatpush1.bf16.msra.mxu1 %v17513_v49  ;;  %12072 = vmatprep.subr.bf16.mxu0 %v17518_v50  ;;  %v17597_v49 = vld [vmem:[#allocation20 + $0xfa8] ss:$16 sps:$4 sm:$0xff]   ;;  %v17602_v50 = vld [vmem:[#allocation20 + $0xfc4] ss:$16 sps:$4 sm:$0xff]  }
 0xa07   : > { %12400 = vmatprep.subr.bf16.mxu1 %v17521_v5  ;;  %v17605_v5 = vld [vmem:[#allocation20 + $0xfcc] ss:$16 sps:$4 sm:$0xff]  }
 0xa08   : > { %12064 = vmatmul.mubr.bf16.vlgmr.msra.gmra.mrb[52].mxu0 %v8687_v51 }
 0xa09   : > { %12392 = vmatmul.mubr.bf16.vlgmr.msra.gmra.mrb[60].mxu1 %v8687_v51  ;;  %12073 = vmatpush1.bf16.msra.mxu0 %v17516_v54  ;;  %v17603_v54 = vld [vmem:[#allocation20 + $0xfc8] ss:$16 sps:$4 sm:$0xff]   ;;  %v17608_v51 = vld [vmem:[#allocation20 + $0xfe4] ss:$16 sps:$4 sm:$0xff]  }
 0xa0a   : > { %12104 = vmatprep.mubr.bf16.mxu0 %v8690_v58  ;;  %12401 = vmatpush1.bf16.msra.mxu1 %v17519_v55  ;;  %v17611_v55 = vld [vmem:[#allocation20 + $0xfec] ss:$16 sps:$4 sm:$0xff]  }
 0xa0b   : > { %12432 = vmatprep.mubr.bf16.mxu1 %v8690_v58  ;;  %12074 = vmatprep.subr.bf16.mxu0 %v17524_v57  ;;  %v17606_v57 = vld [vmem:[#allocation20 + $0xfe0] ss:$16 sps:$4 sm:$0xff]   ;;  %v8673_v58 = vmax.f32 %v19350_v42, 0.0  ;;  %v17621_v42 = vld [vmem:[#allocation23 + $0x28] ss:$16 sps:$4 sm:$0xff]  }
 0xa0c   : > { %12402 = vmatprep.subr.bf16.mxu1 %v17527_v32  ;;  %v17609_v32 = vld [vmem:[#allocation20 + $0xfe8] ss:$16 sps:$4 sm:$0xff]  }
 0xa0d   : > { %12075 = vmatpush1.bf16.msra.mxu0 %v17522_v29  ;;  %v17614_v29 = vld [vmem:[#allocation23 + $0x4] ss:$16 sps:$4 sm:$0xff]  }
 0xa0e   : > { %12403 = vmatpush1.bf16.msra.mxu1 %v17525_v59  ;;  %12076 = vmatprep.subr.bf16.mxu0 %v17530_v60  ;;  %v17617_v59 = vld [vmem:[#allocation23 + $0xc] ss:$16 sps:$4 sm:$0xff]   ;;  %v17612_v60 = vld [vmem:[#allocation23] ss:$16 sps:$4 sm:$0xff]  }
 0xa0f   : > { %12404 = vmatprep.subr.bf16.mxu1 %v17533_v19  ;;  %v8689_v19 = vpack.c.bf16 %v8673_v58, %v8673_v58  ;;  %v17701_v58 = vld [vmem:[#allocation23 + $0x1cc] ss:$16 sps:$4 sm:$0xff]  }
 0xa11   : > { %12077 = vmatpush1.bf16.msra.mxu0 %v17528_v34  ;;  %v17615_v34 = vld [vmem:[#allocation23 + $0x8] ss:$16 sps:$4 sm:$0xff]  }
 0xa12   : > { %12405 = vmatpush1.bf16.msra.mxu1 %v17531_v47  ;;  %12078 = vmatprep.subr.bf16.mxu0 %v17536_v21  ;;  %v17620_v47 = vld [vmem:[#allocation23 + $0x24] ss:$16 sps:$4 sm:$0xff]   ;;  %v17623_v21 = vld [vmem:[#allocation23 + $0x2c] ss:$16 sps:$4 sm:$0xff]  }
 0xa13   : > { %12406 = vmatprep.subr.bf16.mxu1 %v17539_v38  ;;  %v17618_v38 = vld [vmem:[#allocation23 + $0x20] ss:$16 sps:$4 sm:$0xff]  }
 0xa15   : > { %12079 = vmatpush1.bf16.msra.mxu0 %v17534_v62  ;;  %v17626_v62 = vld [vmem:[#allocation23 + $0x44] ss:$16 sps:$4 sm:$0xff]  }
 0xa16   : > { %12407 = vmatpush1.bf16.msra.mxu1 %v17537_v63  ;;  %12080 = vmatprep.subr.bf16.mxu0 %v17542_v52  ;;  %v17629_v63 = vld [vmem:[#allocation23 + $0x4c] ss:$16 sps:$4 sm:$0xff]   ;;  %v17624_v52 = vld [vmem:[#allocation23 + $0x40] ss:$16 sps:$4 sm:$0xff]  }
 0xa17   : > { %12408 = vmatprep.subr.bf16.mxu1 %v17545_v40  ;;  %v17627_v40 = vld [vmem:[#allocation23 + $0x48] ss:$16 sps:$4 sm:$0xff]  }
 0xa19   : > { %12081 = vmatpush1.bf16.msra.mxu0 %v17540_v12  ;;  %v17632_v12 = vld [vmem:[#allocation23 + $0x64] ss:$16 sps:$4 sm:$0xff]  }
 0xa1a   : > { %12409 = vmatpush1.bf16.msra.mxu1 %v17543_v0  ;;  %12082 = vmatprep.subr.bf16.mxu0 %v17548_v1  ;;  %v17635_v0 = vld [vmem:[#allocation23 + $0x6c] ss:$16 sps:$4 sm:$0xff]   ;;  %v17630_v1 = vld [vmem:[#allocation23 + $0x60] ss:$16 sps:$4 sm:$0xff]  }
 0xa1b   : > { %12410 = vmatprep.subr.bf16.mxu1 %v17551_v2  ;;  %v17633_v2 = vld [vmem:[#allocation23 + $0x68] ss:$16 sps:$4 sm:$0xff]  }
 0xa1d   : > { %12083 = vmatpush1.bf16.msra.mxu0 %v17546_v27  ;;  %v17638_v27 = vld [vmem:[#allocation23 + $0x84] ss:$16 sps:$4 sm:$0xff]  }
 0xa1e   : > { %12411 = vmatpush1.bf16.msra.mxu1 %v17549_v31  ;;  %12084 = vmatprep.subr.bf16.mxu0 %v17554_v3  ;;  %v17641_v31 = vld [vmem:[#allocation23 + $0x8c] ss:$16 sps:$4 sm:$0xff]   ;;  %v17636_v3 = vld [vmem:[#allocation23 + $0x80] ss:$16 sps:$4 sm:$0xff]  }
 0xa1f   : > { %12412 = vmatprep.subr.bf16.mxu1 %v17557_v28  ;;  %v17639_v28 = vld [vmem:[#allocation23 + $0x88] ss:$16 sps:$4 sm:$0xff]  }
 0xa21   : > { %12085 = vmatpush1.bf16.msra.mxu0 %v17552_v4  ;;  %v17644_v4 = vld [vmem:[#allocation23 + $0xa4] ss:$16 sps:$4 sm:$0xff]  }
 0xa22   : > { %12413 = vmatpush1.bf16.msra.mxu1 %v17555_v56  ;;  %12086 = vmatprep.subr.bf16.mxu0 %v17560_v6  ;;  %v17647_v56 = vld [vmem:[#allocation23 + $0xac] ss:$16 sps:$4 sm:$0xff]   ;;  %v17642_v6 = vld [vmem:[#allocation23 + $0xa0] ss:$16 sps:$4 sm:$0xff]  }
 0xa23   : > { %12414 = vmatprep.subr.bf16.mxu1 %v17563_v41  ;;  %v17645_v41 = vld [vmem:[#allocation23 + $0xa8] ss:$16 sps:$4 sm:$0xff]  }
 0xa25   : > { %12087 = vmatpush1.bf16.msra.mxu0 %v17558_v11  ;;  %v17650_v11 = vld [vmem:[#allocation23 + $0xc4] ss:$16 sps:$4 sm:$0xff]  }
 0xa26   : > { %12415 = vmatpush1.bf16.msra.mxu1 %v17561_v39  ;;  %12088 = vmatprep.subr.bf16.mxu0 %v17566_v13  ;;  %v17653_v39 = vld [vmem:[#allocation23 + $0xcc] ss:$16 sps:$4 sm:$0xff]   ;;  %v17648_v13 = vld [vmem:[#allocation23 + $0xc0] ss:$16 sps:$4 sm:$0xff]  }
 0xa27   : > { %12416 = vmatprep.subr.bf16.mxu1 %v17569_v14  ;;  %v17651_v14 = vld [vmem:[#allocation23 + $0xc8] ss:$16 sps:$4 sm:$0xff]  }
 0xa29   : > { %12089 = vmatpush1.bf16.msra.mxu0 %v17564_v15  ;;  %v17656_v15 = vld [vmem:[#allocation23 + $0xe4] ss:$16 sps:$4 sm:$0xff]  }
 0xa2a   : > { %12417 = vmatpush1.bf16.msra.mxu1 %v17567_v16  ;;  %12090 = vmatprep.subr.bf16.mxu0 %v17572_v24  ;;  %v17659_v16 = vld [vmem:[#allocation23 + $0xec] ss:$16 sps:$4 sm:$0xff]   ;;  %v17654_v24 = vld [vmem:[#allocation23 + $0xe0] ss:$16 sps:$4 sm:$0xff]  }
 0xa2b   : > { %12418 = vmatprep.subr.bf16.mxu1 %v17575_v35  ;;  %v17657_v35 = vld [vmem:[#allocation23 + $0xe8] ss:$16 sps:$4 sm:$0xff]  }
 0xa2d   : > { %12091 = vmatpush1.bf16.msra.mxu0 %v17570_v36  ;;  %v17662_v36 = vld [vmem:[#allocation23 + $0x104] ss:$16 sps:$4 sm:$0xff]  }
 0xa2e   : > { %12419 = vmatpush1.bf16.msra.mxu1 %v17573_v18  ;;  %12092 = vmatprep.subr.bf16.mxu0 %v17578_v30  ;;  %v17665_v18 = vld [vmem:[#allocation23 + $0x10c] ss:$16 sps:$4 sm:$0xff]   ;;  %v17660_v30 = vld [vmem:[#allocation23 + $0x100] ss:$16 sps:$4 sm:$0xff]  }
 0xa2f   : > { %12420 = vmatprep.subr.bf16.mxu1 %v17581_v22  ;;  %v17663_v22 = vld [vmem:[#allocation23 + $0x108] ss:$16 sps:$4 sm:$0xff]  }
 0xa31   : > { %12093 = vmatpush1.bf16.msra.mxu0 %v17576_v23  ;;  %v17668_v23 = vld [vmem:[#allocation23 + $0x124] ss:$16 sps:$4 sm:$0xff]  }
 0xa32   : > { %12421 = vmatpush1.bf16.msra.mxu1 %v17579_v25  ;;  %12094 = vmatprep.subr.bf16.mxu0 %v17584_v33  ;;  %v17671_v25 = vld [vmem:[#allocation23 + $0x12c] ss:$16 sps:$4 sm:$0xff]   ;;  %v17666_v33 = vld [vmem:[#allocation23 + $0x120] ss:$16 sps:$4 sm:$0xff]  }
 0xa33   : > { %12422 = vmatprep.subr.bf16.mxu1 %v17587_v43  ;;  %v17669_v43 = vld [vmem:[#allocation23 + $0x128] ss:$16 sps:$4 sm:$0xff]  }
 0xa35   : > { %12095 = vmatpush1.bf16.msra.mxu0 %v17582_v44  ;;  %v17674_v44 = vld [vmem:[#allocation23 + $0x144] ss:$16 sps:$4 sm:$0xff]  }
 0xa36   : > { %12423 = vmatpush1.bf16.msra.mxu1 %v17585_v45  ;;  %12096 = vmatprep.subr.bf16.mxu0 %v17590_v37  ;;  %v17677_v45 = vld [vmem:[#allocation23 + $0x14c] ss:$16 sps:$4 sm:$0xff]   ;;  %v17672_v37 = vld [vmem:[#allocation23 + $0x140] ss:$16 sps:$4 sm:$0xff]  }
 0xa37   : > { %12424 = vmatprep.subr.bf16.mxu1 %v17593_v46  ;;  %v17675_v46 = vld [vmem:[#allocation23 + $0x148] ss:$16 sps:$4 sm:$0xff]  }
 0xa39   : > { %12097 = vmatpush1.bf16.msra.mxu0 %v17588_v7  ;;  %v17680_v7 = vld [vmem:[#allocation23 + $0x164] ss:$16 sps:$4 sm:$0xff]  }
 0xa3a   : > { %12425 = vmatpush1.bf16.msra.mxu1 %v17591_v48  ;;  %12098 = vmatprep.subr.bf16.mxu0 %v17596_v61  ;;  %v17683_v48 = vld [vmem:[#allocation23 + $0x16c] ss:$16 sps:$4 sm:$0xff]   ;;  %v17678_v61 = vld [vmem:[#allocation23 + $0x160] ss:$16 sps:$4 sm:$0xff]  }
 0xa3b   : > { %12426 = vmatprep.subr.bf16.mxu1 %v17599_v9  ;;  %v17681_v9 = vld [vmem:[#allocation23 + $0x168] ss:$16 sps:$4 sm:$0xff]  }
 0xa3d   : > { %12099 = vmatpush1.bf16.msra.mxu0 %v17594_v26  ;;  %v17686_v26 = vld [vmem:[#allocation23 + $0x184] ss:$16 sps:$4 sm:$0xff]  }
 0xa3e   : > { %12427 = vmatpush1.bf16.msra.mxu1 %v17597_v49  ;;  %12100 = vmatprep.subr.bf16.mxu0 %v17602_v50  ;;  %v17689_v49 = vld [vmem:[#allocation23 + $0x18c] ss:$16 sps:$4 sm:$0xff]   ;;  %v17684_v50 = vld [vmem:[#allocation23 + $0x180] ss:$16 sps:$4 sm:$0xff]  }
 0xa3f   : > { %12428 = vmatprep.subr.bf16.mxu1 %v17605_v5  ;;  %v17687_v5 = vld [vmem:[#allocation23 + $0x188] ss:$16 sps:$4 sm:$0xff]  }
 0xa41   : > { %12101 = vmatpush1.bf16.msra.mxu0 %v17600_v53  ;;  %v17692_v53 = vld [vmem:[#allocation23 + $0x1a4] ss:$16 sps:$4 sm:$0xff]  }
 0xa42   : > { %12429 = vmatpush1.bf16.msra.mxu1 %v17603_v54  ;;  %12102 = vmatprep.subr.bf16.mxu0 %v17608_v51  ;;  %v17695_v54 = vld [vmem:[#allocation23 + $0x1ac] ss:$16 sps:$4 sm:$0xff]   ;;  %v17690_v51 = vld [vmem:[#allocation23 + $0x1a0] ss:$16 sps:$4 sm:$0xff]  }
 0xa43   : > { %12430 = vmatprep.subr.bf16.mxu1 %v17611_v55  ;;  %v17693_v55 = vld [vmem:[#allocation23 + $0x1a8] ss:$16 sps:$4 sm:$0xff]  }
 0xa45   : > { %12103 = vmatpush1.bf16.msra.mxu0 %v17606_v57  ;;  %v17698_v57 = vld [vmem:[#allocation23 + $0x1c4] ss:$16 sps:$4 sm:$0xff]  }
 0xa46   : > { %12431 = vmatpush1.bf16.msra.mxu1 %v17609_v32  ;;  %13239 = vmatprep.subr.bf16.mxu0 %v17614_v29  ;;  %v17696_v32 = vld [vmem:[#allocation23 + $0x1c0] ss:$16 sps:$4 sm:$0xff]   ;;  %v17699_v29 = vld [vmem:[#allocation23 + $0x1c8] ss:$16 sps:$4 sm:$0xff]  }
 0xa47   : > { %13321 = vmatprep.subr.bf16.mxu1 %v17617_v59  ;;  %v17704_v59 = vld [vmem:[#allocation23 + $0x1e4] ss:$16 sps:$4 sm:$0xff]  }
 0xa48   : > { %12105 = vmatmul.mubr.bf16.vlgmr.msra.gmra.mrb[52].mxu0 %v8689_v19 }
 0xa49   : > { %12433 = vmatmul.mubr.bf16.vlgmr.msra.gmra.mrb[60].mxu1 %v8689_v19  ;;  %13240 = vmatpush1.bf16.msra.mxu0 %v17612_v60  ;;  %v17707_v60 = vld [vmem:[#allocation23 + $0x1ec] ss:$16 sps:$4 sm:$0xff]   ;;  %v17702_v19 = vld [vmem:[#allocation23 + $0x1e0] ss:$16 sps:$4 sm:$0xff]  }
 0xa4a   : > { %13322 = vmatpush1.bf16.msra.mxu1 %v17615_v34  ;;  %13241 = vmatprep.subr.bf16.mxu0 %v17620_v47  ;;  %v17705_v34 = vld [vmem:[#allocation23 + $0x1e8] ss:$16 sps:$4 sm:$0xff]   ;;  %v17710_v47 = vld [vmem:[#allocation23 + $0x204] ss:$16 sps:$4 sm:$0xff]  }
 0xa4b   : > { %13323 = vmatprep.subr.bf16.mxu1 %v17623_v21  ;;  %v17713_v21 = vld [vmem:[#allocation23 + $0x20c] ss:$16 sps:$4 sm:$0xff]  }
 0xa4d   : > { %13242 = vmatpush1.bf16.msra.mxu0 %v17618_v38  ;;  %v19377_v38 = vld [vmem:[#allocation22] sm:$0xf] }
 0xa4e   : > { %13324 = vmatpush1.bf16.msra.mxu1 %v17621_v42  ;;  %13243 = vmatprep.subr.bf16.mxu0 %v17626_v62  ;;  %v9208_v42 = vrot.slane %v19377_v38, %v19134_v8  ;;  %v9212_v62 = vrot.slane %v19377_v38, %v19139_v10 }
 0xa4f   : > { %13325 = vmatprep.subr.bf16.mxu1 %v17629_v63  ;;  %v9220_v63 = vrot.slane %v19377_v38, %v19149_v20 }
 0xa51   : > { %13244 = vmatpush1.bf16.msra.mxu0 %v17624_v52 }
 0xa52   : > { %13326 = vmatpush1.bf16.msra.mxu1 %v17627_v40  ;;  %13245 = vmatprep.subr.bf16.mxu0 %v17632_v12 }
 0xa53   : > { %13327 = vmatprep.subr.bf16.mxu1 %v17635_v0 }
 0xa55   : > { %13246 = vmatpush1.bf16.msra.mxu0 %v17630_v1 }
 0xa56   : > { %13328 = vmatpush1.bf16.msra.mxu1 %v17633_v2  ;;  %13247 = vmatprep.subr.bf16.mxu0 %v17638_v27 }
 0xa57   : > { %13329 = vmatprep.subr.bf16.mxu1 %v17641_v31 }
 0xa59   : > { %13248 = vmatpush1.bf16.msra.mxu0 %v17636_v3 }
 0xa5a   : > { %13330 = vmatpush1.bf16.msra.mxu1 %v17639_v28  ;;  %13249 = vmatprep.subr.bf16.mxu0 %v17644_v4 }
 0xa5b   : > { %13331 = vmatprep.subr.bf16.mxu1 %v17647_v56 }
 0xa5d   : > { %13250 = vmatpush1.bf16.msra.mxu0 %v17642_v6 }
 0xa5e   : > { %13332 = vmatpush1.bf16.msra.mxu1 %v17645_v41  ;;  %13251 = vmatprep.subr.bf16.mxu0 %v17650_v11 }
 0xa5f   : > { %13333 = vmatprep.subr.bf16.mxu1 %v17653_v39  ;;  %v17708_v39 = vld [vmem:[#allocation23 + $0x200] ss:$16 sps:$4 sm:$0xff]  }
 0xa61   : > { %13252 = vmatpush1.bf16.msra.mxu0 %v17648_v13  ;;  %v17711_v13 = vld [vmem:[#allocation23 + $0x208] ss:$16 sps:$4 sm:$0xff]  }
 0xa62   : > { %13334 = vmatpush1.bf16.msra.mxu1 %v17651_v14  ;;  %13253 = vmatprep.subr.bf16.mxu0 %v17656_v15  ;;  %v17716_v15 = vld [vmem:[#allocation23 + $0x224] ss:$16 sps:$4 sm:$0xff]  }
 0xa63   : > { %13335 = vmatprep.subr.bf16.mxu1 %v17659_v16  ;;  %v17719_v16 = vld [vmem:[#allocation23 + $0x22c] ss:$16 sps:$4 sm:$0xff]  }
 0xa65   : > { %13254 = vmatpush1.bf16.msra.mxu0 %v17654_v24 }
 0xa66   : > { %13336 = vmatpush1.bf16.msra.mxu1 %v17657_v35  ;;  %13255 = vmatprep.subr.bf16.mxu0 %v17662_v36  ;;  %v17714_v35 = vld [vmem:[#allocation23 + $0x220] ss:$16 sps:$4 sm:$0xff]   ;;  %v17717_v36 = vld [vmem:[#allocation23 + $0x228] ss:$16 sps:$4 sm:$0xff]  }
 0xa67   : > { %13337 = vmatprep.subr.bf16.mxu1 %v17665_v18  ;;  %v17722_v18 = vld [vmem:[#allocation23 + $0x244] ss:$16 sps:$4 sm:$0xff]  }
 0xa69   : > { %13256 = vmatpush1.bf16.msra.mxu0 %v17660_v30  ;;  %v17725_v30 = vld [vmem:[#allocation23 + $0x24c] ss:$16 sps:$4 sm:$0xff]  }
 0xa6a   : > { %13338 = vmatpush1.bf16.msra.mxu1 %v17663_v22  ;;  %13257 = vmatprep.subr.bf16.mxu0 %v17668_v23  ;;  %v17720_v22 = vld [vmem:[#allocation23 + $0x240] ss:$16 sps:$4 sm:$0xff]   ;;  %v17723_v23 = vld [vmem:[#allocation23 + $0x248] ss:$16 sps:$4 sm:$0xff]  }
 0xa6b   : > { %13339 = vmatprep.subr.bf16.mxu1 %v17671_v25  ;;  %v17728_v25 = vld [vmem:[#allocation23 + $0x264] ss:$16 sps:$4 sm:$0xff]  }
 0xa6d   : > { %13258 = vmatpush1.bf16.msra.mxu0 %v17666_v33  ;;  %v17731_v33 = vld [vmem:[#allocation23 + $0x26c] ss:$16 sps:$4 sm:$0xff]  }
 0xa6e   : > { %13340 = vmatpush1.bf16.msra.mxu1 %v17669_v43  ;;  %13259 = vmatprep.subr.bf16.mxu0 %v17674_v44  ;;  %v17726_v43 = vld [vmem:[#allocation23 + $0x260] ss:$16 sps:$4 sm:$0xff]   ;;  %v17729_v44 = vld [vmem:[#allocation23 + $0x268] ss:$16 sps:$4 sm:$0xff]  }
 0xa6f   : > { %13341 = vmatprep.subr.bf16.mxu1 %v17677_v45  ;;  %v17734_v45 = vld [vmem:[#allocation23 + $0x284] ss:$16 sps:$4 sm:$0xff]  }
 0xa71   : > { %13260 = vmatpush1.bf16.msra.mxu0 %v17672_v37  ;;  %v17737_v37 = vld [vmem:[#allocation23 + $0x28c] ss:$16 sps:$4 sm:$0xff]  }
 0xa72   : > { %13342 = vmatpush1.bf16.msra.mxu1 %v17675_v46  ;;  %13261 = vmatprep.subr.bf16.mxu0 %v17680_v7  ;;  %v17732_v46 = vld [vmem:[#allocation23 + $0x280] ss:$16 sps:$4 sm:$0xff]   ;;  %v17735_v7 = vld [vmem:[#allocation23 + $0x288] ss:$16 sps:$4 sm:$0xff]  }
 0xa73   : > { %13343 = vmatprep.subr.bf16.mxu1 %v17683_v48  ;;  %v17740_v48 = vld [vmem:[#allocation23 + $0x2a4] ss:$16 sps:$4 sm:$0xff]  }
 0xa75   : > { %13262 = vmatpush1.bf16.msra.mxu0 %v17678_v61  ;;  %v17743_v61 = vld [vmem:[#allocation23 + $0x2ac] ss:$16 sps:$4 sm:$0xff]  }
 0xa76   : > { %13344 = vmatpush1.bf16.msra.mxu1 %v17681_v9  ;;  %13263 = vmatprep.subr.bf16.mxu0 %v17686_v26  ;;  %v17738_v9 = vld [vmem:[#allocation23 + $0x2a0] ss:$16 sps:$4 sm:$0xff]   ;;  %v17741_v26 = vld [vmem:[#allocation23 + $0x2a8] ss:$16 sps:$4 sm:$0xff]  }
 0xa77   : > { %13345 = vmatprep.subr.bf16.mxu1 %v17689_v49  ;;  %v17746_v49 = vld [vmem:[#allocation23 + $0x2c4] ss:$16 sps:$4 sm:$0xff]  }
 0xa79   : > { %13264 = vmatpush1.bf16.msra.mxu0 %v17684_v50  ;;  %v17749_v50 = vld [vmem:[#allocation23 + $0x2cc] ss:$16 sps:$4 sm:$0xff]  }
 0xa7a   : > { %13346 = vmatpush1.bf16.msra.mxu1 %v17687_v5  ;;  %13265 = vmatprep.subr.bf16.mxu0 %v17692_v53  ;;  %v17744_v5 = vld [vmem:[#allocation23 + $0x2c0] ss:$16 sps:$4 sm:$0xff]   ;;  %v17747_v53 = vld [vmem:[#allocation23 + $0x2c8] ss:$16 sps:$4 sm:$0xff]  }
 0xa7b   : > { %13347 = vmatprep.subr.bf16.mxu1 %v17695_v54  ;;  %v17752_v54 = vld [vmem:[#allocation23 + $0x2e4] ss:$16 sps:$4 sm:$0xff]  }
 0xa7d   : > { %13266 = vmatpush1.bf16.msra.mxu0 %v17690_v51  ;;  %v17755_v51 = vld [vmem:[#allocation23 + $0x2ec] ss:$16 sps:$4 sm:$0xff]  }
 0xa7e   : > { %13348 = vmatpush1.bf16.msra.mxu1 %v17693_v55  ;;  %13267 = vmatprep.subr.bf16.mxu0 %v17698_v57  ;;  %v17750_v55 = vld [vmem:[#allocation23 + $0x2e0] ss:$16 sps:$4 sm:$0xff]   ;;  %v17753_v57 = vld [vmem:[#allocation23 + $0x2e8] ss:$16 sps:$4 sm:$0xff]  }
 0xa7f   : > { %13349 = vmatprep.subr.bf16.mxu1 %v17701_v58  ;;  %v17758_v58 = vld [vmem:[#allocation23 + $0x304] ss:$16 sps:$4 sm:$0xff]  }
 0xa81   : > { %13268 = vmatpush1.bf16.msra.mxu0 %v17696_v32  ;;  %v17761_v32 = vld [vmem:[#allocation23 + $0x30c] ss:$16 sps:$4 sm:$0xff]  }
 0xa82   : > { %13350 = vmatpush1.bf16.msra.mxu1 %v17699_v29  ;;  %13269 = vmatprep.subr.bf16.mxu0 %v17704_v59  ;;  %v17756_v29 = vld [vmem:[#allocation23 + $0x300] ss:$16 sps:$4 sm:$0xff]   ;;  %v17759_v59 = vld [vmem:[#allocation23 + $0x308] ss:$16 sps:$4 sm:$0xff]  }
 0xa83   : > { %13351 = vmatprep.subr.bf16.mxu1 %v17707_v60  ;;  %v17764_v60 = vld [vmem:[#allocation23 + $0x324] ss:$16 sps:$4 sm:$0xff]  }
 0xa85   : > { %13270 = vmatpush1.bf16.msra.mxu0 %v17702_v19  ;;  %v17767_v19 = vld [vmem:[#allocation23 + $0x32c] ss:$16 sps:$4 sm:$0xff]  }
 0xa86   : > { %13352 = vmatpush1.bf16.msra.mxu1 %v17705_v34  ;;  %13280 = vmatprep.subr.bf16.mxu0 %v17710_v47  ;;  %v17762_v34 = vld [vmem:[#allocation23 + $0x320] ss:$16 sps:$4 sm:$0xff]   ;;  %v17765_v47 = vld [vmem:[#allocation23 + $0x328] ss:$16 sps:$4 sm:$0xff]  }
 0xa87   : > { %13362 = vmatprep.subr.bf16.mxu1 %v17713_v21  ;;  %v17770_v21 = vld [vmem:[#allocation23 + $0x344] ss:$16 sps:$4 sm:$0xff]  }
 0xb1b   : > { %v12106_v52 = vpop.f32.mrb[52].mxu0 }
 0xb1c   : > { %v16090_v40 = vadd.f32 %v12106_v52, %v9208_v42  ;;  %v19385_v12 = vpop.f32.mrb[60].mxu1  ;;  %v12108_v0 = vpop.f32.mrb[53].mxu0  ;;  %v17773_v42 = vld [vmem:[#allocation23 + $0x34c] ss:$16 sps:$4 sm:$0xff]   ;;  %v17776_v52 = vld [vmem:[#allocation23 + $0x364] ss:$16 sps:$4 sm:$0xff]  }
 0xb1d   : > { %v16091_v1 = vadd.f32 %v12108_v0, %v9212_v62  ;;  %v12436_v2 = vpop.f32.mrb[61].mxu1  ;;  %v12110_v27 = vpop.f32.mrb[54].mxu0  ;;  %v17768_v62 = vld [vmem:[#allocation23 + $0x340] ss:$16 sps:$4 sm:$0xff]  }
 0xb1e   : > { %v12441_v31 = vmax.f32 %v16090_v40, 0.0  ;;  %v16093_v3 = vadd.f32 %v12436_v2, %v9220_v63  ;;  %v12438_v28 = vpop.f32.mrb[62].mxu1  ;;  %v12111_v4 = vpop.f32.mrb[55].mxu0  ;;  %v17771_v63 = vld [vmem:[#allocation23 + $0x348] ss:$16 sps:$4 sm:$0xff]  }
 0xb1f   : > { %v12442_v56 = vmax.f32 %v16091_v1, 0.0  ;;  %v12439_v6 = vpop.f32.mrb[63].mxu1  ;;  %v17779_v40 = vld [vmem:[#allocation23 + $0x36c] ss:$16 sps:$4 sm:$0xff]   ;;  %v17774_v0 = vld [vmem:[#allocation23 + $0x360] ss:$16 sps:$4 sm:$0xff]  }
 0xb20   : > { %v12444_v41 = vmax.f32 %v16093_v3, 0.0  ;;  %v12445_v14 = vpack.c.bf16 %v12441_v31, %v12441_v31  ;;  %v17777_v1 = vld [vmem:[#allocation23 + $0x368] ss:$16 sps:$4 sm:$0xff]   ;;  %v17782_v2 = vld [vmem:[#allocation23 + $0x384] ss:$16 sps:$4 sm:$0xff]  }
 0xb21   : > { %v12446_v11 = vpack.c.bf16 %v12442_v56, %v12442_v56  ;;  %v17785_v27 = vld [vmem:[#allocation23 + $0x38c] ss:$16 sps:$4 sm:$0xff]   ;;  %v17780_v31 = vld [vmem:[#allocation23 + $0x380] ss:$16 sps:$4 sm:$0xff]   ;;  %v17783_v3 = vld [vmem:[#allocation23 + $0x388] ss:$16 sps:$4 sm:$0xff]  }
 0xb22   : > { %v12448_v24 = vpack.c.bf16 %v12444_v41, %v12444_v41  ;;  %v17788_v28 = vld [vmem:[#allocation23 + $0x3a4] ss:$16 sps:$4 sm:$0xff]   ;;  %v17791_v4 = vld [vmem:[#allocation23 + $0x3ac] ss:$16 sps:$4 sm:$0xff]   ;;  %v17786_v56 = vld [vmem:[#allocation23 + $0x3a0] ss:$16 sps:$4 sm:$0xff]   ;;  %v9216_v41 = vrot.slane %v19377_v38, %v19146_v17 }
 0xb23   : > { %13271 = vmatprep.mubr.bf16.mxu0 %v12446_v11  ;;  %13353 = vmatprep.mubr.bf16.mxu1 %v12446_v11  ;;  %v17789_v6 = vld [vmem:[#allocation23 + $0x3a8] ss:$16 sps:$4 sm:$0xff]   ;;  %v17794_v11 = vld [vmem:[#allocation23 + $0x3c4] ss:$16 sps:$4 sm:$0xff]  }
 0xb24   : > { %13272 = vmatmul.mubr.bf16.vlgmr.msra.gmra.mrb[56].mxu0 %v12445_v14  ;;  %13354 = vmatmul.mubr.bf16.vlgmr.msra.gmra.mrb[64].mxu1 %v12445_v14  ;;  %v17795_v14 = vld [vmem:[#allocation23 + $0x3c8] ss:$16 sps:$4 sm:$0xff]  }
 0xb25   : > { %13281 = vmatpush1.bf16.msra.mxu0 %v17708_v39  ;;  %13363 = vmatpush1.bf16.msra.mxu1 %v17711_v13  ;;  %v17797_v39 = vld [vmem:[#allocation23 + $0x3cc] ss:$16 sps:$4 sm:$0xff]   ;;  %v17792_v13 = vld [vmem:[#allocation23 + $0x3c0] ss:$16 sps:$4 sm:$0xff]  }
 0xb26   : > { %13312 = vmatprep.mubr.bf16.mxu0 %v12448_v24  ;;  %13394 = vmatprep.mubr.bf16.mxu1 %v12448_v24  ;;  %v17803_v24 = vld [vmem:[#allocation23 + $0x3ec] ss:$16 sps:$4 sm:$0xff]   ;;  %v17806_v38 = vld [vmem:[#allocation26 + $0x4] ss:$8 sps:$4 sm:$0xff]  }
 0xb27   : > { %13282 = vmatprep.subr.bf16.mxu0 %v17716_v15  ;;  %13364 = vmatprep.subr.bf16.mxu1 %v17719_v16  ;;  %v16092_v15 = vadd.f32 %v19385_v12, %v9216_v41  ;;  %v17800_v16 = vld [vmem:[#allocation23 + $0x3e4] ss:$16 sps:$4 sm:$0xff]  }
 0xb28   : > { %v17807_v12 = vld [vmem:[#allocation26 + $0x10] ss:$8 sps:$4 sm:$0xff]  }
 0xb29   : > { %13283 = vmatpush1.bf16.msra.mxu0 %v17714_v35  ;;  %13365 = vmatpush1.bf16.msra.mxu1 %v17717_v36  ;;  %v17798_v35 = vld [vmem:[#allocation23 + $0x3e0] ss:$16 sps:$4 sm:$0xff]   ;;  %v17801_v36 = vld [vmem:[#allocation23 + $0x3e8] ss:$16 sps:$4 sm:$0xff]  }
 0xb2a   : > { %13284 = vmatprep.subr.bf16.mxu0 %v17722_v18  ;;  %13366 = vmatprep.subr.bf16.mxu1 %v17725_v30  ;;  %v12443_v18 = vmax.f32 %v16092_v15, 0.0  ;;  %v17804_v30 = vld [vmem:[#allocation26] ss:$8 sps:$4 sm:$0xff]  }
 0xb2d   : > { %13285 = vmatpush1.bf16.msra.mxu0 %v17720_v22  ;;  %13367 = vmatpush1.bf16.msra.mxu1 %v17723_v23  ;;  %v12447_v22 = vpack.c.bf16 %v12443_v18, %v12443_v18  ;;  %v17809_v23 = vld [vmem:[#allocation26 + $0x14] ss:$8 sps:$4 sm:$0xff]  }
 0xb2e   : > { %13286 = vmatprep.subr.bf16.mxu0 %v17728_v25  ;;  %13368 = vmatprep.subr.bf16.mxu1 %v17731_v33  ;;  %v17812_v25 = vld [vmem:[#allocation26 + $0x24] ss:$8 sps:$4 sm:$0xff]   ;;  %v17810_v33 = vld [vmem:[#allocation26 + $0x20] ss:$8 sps:$4 sm:$0xff]   ;;  %v17863_v18 = vld [vmem:[#allocation26 + $0x134] ss:$8 sps:$4 sm:$0xff]  }
 0xb31   : > { %13287 = vmatpush1.bf16.msra.mxu0 %v17726_v43  ;;  %13369 = vmatpush1.bf16.msra.mxu1 %v17729_v44  ;;  %v17815_v43 = vld [vmem:[#allocation26 + $0x34] ss:$8 sps:$4 sm:$0xff]   ;;  %v17813_v44 = vld [vmem:[#allocation26 + $0x30] ss:$8 sps:$4 sm:$0xff]  }
 0xb32   : > { %13288 = vmatprep.subr.bf16.mxu0 %v17734_v45  ;;  %13370 = vmatprep.subr.bf16.mxu1 %v17737_v37  ;;  %v17818_v45 = vld [vmem:[#allocation26 + $0x44] ss:$8 sps:$4 sm:$0xff]   ;;  %v17816_v37 = vld [vmem:[#allocation26 + $0x40] ss:$8 sps:$4 sm:$0xff]  }
 0xb35   : > { %13289 = vmatpush1.bf16.msra.mxu0 %v17732_v46  ;;  %13371 = vmatpush1.bf16.msra.mxu1 %v17735_v7  ;;  %v17821_v46 = vld [vmem:[#allocation26 + $0x54] ss:$8 sps:$4 sm:$0xff]   ;;  %v17819_v7 = vld [vmem:[#allocation26 + $0x50] ss:$8 sps:$4 sm:$0xff]  }
 0xb36   : > { %13290 = vmatprep.subr.bf16.mxu0 %v17740_v48  ;;  %13372 = vmatprep.subr.bf16.mxu1 %v17743_v61  ;;  %v17824_v48 = vld [vmem:[#allocation26 + $0x64] ss:$8 sps:$4 sm:$0xff]   ;;  %v17822_v61 = vld [vmem:[#allocation26 + $0x60] ss:$8 sps:$4 sm:$0xff]  }
 0xb39   : > { %13291 = vmatpush1.bf16.msra.mxu0 %v17738_v9  ;;  %13373 = vmatpush1.bf16.msra.mxu1 %v17741_v26  ;;  %v17827_v9 = vld [vmem:[#allocation26 + $0x74] ss:$8 sps:$4 sm:$0xff]   ;;  %v17825_v26 = vld [vmem:[#allocation26 + $0x70] ss:$8 sps:$4 sm:$0xff]  }
 0xb3a   : > { %13292 = vmatprep.subr.bf16.mxu0 %v17746_v49  ;;  %13374 = vmatprep.subr.bf16.mxu1 %v17749_v50  ;;  %v17830_v49 = vld [vmem:[#allocation26 + $0x84] ss:$8 sps:$4 sm:$0xff]   ;;  %v17828_v50 = vld [vmem:[#allocation26 + $0x80] ss:$8 sps:$4 sm:$0xff]  }
 0xb3d   : > { %13293 = vmatpush1.bf16.msra.mxu0 %v17744_v5  ;;  %13375 = vmatpush1.bf16.msra.mxu1 %v17747_v53  ;;  %v17833_v5 = vld [vmem:[#allocation26 + $0x94] ss:$8 sps:$4 sm:$0xff]   ;;  %v17831_v53 = vld [vmem:[#allocation26 + $0x90] ss:$8 sps:$4 sm:$0xff]  }
 0xb3e   : > { %13294 = vmatprep.subr.bf16.mxu0 %v17752_v54  ;;  %13376 = vmatprep.subr.bf16.mxu1 %v17755_v51  ;;  %v17836_v54 = vld [vmem:[#allocation26 + $0xa4] ss:$8 sps:$4 sm:$0xff]   ;;  %v17834_v51 = vld [vmem:[#allocation26 + $0xa0] ss:$8 sps:$4 sm:$0xff]  }
 0xb41   : > { %13295 = vmatpush1.bf16.msra.mxu0 %v17750_v55  ;;  %13377 = vmatpush1.bf16.msra.mxu1 %v17753_v57  ;;  %v17839_v55 = vld [vmem:[#allocation26 + $0xb4] ss:$8 sps:$4 sm:$0xff]   ;;  %v17837_v57 = vld [vmem:[#allocation26 + $0xb0] ss:$8 sps:$4 sm:$0xff]  }
 0xb42   : > { %13296 = vmatprep.subr.bf16.mxu0 %v17758_v58  ;;  %13378 = vmatprep.subr.bf16.mxu1 %v17761_v32  ;;  %v17842_v58 = vld [vmem:[#allocation26 + $0xc4] ss:$8 sps:$4 sm:$0xff]   ;;  %v17840_v32 = vld [vmem:[#allocation26 + $0xc0] ss:$8 sps:$4 sm:$0xff]  }
 0xb45   : > { %13297 = vmatpush1.bf16.msra.mxu0 %v17756_v29  ;;  %13379 = vmatpush1.bf16.msra.mxu1 %v17759_v59  ;;  %v17845_v29 = vld [vmem:[#allocation26 + $0xd4] ss:$8 sps:$4 sm:$0xff]   ;;  %v17843_v59 = vld [vmem:[#allocation26 + $0xd0] ss:$8 sps:$4 sm:$0xff]  }
 0xb46   : > { %13298 = vmatprep.subr.bf16.mxu0 %v17764_v60  ;;  %13380 = vmatprep.subr.bf16.mxu1 %v17767_v19  ;;  %v17848_v60 = vld [vmem:[#allocation26 + $0xe4] ss:$8 sps:$4 sm:$0xff]   ;;  %v17846_v19 = vld [vmem:[#allocation26 + $0xe0] ss:$8 sps:$4 sm:$0xff]  }
 0xb49   : > { %13299 = vmatpush1.bf16.msra.mxu0 %v17762_v34  ;;  %13381 = vmatpush1.bf16.msra.mxu1 %v17765_v47  ;;  %v17851_v34 = vld [vmem:[#allocation26 + $0xf4] ss:$8 sps:$4 sm:$0xff]   ;;  %v17849_v47 = vld [vmem:[#allocation26 + $0xf0] ss:$8 sps:$4 sm:$0xff]  }
 0xb4a   : > { %13300 = vmatprep.subr.bf16.mxu0 %v17770_v21  ;;  %13382 = vmatprep.subr.bf16.mxu1 %v17773_v42  ;;  %v17854_v21 = vld [vmem:[#allocation26 + $0x104] ss:$8 sps:$4 sm:$0xff]   ;;  %v19390_v42 = vld [vmem:[#allocation25] sm:$0xf] }
 0xb4d   : > { %13301 = vmatpush1.bf16.msra.mxu0 %v17768_v62  ;;  %13383 = vmatpush1.bf16.msra.mxu1 %v17771_v63  ;;  %v12582_v62 = vrot.slane %v19390_v42, %v19134_v8  ;;  %v12586_v63 = vrot.slane %v19390_v42, %v19139_v10 }
 0xb4e   : > { %13302 = vmatprep.subr.bf16.mxu0 %v17776_v52  ;;  %13384 = vmatprep.subr.bf16.mxu1 %v17779_v40  ;;  %v12594_v52 = vrot.slane %v19390_v42, %v19149_v20 }
 0xb51   : > { %13303 = vmatpush1.bf16.msra.mxu0 %v17774_v0  ;;  %13385 = vmatpush1.bf16.msra.mxu1 %v17777_v1 }
 0xb52   : > { %13304 = vmatprep.subr.bf16.mxu0 %v17782_v2  ;;  %13386 = vmatprep.subr.bf16.mxu1 %v17785_v27 }
 0xb55   : > { %13305 = vmatpush1.bf16.msra.mxu0 %v17780_v31  ;;  %13387 = vmatpush1.bf16.msra.mxu1 %v17783_v3 }
 0xb56   : > { %13306 = vmatprep.subr.bf16.mxu0 %v17788_v28  ;;  %13388 = vmatprep.subr.bf16.mxu1 %v17791_v4 }
 0xb59   : > { %13307 = vmatpush1.bf16.msra.mxu0 %v17786_v56  ;;  %13389 = vmatpush1.bf16.msra.mxu1 %v17789_v6 }
 0xb5a   : > { %13308 = vmatprep.subr.bf16.mxu0 %v17794_v11  ;;  %13390 = vmatprep.subr.bf16.mxu1 %v17797_v39 }
 0xb5d   : > { %13309 = vmatpush1.bf16.msra.mxu0 %v17792_v13  ;;  %13391 = vmatpush1.bf16.msra.mxu1 %v17795_v14  ;;  %v17852_v14 = vld [vmem:[#allocation26 + $0x100] ss:$8 sps:$4 sm:$0xff]  }
 0xb5e   : > { %13310 = vmatprep.subr.bf16.mxu0 %v17800_v16  ;;  %13392 = vmatprep.subr.bf16.mxu1 %v17803_v24  ;;  %v17857_v16 = vld [vmem:[#allocation26 + $0x114] ss:$8 sps:$4 sm:$0xff]   ;;  %v17855_v24 = vld [vmem:[#allocation26 + $0x110] ss:$8 sps:$4 sm:$0xff]  }
 0xb61   : > { %13311 = vmatpush1.bf16.msra.mxu0 %v17798_v35  ;;  %13393 = vmatpush1.bf16.msra.mxu1 %v17801_v36  ;;  %v17860_v35 = vld [vmem:[#allocation26 + $0x124] ss:$8 sps:$4 sm:$0xff]   ;;  %v17858_v36 = vld [vmem:[#allocation26 + $0x120] ss:$8 sps:$4 sm:$0xff]  }
 0xb62   : > { %13807 = vmatprep.subr.bf16.mxu0 %v17806_v38  ;;  %v17861_v38 = vld [vmem:[#allocation26 + $0x130] ss:$8 sps:$4 sm:$0xff]  }
 0xb64   : > { %13313 = vmatmul.mubr.bf16.vlgmr.msra.gmra.mrb[56].mxu0 %v12447_v22  ;;  %13395 = vmatmul.mubr.bf16.vlgmr.msra.gmra.mrb[64].mxu1 %v12447_v22  ;;  %v17864_v22 = vld [vmem:[#allocation26 + $0x140] ss:$8 sps:$4 sm:$0xff]  }
 0xb65   : > { %13808 = vmatpush1.bf16.msra.mxu0 %v17804_v30  ;;  %v17866_v30 = vld [vmem:[#allocation26 + $0x144] ss:$8 sps:$4 sm:$0xff]  }
 0xb66   : > { %13809 = vmatprep.subr.bf16.mxu0 %v17809_v23  ;;  %v17869_v23 = vld [vmem:[#allocation26 + $0x154] ss:$8 sps:$4 sm:$0xff]  }
 0xb69   : > { %13810 = vmatpush1.bf16.msra.mxu0 %v17807_v12  ;;  %v17867_v12 = vld [vmem:[#allocation26 + $0x150] ss:$8 sps:$4 sm:$0xff]  }
 0xb6a   : > { %13811 = vmatprep.subr.bf16.mxu0 %v17812_v25  ;;  %v17872_v25 = vld [vmem:[#allocation26 + $0x164] ss:$8 sps:$4 sm:$0xff]  }
 0xb6d   : > { %13812 = vmatpush1.bf16.msra.mxu0 %v17810_v33  ;;  %v17870_v33 = vld [vmem:[#allocation26 + $0x160] ss:$8 sps:$4 sm:$0xff]  }
 0xb6e   : > { %13813 = vmatprep.subr.bf16.mxu0 %v17815_v43  ;;  %v17875_v43 = vld [vmem:[#allocation26 + $0x174] ss:$8 sps:$4 sm:$0xff]  }
 0xb71   : > { %13814 = vmatpush1.bf16.msra.mxu0 %v17813_v44  ;;  %v17873_v44 = vld [vmem:[#allocation26 + $0x170] ss:$8 sps:$4 sm:$0xff]  }
 0xb72   : > { %13815 = vmatprep.subr.bf16.mxu0 %v17818_v45  ;;  %v17878_v45 = vld [vmem:[#allocation26 + $0x184] ss:$8 sps:$4 sm:$0xff]  }
 0xb75   : > { %13816 = vmatpush1.bf16.msra.mxu0 %v17816_v37  ;;  %v17876_v37 = vld [vmem:[#allocation26 + $0x180] ss:$8 sps:$4 sm:$0xff]  }
 0xb76   : > { %13817 = vmatprep.subr.bf16.mxu0 %v17821_v46  ;;  %v17881_v46 = vld [vmem:[#allocation26 + $0x194] ss:$8 sps:$4 sm:$0xff]  }
 0xb79   : > { %13818 = vmatpush1.bf16.msra.mxu0 %v17819_v7  ;;  %v17879_v7 = vld [vmem:[#allocation26 + $0x190] ss:$8 sps:$4 sm:$0xff]  }
 0xb7a   : > { %13819 = vmatprep.subr.bf16.mxu0 %v17824_v48  ;;  %v17884_v48 = vld [vmem:[#allocation26 + $0x1a4] ss:$8 sps:$4 sm:$0xff]  }
 0xb7d   : > { %13820 = vmatpush1.bf16.msra.mxu0 %v17822_v61  ;;  %v17882_v61 = vld [vmem:[#allocation26 + $0x1a0] ss:$8 sps:$4 sm:$0xff]  }
 0xb7e   : > { %13821 = vmatprep.subr.bf16.mxu0 %v17827_v9  ;;  %v17887_v9 = vld [vmem:[#allocation26 + $0x1b4] ss:$8 sps:$4 sm:$0xff]  }
 0xb81   : > { %13822 = vmatpush1.bf16.msra.mxu0 %v17825_v26  ;;  %v17885_v26 = vld [vmem:[#allocation26 + $0x1b0] ss:$8 sps:$4 sm:$0xff]  }
 0xb82   : > { %13823 = vmatprep.subr.bf16.mxu0 %v17830_v49  ;;  %v17890_v49 = vld [vmem:[#allocation26 + $0x1c4] ss:$8 sps:$4 sm:$0xff]  }
 0xb85   : > { %13824 = vmatpush1.bf16.msra.mxu0 %v17828_v50  ;;  %v17888_v50 = vld [vmem:[#allocation26 + $0x1c0] ss:$8 sps:$4 sm:$0xff]  }
 0xb86   : > { %13825 = vmatprep.subr.bf16.mxu0 %v17833_v5  ;;  %v17893_v5 = vld [vmem:[#allocation26 + $0x1d4] ss:$8 sps:$4 sm:$0xff]  }
 0xb89   : > { %13826 = vmatpush1.bf16.msra.mxu0 %v17831_v53  ;;  %v17891_v53 = vld [vmem:[#allocation26 + $0x1d0] ss:$8 sps:$4 sm:$0xff]  }
 0xb8a   : > { %13827 = vmatprep.subr.bf16.mxu0 %v17836_v54  ;;  %v12590_v54 = vrot.slane %v19390_v42, %v19146_v17 }
 0xb8d   : > { %13828 = vmatpush1.bf16.msra.mxu0 %v17834_v51  ;;  %v17896_v51 = vld [vmem:[#allocation26 + $0x1e4] ss:$8 sps:$4 sm:$0xff]  }
 0xb8e   : > { %13829 = vmatprep.subr.bf16.mxu0 %v17839_v55  ;;  %v17894_v55 = vld [vmem:[#allocation26 + $0x1e0] ss:$8 sps:$4 sm:$0xff]  }
 0xb91   : > { %13830 = vmatpush1.bf16.msra.mxu0 %v17837_v57 }
 0xb92   : > { %13831 = vmatprep.subr.bf16.mxu0 %v17842_v58  ;;  %v17899_v58 = vld [vmem:[#allocation26 + $0x1f4] ss:$8 sps:$4 sm:$0xff]  }
 0xb95   : > { %13832 = vmatpush1.bf16.msra.mxu0 %v17840_v32  ;;  %v17897_v32 = vld [vmem:[#allocation26 + $0x1f0] ss:$8 sps:$4 sm:$0xff]  }
 0xb96   : > { %13833 = vmatprep.subr.bf16.mxu0 %v17845_v29 }
 0xb99   : > { %13834 = vmatpush1.bf16.msra.mxu0 %v17843_v59 }
 0xb9a   : > { %13835 = vmatprep.subr.bf16.mxu0 %v17848_v60 }
 0xb9d   : > { %13836 = vmatpush1.bf16.msra.mxu0 %v17846_v19 }
 0xb9e   : > { %13837 = vmatprep.subr.bf16.mxu0 %v17851_v34 }
 0xba1   : > { %13838 = vmatpush1.bf16.msra.mxu0 %v17849_v47 }
 0xba2   : > { %13848 = vmatprep.subr.bf16.mxu0 %v17854_v21 }
 0xc37   : > { %v13314_v40 = vpop.f32.mrb[56].mxu0  ;;  %v19398_v0 = vpop.f32.mrb[64].mxu1 }
 0xc38   : > { %v16094_v1 = vadd.f32 %v13314_v40, %v12582_v62  ;;  %v13316_v2 = vpop.f32.mrb[57].mxu0  ;;  %v13398_v27 = vpop.f32.mrb[65].mxu1  ;;  %v16096_v57 = vadd.f32 %v19398_v0, %v12590_v54 }
 0xc39   : > { %v16095_v31 = vadd.f32 %v13316_v2, %v12586_v63  ;;  %v16097_v3 = vadd.f32 %v13398_v27, %v12594_v52  ;;  %v13318_v28 = vpop.f32.mrb[58].mxu0  ;;  %v13400_v4 = vpop.f32.mrb[66].mxu1 }
 0xc3a   : > { %v13403_v56 = vmax.f32 %v16094_v1, 0.0  ;;  %v13319_v6 = vpop.f32.mrb[59].mxu0  ;;  %v13401_v41 = vpop.f32.mrb[67].mxu1  ;;  %v13405_v29 = vmax.f32 %v16096_v57, 0.0 }
 0xc3b   : > { %v13404_v11 = vmax.f32 %v16095_v31, 0.0  ;;  %v13406_v39 = vmax.f32 %v16097_v3, 0.0 }
 0xc3c   : > { %v13407_v15 = vpack.c.bf16 %v13403_v56, %v13403_v56  ;;  %v13409_v59 = vpack.c.bf16 %v13405_v29, %v13405_v29 }
 0xc3d   : > { %v13408_v13 = vpack.c.bf16 %v13404_v11, %v13404_v11  ;;  %v13410_v20 = vpack.c.bf16 %v13406_v39, %v13406_v39 }
 0xc3f   : > { %13839 = vmatprep.mubr.bf16.mxu0 %v13408_v13 }
 0xc40   : > { %13840 = vmatmul.mubr.bf16.vlgmr.msra.gmra.mrb[60].mxu0 %v13407_v15 }
 0xc41   : > { %13849 = vmatpush1.bf16.msra.mxu0 %v17852_v14  ;;  %13880 = vmatprep.mubr.bf16.mxu0 %v13410_v20 }
 0xc42   : > { %13850 = vmatprep.subr.bf16.mxu0 %v17857_v16 }
 0xc45   : > { %13851 = vmatpush1.bf16.msra.mxu0 %v17855_v24 }
 0xc46   : > { %13852 = vmatprep.subr.bf16.mxu0 %v17860_v35 }
 0xc49   : > { %13853 = vmatpush1.bf16.msra.mxu0 %v17858_v36 }
 0xc4a   : > { %13854 = vmatprep.subr.bf16.mxu0 %v17863_v18 }
 0xc4d   : > { %13855 = vmatpush1.bf16.msra.mxu0 %v17861_v38 }
 0xc4e   : > { %13856 = vmatprep.subr.bf16.mxu0 %v17866_v30 }
 0xc51   : > { %13857 = vmatpush1.bf16.msra.mxu0 %v17864_v22 }
 0xc52   : > { %13858 = vmatprep.subr.bf16.mxu0 %v17869_v23 }
 0xc55   : > { %13859 = vmatpush1.bf16.msra.mxu0 %v17867_v12 }
 0xc56   : > { %13860 = vmatprep.subr.bf16.mxu0 %v17872_v25 }
 0xc59   : > { %13861 = vmatpush1.bf16.msra.mxu0 %v17870_v33 }
 0xc5a   : > { %13862 = vmatprep.subr.bf16.mxu0 %v17875_v43 }
 0xc5d   : > { %13863 = vmatpush1.bf16.msra.mxu0 %v17873_v44 }
 0xc5e   : > { %13864 = vmatprep.subr.bf16.mxu0 %v17878_v45 }
 0xc61   : > { %13865 = vmatpush1.bf16.msra.mxu0 %v17876_v37 }
 0xc62   : > { %13866 = vmatprep.subr.bf16.mxu0 %v17881_v46 }
 0xc65   : > { %13867 = vmatpush1.bf16.msra.mxu0 %v17879_v7 }
 0xc66   : > { %13868 = vmatprep.subr.bf16.mxu0 %v17884_v48 }
 0xc69   : > { %13869 = vmatpush1.bf16.msra.mxu0 %v17882_v61 }
 0xc6a   : > { %13870 = vmatprep.subr.bf16.mxu0 %v17887_v9 }
 0xc6d   : > { %13871 = vmatpush1.bf16.msra.mxu0 %v17885_v26 }
 0xc6e   : > { %13872 = vmatprep.subr.bf16.mxu0 %v17890_v49 }
 0xc71   : > { %13873 = vmatpush1.bf16.msra.mxu0 %v17888_v50 }
 0xc72   : > { %13874 = vmatprep.subr.bf16.mxu0 %v17893_v5 }
 0xc75   : > { %13875 = vmatpush1.bf16.msra.mxu0 %v17891_v53 }
 0xc76   : > { %13876 = vmatprep.subr.bf16.mxu0 %v17896_v51 }
 0xc79   : > { %13877 = vmatpush1.bf16.msra.mxu0 %v17894_v55 }
 0xc7a   : > { %13878 = vmatprep.subr.bf16.mxu0 %v17899_v58 }
 0xc7d   : > { %13879 = vmatpush1.bf16.msra.mxu0 %v17897_v32 }
 0xc80   : > { %13881 = vmatmul.mubr.bf16.vlgmr.msra.gmra.mrb[60].mxu0 %v13409_v59 }
 0xc81   : > { %18391 = shalt.err (!%p18388_p1)
}
 0xc82   : > { %s18392_s2 = scalar_lea.hbm %s19408_s18, 128  ;;  %s18396_s19 = scalar_lea.hbm %s19577_s24, 512 }
 0xc83   : > { %p18393_p13 = scmp.ne.s32.totalorder %s19408_s18, %s18392_s2  ;;  %p18397_p3 = scmp.lt.u32.totalorder %s19408_s18, %s19577_s24 }
 0xc84   : > { %p18398_p5 = scmp.lt.u32.totalorder %s18396_s19, %s18392_s2  ;;  %p18400_p11 = scmp.lt.u32.totalorder %s18392_s2, %s19408_s18 }
 0xc85   : > { %p18394_p0 = pnand %p18393_p13, %p19578_p7 }
 0xc86   : > { %p18399_p10 = por %p18398_p5, %p18397_p3 }
 0xc87   : > { %p18395_p2 = pneg %p18394_p0 }
 0xc88   : > { %p18401_p4 = por %p18400_p11, %p18399_p10 }
 0xc8a   : > { %p18402_p8 = pnand %p18401_p4, %p18395_p2 }
 0xc8c   : > { %18405 = shalt.err (!%p18402_p8)
}
 0xc8d   : > { %16274 = dma.vmem_to_hbm [thread:$0]  (%p19578_p7), %s13911_s0, 128, %s19408_s18, %s13892_s1   ;;  %v13475_v17 = vld [vmem:[#allocation28] sm:$0x3] }
 0xc8e   : > { %v13480_v60 = vrot.slane %v13475_v17, %v19134_v8  ;;  %v13484_v19 = vrot.slane %v13475_v17, %v19139_v10  ;;  %s15893_s4 = sshll.u32 %s19560_s21, 8  ;;  %s19579_s20 = sshll.u32 %s19077_s5, 4 }
 0xc8f   : > { %s818_s29 = scalar_lea.vmem [#allocation30], %s19579_s20  ;;  %s19580_s27 = sld [smem:[#allocation56_spill]] }
 0xc90   : > { %s13924_s2 = sshll.u32 %s818_s29, 4  ;;  %s13897_s21 = scalar_lea.sflag [#allocation31], %s19077_s5  ;;  %s19438_s2 = int_to_ptr.vmem [resolvable:$true] %s13924_s2 }
 0xc91   : > { %s18406_s18 = scalar_lea.vmem %s19438_s2, 256  ;;  %s18536_s1 = smov [#allocation30]  }
 0xc92   : > { %p18407_p6 = scmp.ne.s32.totalorder %s19438_s2, %s18406_s18  ;;  %s18410_s20 = sshll.u32 %s18536_s1, 4  ;;  %s18411_s20 = int_to_ptr.vmem [resolvable:$false] %s18410_s20 }
 0xc93   : > { %s18412_s25 = scalar_lea.vmem %s18411_s20, 512  ;;  %p18413_p1 = scmp.lt.s32.totalorder %s19438_s2, %s18411_s20 }
 0xc94   : > { %p18408_p9 = pnand %p18407_p6, %p19578_p7  ;;  %p18414_p13 = scmp.lt.s32.totalorder %s18412_s25, %s18406_s18 }
 0xc95   : > { %s19581_s23 = smov %s19580_s27  ;;  %s19436_s0 = scalar_lea.hbm %s19580_s27, %s15893_s4 }
 0xc96   : > { %p18409_p12 = pneg %p18408_p9  ;;  %p18415_p0 = por %p18414_p13, %p18413_p1 }
 0xc98   : > { %p18416_p2 = pnand %p18415_p0, %p18409_p12 }
 0xd53   : > { %v13882_v34 = vpop.f32.mrb[60].mxu0 }
 0xd54   : > { %v16098_v47 = vadd.f32 %v13882_v34, %v13480_v60  ;;  %v13884_v21 = vpop.f32.mrb[61].mxu0 }
 0xd55   : > { %v16099_v42 = vadd.f32 %v13884_v21, %v13484_v19  ;;  %v13886_v62 = vpop.f32.mrb[62].mxu0 }
 0xd56   : > { %13889 = vst [vmem:[%s818_s29] sm:$0xff] %v16098_v47  ;;  %v13887_v8 = vpop.f32.mrb[63].mxu0 }
 0xd57   : > { %13890 = vst [vmem:[%s818_s29 + $0x8] sm:$0xff] %v16099_v42 }
 0xd58   : > { %18419 = shalt.err (!%p18416_p2)
}
 0xd59   : > { %s18420_s5 = scalar_lea.hbm %s19436_s0, 256  ;;  %s18424_s19 = scalar_lea.hbm %s19581_s23, 1024 }
 0xd5a   : > { %p18421_p3 = scmp.ne.s32.totalorder %s19436_s0, %s18420_s5  ;;  %p18425_p11 = scmp.lt.u32.totalorder %s19436_s0, %s19581_s23 }
 0xd5b   : > { %p18426_p4 = scmp.lt.u32.totalorder %s18424_s19, %s18420_s5  ;;  %p18428_p6 = scmp.lt.u32.totalorder %s18420_s5, %s19436_s0 }
 0xd5c   : > { %p18422_p5 = pnand %p18421_p3, %p19578_p7 }
 0xd5d   : > { %p18427_p8 = por %p18426_p4, %p18425_p11 }
 0xd5e   : > { %p18423_p10 = pneg %p18422_p5 }
 0xd5f   : > { %p18429_p9 = por %p18428_p6, %p18427_p8 }
 0xd61   : > { %p18430_p12 = pnand %p18429_p9, %p18423_p10 }
 0xd63   : > { %18433 = shalt.err (!%p18430_p12)
}
 0xd64   : > { %16275 = dma.vmem_to_hbm [thread:$0]  (%p19578_p7), %s19438_s2, 256, %s19436_s0, %s13897_s21  }
 0xd65 PF: > { %s19582_s18 = sld [smem:[#allocation46_spill]]  ;;  %s19583_s20 = sld [smem:[#allocation43_spill]] }
 0xd66   : > { %p19584_p13 = scmp.ne.s32.totalorder %s19554_s26, 0 }
 0xd6b   : > { %p16371_p1 = scmp.ge.s32.totalorder %s19582_s18, 2  ;;  %s13936_s25 = sand.u32 1, %s19583_s20  }
 0xd6c   : > { %s13937_s4 = scalar_lea.sflag [#allocation4], %s13936_s25 }
 0xd6d   : > { %p16332_p0 = pnand %p16371_p1, %p19584_p13 }
 0xd6f   : > { %18487 = dma.done.wait (!%p16332_p0), %s13937_s4, 128  }
 0xd70   : > { %18489 = vsyncadd (!%p16332_p0), %s13937_s4, 4294967168  ;;  %s13946_s5 = scalar_lea.sflag [#allocation31], %s13936_s25 }
 0xd71   : > { %18491 = dma.done.wait (!%p16332_p0), %s13946_s5, 256  }
 0xd72   : > { %18493 = vsyncadd (!%p16332_p0), %s13946_s5, 4294967040  ;;  %s19585_s27 = sld [smem:[#allocation44_spill]]  ;;  %s19586_s28 = sld [smem:[#allocation45_spill]] }
 0xd73   : > { %p43_p7 = scmp.ge.s32.totalorder %s19007_s30, 6   ;;  %s19587_s29 = smov %s19019_s3 }
 0xd75   :  { %45 = sbr.rel (!%p43_p7) target bundleno = 24 (0x18), region = 214 }
 0xd7c   :  { %13951 = vsyncpa [#allocation3], 1 }
 0xd7d   :  { %13953 = vsyncpa [#allocation3 + $0x1], 1 }
 0xd7e   :  { %13954 = vsyncpa [#allocation6], 1 }
 0xd7f   :  { %13955 = vsyncpa [#allocation9], 1 }
 0xd80   :  { %13956 = vsyncpa [#allocation12], 1 }
 0xd81   :  { %13957 = vsyncpa [#allocation15], 1 }
 0xd82   :  { %13958 = vsyncpa [#allocation18], 1 }
 0xd83   :  { %13959 = vsyncpa [#allocation21], 1 }
 0xd84   :  { %13960 = vsyncpa [#allocation24], 1 }
 0xd85   :  { %13961 = vsyncpa [#allocation27], 1 }
 0xd86   :  { %13962 = vsyncpa [#allocation4], 1 }
 0xd87   :  { %13964 = vsyncpa [#allocation4 + $0x1], 1 }
 0xd88   :  { %13965 = vsyncpa [#allocation31], 1 }
 0xd89   :  { %13967 = vsyncpa [#allocation31 + $0x1], 1 }

</bundles_post_ra>
